<compile_context>
chip_gen: v5e
topology: v5e:2x2
jax: 0.10.0
libtpu: 0.0.40
codegen_flags: <defaults>
</compile_context>

<pallas_src>
import jax
import jax.numpy as jnp
from jax.experimental import pallas as pl
from jax.experimental.pallas import tpu as pltpu

# ----------------------------- configuration --------------------------------
IMG_RES   = 16          # CLIP input resolution (224 in the real model)
PATCH     = 8           # patch size (14 in the real model)
WIDTH     = 32          # transformer width
LAYERS    = 2
HEADS     = 4
EMBED_DIM = 16          # output projection dim
HEAD_DIM  = WIDTH // HEADS
GRID      = IMG_RES // PATCH
N_PATCH   = GRID * GRID
N_TOK     = N_PATCH + 1            # CLS + patches (= 5)
T_PAD     = 8                      # token axis padded to a sublane multiple
D_PATCH   = 3 * PATCH * PATCH
MLP_DIM   = 4 * WIDTH              # 128 (already lane-dense)

LANE      = 128
D_PAD     = ((D_PATCH + LANE - 1) // LANE) * LANE      # 256 (lane-dense patch K)
EMBED_PAD = ((EMBED_DIM + LANE - 1) // LANE) * LANE    # 128 (lane-dense output)
QKV_PAD   = ((3 * WIDTH + LANE - 1) // LANE) * LANE    # 128 (lane-dense qkv store)
TB        = 32                                         # images per grid step
TT        = TB * T_PAD                                 # 256 rows per grid step
KCOLS     = HEADS * T_PAD                              # 32 head-major key columns

CLIP_MEAN = jnp.array([0.48145466, 0.4578275, 0.40821073], jnp.float32)
CLIP_STD  = jnp.array([0.26862954, 0.26130258, 0.27577711], jnp.float32)


# -------------------------- preprocess (glue) -------------------------------
def _cubic_kernel(t, a=-0.75):
    at = jnp.abs(t)
    at2 = at * at
    at3 = at2 * at
    w1 = (a + 2.0) * at3 - (a + 3.0) * at2 + 1.0
    w2 = a * at3 - 5.0 * a * at2 + 8.0 * a * at - 4.0 * a
    return jnp.where(at <= 1.0, w1, jnp.where(at < 2.0, w2, 0.0))


def _bicubic_matrix(in_size, out_size):
    # align_corners=True source coordinates, border-replicated taps (PyTorch/kornia).
    if out_size == 1:
        src = jnp.zeros((1,), jnp.float32)
    else:
        src = jnp.arange(out_size, dtype=jnp.float32) * (in_size - 1) / (out_size - 1)
    i0 = jnp.floor(src).astype(jnp.int32)
    taps = i0[:, None] + jnp.arange(-1, 3, dtype=jnp.int32)[None, :]          # (out, 4)
    w = _cubic_kernel(src[:, None] - taps.astype(jnp.float32))                 # (out, 4)
    taps = jnp.clip(taps, 0, in_size - 1)
    rows = jnp.broadcast_to(jnp.arange(out_size)[:, None], taps.shape)
    return jnp.zeros((out_size, in_size), jnp.float32).at[rows, taps].add(w)


def bicubic_resize(x, out_h, out_w):
    # x: (B, C, H, W).  Separable bicubic, align_corners=True, antialias=False.
    # TODO(synk): resize stays in plain JAX (weight-matrix einsum), not in Pallas.
    mh = _bicubic_matrix(x.shape[2], out_h)
    mw = _bicubic_matrix(x.shape[3], out_w)
    return jnp.einsum('oh,bchw,pw->bcop', mh, x, mw)


def fold_preprocess_into_conv(conv_w):
    # normalize(x) = ((x+1)/2 - mean)/std = x*s1 + s0   (per input channel)
    # conv1 has no bias, so conv1(normalize(x)) = conv1'(x) + b'.
    s1 = 1.0 / (2.0 * CLIP_STD)                                    # (3,)
    s0 = (0.5 - CLIP_MEAN) / CLIP_STD                              # (3,)
    w_scaled = conv_w * s1[None, :, None, None]                    # (WIDTH, 3, P, P)
    wp = w_scaled.reshape(WIDTH, D_PATCH).T                        # (D_PATCH, WIDTH)
    bp = jnp.einsum('ocij,c->o', conv_w, s0)[None, :]              # (1, WIDTH)
    return wp, bp


# ------------------------------ parameters ----------------------------------
def init_params(key):
    ks = jax.random.split(key, 8)
    nrm = lambda k, s, sc: sc * jax.random.normal(k, s, jnp.float32)
    p = {}
    p['conv_w']    = nrm(ks[0], (WIDTH, 3, PATCH, PATCH), 0.05)     # conv1, bias=False
    p['cls']       = nrm(ks[1], (1, WIDTH), 0.02)
    p['pos']       = nrm(ks[2], (N_TOK, WIDTH), 0.01)
    p['ln_pre_g']  = jnp.ones((1, WIDTH), jnp.float32)
    p['ln_pre_b']  = jnp.zeros((1, WIDTH), jnp.float32)
    p['ln1_g']     = jnp.ones((LAYERS, 1, WIDTH), jnp.float32)
    p['ln1_b']     = jnp.zeros((LAYERS, 1, WIDTH), jnp.float32)
    p['wqkv']      = nrm(ks[3], (LAYERS, WIDTH, 3 * WIDTH), 0.05)
    p['bqkv']      = jnp.zeros((LAYERS, 1, 3 * WIDTH), jnp.float32)
    p['wo']        = nrm(ks[4], (LAYERS, WIDTH, WIDTH), 0.05)
    p['bo']        = jnp.zeros((LAYERS, 1, WIDTH), jnp.float32)
    p['ln2_g']     = jnp.ones((LAYERS, 1, WIDTH), jnp.float32)
    p['ln2_b']     = jnp.zeros((LAYERS, 1, WIDTH), jnp.float32)
    p['wfc1']      = nrm(ks[5], (LAYERS, WIDTH, MLP_DIM), 0.05)
    p['bfc1']      = jnp.zeros((LAYERS, 1, MLP_DIM), jnp.float32)
    p['wfc2']      = nrm(ks[6], (LAYERS, MLP_DIM, WIDTH), 0.05)
    p['bfc2']      = jnp.zeros((LAYERS, 1, WIDTH), jnp.float32)
    p['ln_post_g'] = jnp.ones((1, WIDTH), jnp.float32)
    p['ln_post_b'] = jnp.zeros((1, WIDTH), jnp.float32)
    p['proj']      = nrm(ks[7], (WIDTH, EMBED_DIM), 0.05)
    return p


def prepare_weights(p):
    """One-time kernel-ready weight preparation (bf16 casts, lane padding,
    preprocessing / CLS / pos / scale folding).  Frozen weights -> do this once."""
    bf16 = jnp.bfloat16
    scale = 1.0 / (HEAD_DIM ** 0.5)
    wp, bp = fold_preprocess_into_conv(p['conv_w'])
    w = {}
    w['wp'] = jnp.pad(wp, ((0, D_PAD - D_PATCH), (0, 0))).astype(bf16)        # (D_PAD, W)

    # token additive bias (T_PAD, W): row 0 = CLS + pos[0]; patch rows = conv
    # bias (folded preprocess offset) + pos; padded rows = 0.
    tok_bias = jnp.zeros((T_PAD, WIDTH), jnp.float32)
    tok_bias = tok_bias.at[0].set(p['cls'][0] + p['pos'][0])
    tok_bias = tok_bias.at[1:N_TOK].set(bp + p['pos'][1:N_TOK])
    w['tok_bias'] = tok_bias

    w['ln_pre_g'], w['ln_pre_b'] = p['ln_pre_g'], p['ln_pre_b']

    # qkv: fold 1/sqrt(head_dim) into the q columns; pad 96 -> 128 columns.
    zpad_w = jnp.zeros((LAYERS, WIDTH, QKV_PAD - 3 * WIDTH), jnp.float32)
    zpad_b = jnp.zeros((LAYERS, 1, QKV_PAD - 3 * WIDTH), jnp.float32)
    w['wqkv'] = jnp.concatenate(
        [p['wqkv'][:, :, :WIDTH] * scale, p['wqkv'][:, :, WIDTH:], zpad_w],
        axis=-1).astype(bf16)                                                  # (L, W, 128)
    w['bqkv'] = jnp.concatenate(
        [p['bqkv'][:, :, :WIDTH] * scale, p['bqkv'][:, :, WIDTH:], zpad_b],
        axis=-1)                                                               # (L, 1, 128)

    w['ln1_g'], w['ln1_b'] = p['ln1_g'], p['ln1_b']
    w['wo'], w['bo'] = p['wo'].astype(bf16), p['bo']
    w['ln2_g'], w['ln2_b'] = p['ln2_g'], p['ln2_b']
    w['wfc1'], w['bfc1'] = p['wfc1'].astype(bf16), p['bfc1']
    w['wfc2'], w['bfc2'] = p['wfc2'].astype(bf16), p['bfc2']
    w['ln_post_g'], w['ln_post_b'] = p['ln_post_g'], p['ln_post_b']
    w['proj'] = jnp.pad(p['proj'], ((0, 0), (0, EMBED_PAD - EMBED_DIM))).astype(bf16)

    # attention constants -----------------------------------------------------
    # head_mask[h, 0, d] = 1 iff feature lane d belongs to head h: used to build
    # head-masked K/V stacks so one full-width contraction = per-head scores.
    d_head = jnp.arange(WIDTH) // HEAD_DIM
    w['head_mask'] = (d_head[None, :] == jnp.arange(HEADS)[:, None]) \
        .astype(bf16)[:, None, :]                                              # (H, 1, W)
    # additive key mask over the head-major key columns: padded tokens -> -1e30
    key_idx = jnp.arange(KCOLS) % T_PAD
    w['attn_bias'] = jnp.where(key_idx < N_TOK, 0.0, -1e30) \
        .astype(jnp.float32)[None, :]                                          # (1, KCOLS)
    # group-indicator matrix: per-head softmax denominator via one tiny matmul
    grp = jnp.arange(KCOLS) // T_PAD
    w['gmat'] = (grp[:, None] == grp[None, :]).astype(jnp.float32)             # (KCOLS, KCOLS)
    return w


# ------------------------------ Pallas kernel --------------------------------
def _vit_kernel(patches_ref, wp_ref, tokb_ref, lnpre_g_ref, lnpre_b_ref,
                hmask_ref, abias_ref, gmat_ref, lnpost_g_ref, lnpost_b_ref, proj_ref,
                ln1_g_ref, ln1_b_ref, wqkv_ref, bqkv_ref, wo_ref, bo_ref,
                ln2_g_ref, ln2_b_ref, wfc1_ref, bfc1_ref, wfc2_ref, bfc2_ref,
                out_ref, x_scratch):
    l = pl.program_id(1)

    def ln(x, g, b, eps=1e-5):
        mu = jnp.mean(x, axis=-1, keepdims=True)
        xc = x - mu
        var = jnp.mean(xc * xc, axis=-1, keepdims=True)
        return xc * jax.lax.rsqrt(var + eps) * g + b

    def mm(a, w_ref):
        # bf16 MXU operands, f32 accumulation.
        return jnp.dot(a.astype(jnp.bfloat16), w_ref[...],
                       preferred_element_type=jnp.float32)

    # ---- patch embed + [CLS]/pos (folded) + ln_pre (first layer step only) ----
    @pl.when(l == 0)
    def _():
        xp = mm(patches_ref[...], wp_ref)                        # (TB*N_PATCH, W) f32
        tok = jnp.concatenate(
            [jnp.zeros((TB, 1, WIDTH), jnp.float32),             # CLS slot
             xp.reshape(TB, N_PATCH, WIDTH),
             jnp.zeros((TB, T_PAD - 1 - N_PATCH, WIDTH), jnp.float32)],  # pad tokens
            axis=1)                                              # (TB, T_PAD, W)
        tok = tok + tokb_ref[...]                                # + CLS / pos / conv-bias
        x_scratch[...] = ln(tok.reshape(TT, WIDTH),
                            lnpre_g_ref[...], lnpre_b_ref[...])  # ln_pre

    # ---- one transformer residual block per layer grid step ----
    x = x_scratch[...]                                           # (TT, W) f32

    # multi-head self-attention, all heads in two batched matmuls
    y = ln(x, ln1_g_ref[...], ln1_b_ref[...])
    qkv = mm(y, wqkv_ref) + bqkv_ref[...]                        # (TT, QKV_PAD); q pre-scaled
    q3 = qkv[:, 0:WIDTH].reshape(TB, T_PAD, WIDTH).astype(jnp.bfloat16)
    k3 = qkv[:, WIDTH:2 * WIDTH].reshape(TB, T_PAD, WIDTH).astype(jnp.bfloat16)
    v3 = qkv[:, 2 * WIDTH:3 * WIDTH].reshape(TB, T_PAD, WIDTH).astype(jnp.bfloat16)
    hm = hmask_ref[...]                                          # (HEADS, 1, W) 0/1 bf16
    # head-masked key/value stacks: row (h, t) keeps only head-h lanes, so a
    # full-width contraction yields exactly the per-head dot products.
    kb = (k3[:, None, :, :] * hm).reshape(TB, KCOLS, WIDTH)
    vb = (v3[:, None, :, :] * hm).reshape(TB, KCOLS, WIDTH)
    s = jnp.einsum('bqd,bkd->bqk', q3, kb,
                   preferred_element_type=jnp.float32)           # (TB, T_PAD, KCOLS)
    s = s + abias_ref[...]                                       # mask padded keys (-1e30)
    m = jnp.max(s, axis=-1, keepdims=True)                       # shared row max (stability)
    e = jnp.exp(s - m)
    # per-head denominators broadcast back to columns via one (KCOLS,KCOLS) matmul
    den = jnp.dot(e.reshape(TT, KCOLS), gmat_ref[...],
                  preferred_element_type=jnp.float32).reshape(TB, T_PAD, KCOLS)
    p_attn = (e * pl.reciprocal(den + 1e-20, approx=True)).astype(jnp.bfloat16)
    ctx = jnp.einsum('bqk,bkd->bqd', p_attn, vb,
                     preferred_element_type=jnp.float32)         # heads already concatenated
    x = x + mm(ctx.reshape(TT, WIDTH), wo_ref) + bo_ref[...]     # ONE fused out-proj

    # MLP block (QuickGELU: h*sigmoid(1.702h) == h*0.5*(tanh(0.851h)+1))
    y = ln(x, ln2_g_ref[...], ln2_b_ref[...])
    h1 = mm(y, wfc1_ref) + bfc1_ref[...]
    h1 = h1 * (0.5 * (jnp.tanh(0.851 * h1) + 1.0))
    x = x + mm(h1, wfc2_ref) + bfc2_ref[...]
    x_scratch[...] = x

    # ---- ln_post on CLS + projection (last layer step only) ----
    @pl.when(l == pl.num_programs(1) - 1)
    def _():
        cls_tok = x.reshape(TB, T_PAD, WIDTH)[:, 0:1, :].reshape(TB, WIDTH)  # stride-8 gather
        cls_tok = ln(cls_tok, lnpost_g_ref[...], lnpost_b_ref[...])
        out_ref[...] = jnp.dot(cls_tok.astype(jnp.bfloat16), proj_ref[...],
                               preferred_element_type=jnp.float32)           # (TB, EMBED_PAD)


# ------------------------------ wrappers --------------------------------------
def _cost_estimate(batch):
    toks = batch * T_PAD
    mm_flops = toks * LAYERS * 2 * WIDTH * (QKV_PAD + WIDTH + 2 * MLP_DIM)
    attn_flops = batch * LAYERS * 2 * T_PAD * KCOLS * (2 * WIDTH + KCOLS)
    embed_flops = 2 * batch * N_PATCH * D_PAD * WIDTH + 2 * batch * WIDTH * EMBED_PAD
    transcendentals = batch * LAYERS * (2 * T_PAD * KCOLS + T_PAD * MLP_DIM)
    nb = max(batch // TB, 1)
    layer_w_bytes = LAYERS * 2 * WIDTH * (QKV_PAD + WIDTH + 2 * MLP_DIM)
    weight_bytes = nb * layer_w_bytes + 2 * (D_PAD * WIDTH + WIDTH * EMBED_PAD)
    io_bytes = 2 * batch * N_PATCH * D_PAD + 4 * batch * EMBED_PAD
    return pl.CostEstimate(flops=mm_flops + attn_flops + embed_flops,
                           transcendentals=transcendentals,
                           bytes_accessed=weight_bytes + io_bytes)


def encode_image(patches, w):
    # patches: (B, N_PATCH, D_PATCH) f32
    B = patches.shape[0]
    B_pad = ((B + TB - 1) // TB) * TB
    if B_pad != B:
        patches = jnp.pad(patches, ((0, B_pad - B), (0, 0), (0, 0)))
    # lane-dense K pad, pre-flatten to 2-D, and ship as bf16 (halves input DMA).
    patches = jnp.pad(patches, ((0, 0), (0, 0), (0, D_PAD - D_PATCH)))
    pflat = patches.reshape(B_pad * N_PATCH, D_PAD).astype(jnp.bfloat16)
    nb = B_pad // TB

    shared = [w['wp'], w['tok_bias'], w['ln_pre_g'], w['ln_pre_b'],
              w['head_mask'], w['attn_bias'], w['gmat'],
              w['ln_post_g'], w['ln_post_b'], w['proj']]
    per_layer = [w['ln1_g'], w['ln1_b'], w['wqkv'], w['bqkv'], w['wo'], w['bo'],
                 w['ln2_g'], w['ln2_b'], w['wfc1'], w['bfc1'], w['wfc2'], w['bfc2']]

    def full_spec(a):
        nd = a.ndim
        return pl.BlockSpec(a.shape, lambda b, l, nd=nd: (0,) * nd)

    def layer_spec(a):
        n0 = a.ndim - 1
        return pl.BlockSpec((None,) + a.shape[1:],
                            lambda b, l, n0=n0: (l,) + (0,) * n0)

    in_specs = ([pl.BlockSpec((TB * N_PATCH, D_PAD), lambda b, l: (b, 0))]
                + [full_spec(a) for a in shared]
                + [layer_spec(a) for a in per_layer])

    out = pl.pallas_call(
        _vit_kernel,
        out_shape=jax.ShapeDtypeStruct((B_pad, EMBED_PAD), jnp.float32),
        grid_spec=pltpu.PrefetchScalarGridSpec(
            num_scalar_prefetch=0,
            grid=(nb, LAYERS),
            in_specs=in_specs,
            out_specs=pl.BlockSpec((TB, EMBED_PAD), lambda b, l: (b, 0)),
            scratch_shapes=[pltpu.VMEM((TT, WIDTH), jnp.float32)],
        ),
        compiler_params=pltpu.CompilerParams(
            dimension_semantics=("parallel", "arbitrary")),
        cost_estimate=_cost_estimate(B_pad),
    )(pflat, *shared, *per_layer)
    return out[:B, :EMBED_DIM]


@jax.jit
def frozen_clip_image_embedder(x, weights):
    # layout: x is NCHW (B, 3, H, W), values in [-1, 1] (PyTorch convention).
    xr = bicubic_resize(x.astype(jnp.float32), IMG_RES, IMG_RES)          # (B,3,R,R)
    B = xr.shape[0]
    # unfold into non-overlapping patches, flattened (c, i, j)-major to match conv1.
    patches = xr.reshape(B, 3, GRID, PATCH, GRID, PATCH)
    patches = patches.transpose(0, 2, 4, 1, 3, 5).reshape(B, N_PATCH, D_PATCH)
    return encode_image(patches, weights)


# --------------------------------- main ---------------------------------------
if __name__ == "__main__":
    key = jax.random.PRNGKey(0)
    kp, kx = jax.random.split(key)
    params = init_params(kp)
    weights = prepare_weights(params)   # one-time weight prep (casts/pads/foldings hoisted)
    # batch of 64 so the batch-tile grid axis (TB=32) has 2 "parallel" steps
    # (keeps both TensorCores busy on v7x).
    x = jax.random.uniform(kx, (64, 3, 24, 24), jnp.float32, minval=-1.0, maxval=1.0)
    out = frozen_clip_image_embedder(x, weights)
    jax.block_until_ready(out)
    assert out.shape == (64, EMBED_DIM) and out.dtype == jnp.float32
    assert bool(jnp.all(jnp.isfinite(out)))
    print("KERNEL_OK")
</pallas_src>

<mosaic_0001>
module attributes {stable_mosaic.version = 11 : i64} {
  func.func @_vit_kernel(%arg0: i32, %arg1: i32, %arg2: memref<128x256xbf16, #tpu.memory_space<vmem>>, %arg3: memref<256x32xbf16, #tpu.memory_space<vmem>>, %arg4: memref<8x32xf32, #tpu.memory_space<vmem>>, %arg5: memref<1x32xf32, #tpu.memory_space<vmem>>, %arg6: memref<1x32xf32, #tpu.memory_space<vmem>>, %arg7: memref<4x1x32xbf16, #tpu.memory_space<vmem>>, %arg8: memref<1x32xf32, #tpu.memory_space<vmem>>, %arg9: memref<32x32xf32, #tpu.memory_space<vmem>>, %arg10: memref<1x32xf32, #tpu.memory_space<vmem>>, %arg11: memref<1x32xf32, #tpu.memory_space<vmem>>, %arg12: memref<32x128xbf16, #tpu.memory_space<vmem>>, %arg13: memref<1x1x32xf32, #tpu.memory_space<vmem>>, %arg14: memref<1x1x32xf32, #tpu.memory_space<vmem>>, %arg15: memref<1x32x128xbf16, #tpu.memory_space<vmem>>, %arg16: memref<1x1x128xf32, #tpu.memory_space<vmem>>, %arg17: memref<1x32x32xbf16, #tpu.memory_space<vmem>>, %arg18: memref<1x1x32xf32, #tpu.memory_space<vmem>>, %arg19: memref<1x1x32xf32, #tpu.memory_space<vmem>>, %arg20: memref<1x1x32xf32, #tpu.memory_space<vmem>>, %arg21: memref<1x32x128xbf16, #tpu.memory_space<vmem>>, %arg22: memref<1x1x128xf32, #tpu.memory_space<vmem>>, %arg23: memref<1x128x32xbf16, #tpu.memory_space<vmem>>, %arg24: memref<1x1x32xf32, #tpu.memory_space<vmem>>, %arg25: memref<32x128xf32, #tpu.memory_space<vmem>>, %arg26: memref<256x32xf32, #tpu.memory_space<vmem>>) attributes {dimension_semantics = [#tpu.dimension_semantics<parallel>, #tpu.dimension_semantics<arbitrary>], iteration_bounds = array<i64: 2, 2>, scalar_prefetch = 0 : i64, scratch_operands = 1 : i64, tpu.core_type = #tpu.core_type<tc>, window_params = [{transform_indices = @transform_0, window_bounds = array<i64: 128, 256>}, {pipeline_mode = #tpu.pipeline_mode<synchronous>, transform_indices = @transform_1, window_bounds = array<i64: 256, 32>}, {pipeline_mode = #tpu.pipeline_mode<synchronous>, transform_indices = @transform_2, window_bounds = array<i64: 8, 32>}, {pipeline_mode = #tpu.pipeline_mode<synchronous>, transform_indices = @transform_3, window_bounds = array<i64: 1, 32>}, {pipeline_mode = #tpu.pipeline_mode<synchronous>, transform_indices = @transform_4, window_bounds = array<i64: 1, 32>}, {pipeline_mode = #tpu.pipeline_mode<synchronous>, transform_indices = @transform_5, window_bounds = array<i64: 4, 1, 32>}, {pipeline_mode = #tpu.pipeline_mode<synchronous>, transform_indices = @transform_6, window_bounds = array<i64: 1, 32>}, {pipeline_mode = #tpu.pipeline_mode<synchronous>, transform_indices = @transform_7, window_bounds = array<i64: 32, 32>}, {pipeline_mode = #tpu.pipeline_mode<synchronous>, transform_indices = @transform_8, window_bounds = array<i64: 1, 32>}, {pipeline_mode = #tpu.pipeline_mode<synchronous>, transform_indices = @transform_9, window_bounds = array<i64: 1, 32>}, {pipeline_mode = #tpu.pipeline_mode<synchronous>, transform_indices = @transform_10, window_bounds = array<i64: 32, 128>}, {transform_indices = @transform_11, window_bounds = array<i64: 1, 1, 32>}, {transform_indices = @transform_12, window_bounds = array<i64: 1, 1, 32>}, {transform_indices = @transform_13, window_bounds = array<i64: 1, 32, 128>}, {transform_indices = @transform_14, window_bounds = array<i64: 1, 1, 128>}, {transform_indices = @transform_15, window_bounds = array<i64: 1, 32, 32>}, {transform_indices = @transform_16, window_bounds = array<i64: 1, 1, 32>}, {transform_indices = @transform_17, window_bounds = array<i64: 1, 1, 32>}, {transform_indices = @transform_18, window_bounds = array<i64: 1, 1, 32>}, {transform_indices = @transform_19, window_bounds = array<i64: 1, 32, 128>}, {transform_indices = @transform_20, window_bounds = array<i64: 1, 1, 128>}, {transform_indices = @transform_21, window_bounds = array<i64: 1, 128, 32>}, {transform_indices = @transform_22, window_bounds = array<i64: 1, 1, 32>}, {transform_indices = @transform_23, window_bounds = array<i64: 32, 128>}]} {
    %c0_i32 = arith.constant 0 : i32
    %0 = arith.cmpi eq, %arg1, %c0_i32 : i32
    %1 = arith.extui %0 : i1 to i32
    %c0_i32_0 = arith.constant 0 : i32
    %2 = arith.cmpi ne, %1, %c0_i32_0 : i32
    scf.if %2 {
      %c0_69 = arith.constant 0 : index
      %c0_70 = arith.constant 0 : index
      %141 = vector.load %arg2[%c0_69, %c0_70] : memref<128x256xbf16, #tpu.memory_space<vmem>>, vector<128x256xbf16>
      %c0_71 = arith.constant 0 : index
      %c0_72 = arith.constant 0 : index
      %142 = vector.load %arg3[%c0_71, %c0_72] : memref<256x32xbf16, #tpu.memory_space<vmem>>, vector<256x32xbf16>
      %cst_73 = arith.constant dense<0.000000e+00> : vector<128x32xf32>
      %143 = tpu.matmul %141, %142, %cst_73 {dimension_numbers = #tpu.dot_dimension_numbers<[1], [0], [0], [1], [0, 0, 1, 1], [], []>} : vector<128x256xbf16>, vector<256x32xbf16>, vector<128x32xf32> -> vector<128x32xf32>
      %cst_74 = arith.constant 0.000000e+00 : f32
      %144 = vector.broadcast %cst_74 : f32 to vector<32x1x32xf32>
      %145 = vector.shape_cast %143 : vector<128x32xf32> to vector<32x4x32xf32>
      %cst_75 = arith.constant 0.000000e+00 : f32
      %146 = vector.broadcast %cst_75 : f32 to vector<32x3x32xf32>
      %147 = tpu.concatenate %144, %145, %146 in 1 : vector<32x1x32xf32>, vector<32x4x32xf32>, vector<32x3x32xf32> -> vector<32x8x32xf32>
      %c0_76 = arith.constant 0 : index
      %c0_77 = arith.constant 0 : index
      %148 = vector.load %arg4[%c0_76, %c0_77] : memref<8x32xf32, #tpu.memory_space<vmem>>, vector<8x32xf32>
      %149 = vector.shape_cast %148 : vector<8x32xf32> to vector<1x8x32xf32>
      %150 = vector.broadcast %149 : vector<1x8x32xf32> to vector<32x8x32xf32>
      %151 = arith.addf %147, %150 : vector<32x8x32xf32>
      %152 = vector.shape_cast %151 : vector<32x8x32xf32> to vector<256x32xf32>
      %c0_78 = arith.constant 0 : index
      %c0_79 = arith.constant 0 : index
      %153 = vector.load %arg5[%c0_78, %c0_79] : memref<1x32xf32, #tpu.memory_space<vmem>>, vector<1x32xf32>
      %c0_80 = arith.constant 0 : index
      %c0_81 = arith.constant 0 : index
      %154 = vector.load %arg6[%c0_80, %c0_81] : memref<1x32xf32, #tpu.memory_space<vmem>>, vector<1x32xf32>
      %cst_82 = arith.constant dense<0.000000e+00> : vector<256xf32>
      %155 = vector.multi_reduction <add>, %152, %cst_82 [1] : vector<256x32xf32> to vector<256xf32>
      %156 = vector.shape_cast %155 : vector<256xf32> to vector<256x1xf32>
      %cst_83 = arith.constant 3.200000e+01 : f32
      %157 = vector.broadcast %cst_83 : f32 to vector<256x1xf32>
      %158 = arith.divf %156, %157 : vector<256x1xf32>
      %159 = vector.broadcast %158 : vector<256x1xf32> to vector<256x32xf32>
      %160 = arith.subf %152, %159 : vector<256x32xf32>
      %161 = arith.mulf %160, %160 : vector<256x32xf32>
      %cst_84 = arith.constant dense<0.000000e+00> : vector<256xf32>
      %162 = vector.multi_reduction <add>, %161, %cst_84 [1] : vector<256x32xf32> to vector<256xf32>
      %163 = vector.shape_cast %162 : vector<256xf32> to vector<256x1xf32>
      %cst_85 = arith.constant 3.200000e+01 : f32
      %164 = vector.broadcast %cst_85 : f32 to vector<256x1xf32>
      %165 = arith.divf %163, %164 : vector<256x1xf32>
      %cst_86 = arith.constant 9.99999974E-6 : f32
      %166 = vector.broadcast %cst_86 : f32 to vector<256x1xf32>
      %167 = arith.addf %165, %166 : vector<256x1xf32>
      %168 = math.rsqrt %167 : vector<256x1xf32>
      %169 = vector.broadcast %168 : vector<256x1xf32> to vector<256x32xf32>
      %170 = arith.mulf %160, %169 : vector<256x32xf32>
      %171 = vector.broadcast %153 : vector<1x32xf32> to vector<256x32xf32>
      %172 = arith.mulf %170, %171 : vector<256x32xf32>
      %173 = vector.broadcast %154 : vector<1x32xf32> to vector<256x32xf32>
      %174 = arith.addf %172, %173 : vector<256x32xf32>
      %c0_87 = arith.constant 0 : index
      %c0_88 = arith.constant 0 : index
      %175 = vector.load %arg26[%c0_87, %c0_88] : memref<256x32xf32, #tpu.memory_space<vmem>>, vector<256x32xf32>
      tpu.vector_store %arg26[%c0_87, %c0_88], %174 {strides = array<i32>} : memref<256x32xf32, #tpu.memory_space<vmem>>, vector<256x32xf32>,
    } else {
    }
    %c0 = arith.constant 0 : index
    %c0_1 = arith.constant 0 : index
    %3 = vector.load %arg26[%c0, %c0_1] : memref<256x32xf32, #tpu.memory_space<vmem>>, vector<256x32xf32>
    %c0_2 = arith.constant 0 : index
    %c0_3 = arith.constant 0 : index
    %c0_4 = arith.constant 0 : index
    %4 = vector.load %arg13[%c0_2, %c0_3, %c0_4] : memref<1x1x32xf32, #tpu.memory_space<vmem>>, vector<1x1x32xf32>
    %5 = vector.shape_cast %4 : vector<1x1x32xf32> to vector<1x32xf32>
    %c0_5 = arith.constant 0 : index
    %c0_6 = arith.constant 0 : index
    %c0_7 = arith.constant 0 : index
    %6 = vector.load %arg14[%c0_5, %c0_6, %c0_7] : memref<1x1x32xf32, #tpu.memory_space<vmem>>, vector<1x1x32xf32>
    %7 = vector.shape_cast %6 : vector<1x1x32xf32> to vector<1x32xf32>
    %cst = arith.constant dense<0.000000e+00> : vector<256xf32>
    %8 = vector.multi_reduction <add>, %3, %cst [1] : vector<256x32xf32> to vector<256xf32>
    %9 = vector.shape_cast %8 : vector<256xf32> to vector<256x1xf32>
    %cst_8 = arith.constant 3.200000e+01 : f32
    %10 = vector.broadcast %cst_8 : f32 to vector<256x1xf32>
    %11 = arith.divf %9, %10 : vector<256x1xf32>
    %12 = vector.broadcast %11 : vector<256x1xf32> to vector<256x32xf32>
    %13 = arith.subf %3, %12 : vector<256x32xf32>
    %14 = arith.mulf %13, %13 : vector<256x32xf32>
    %cst_9 = arith.constant dense<0.000000e+00> : vector<256xf32>
    %15 = vector.multi_reduction <add>, %14, %cst_9 [1] : vector<256x32xf32> to vector<256xf32>
    %16 = vector.shape_cast %15 : vector<256xf32> to vector<256x1xf32>
    %cst_10 = arith.constant 3.200000e+01 : f32
    %17 = vector.broadcast %cst_10 : f32 to vector<256x1xf32>
    %18 = arith.divf %16, %17 : vector<256x1xf32>
    %cst_11 = arith.constant 9.99999974E-6 : f32
    %19 = vector.broadcast %cst_11 : f32 to vector<256x1xf32>
    %20 = arith.addf %18, %19 : vector<256x1xf32>
    %21 = math.rsqrt %20 : vector<256x1xf32>
    %22 = vector.broadcast %21 : vector<256x1xf32> to vector<256x32xf32>
    %23 = arith.mulf %13, %22 : vector<256x32xf32>
    %24 = vector.broadcast %5 : vector<1x32xf32> to vector<256x32xf32>
    %25 = arith.mulf %23, %24 : vector<256x32xf32>
    %26 = vector.broadcast %7 : vector<1x32xf32> to vector<256x32xf32>
    %27 = arith.addf %25, %26 : vector<256x32xf32>
    %28 = arith.truncf %27 : vector<256x32xf32> to vector<256x32xbf16>
    %c0_12 = arith.constant 0 : index
    %c0_13 = arith.constant 0 : index
    %c0_14 = arith.constant 0 : index
    %29 = vector.load %arg15[%c0_12, %c0_13, %c0_14] : memref<1x32x128xbf16, #tpu.memory_space<vmem>>, vector<1x32x128xbf16>
    %30 = vector.shape_cast %29 : vector<1x32x128xbf16> to vector<32x128xbf16>
    %cst_15 = arith.constant dense<0.000000e+00> : vector<256x128xf32>
    %31 = tpu.matmul %28, %30, %cst_15 {dimension_numbers = #tpu.dot_dimension_numbers<[1], [0], [0], [1], [0, 0, 1, 1], [], []>} : vector<256x32xbf16>, vector<32x128xbf16>, vector<256x128xf32> -> vector<256x128xf32>
    %c0_16 = arith.constant 0 : index
    %c0_17 = arith.constant 0 : index
    %c0_18 = arith.constant 0 : index
    %32 = vector.load %arg16[%c0_16, %c0_17, %c0_18] : memref<1x1x128xf32, #tpu.memory_space<vmem>>, vector<1x1x128xf32>
    %33 = vector.shape_cast %32 : vector<1x1x128xf32> to vector<1x128xf32>
    %34 = vector.broadcast %33 : vector<1x128xf32> to vector<256x128xf32>
    %35 = arith.addf %31, %34 : vector<256x128xf32>
    %36 = vector.extract_strided_slice %35 {offsets = [0, 0], sizes = [256, 32], strides = [1, 1]} : vector<256x128xf32> to vector<256x32xf32>
    %37 = vector.shape_cast %36 : vector<256x32xf32> to vector<32x8x32xf32>
    %38 = arith.truncf %37 : vector<32x8x32xf32> to vector<32x8x32xbf16>
    %39 = vector.extract_strided_slice %35 {offsets = [0, 32], sizes = [256, 32], strides = [1, 1]} : vector<256x128xf32> to vector<256x32xf32>
    %40 = vector.shape_cast %39 : vector<256x32xf32> to vector<32x8x32xf32>
    %41 = arith.truncf %40 : vector<32x8x32xf32> to vector<32x8x32xbf16>
    %42 = vector.extract_strided_slice %35 {offsets = [0, 64], sizes = [256, 32], strides = [1, 1]} : vector<256x128xf32> to vector<256x32xf32>
    %43 = vector.shape_cast %42 : vector<256x32xf32> to vector<32x8x32xf32>
    %44 = arith.truncf %43 : vector<32x8x32xf32> to vector<32x8x32xbf16>
    %c0_19 = arith.constant 0 : index
    %c0_20 = arith.constant 0 : index
    %c0_21 = arith.constant 0 : index
    %45 = vector.load %arg7[%c0_19, %c0_20, %c0_21] : memref<4x1x32xbf16, #tpu.memory_space<vmem>>, vector<4x1x32xbf16>
    %46 = vector.shape_cast %41 : vector<32x8x32xbf16> to vector<32x1x8x32xbf16>
    %47 = vector.shape_cast %45 : vector<4x1x32xbf16> to vector<1x4x1x32xbf16>
    %48 = vector.broadcast %46 : vector<32x1x8x32xbf16> to vector<32x4x8x32xbf16>
    %49 = vector.broadcast %47 : vector<1x4x1x32xbf16> to vector<32x4x8x32xbf16>
    %50 = arith.mulf %48, %49 : vector<32x4x8x32xbf16>
    %51 = vector.shape_cast %50 : vector<32x4x8x32xbf16> to vector<32x32x32xbf16>
    %52 = vector.shape_cast %44 : vector<32x8x32xbf16> to vector<32x1x8x32xbf16>
    %53 = vector.shape_cast %45 : vector<4x1x32xbf16> to vector<1x4x1x32xbf16>
    %54 = vector.broadcast %52 : vector<32x1x8x32xbf16> to vector<32x4x8x32xbf16>
    %55 = vector.broadcast %53 : vector<1x4x1x32xbf16> to vector<32x4x8x32xbf16>
    %56 = arith.mulf %54, %55 : vector<32x4x8x32xbf16>
    %57 = vector.shape_cast %56 : vector<32x4x8x32xbf16> to vector<32x32x32xbf16>
    "tpu.trace_start"() <{level = 10 : i32, message = "bqd,bkd->bqk"}> : () -> ()
    %cst_22 = arith.constant dense<0.000000e+00> : vector<32x8x32xf32>
    %58 = tpu.matmul %38, %51, %cst_22 {dimension_numbers = #tpu.dot_dimension_numbers<[2], [2], [1], [1], [0, 0, 0, 1, 1, 1], [0], [0]>} : vector<32x8x32xbf16>, vector<32x32x32xbf16>, vector<32x8x32xf32> -> vector<32x8x32xf32>
    "tpu.trace_stop"() : () -> ()
    %c0_23 = arith.constant 0 : index
    %c0_24 = arith.constant 0 : index
    %59 = vector.load %arg8[%c0_23, %c0_24] : memref<1x32xf32, #tpu.memory_space<vmem>>, vector<1x32xf32>
    %60 = vector.shape_cast %59 : vector<1x32xf32> to vector<1x1x32xf32>
    %61 = vector.broadcast %60 : vector<1x1x32xf32> to vector<32x8x32xf32>
    %62 = arith.addf %58, %61 : vector<32x8x32xf32>
    %cst_25 = arith.constant dense<0xFF800000> : vector<32x8xf32>
    %63 = vector.multi_reduction <maximumf>, %62, %cst_25 [2] : vector<32x8x32xf32> to vector<32x8xf32>
    %64 = vector.shape_cast %63 : vector<32x8xf32> to vector<32x8x1xf32>
    %65 = vector.broadcast %64 : vector<32x8x1xf32> to vector<32x8x32xf32>
    %66 = arith.subf %62, %65 : vector<32x8x32xf32>
    %67 = math.exp %66 : vector<32x8x32xf32>
    %68 = vector.shape_cast %67 : vector<32x8x32xf32> to vector<256x32xf32>
    %c0_26 = arith.constant 0 : index
    %c0_27 = arith.constant 0 : index
    %69 = vector.load %arg9[%c0_26, %c0_27] : memref<32x32xf32, #tpu.memory_space<vmem>>, vector<32x32xf32>
    %cst_28 = arith.constant dense<0.000000e+00> : vector<256x32xf32>
    %70 = tpu.matmul %68, %69, %cst_28 {dimension_numbers = #tpu.dot_dimension_numbers<[1], [0], [0], [1], [0, 0, 1, 1], [], []>} : vector<256x32xf32>, vector<32x32xf32>, vector<256x32xf32> -> vector<256x32xf32>
    %71 = vector.shape_cast %70 : vector<256x32xf32> to vector<32x8x32xf32>
    %cst_29 = arith.constant 9.99999968E-21 : f32
    %72 = vector.broadcast %cst_29 : f32 to vector<32x8x32xf32>
    %73 = arith.addf %71, %72 : vector<32x8x32xf32>
    %74 = tpu.reciprocal %73 {approx = true} : vector<32x8x32xf32> -> vector<32x8x32xf32>
    %75 = arith.mulf %67, %74 : vector<32x8x32xf32>
    %76 = arith.truncf %75 : vector<32x8x32xf32> to vector<32x8x32xbf16>
    "tpu.trace_start"() <{level = 10 : i32, message = "bqk,bkd->bqd"}> : () -> ()
    %cst_30 = arith.constant dense<0.000000e+00> : vector<32x8x32xf32>
    %77 = tpu.matmul %76, %57, %cst_30 {dimension_numbers = #tpu.dot_dimension_numbers<[2], [1], [1], [2], [0, 0, 0, 1, 1, 2], [0], [0]>} : vector<32x8x32xbf16>, vector<32x32x32xbf16>, vector<32x8x32xf32> -> vector<32x8x32xf32>
    "tpu.trace_stop"() : () -> ()
    %78 = vector.shape_cast %77 : vector<32x8x32xf32> to vector<256x32xf32>
    %79 = arith.truncf %78 : vector<256x32xf32> to vector<256x32xbf16>
    %c0_31 = arith.constant 0 : index
    %c0_32 = arith.constant 0 : index
    %c0_33 = arith.constant 0 : index
    %80 = vector.load %arg17[%c0_31, %c0_32, %c0_33] : memref<1x32x32xbf16, #tpu.memory_space<vmem>>, vector<1x32x32xbf16>
    %81 = vector.shape_cast %80 : vector<1x32x32xbf16> to vector<32x32xbf16>
    %cst_34 = arith.constant dense<0.000000e+00> : vector<256x32xf32>
    %82 = tpu.matmul %79, %81, %cst_34 {dimension_numbers = #tpu.dot_dimension_numbers<[1], [0], [0], [1], [0, 0, 1, 1], [], []>} : vector<256x32xbf16>, vector<32x32xbf16>, vector<256x32xf32> -> vector<256x32xf32>
    %83 = arith.addf %3, %82 : vector<256x32xf32>
    %c0_35 = arith.constant 0 : index
    %c0_36 = arith.constant 0 : index
    %c0_37 = arith.constant 0 : index
    %84 = vector.load %arg18[%c0_35, %c0_36, %c0_37] : memref<1x1x32xf32, #tpu.memory_space<vmem>>, vector<1x1x32xf32>
    %85 = vector.shape_cast %84 : vector<1x1x32xf32> to vector<1x32xf32>
    %86 = vector.broadcast %85 : vector<1x32xf32> to vector<256x32xf32>
    %87 = arith.addf %83, %86 : vector<256x32xf32>
    %c0_38 = arith.constant 0 : index
    %c0_39 = arith.constant 0 : index
    %c0_40 = arith.constant 0 : index
    %88 = vector.load %arg19[%c0_38, %c0_39, %c0_40] : memref<1x1x32xf32, #tpu.memory_space<vmem>>, vector<1x1x32xf32>
    %89 = vector.shape_cast %88 : vector<1x1x32xf32> to vector<1x32xf32>
    %c0_41 = arith.constant 0 : index
    %c0_42 = arith.constant 0 : index
    %c0_43 = arith.constant 0 : index
    %90 = vector.load %arg20[%c0_41, %c0_42, %c0_43] : memref<1x1x32xf32, #tpu.memory_space<vmem>>, vector<1x1x32xf32>
    %91 = vector.shape_cast %90 : vector<1x1x32xf32> to vector<1x32xf32>
    %cst_44 = arith.constant dense<0.000000e+00> : vector<256xf32>
    %92 = vector.multi_reduction <add>, %87, %cst_44 [1] : vector<256x32xf32> to vector<256xf32>
    %93 = vector.shape_cast %92 : vector<256xf32> to vector<256x1xf32>
    %cst_45 = arith.constant 3.200000e+01 : f32
    %94 = vector.broadcast %cst_45 : f32 to vector<256x1xf32>
    %95 = arith.divf %93, %94 : vector<256x1xf32>
    %96 = vector.broadcast %95 : vector<256x1xf32> to vector<256x32xf32>
    %97 = arith.subf %87, %96 : vector<256x32xf32>
    %98 = arith.mulf %97, %97 : vector<256x32xf32>
    %cst_46 = arith.constant dense<0.000000e+00> : vector<256xf32>
    %99 = vector.multi_reduction <add>, %98, %cst_46 [1] : vector<256x32xf32> to vector<256xf32>
    %100 = vector.shape_cast %99 : vector<256xf32> to vector<256x1xf32>
    %cst_47 = arith.constant 3.200000e+01 : f32
    %101 = vector.broadcast %cst_47 : f32 to vector<256x1xf32>
    %102 = arith.divf %100, %101 : vector<256x1xf32>
    %cst_48 = arith.constant 9.99999974E-6 : f32
    %103 = vector.broadcast %cst_48 : f32 to vector<256x1xf32>
    %104 = arith.addf %102, %103 : vector<256x1xf32>
    %105 = math.rsqrt %104 : vector<256x1xf32>
    %106 = vector.broadcast %105 : vector<256x1xf32> to vector<256x32xf32>
    %107 = arith.mulf %97, %106 : vector<256x32xf32>
    %108 = vector.broadcast %89 : vector<1x32xf32> to vector<256x32xf32>
    %109 = arith.mulf %107, %108 : vector<256x32xf32>
    %110 = vector.broadcast %91 : vector<1x32xf32> to vector<256x32xf32>
    %111 = arith.addf %109, %110 : vector<256x32xf32>
    %112 = arith.truncf %111 : vector<256x32xf32> to vector<256x32xbf16>
    %c0_49 = arith.constant 0 : index
    %c0_50 = arith.constant 0 : index
    %c0_51 = arith.constant 0 : index
    %113 = vector.load %arg21[%c0_49, %c0_50, %c0_51] : memref<1x32x128xbf16, #tpu.memory_space<vmem>>, vector<1x32x128xbf16>
    %114 = vector.shape_cast %113 : vector<1x32x128xbf16> to vector<32x128xbf16>
    %cst_52 = arith.constant dense<0.000000e+00> : vector<256x128xf32>
    %115 = tpu.matmul %112, %114, %cst_52 {dimension_numbers = #tpu.dot_dimension_numbers<[1], [0], [0], [1], [0, 0, 1, 1], [], []>} : vector<256x32xbf16>, vector<32x128xbf16>, vector<256x128xf32> -> vector<256x128xf32>
    %c0_53 = arith.constant 0 : index
    %c0_54 = arith.constant 0 : index
    %c0_55 = arith.constant 0 : index
    %116 = vector.load %arg22[%c0_53, %c0_54, %c0_55] : memref<1x1x128xf32, #tpu.memory_space<vmem>>, vector<1x1x128xf32>
    %117 = vector.shape_cast %116 : vector<1x1x128xf32> to vector<1x128xf32>
    %118 = vector.broadcast %117 : vector<1x128xf32> to vector<256x128xf32>
    %119 = arith.addf %115, %118 : vector<256x128xf32>
    %cst_56 = arith.constant 8.510000e-01 : f32
    %120 = vector.broadcast %cst_56 : f32 to vector<256x128xf32>
    %121 = arith.mulf %120, %119 : vector<256x128xf32>
    %122 = math.tanh %121 : vector<256x128xf32>
    %cst_57 = arith.constant 1.000000e+00 : f32
    %123 = vector.broadcast %cst_57 : f32 to vector<256x128xf32>
    %124 = arith.addf %122, %123 : vector<256x128xf32>
    %cst_58 = arith.constant 5.000000e-01 : f32
    %125 = vector.broadcast %cst_58 : f32 to vector<256x128xf32>
    %126 = arith.mulf %125, %124 : vector<256x128xf32>
    %127 = arith.mulf %119, %126 : vector<256x128xf32>
    %128 = arith.truncf %127 : vector<256x128xf32> to vector<256x128xbf16>
    %c0_59 = arith.constant 0 : index
    %c0_60 = arith.constant 0 : index
    %c0_61 = arith.constant 0 : index
    %129 = vector.load %arg23[%c0_59, %c0_60, %c0_61] : memref<1x128x32xbf16, #tpu.memory_space<vmem>>, vector<1x128x32xbf16>
    %130 = vector.shape_cast %129 : vector<1x128x32xbf16> to vector<128x32xbf16>
    %cst_62 = arith.constant dense<0.000000e+00> : vector<256x32xf32>
    %131 = tpu.matmul %128, %130, %cst_62 {dimension_numbers = #tpu.dot_dimension_numbers<[1], [0], [0], [1], [0, 0, 1, 1], [], []>} : vector<256x128xbf16>, vector<128x32xbf16>, vector<256x32xf32> -> vector<256x32xf32>
    %132 = arith.addf %87, %131 : vector<256x32xf32>
    %c0_63 = arith.constant 0 : index
    %c0_64 = arith.constant 0 : index
    %c0_65 = arith.constant 0 : index
    %133 = vector.load %arg24[%c0_63, %c0_64, %c0_65] : memref<1x1x32xf32, #tpu.memory_space<vmem>>, vector<1x1x32xf32>
    %134 = vector.shape_cast %133 : vector<1x1x32xf32> to vector<1x32xf32>
    %135 = vector.broadcast %134 : vector<1x32xf32> to vector<256x32xf32>
    %136 = arith.addf %132, %135 : vector<256x32xf32>
    %c0_66 = arith.constant 0 : index
    %c0_67 = arith.constant 0 : index
    %137 = vector.load %arg26[%c0_66, %c0_67] : memref<256x32xf32, #tpu.memory_space<vmem>>, vector<256x32xf32>
    tpu.vector_store %arg26[%c0_66, %c0_67], %136 {strides = array<i32>} : memref<256x32xf32, #tpu.memory_space<vmem>>, vector<256x32xf32>,
    %c1_i32 = arith.constant 1 : i32
    %138 = arith.cmpi eq, %arg1, %c1_i32 : i32
    %139 = arith.extui %138 : i1 to i32
    %c0_i32_68 = arith.constant 0 : i32
    %140 = arith.cmpi ne, %139, %c0_i32_68 : i32
    scf.if %140 {
      %141 = vector.shape_cast %136 : vector<256x32xf32> to vector<32x8x32xf32>
      %142 = vector.extract_strided_slice %141 {offsets = [0, 0, 0], sizes = [32, 1, 32], strides = [1, 1, 1]} : vector<32x8x32xf32> to vector<32x1x32xf32>
      %143 = vector.shape_cast %142 : vector<32x1x32xf32> to vector<32x32xf32>
      %c0_69 = arith.constant 0 : index
      %c0_70 = arith.constant 0 : index
      %144 = vector.load %arg10[%c0_69, %c0_70] : memref<1x32xf32, #tpu.memory_space<vmem>>, vector<1x32xf32>
      %c0_71 = arith.constant 0 : index
      %c0_72 = arith.constant 0 : index
      %145 = vector.load %arg11[%c0_71, %c0_72] : memref<1x32xf32, #tpu.memory_space<vmem>>, vector<1x32xf32>
      %cst_73 = arith.constant dense<0.000000e+00> : vector<32xf32>
      %146 = vector.multi_reduction <add>, %143, %cst_73 [1] : vector<32x32xf32> to vector<32xf32>
      %147 = vector.shape_cast %146 : vector<32xf32> to vector<32x1xf32>
      %cst_74 = arith.constant 3.200000e+01 : f32
      %148 = vector.broadcast %cst_74 : f32 to vector<32x1xf32>
      %149 = arith.divf %147, %148 : vector<32x1xf32>
      %150 = vector.broadcast %149 : vector<32x1xf32> to vector<32x32xf32>
      %151 = arith.subf %143, %150 : vector<32x32xf32>
      %152 = arith.mulf %151, %151 : vector<32x32xf32>
      %cst_75 = arith.constant dense<0.000000e+00> : vector<32xf32>
      %153 = vector.multi_reduction <add>, %152, %cst_75 [1] : vector<32x32xf32> to vector<32xf32>
      %154 = vector.shape_cast %153 : vector<32xf32> to vector<32x1xf32>
      %cst_76 = arith.constant 3.200000e+01 : f32
      %155 = vector.broadcast %cst_76 : f32 to vector<32x1xf32>
      %156 = arith.divf %154, %155 : vector<32x1xf32>
      %cst_77 = arith.constant 9.99999974E-6 : f32
      %157 = vector.broadcast %cst_77 : f32 to vector<32x1xf32>
      %158 = arith.addf %156, %157 : vector<32x1xf32>
      %159 = math.rsqrt %158 : vector<32x1xf32>
      %160 = vector.broadcast %159 : vector<32x1xf32> to vector<32x32xf32>
      %161 = arith.mulf %151, %160 : vector<32x32xf32>
      %162 = vector.broadcast %144 : vector<1x32xf32> to vector<32x32xf32>
      %163 = arith.mulf %161, %162 : vector<32x32xf32>
      %164 = vector.broadcast %145 : vector<1x32xf32> to vector<32x32xf32>
      %165 = arith.addf %163, %164 : vector<32x32xf32>
      %166 = arith.truncf %165 : vector<32x32xf32> to vector<32x32xbf16>
      %c0_78 = arith.constant 0 : index
      %c0_79 = arith.constant 0 : index
      %167 = vector.load %arg12[%c0_78, %c0_79] : memref<32x128xbf16, #tpu.memory_space<vmem>>, vector<32x128xbf16>
      %cst_80 = arith.constant dense<0.000000e+00> : vector<32x128xf32>
      %168 = tpu.matmul %166, %167, %cst_80 {dimension_numbers = #tpu.dot_dimension_numbers<[1], [0], [0], [1], [0, 0, 1, 1], [], []>} : vector<32x32xbf16>, vector<32x128xbf16>, vector<32x128xf32> -> vector<32x128xf32>
      %c0_81 = arith.constant 0 : index
      %c0_82 = arith.constant 0 : index
      %169 = vector.load %arg25[%c0_81, %c0_82] : memref<32x128xf32, #tpu.memory_space<vmem>>, vector<32x128xf32>
      tpu.vector_store %arg25[%c0_81, %c0_82], %168 {strides = array<i32>} : memref<32x128xf32, #tpu.memory_space<vmem>>, vector<32x128xf32>,
    } else {
    }
    return
  }
  func.func @transform_0(%arg0: i32, %arg1: i32) -> (i32, i32) {
    %c0_i32 = arith.constant 0 : i32
    %c0_i32_0 = arith.constant 0 : i32
    return %arg0, %c0_i32 : i32, i32
  }
  func.func @transform_1(%arg0: i32, %arg1: i32) -> (i32, i32) {
    %c0_i32 = arith.constant 0 : i32
    %c0_i32_0 = arith.constant 0 : i32
    %c0_i32_1 = arith.constant 0 : i32
    return %c0_i32, %c0_i32_0 : i32, i32
  }
  func.func @transform_2(%arg0: i32, %arg1: i32) -> (i32, i32) {
    %c0_i32 = arith.constant 0 : i32
    %c0_i32_0 = arith.constant 0 : i32
    %c0_i32_1 = arith.constant 0 : i32
    return %c0_i32, %c0_i32_0 : i32, i32
  }
  func.func @transform_3(%arg0: i32, %arg1: i32) -> (i32, i32) {
    %c0_i32 = arith.constant 0 : i32
    %c0_i32_0 = arith.constant 0 : i32
    %c0_i32_1 = arith.constant 0 : i32
    return %c0_i32, %c0_i32_0 : i32, i32
  }
  func.func @transform_4(%arg0: i32, %arg1: i32) -> (i32, i32) {
    %c0_i32 = arith.constant 0 : i32
    %c0_i32_0 = arith.constant 0 : i32
    %c0_i32_1 = arith.constant 0 : i32
    return %c0_i32, %c0_i32_0 : i32, i32
  }
  func.func @transform_5(%arg0: i32, %arg1: i32) -> (i32, i32, i32) {
    %c0_i32 = arith.constant 0 : i32
    %c0_i32_0 = arith.constant 0 : i32
    %c0_i32_1 = arith.constant 0 : i32
    %c0_i32_2 = arith.constant 0 : i32
    return %c0_i32, %c0_i32_0, %c0_i32_1 : i32, i32, i32
  }
  func.func @transform_6(%arg0: i32, %arg1: i32) -> (i32, i32) {
    %c0_i32 = arith.constant 0 : i32
    %c0_i32_0 = arith.constant 0 : i32
    %c0_i32_1 = arith.constant 0 : i32
    return %c0_i32, %c0_i32_0 : i32, i32
  }
  func.func @transform_7(%arg0: i32, %arg1: i32) -> (i32, i32) {
    %c0_i32 = arith.constant 0 : i32
    %c0_i32_0 = arith.constant 0 : i32
    %c0_i32_1 = arith.constant 0 : i32
    return %c0_i32, %c0_i32_0 : i32, i32
  }
  func.func @transform_8(%arg0: i32, %arg1: i32) -> (i32, i32) {
    %c0_i32 = arith.constant 0 : i32
    %c0_i32_0 = arith.constant 0 : i32
    %c0_i32_1 = arith.constant 0 : i32
    return %c0_i32, %c0_i32_0 : i32, i32
  }
  func.func @transform_9(%arg0: i32, %arg1: i32) -> (i32, i32) {
    %c0_i32 = arith.constant 0 : i32
    %c0_i32_0 = arith.constant 0 : i32
    %c0_i32_1 = arith.constant 0 : i32
    return %c0_i32, %c0_i32_0 : i32, i32
  }
  func.func @transform_10(%arg0: i32, %arg1: i32) -> (i32, i32) {
    %c0_i32 = arith.constant 0 : i32
    %c0_i32_0 = arith.constant 0 : i32
    %c0_i32_1 = arith.constant 0 : i32
    return %c0_i32, %c0_i32_0 : i32, i32
  }
  func.func @transform_11(%arg0: i32, %arg1: i32) -> (i32, i32, i32) {
    %c0_i32 = arith.constant 0 : i32
    %c0_i32_0 = arith.constant 0 : i32
    %c0_i32_1 = arith.constant 0 : i32
    return %arg1, %c0_i32, %c0_i32_0 : i32, i32, i32
  }
  func.func @transform_12(%arg0: i32, %arg1: i32) -> (i32, i32, i32) {
    %c0_i32 = arith.constant 0 : i32
    %c0_i32_0 = arith.constant 0 : i32
    %c0_i32_1 = arith.constant 0 : i32
    return %arg1, %c0_i32, %c0_i32_0 : i32, i32, i32
  }
  func.func @transform_13(%arg0: i32, %arg1: i32) -> (i32, i32, i32) {
    %c0_i32 = arith.constant 0 : i32
    %c0_i32_0 = arith.constant 0 : i32
    %c0_i32_1 = arith.constant 0 : i32
    return %arg1, %c0_i32, %c0_i32_0 : i32, i32, i32
  }
  func.func @transform_14(%arg0: i32, %arg1: i32) -> (i32, i32, i32) {
    %c0_i32 = arith.constant 0 : i32
    %c0_i32_0 = arith.constant 0 : i32
    %c0_i32_1 = arith.constant 0 : i32
    return %arg1, %c0_i32, %c0_i32_0 : i32, i32, i32
  }
  func.func @transform_15(%arg0: i32, %arg1: i32) -> (i32, i32, i32) {
    %c0_i32 = arith.constant 0 : i32
    %c0_i32_0 = arith.constant 0 : i32
    %c0_i32_1 = arith.constant 0 : i32
    return %arg1, %c0_i32, %c0_i32_0 : i32, i32, i32
  }
  func.func @transform_16(%arg0: i32, %arg1: i32) -> (i32, i32, i32) {
    %c0_i32 = arith.constant 0 : i32
    %c0_i32_0 = arith.constant 0 : i32
    %c0_i32_1 = arith.constant 0 : i32
    return %arg1, %c0_i32, %c0_i32_0 : i32, i32, i32
  }
  func.func @transform_17(%arg0: i32, %arg1: i32) -> (i32, i32, i32) {
    %c0_i32 = arith.constant 0 : i32
    %c0_i32_0 = arith.constant 0 : i32
    %c0_i32_1 = arith.constant 0 : i32
    return %arg1, %c0_i32, %c0_i32_0 : i32, i32, i32
  }
  func.func @transform_18(%arg0: i32, %arg1: i32) -> (i32, i32, i32) {
    %c0_i32 = arith.constant 0 : i32
    %c0_i32_0 = arith.constant 0 : i32
    %c0_i32_1 = arith.constant 0 : i32
    return %arg1, %c0_i32, %c0_i32_0 : i32, i32, i32
  }
  func.func @transform_19(%arg0: i32, %arg1: i32) -> (i32, i32, i32) {
    %c0_i32 = arith.constant 0 : i32
    %c0_i32_0 = arith.constant 0 : i32
    %c0_i32_1 = arith.constant 0 : i32
    return %arg1, %c0_i32, %c0_i32_0 : i32, i32, i32
  }
  func.func @transform_20(%arg0: i32, %arg1: i32) -> (i32, i32, i32) {
    %c0_i32 = arith.constant 0 : i32
    %c0_i32_0 = arith.constant 0 : i32
    %c0_i32_1 = arith.constant 0 : i32
    return %arg1, %c0_i32, %c0_i32_0 : i32, i32, i32
  }
  func.func @transform_21(%arg0: i32, %arg1: i32) -> (i32, i32, i32) {
    %c0_i32 = arith.constant 0 : i32
    %c0_i32_0 = arith.constant 0 : i32
    %c0_i32_1 = arith.constant 0 : i32
    return %arg1, %c0_i32, %c0_i32_0 : i32, i32, i32
  }
  func.func @transform_22(%arg0: i32, %arg1: i32) -> (i32, i32, i32) {
    %c0_i32 = arith.constant 0 : i32
    %c0_i32_0 = arith.constant 0 : i32
    %c0_i32_1 = arith.constant 0 : i32
    return %arg1, %c0_i32, %c0_i32_0 : i32, i32, i32
  }
  func.func @transform_23(%arg0: i32, %arg1: i32) -> (i32, i32) {
    %c0_i32 = arith.constant 0 : i32
    %c0_i32_0 = arith.constant 0 : i32
    return %arg0, %c0_i32 : i32, i32
  }
}

</mosaic_0001>

<bundles_post_ra>
// kernel: frozen_clip_image_embedder.1
= control target key start
LH: loop header
LB: loop body
LE: loop exit
PB: predicated region body
PF: predicated region fallthrough
CT: control target
= control target key end

     0   :  { %s10347_s30 = smov 0   ;;  %s10349_s24 = smov 0   ;;  %s15498_s0 = inlined_call_operand.vmem [shape: bf16[256,256], index: 0, kind: input, shape index: {}]   ;;  %s15499_s1 = inlined_call_operand.vmem [shape: bf16[256,32], index: 1, kind: input, shape index: {}]   ;;  %s15500_s2 = inlined_call_operand.vmem [shape: f32[8,32], index: 2, kind: input, shape index: {}]   ;;  %s15501_s3 = inlined_call_operand.vmem [shape: f32[1,32], index: 3, kind: input, shape index: {}]   ;;  %s15502_s4 = inlined_call_operand.vmem [shape: f32[1,32], index: 4, kind: input, shape index: {}]   ;;  %s15503_s5 = inlined_call_operand.vmem [shape: bf16[4,1,32], index: 5, kind: input, shape index: {}]   ;;  %s15504_s6 = inlined_call_operand.vmem [shape: f32[1,32], index: 6, kind: input, shape index: {}]   ;;  %s15505_s7 = inlined_call_operand.vmem [shape: f32[32,32], index: 7, kind: input, shape index: {}]   ;;  %s15506_s8 = inlined_call_operand.vmem [shape: f32[1,32], index: 8, kind: input, shape index: {}]   ;;  %s15507_s9 = inlined_call_operand.vmem [shape: f32[1,32], index: 9, kind: input, shape index: {}]   ;;  %s15508_s10 = inlined_call_operand.vmem [shape: bf16[32,128], index: 10, kind: input, shape index: {}]   ;;  %s15509_s11 = inlined_call_operand.vmem [shape: f32[2,1,32], index: 11, kind: input, shape index: {}]   ;;  %s15510_s12 = inlined_call_operand.vmem [shape: f32[2,1,32], index: 12, kind: input, shape index: {}]   ;;  %s15511_s13 = inlined_call_operand.vmem [shape: bf16[2,32,128], index: 13, kind: input, shape index: {}]   ;;  %s15512_s14 = inlined_call_operand.vmem [shape: f32[2,1,128], index: 14, kind: input, shape index: {}]   ;;  %s15513_s15 = inlined_call_operand.vmem [shape: bf16[2,32,32], index: 15, kind: input, shape index: {}]   ;;  %s15514_s16 = inlined_call_operand.vmem [shape: f32[2,1,32], index: 16, kind: input, shape index: {}]   ;;  %s15515_s17 = inlined_call_operand.vmem [shape: f32[2,1,32], index: 17, kind: input, shape index: {}]   ;;  %s15516_s18 = inlined_call_operand.vmem [shape: f32[2,1,32], index: 18, kind: input, shape index: {}]   ;;  %s15517_s19 = inlined_call_operand.vmem [shape: bf16[2,32,128], index: 19, kind: input, shape index: {}]   ;;  %s15518_s20 = inlined_call_operand.vmem [shape: f32[2,1,128], index: 20, kind: input, shape index: {}]   ;;  %s15519_s21 = inlined_call_operand.vmem [shape: bf16[2,128,32], index: 21, kind: input, shape index: {}]   ;;  %s15520_s22 = inlined_call_operand.vmem [shape: f32[2,1,32], index: 22, kind: input, shape index: {}]   ;;  %s15521_s23 = inlined_call_operand.vmem [shape: f32[64,128], index: 23, kind: output, shape index: {}]  }
   0x1   :  { %15630 = sst [smem:[#allocation47_spill]] %s15498_s0  ;;  %s10351_s25 = smov 0  }
   0x2   :  { %15631 = sst [smem:[#allocation48_spill]] %s15499_s1 }
   0x3   :  { %15632 = sst [smem:[#allocation49_spill]] %s15500_s2 }
   0x4   :  { %15633 = sst [smem:[#allocation50_spill]] %s15501_s3 }
   0x5   :  { %15634 = sst [smem:[#allocation51_spill]] %s15502_s4  ;;  %s10345_s4 = smov 0  }
   0x6   :  { %15635 = sst [smem:[#allocation52_spill]] %s15503_s5  ;;  %s10353_s5 = smov 0  }
   0x7   :  { %15636 = sst [smem:[#allocation53_spill]] %s15504_s6 }
   0x8   :  { %15637 = sst [smem:[#allocation54_spill]] %s15505_s7 }
   0x9   :  { %15638 = sst [smem:[#allocation55_spill]] %s15506_s8 }
   0xa   :  { %15639 = sst [smem:[#allocation56_spill]] %s15507_s9 }
   0xb   :  { %15640 = sst [smem:[#allocation57_spill]] %s15508_s10 }
   0xc   :  { %15641 = sst [smem:[#allocation58_spill]] %s15509_s11 }
   0xd   :  { %15642 = sst [smem:[#allocation59_spill]] %s15510_s12 }
   0xe   :  { %15643 = sst [smem:[#allocation60_spill]] %s15511_s13 }
   0xf   :  { %15644 = sst [smem:[#allocation61_spill]] %s15512_s14 }
  0x10   :  { %15645 = sst [smem:[#allocation62_spill]] %s15513_s15 }
  0x11   :  { %15646 = sst [smem:[#allocation63_spill]] %s15514_s16 }
  0x12   :  { %15647 = sst [smem:[#allocation64_spill]] %s15515_s17 }
  0x13   :  { %15648 = sst [smem:[#allocation65_spill]] %s15516_s18 }
  0x14 LB: > { %15649 = sst [smem:[#allocation3_spill]] %s10202_s4  ;;  %s42_s1 = sadd.s32 1, %s10210_s24  ;;  %s10218_s5 = sphi %s10353_s5, %s33_s5   ;;  %s10214_s25 = sphi %s10351_s25, %s15864_s25   ;;  %s10210_s24 = sphi %s10349_s24, %s15863_s24   ;;  %s10206_s30 = sphi %s10347_s30, %s15862_s30   ;;  %s10202_s4 = sphi %s10345_s4, %s15861_s4  }
  0x15   : > { %15650 = sst [smem:[#allocation4_spill]] %s10210_s24  ;;  %s45_s26 = sadd.s32 1, %s10214_s25 }
  0x16   : > { %15651 = sst [smem:[#allocation5_spill]] %s10214_s25  ;;  %p43_p0 = scmp.ge.s32.totalorder %s42_s1, 2 }
  0x17   : > { %15652 = sst [smem:[#allocation6_spill]] %s10218_s5  ;;  %p9229_p1 = scmp.ge.s32.totalorder %s10218_s5, 1 }
  0x18   : > { %p755_p2 = scmp.lt.s32.totalorder %s10218_s5, 5  ;;  %s15866_s1 = smov (%p43_p0, %s42_s1), 0 }
  0x19   : > { %15653 = sst [smem:[#allocation7_spill]] %s15866_s1  ;;  %s15868_s26 = smov (!%p43_p0, %s45_s26), %s10214_s25 }
  0x1a   : > { %p756_p3 = pnand %p9229_p1, %p755_p2  ;;  %p47_p4 = scmp.ge.s32.totalorder %s15868_s26, 2 }
  0x1c   : > { %s15870_s26 = smov (%p47_p4, %s15868_s26), 0  ;;  %759 = sbr.rel (%p756_p3) target bundleno = 4093 (0xffd), region = 112 }
  0x1d   : > { %15654 = sst [smem:[#allocation8_spill]] %s15870_s26 }
  0x21   : > { %s9230_s2 = sshll.u32 %s10206_s30, 4  ;;  %p871_p5 = scmp.lt.s32.totalorder %s10202_s4, 1 }
  0x22   : > { %p865_p6 = scmp.lt.s32.totalorder %s9230_s2, 31  ;;  %s9241_s6 = sshll.u32 %s10206_s30, 2 }
  0x23   : > { %s872_s27 = scalar_select %p871_p5, %s10202_s4, 1 }
  0x24   : > { %s15872_s2 = smov (!%p865_p6, %s9230_s2), 31  ;;  %s15655_s11 = sld [smem:[#allocation58_spill]] }
  0x25   : > { %s15656_s12 = sld [smem:[#allocation59_spill]]  ;;  %s9585_s1 = sshll.u32 %s15872_s2, 3 }
  0x26   : > { %s9586_s25 = sshll.u32 %s872_s27, 4  ;;  %s15658_s9 = sld [smem:[#allocation47_spill]] }
  0x27   : > { %s15659_s13 = sld [smem:[#allocation60_spill]]  ;;  %s10431_s3 = scalar_lea.vmem %s15517_s19, %s9586_s25 }
  0x28   : > { %s15660_s14 = sld [smem:[#allocation61_spill]]  ;;  %s10446_s30 = scalar_lea.vmem %s15520_s22, %s872_s27 }
  0x29   : > { %s15661_s15 = sld [smem:[#allocation62_spill]]  ;;  %p916_p7 = scmp.lt.s32.totalorder %s9241_s6, 7 }
  0x2a   : > { %s10386_s29 = scalar_lea.vmem %s15655_s11, %s872_s27  ;;  %s15662_s16 = sld [smem:[#allocation63_spill]] }
  0x2b   : > { %s10391_s26 = scalar_lea.vmem %s15656_s12, %s872_s27  ;;  %s15663_s17 = sld [smem:[#allocation64_spill]] }
  0x2c   : > { %15657 = sst [smem:[#allocation9_spill]] %s10391_s26  ;;  %s10396_s8 = scalar_lea.vmem %s15658_s9, %s9585_s1 }
  0x2d   : > { %s10401_s4 = scalar_lea.vmem %s15659_s13, %s9586_s25  ;;  %s15664_s18 = sld [smem:[#allocation65_spill]] }
  0x2e   : > { %s10406_s11 = scalar_lea.vmem %s15660_s14, %s872_s27  ;;  %s10436_s12 = scalar_lea.vmem %s15518_s20, %s872_s27 }
  0x2f   : > { %s10411_s2 = scalar_lea.vmem %s15661_s15, %s9586_s25  ;;  %s9589_s26 = sshll.u32 %s872_s27, 6 }
  0x30   : > { %s10416_s9 = scalar_lea.vmem %s15662_s16, %s872_s27  ;;  %s10441_s5 = scalar_lea.vmem %s15519_s21, %s9589_s26 }
  0x31   : > { %s10421_s10 = scalar_lea.vmem %s15663_s17, %s872_s27  ;;  %s15874_s6 = smov (!%p916_p7, %s9241_s6), 7 }
  0x32   : > { %s9242_s13 = sshll.u32 %s15874_s6, 3  ;;  %s15665_s0 = sld [smem:[#allocation3_spill]] }
  0x33   : > { %s10426_s7 = scalar_lea.vmem %s15664_s18, %s872_s27  ;;  %s10451_s14 = scalar_lea.vmem %s15521_s23, %s9242_s13 }
  0x38   : > { %p9243_p8 = scmp.ne.s32.totalorder %s15665_s0, 0 }
  0x39   : > { %s15666_s26 = sld [smem:[#allocation48_spill]] (!%p9243_p8) }
  0x3a   : > { %925 = sbr.rel (%p9243_p8) target bundleno = 621 (0x26d), region = 116  ;;  %s15667_s13 = sld [smem:[#allocation49_spill]] (!%p9243_p8) }
  0x3b   : > { %s15668_s28 = sld [smem:[#allocation50_spill]] (!%p9243_p8) }
  0x3c   : > { %s15669_s24 = sld [smem:[#allocation51_spill]] (!%p9243_p8) }
  0x3f   : > { %v9613_v0 = vld [vmem:[%s15666_s26 + $0x38] sm:$0xff]  ;;  %v9612_v2 = vld [vmem:[%s15666_s26 + $0x30] sm:$0xff]  ;;  %v9611_v4 = vld [vmem:[%s15666_s26 + $0x28] sm:$0xff]  ;;  %vm1411_vm0 = vcmask 1040384   ;;  %vm1444_vm1 = vcmask 1044480   ;;  %vm1512_vm2 = vcmask 261120  }
  0x40   : > { %v9621_v1 = vld [vmem:[%s15666_s26 + $0x78] sm:$0xff]  ;;  %1150 = vmatpush.bf16.msra.mxu0 %v9613_v0  ;;  %v9620_v3 = vld [vmem:[%s15666_s26 + $0x70] sm:$0xff]  ;;  %9638 = vmatpush.bf16.msra.mxu2 %v9613_v0  ;;  %v9619_v5 = vld [vmem:[%s15666_s26 + $0x68] sm:$0xff] }
  0x41   : > { %1199 = vmatpush.bf16.msra.mxu1 %v9621_v1  ;;  %9646 = vmatpush.bf16.msra.mxu3 %v9621_v1  ;;  %v9610_v6 = vld [vmem:[%s15666_s26 + $0x20] sm:$0xff]  ;;  %v9609_v8 = vld [vmem:[%s15666_s26 + $0x18] sm:$0xff]  ;;  %v9608_v10 = vld [vmem:[%s15666_s26 + $0x10] sm:$0xff] }
  0x42   : > { %v9618_v7 = vld [vmem:[%s15666_s26 + $0x60] sm:$0xff]  ;;  %v9617_v9 = vld [vmem:[%s15666_s26 + $0x58] sm:$0xff]  ;;  %v9616_v11 = vld [vmem:[%s15666_s26 + $0x50] sm:$0xff]  ;;  %s15670_s16 = smov %s15669_s24 }
  0x43   : > { %v9607_v12 = vld [vmem:[%s15666_s26 + $0x8] sm:$0xff]  ;;  %v9606_v14 = vld [vmem:[%s15666_s26] sm:$0xff]  ;;  %v9254_v28 = vld [vmem:[%s10396_s8 + $0x10] sm:$0xf] }
  0x44   : > { %1151 = vmatpush.bf16.msra.mxu0 %v9612_v2  ;;  %9639 = vmatpush.bf16.msra.mxu2 %v9612_v2  ;;  %v9615_v13 = vld [vmem:[%s15666_s26 + $0x48] sm:$0xff]  ;;  %v9614_v15 = vld [vmem:[%s15666_s26 + $0x40] sm:$0xff]  ;;  %v9593_v29 = vld [vmem:[%s10396_s8 + $0x14] sm:$0xf0] }
  0x45   : > { %1200 = vmatpush.bf16.msra.mxu1 %v9620_v3  ;;  %9647 = vmatpush.bf16.msra.mxu3 %v9620_v3  ;;  %v9246_v16 = vld [vmem:[%s10396_s8] sm:$0xf]  ;;  %v9591_v17 = vld [vmem:[%s10396_s8 + $0x4] sm:$0xf0]  ;;  %v9590_v18 = vld [vmem:[%s10396_s8 + $0x4] sm:$0xf]  ;;  %v9255_v36 = vor.u32 %v9593_v29, %v9254_v28 }
  0x46   : > { %v9248_v19 = vld [vmem:[%s10396_s8 + $0x8] sm:$0xf0]  ;;  %v9278_v20 = vld [vmem:[%s10396_s8 + $0x40] sm:$0xf]  ;;  %v9599_v21 = vld [vmem:[%s10396_s8 + $0x44] sm:$0xf0]  ;;  %v9247_v24 = vor.u32 %v9591_v17, %v9246_v16 }
  0x47   : > { %v9598_v22 = vld [vmem:[%s10396_s8 + $0x44] sm:$0xf]  ;;  %v9280_v23 = vld [vmem:[%s10396_s8 + $0x48] sm:$0xf0]  ;;  %v9251_v25 = vor.u32 %v9590_v18, %v9248_v19  ;;  %v9279_v26 = vor.u32 %v9599_v21, %v9278_v20  ;;  %v9592_v30 = vld [vmem:[%s10396_s8 + $0x14] sm:$0xf] }
  0x48   : > { %1152 = vmatpush.bf16.msra.mxu0 %v9611_v4  ;;  %9640 = vmatpush.bf16.msra.mxu2 %v9611_v4  ;;  %v9283_v27 = vor.u32 %v9598_v22, %v9280_v23  ;;  %v9256_v31 = vld [vmem:[%s10396_s8 + $0x18] sm:$0xf0]  ;;  %v9286_v32 = vld [vmem:[%s10396_s8 + $0x50] sm:$0xf]  ;;  %v9601_v33 = vld [vmem:[%s10396_s8 + $0x54] sm:$0xf0] }
  0x49   : > { %1201 = vmatpush.bf16.msra.mxu1 %v9619_v5  ;;  %9648 = vmatpush.bf16.msra.mxu3 %v9619_v5  ;;  %v9600_v34 = vld [vmem:[%s10396_s8 + $0x54] sm:$0xf]  ;;  %v9288_v35 = vld [vmem:[%s10396_s8 + $0x58] sm:$0xf0]  ;;  %v9259_v37 = vor.u32 %v9592_v30, %v9256_v31  ;;  %v9287_v38 = vor.u32 %v9601_v33, %v9286_v32  ;;  %v9262_v40 = vld [vmem:[%s10396_s8 + $0x20] sm:$0xf] }
  0x4a   : > { %v9291_v39 = vor.u32 %v9600_v34, %v9288_v35  ;;  %v9595_v41 = vld [vmem:[%s10396_s8 + $0x24] sm:$0xf0]  ;;  %v9594_v42 = vld [vmem:[%s10396_s8 + $0x24] sm:$0xf]  ;;  %v9264_v43 = vld [vmem:[%s10396_s8 + $0x28] sm:$0xf0] }
  0x4b   : > { %v9294_v44 = vld [vmem:[%s10396_s8 + $0x60] sm:$0xf]  ;;  %v9603_v45 = vld [vmem:[%s10396_s8 + $0x64] sm:$0xf0]  ;;  %v9602_v46 = vld [vmem:[%s10396_s8 + $0x64] sm:$0xf]  ;;  %v9263_v48 = vor.u32 %v9595_v41, %v9262_v40  ;;  %v9267_v49 = vor.u32 %v9594_v42, %v9264_v43 }
  0x4c   : > { %1153 = vmatpush.bf16.msra.mxu0 %v9610_v6  ;;  %9641 = vmatpush.bf16.msra.mxu2 %v9610_v6  ;;  %v9296_v47 = vld [vmem:[%s10396_s8 + $0x68] sm:$0xf0]  ;;  %v9295_v50 = vor.u32 %v9603_v45, %v9294_v44  ;;  %v9270_v52 = vld [vmem:[%s10396_s8 + $0x30] sm:$0xf]  ;;  %v9597_v53 = vld [vmem:[%s10396_s8 + $0x34] sm:$0xf0] }
  0x4d   : > { %1202 = vmatpush.bf16.msra.mxu1 %v9618_v7  ;;  %9649 = vmatpush.bf16.msra.mxu3 %v9618_v7  ;;  %v9299_v51 = vor.u32 %v9602_v46, %v9296_v47  ;;  %v9596_v54 = vld [vmem:[%s10396_s8 + $0x34] sm:$0xf]  ;;  %v9272_v55 = vld [vmem:[%s10396_s8 + $0x38] sm:$0xf0]  ;;  %v9302_v56 = vld [vmem:[%s10396_s8 + $0x70] sm:$0xf]  ;;  %v9271_v60 = vor.u32 %v9597_v53, %v9270_v52 }
  0x4e   : > { %v9605_v57 = vld [vmem:[%s10396_s8 + $0x74] sm:$0xf0]  ;;  %v9604_v58 = vld [vmem:[%s10396_s8 + $0x74] sm:$0xf]  ;;  %v9304_v59 = vld [vmem:[%s10396_s8 + $0x78] sm:$0xf0]  ;;  %v9275_v61 = vor.u32 %v9596_v54, %v9272_v55 }
  0x4f   : > { %v9303_v62 = vor.u32 %v9605_v57, %v9302_v56  ;;  %v9307_v63 = vor.u32 %v9604_v58, %v9304_v59 }
  0x50   : > { %1154 = vmatpush.bf16.msra.mxu0 %v9609_v8  ;;  %9642 = vmatpush.bf16.msra.mxu2 %v9609_v8 }
  0x51   : > { %1203 = vmatpush.bf16.msra.mxu1 %v9617_v9  ;;  %9650 = vmatpush.bf16.msra.mxu3 %v9617_v9 }
  0x54   : > { %1155 = vmatpush.bf16.msra.mxu0 %v9608_v10  ;;  %9643 = vmatpush.bf16.msra.mxu2 %v9608_v10 }
  0x55   : > { %1204 = vmatpush.bf16.msra.mxu1 %v9616_v11  ;;  %9651 = vmatpush.bf16.msra.mxu3 %v9616_v11 }
  0x58   : > { %1156 = vmatpush.bf16.msra.mxu0 %v9607_v12  ;;  %9644 = vmatpush.bf16.msra.mxu2 %v9607_v12 }
  0x59   : > { %1205 = vmatpush.bf16.msra.mxu1 %v9615_v13  ;;  %9652 = vmatpush.bf16.msra.mxu3 %v9615_v13  ;;  %v10541_v13 = vld [vmem:[%s15667_s13] sm:$0xff] }
  0x5c   : > { %1157 = vmatpush.bf16.msra.mxu0 %v9606_v14  ;;  %9645 = vmatpush.bf16.msra.mxu2 %v9606_v14 }
  0x5d   : > { %1206 = vmatpush.bf16.msra.mxu1 %v9614_v15  ;;  %9653 = vmatpush.bf16.msra.mxu3 %v9614_v15 }
  0x5f   : > { %1158 = vmatmul.bf16.vlgmr.msra.gmra.mxu0 %v9247_v24  ;;  %1178 = vmatmul.bf16.vlgmr.msra.gmra.mxu2 %v9279_v26 }
  0x60   : > { %1207 = vmatmul.bf16.vlgmr.msra.gmra.mxu1 %v9251_v25  ;;  %1227 = vmatmul.bf16.vlgmr.msra.gmra.mxu3 %v9283_v27 }
  0x6f   : > { %1163 = vmatmul.bf16.gmra.mxu0 %v9255_v36  ;;  %1183 = vmatmul.bf16.gmra.mxu2 %v9287_v38 }
  0x70   : > { %1212 = vmatmul.bf16.gmra.mxu1 %v9259_v37  ;;  %1232 = vmatmul.bf16.gmra.mxu3 %v9291_v39 }
  0x7f   : > { %1168 = vmatmul.bf16.gmra.mxu0 %v9263_v48  ;;  %1188 = vmatmul.bf16.gmra.mxu2 %v9295_v50 }
  0x80   : > { %1217 = vmatmul.bf16.gmra.mxu1 %v9267_v49  ;;  %1237 = vmatmul.bf16.gmra.mxu3 %v9299_v51 }
  0x8f   : > { %1173 = vmatmul.bf16.gmra.mxu0 %v9271_v60  ;;  %1193 = vmatmul.bf16.gmra.mxu2 %v9303_v62 }
  0x90   : > { %1222 = vmatmul.bf16.gmra.mxu1 %v9275_v61  ;;  %1242 = vmatmul.bf16.gmra.mxu3 %v9307_v63 }
  0xdc   : > { %v1159_v0 = vpop.f32.mrf.mxu0 }
  0xdd   : > { %v1208_v1 = vpop.f32.mrf.mxu1 }
  0xde   : > { %v1209_v2 = vadd.f32 %v1208_v1, %v1159_v0 }
  0xe0   : > { %v1264_v3 = vrot.slane %v1209_v2, 4  ;;  %1280 = vst [vmem:[#allocation1] ss:$2 sm:$0xff] %v1209_v2 }
  0xe2   : > { %1283 = vst [vmem:[#allocation1 + $0x10] ss:$2 sm:$0xff] %v1264_v3  ;;  %v10534_v10 = vpop.f32.mrf.mxu2 }
  0xe3   : > { %v10536_v11 = vpop.f32.mrf.mxu3 }
  0xe4   : > { %v1161_v4 = vpop.f32.mrf.mxu0 }
  0xe5   : > { %v1210_v5 = vpop.f32.mrf.mxu1 }
  0xe6   : > { %v1211_v6 = vadd.f32 %v1210_v5, %v1161_v4 }
  0xe7   : > { %v1281_v7 = vld.sshfl [vmem:[#allocation1] sm:$0xff pattern:$0x75316420] }
  0xe8   : > { %v1265_v8 = vrot.slane %v1211_v6, 4  ;;  %1286 = vst [vmem:[#allocation1 + $0x20] ss:$2 sm:$0xff] %v1211_v6  ;;  %v1347_v9 = vrot.slane %v1281_v7, 7 }
  0xe9   : > { %v1284_v12 = vld.sshfl [vmem:[#allocation1 + $0x10] sm:$0xff pattern:$0x75316420] }
  0xea   : > { %1289 = vst [vmem:[#allocation1 + $0x30] ss:$2 sm:$0xff] %v1265_v8  ;;  %v1412_v14 = vsel %vm1411_vm0, 0.0, %v1347_v9  ;;  %v1348_v15 = vrot.slane %v1284_v12, 7  ;;  %v10556_v31 = vpop.f32.mrf.mxu2 }
  0xeb   : > { %v1445_v16 = vsel %vm1444_vm1, %v1412_v14, 0.0  ;;  %v10558_v32 = vpop.f32.mrf.mxu3 }
  0xec   : > { %v10546_v17 = vadd.f32 %v10541_v13, %v1445_v16  ;;  %v1413_v18 = vsel %vm1411_vm0, 0.0, %v1348_v15  ;;  %v1164_v19 = vpop.f32.mrf.mxu0 }
  0xed   : > { %v1213_v20 = vpop.f32.mrf.mxu1  ;;  %v1446_v24 = vsel %vm1444_vm1, %v1413_v18, 0.0 }
  0xee   : > { %v1214_v21 = vadd.f32 %v1213_v20, %v1164_v19  ;;  %v1513_v22 = vsel %vm1512_vm2, %v10546_v17, 0.0  ;;  %v10554_v29 = vadd.f32 %v10541_v13, %v1446_v24 }
  0xef   : > { %1514 = vadd.xlane.f32.xlu0 %v1513_v22  ;;  %v1287_v23 = vld.sshfl [vmem:[#allocation1 + $0x20] sm:$0xff pattern:$0x75316420] }
  0xf0   : > { %v1266_v25 = vrot.slane %v1214_v21, 4  ;;  %1291 = vst [vmem:[#allocation1] ss:$2 sm:$0xff] %v1214_v21  ;;  %v1349_v26 = vrot.slane %v1287_v23, 7  ;;  %v1516_v40 = vsel %vm1512_vm2, %v10554_v29, 0.0 }
  0xf1   : > { %v1290_v27 = vld.sshfl [vmem:[#allocation1 + $0x30] sm:$0xff pattern:$0x75316420] }
  0xf2   : > { %1293 = vst [vmem:[#allocation1 + $0x10] ss:$2 sm:$0xff] %v1266_v25  ;;  %v1414_v28 = vsel %vm1411_vm0, 0.0, %v1349_v26  ;;  %v1350_v30 = vrot.slane %v1290_v27, 7  ;;  %v10579_v52 = vpop.f32.mrf.mxu2 }
  0xf3   : > { %v1447_v33 = vsel %vm1444_vm1, %v1414_v28, 0.0  ;;  %v10581_v53 = vpop.f32.mrf.mxu3 }
  0xf4   : > { %v10562_v34 = vadd.f32 %v10541_v13, %v1447_v33  ;;  %v1415_v35 = vsel %vm1411_vm0, 0.0, %v1350_v30  ;;  %v1166_v36 = vpop.f32.mrf.mxu0 }
  0xf5   : > { %v1215_v37 = vpop.f32.mrf.mxu1  ;;  %v1448_v42 = vsel %vm1444_vm1, %v1415_v35, 0.0 }
  0xf6   : > { %v1216_v38 = vadd.f32 %v1215_v37, %v1166_v36  ;;  %v1519_v39 = vsel %vm1512_vm2, %v10562_v34, 0.0  ;;  %v10571_v46 = vadd.f32 %v10541_v13, %v1448_v42 }
  0xf7   : > { %1520 = vadd.xlane.f32.xlu1 %v1519_v39  ;;  %1517 = vadd.xlane.f32.xlu0 %v1516_v40  ;;  %v1292_v41 = vld.sshfl [vmem:[#allocation1] sm:$0xff pattern:$0x75316420] }
  0xf8   : > { %v1267_v43 = vrot.slane %v1216_v38, 4  ;;  %1295 = vst [vmem:[#allocation1 + $0x20] ss:$2 sm:$0xff] %v1216_v38  ;;  %v1351_v44 = vrot.slane %v1292_v41, 7  ;;  %v1522_v57 = vsel %vm1512_vm2, %v10571_v46, 0.0 }
  0xf9   : > { %v1294_v45 = vld.sshfl [vmem:[#allocation1 + $0x10] sm:$0xff pattern:$0x75316420] }
  0xfa   : > { %1297 = vst [vmem:[#allocation1 + $0x30] ss:$2 sm:$0xff] %v1267_v43  ;;  %v1416_v47 = vsel %vm1411_vm0, 0.0, %v1351_v44  ;;  %v1352_v48 = vrot.slane %v1294_v45, 7  ;;  %v10605_v18 = vpop.f32.mrf.mxu2 }
  0xfb   : > { %v1449_v49 = vsel %vm1444_vm1, %v1416_v47, 0.0  ;;  %v10607_v19 = vpop.f32.mrf.mxu3 }
  0xfc   : > { %v10576_v50 = vadd.f32 %v10541_v13, %v1449_v49  ;;  %v1417_v51 = vsel %vm1411_vm0, 0.0, %v1352_v48  ;;  %v1169_v54 = vpop.f32.mrf.mxu0 }
  0xfd   : > { %v1218_v55 = vpop.f32.mrf.mxu1  ;;  %v1450_v60 = vsel %vm1444_vm1, %v1417_v51, 0.0 }
  0xfe   : > { %v1219_v56 = vadd.f32 %v1218_v55, %v1169_v54  ;;  %v1525_v58 = vsel %vm1512_vm2, %v10576_v50, 0.0  ;;  %v10590_v1 = vadd.f32 %v10541_v13, %v1450_v60  ;;  %v1229_v55 = vadd.f32 %v10536_v11, %v10534_v10 }
  0xff   : > { %1523 = vadd.xlane.f32.xlu1 %v1522_v57  ;;  %1526 = vadd.xlane.f32.xlu2 %v1525_v58  ;;  %v1296_v59 = vld.sshfl [vmem:[#allocation1 + $0x20] sm:$0xff pattern:$0x75316420] }
 0x100   : > { %v1268_v61 = vrot.slane %v1219_v56, 4  ;;  %1299 = vst [vmem:[#allocation1] ss:$2 sm:$0xff] %v1219_v56  ;;  %v1353_v62 = vrot.slane %v1296_v59, 7  ;;  %v1528_v14 = vsel %vm1512_vm2, %v10590_v1, 0.0  ;;  %v1272_v10 = vrot.slane %v1229_v55, 4 }
 0x101   : > { %v1298_v63 = vld.sshfl [vmem:[#allocation1 + $0x30] sm:$0xff pattern:$0x75316420] }
 0x102   : > { %1301 = vst [vmem:[#allocation1 + $0x10] ss:$2 sm:$0xff] %v1268_v61  ;;  %v1418_v0 = vsel %vm1411_vm0, 0.0, %v1353_v62  ;;  %v1354_v2 = vrot.slane %v1298_v63, 7  ;;  %v1189_v44 = vpop.f32.mrf.mxu2 }
 0x103   : > { %v1451_v3 = vsel %vm1444_vm1, %v1418_v0, 0.0  ;;  %v1238_v45 = vpop.f32.mrf.mxu3 }
 0x104   : > { %v10594_v4 = vadd.f32 %v10541_v13, %v1451_v3  ;;  %v1419_v5 = vsel %vm1411_vm0, 0.0, %v1354_v2  ;;  %v1171_v6 = vpop.f32.mrf.mxu0 }
 0x105   : > { %v1220_v7 = vpop.f32.mrf.mxu1  ;;  %v1452_v8 = vsel %vm1444_vm1, %v1419_v5, 0.0 }
 0x106   : > { %v1221_v9 = vadd.f32 %v1220_v7, %v1171_v6  ;;  %v1531_v12 = vsel %vm1512_vm2, %v10594_v4, 0.0  ;;  %v10603_v15 = vadd.f32 %v10541_v13, %v1452_v8 }
 0x107   : > { %1532 = vadd.xlane.f32.xlu0 %v1531_v12  ;;  %1529 = vadd.xlane.f32.xlu2 %v1528_v14  ;;  %v1300_v16 = vld.sshfl [vmem:[#allocation1] sm:$0xff pattern:$0x75316420] }
 0x108   : > { %v1269_v20 = vrot.slane %v1221_v9, 4  ;;  %1303 = vst [vmem:[#allocation1 + $0x20] ss:$2 sm:$0xff] %v1221_v9  ;;  %v1534_v21 = vsel %vm1512_vm2, %v10603_v15, 0.0  ;;  %v1355_v22 = vrot.slane %v1300_v16, 7  ;;  %v1231_v9 = vadd.f32 %v10558_v32, %v10556_v31 }
 0x109   : > { %1535 = vadd.xlane.f32.xlu1 %v1534_v21  ;;  %v1302_v23 = vld.sshfl [vmem:[#allocation1 + $0x10] sm:$0xff pattern:$0x75316420] }
 0x10a   : > { %1305 = vst [vmem:[#allocation1 + $0x30] ss:$2 sm:$0xff] %v1269_v20  ;;  %v1420_v24 = vsel %vm1411_vm0, 0.0, %v1355_v22  ;;  %v1356_v25 = vrot.slane %v1302_v23, 7  ;;  %v1191_v7 = vpop.f32.mrf.mxu2  ;;  %v1234_v20 = vadd.f32 %v10581_v53, %v10579_v52 }
 0x10b   : > { %v1453_v26 = vsel %vm1444_vm1, %v1420_v24, 0.0  ;;  %v1240_v8 = vpop.f32.mrf.mxu3  ;;  %v1273_v24 = vrot.slane %v1231_v9, 4 }
 0x10c   : > { %v10614_v27 = vadd.f32 %v10541_v13, %v1453_v26  ;;  %v1421_v28 = vsel %vm1411_vm0, 0.0, %v1356_v25  ;;  %v1174_v30 = vpop.f32.mrf.mxu0 }
 0x10d   : > { %v1223_v33 = vpop.f32.mrf.mxu1  ;;  %v1454_v35 = vsel %vm1444_vm1, %v1421_v28, 0.0  ;;  %v1274_v28 = vrot.slane %v1234_v20, 4 }
 0x10e   : > { %v1224_v36 = vadd.f32 %v1223_v33, %v1174_v30  ;;  %v1537_v37 = vsel %vm1512_vm2, %v10614_v27, 0.0  ;;  %v10621_v38 = vadd.f32 %v10541_v13, %v1454_v35  ;;  %v1236_v33 = vadd.f32 %v10607_v19, %v10605_v18 }
 0x10f   : > { %1538 = vadd.xlane.f32.xlu2 %v1537_v37  ;;  %v1304_v39 = vld.sshfl [vmem:[#allocation1 + $0x20] sm:$0xff pattern:$0x75316420] }
 0x110   : > { %v1270_v40 = vrot.slane %v1224_v36, 4  ;;  %1307 = vst [vmem:[#allocation1] ss:$2 sm:$0xff] %v1224_v36  ;;  %v1540_v41 = vsel %vm1512_vm2, %v10621_v38, 0.0  ;;  %v1357_v42 = vrot.slane %v1304_v39, 7 }
 0x111   : > { %1541 = vadd.xlane.f32.xlu0 %v1540_v41  ;;  %v1306_v43 = vld.sshfl [vmem:[#allocation1 + $0x30] sm:$0xff pattern:$0x75316420] }
 0x112   : > { %1309 = vst [vmem:[#allocation1 + $0x10] ss:$2 sm:$0xff] %v1270_v40  ;;  %v1422_v47 = vsel %vm1411_vm0, 0.0, %v1357_v42  ;;  %v1358_v48 = vrot.slane %v1306_v43, 7  ;;  %v1239_v42 = vadd.f32 %v1238_v45, %v1189_v44 }
 0x113   : > { %v1455_v49 = vsel %vm1444_vm1, %v1422_v47, 0.0  ;;  %v1243_v18 = vpop.f32.mrf.mxu3 }
 0x114   : > { %v10628_v51 = vadd.f32 %v10541_v13, %v1455_v49  ;;  %v1423_v54 = vsel %vm1411_vm0, 0.0, %v1358_v48  ;;  %v1176_v56 = vpop.f32.mrf.mxu0  ;;  %v1194_v48 = vpop.f32.mrf.mxu2 }
 0x115   : > { %v1225_v57 = vpop.f32.mrf.mxu1  ;;  %v1456_v58 = vsel %vm1444_vm1, %v1423_v54, 0.0 }
 0x116   : > { %v1226_v59 = vadd.f32 %v1225_v57, %v1176_v56  ;;  %v1543_v60 = vsel %vm1512_vm2, %v10628_v51, 0.0  ;;  %v10637_v61 = vadd.f32 %v10541_v13, %v1456_v58  ;;  %v1275_v56 = vrot.slane %v1236_v33, 4 }
 0x117   : > { %1544 = vadd.xlane.f32.xlu1 %v1543_v60  ;;  %v1308_v62 = vld.sshfl [vmem:[#allocation1] sm:$0xff pattern:$0x75316420] }
 0x118   : > { %v1271_v63 = vrot.slane %v1226_v59, 4  ;;  %1311 = vst [vmem:[#allocation1 + $0x20] ss:$2 sm:$0xff] %v1226_v59  ;;  %v1546_v0 = vsel %vm1512_vm2, %v10637_v61, 0.0  ;;  %v1359_v2 = vrot.slane %v1308_v62, 7  ;;  %v1276_v62 = vrot.slane %v1239_v42, 4 }
 0x119   : > { %1547 = vadd.xlane.f32.xlu2 %v1546_v0  ;;  %1315 = vst [vmem:[#allocation1] ss:$2 sm:$0xff] %v1229_v55  ;;  %v1310_v11 = vld.sshfl [vmem:[#allocation1 + $0x10] sm:$0xff pattern:$0x75316420] }
 0x11a   : > { %1313 = vst [vmem:[#allocation1 + $0x30] ss:$2 sm:$0xff] %v1271_v63  ;;  %v1424_v3 = vsel %vm1411_vm0, 0.0, %v1359_v2  ;;  %v1360_v5 = vrot.slane %v1310_v11, 7 }
 0x11b   : > { %v1457_v6 = vsel %vm1444_vm1, %v1424_v3, 0.0  ;;  %1317 = vst [vmem:[#allocation1 + $0x10] ss:$2 sm:$0xff] %v1272_v10  ;;  %v1241_v10 = vadd.f32 %v1240_v8, %v1191_v7 }
 0x11c   : > { %v10646_v12 = vadd.f32 %v10541_v13, %v1457_v6  ;;  %v1425_v14 = vsel %vm1411_vm0, 0.0, %v1360_v5 }
 0x11d   : > { %v1458_v16 = vsel %vm1444_vm1, %v1425_v14, 0.0  ;;  %v1244_v14 = vadd.f32 %v1243_v18, %v1194_v48 }
 0x11e   : > { %v1549_v21 = vsel %vm1512_vm2, %v10646_v12, 0.0  ;;  %v10655_v22 = vadd.f32 %v10541_v13, %v1458_v16 }
 0x11f   : > { %1550 = vadd.xlane.f32.xlu0 %v1549_v21  ;;  %v1312_v23 = vld.sshfl [vmem:[#allocation1 + $0x20] sm:$0xff pattern:$0x75316420] }
 0x120   : > { %v1552_v31 = vsel %vm1512_vm2, %v10655_v22, 0.0  ;;  %1319 = vst [vmem:[#allocation1 + $0x20] ss:$2 sm:$0xff] %v1231_v9  ;;  %v1361_v32 = vrot.slane %v1312_v23, 7 }
 0x121   : > { %1553 = vadd.xlane.f32.xlu1 %v1552_v31  ;;  %v1314_v25 = vld.sshfl [vmem:[#allocation1 + $0x30] sm:$0xff pattern:$0x75316420]  ;;  %v1316_v26 = vld.sshfl [vmem:[#allocation1] sm:$0xff pattern:$0x75316420]  ;;  %v1196_v31 = vpop.f32.mrf.mxu2 }
 0x122   : > { %v1426_v52 = vsel %vm1411_vm0, 0.0, %v1361_v32  ;;  %1321 = vst [vmem:[#allocation1 + $0x30] ss:$2 sm:$0xff] %v1273_v24  ;;  %v1362_v53 = vrot.slane %v1314_v25, 7  ;;  %v1363_v30 = vrot.slane %v1316_v26, 7  ;;  %v1277_v24 = vrot.slane %v1241_v10, 4  ;;  %v1245_v32 = vpop.f32.mrf.mxu3 }
 0x123   : > { %v1459_v35 = vsel %vm1444_vm1, %v1426_v52, 0.0  ;;  %1323 = vst [vmem:[#allocation1] ss:$2 sm:$0xff] %v1234_v20  ;;  %v1318_v36 = vld.sshfl [vmem:[#allocation1 + $0x10] sm:$0xff pattern:$0x75316420] }
 0x124   : > { %v10664_v37 = vadd.f32 %v10541_v13, %v1459_v35  ;;  %v1427_v39 = vsel %vm1411_vm0, 0.0, %v1362_v53  ;;  %v1428_v40 = vsel %vm1411_vm0, 0.0, %v1363_v30  ;;  %v1364_v41 = vrot.slane %v1318_v36, 7  ;;  %1325 = vst [vmem:[#allocation1 + $0x10] ss:$2 sm:$0xff] %v1274_v28 }
 0x125   : > { %v1460_v43 = vsel %vm1444_vm1, %v1427_v39, 0.0  ;;  %v1461_v47 = vsel %vm1444_vm1, %v1428_v40, 0.0  ;;  %v1246_v39 = vadd.f32 %v1245_v32, %v1196_v31 }
 0x126   : > { %v1555_v19 = vsel %vm1512_vm2, %v10664_v37, 0.0  ;;  %v10673_v49 = vadd.f32 %v10541_v13, %v1460_v43  ;;  %v10676_v54 = vadd.f32 %v10541_v13, %v1461_v47  ;;  %v1429_v55 = vsel %vm1411_vm0, 0.0, %v1364_v41 }
 0x127   : > { %1556 = vadd.xlane.f32.xlu2 %v1555_v19  ;;  %v1462_v44 = vsel %vm1444_vm1, %v1429_v55, 0.0  ;;  %v1320_v45 = vld.sshfl [vmem:[#allocation1 + $0x20] sm:$0xff pattern:$0x75316420] }
 0x128   : > { %v1558_v57 = vsel %vm1512_vm2, %v10673_v49, 0.0  ;;  %v1561_v58 = vsel %vm1512_vm2, %v10676_v54, 0.0  ;;  %1327 = vst [vmem:[#allocation1 + $0x20] ss:$2 sm:$0xff] %v1236_v33  ;;  %v1365_v59 = vrot.slane %v1320_v45, 7  ;;  %v10685_v63 = vadd.f32 %v10541_v13, %v1462_v44 }
 0x129   : > { %1559 = vadd.xlane.f32.xlu0 %v1558_v57  ;;  %1562 = vadd.xlane.f32.xlu1 %v1561_v58  ;;  %v1322_v60 = vld.sshfl [vmem:[#allocation1 + $0x30] sm:$0xff pattern:$0x75316420]  ;;  %v1278_v33 = vrot.slane %v1244_v14, 4  ;;  %v1279_v45 = vrot.slane %v1246_v39, 4 }
 0x12a   : > { %v1430_v0 = vsel %vm1411_vm0, 0.0, %v1365_v59  ;;  %1329 = vst [vmem:[#allocation1 + $0x30] ss:$2 sm:$0xff] %v1275_v56  ;;  %v1366_v2 = vrot.slane %v1322_v60, 7  ;;  %v1564_v21 = vsel %vm1512_vm2, %v10685_v63, 0.0 }
 0x12b   : > { %v1463_v11 = vsel %vm1444_vm1, %v1430_v0, 0.0  ;;  %v1324_v3 = vld.sshfl [vmem:[#allocation1] sm:$0xff pattern:$0x75316420] }
 0x12c   : > { %v10690_v5 = vadd.f32 %v10541_v13, %v1463_v11  ;;  %v1431_v6 = vsel %vm1411_vm0, 0.0, %v1366_v2  ;;  %1331 = vst [vmem:[#allocation1] ss:$2 sm:$0xff] %v1239_v42  ;;  %v1367_v9 = vrot.slane %v1324_v3, 7 }
 0x12d   : > { %v1464_v16 = vsel %vm1444_vm1, %v1431_v6, 0.0  ;;  %v1326_v20 = vld.sshfl [vmem:[#allocation1 + $0x10] sm:$0xff pattern:$0x75316420] }
 0x12e   : > { %v10697_v23 = vadd.f32 %v10541_v13, %v1464_v16  ;;  %v1432_v7 = vsel %vm1411_vm0, 0.0, %v1367_v9  ;;  %v1368_v8 = vrot.slane %v1326_v20, 7  ;;  %1333 = vst [vmem:[#allocation1 + $0x10] ss:$2 sm:$0xff] %v1276_v62  ;;  %v1567_v28 = vsel %vm1512_vm2, %v10690_v5, 0.0 }
 0x12f   : > { %1565 = vadd.xlane.f32.xlu2 %v1564_v21  ;;  %v1465_v25 = vsel %vm1444_vm1, %v1432_v7, 0.0  ;;  %v1328_v26 = vld.sshfl [vmem:[#allocation1 + $0x20] sm:$0xff pattern:$0x75316420] }
 0x130   : > { %v1570_v52 = vsel %vm1512_vm2, %v10697_v23, 0.0  ;;  %1335 = vst [vmem:[#allocation1 + $0x20] ss:$2 sm:$0xff] %v1241_v10  ;;  %v1369_v53 = vrot.slane %v1328_v26, 7  ;;  %v1433_v30 = vsel %vm1411_vm0, 0.0, %v1368_v8  ;;  %v10708_v40 = vadd.f32 %v10541_v13, %v1465_v25 }
 0x131   : > { %1568 = vadd.xlane.f32.xlu0 %v1567_v28  ;;  %1571 = vadd.xlane.f32.xlu1 %v1570_v52  ;;  %v1466_v35 = vsel %vm1444_vm1, %v1433_v30, 0.0  ;;  %v1330_v36 = vld.sshfl [vmem:[#allocation1 + $0x30] sm:$0xff pattern:$0x75316420] }
 0x132   : > { %v1434_v41 = vsel %vm1411_vm0, 0.0, %v1369_v53  ;;  %1337 = vst [vmem:[#allocation1 + $0x30] ss:$2 sm:$0xff] %v1277_v24  ;;  %v1370_v42 = vrot.slane %v1330_v36, 7  ;;  %v10716_v18 = vadd.f32 %v10541_v13, %v1466_v35  ;;  %v1573_v56 = vsel %vm1512_vm2, %v10708_v40, 0.0 }
 0x133   : > { %v1467_v43 = vsel %vm1444_vm1, %v1434_v41, 0.0  ;;  %v1332_v47 = vld.sshfl [vmem:[#allocation1] sm:$0xff pattern:$0x75316420] }
 0x134   : > { %v10713_v48 = vadd.f32 %v10541_v13, %v1467_v43  ;;  %v1435_v19 = vsel %vm1411_vm0, 0.0, %v1370_v42  ;;  %1339 = vst [vmem:[#allocation1] ss:$2 sm:$0xff] %v1244_v14  ;;  %v1371_v55 = vrot.slane %v1332_v47, 7  ;;  %v1576_v0 = vsel %vm1512_vm2, %v10716_v18, 0.0 }
 0x135   : > { %v1334_v44 = vld.sshfl [vmem:[#allocation1 + $0x10] sm:$0xff pattern:$0x75316420]  ;;  %v1468_v59 = vsel %vm1444_vm1, %v1435_v19, 0.0 }
 0x136   : > { %v1436_v57 = vsel %vm1411_vm0, 0.0, %v1371_v55  ;;  %v1372_v58 = vrot.slane %v1334_v44, 7  ;;  %1341 = vst [vmem:[#allocation1 + $0x10] ss:$2 sm:$0xff] %v1278_v33  ;;  %v1579_v62 = vsel %vm1512_vm2, %v10713_v48, 0.0  ;;  %v10731_v9 = vadd.f32 %v10541_v13, %v1468_v59 }
 0x137   : > { %1574 = vadd.xlane.f32.xlu2 %v1573_v56  ;;  %v1336_v60 = vld.sshfl [vmem:[#allocation1 + $0x20] sm:$0xff pattern:$0x75316420]  ;;  %v1469_v11 = vsel %vm1444_vm1, %v1436_v57, 0.0  ;;  %v10220_v57 = vmov 32.0  }
 0x138   : > { %v1437_v2 = vsel %vm1411_vm0, 0.0, %v1372_v58  ;;  %1343 = vst [vmem:[#allocation1 + $0x20] ss:$2 sm:$0xff] %v1246_v39  ;;  %v1373_v10 = vrot.slane %v1336_v60, 7  ;;  %v10734_v20 = vadd.f32 %v10541_v13, %v1469_v11  ;;  %v1582_v31 = vsel %vm1512_vm2, %v10731_v9, 0.0 }
 0x139   : > { %1580 = vadd.xlane.f32.xlu1 %v1579_v62  ;;  %1577 = vadd.xlane.f32.xlu0 %v1576_v0  ;;  %v1470_v3 = vsel %vm1444_vm1, %v1437_v2, 0.0  ;;  %v1338_v6 = vld.sshfl [vmem:[#allocation1 + $0x30] sm:$0xff pattern:$0x75316420]  ;;  %9709 = vrcp.f32 %v10220_v57 }
 0x13a   : > { %1345 = vst [vmem:[#allocation1 + $0x30] ss:$2 sm:$0xff] %v1279_v45  ;;  %v1374_v14 = vrot.slane %v1338_v6, 7  ;;  %v10737_v21 = vadd.f32 %v10541_v13, %v1470_v3  ;;  %v1438_v7 = vsel %vm1411_vm0, 0.0, %v1373_v10  ;;  %v1585_v52 = vsel %vm1512_vm2, %v10734_v20, 0.0 }
 0x13b   : > { %v1340_v16 = vld.sshfl [vmem:[#allocation1] sm:$0xff pattern:$0x75316420]  ;;  %v1471_v26 = vsel %vm1444_vm1, %v1438_v7, 0.0 }
 0x13c   : > { %v1375_v8 = vrot.slane %v1340_v16, 7  ;;  %v1439_v32 = vsel %vm1411_vm0, 0.0, %v1374_v14  ;;  %v1588_v53 = vsel %vm1512_vm2, %v10737_v21, 0.0  ;;  %v10752_v39 = vadd.f32 %v10541_v13, %v1471_v26 }
 0x13d   : > { %v1342_v24 = vld.sshfl [vmem:[#allocation1 + $0x10] sm:$0xff pattern:$0x75316420]  ;;  %v1472_v33 = vsel %vm1444_vm1, %v1439_v32, 0.0 }
 0x13e   : > { %v1440_v25 = vsel %vm1411_vm0, 0.0, %v1375_v8  ;;  %v1376_v30 = vrot.slane %v1342_v24, 7  ;;  %v10755_v43 = vadd.f32 %v10541_v13, %v1472_v33  ;;  %v1591_v55 = vsel %vm1512_vm2, %v10752_v39, 0.0 }
 0x13f   : > { %1583 = vadd.xlane.f32.xlu2 %v1582_v31  ;;  %v1344_v28 = vld.sshfl [vmem:[#allocation1 + $0x20] sm:$0xff pattern:$0x75316420]  ;;  %v1473_v35 = vsel %vm1444_vm1, %v1440_v25, 0.0  ;;  %v9710_v11 = vpop.eup %9709 }
 0x140   : > { %v1377_v41 = vrot.slane %v1344_v28, 7  ;;  %v10758_v47 = vadd.f32 %v10541_v13, %v1473_v35  ;;  %v1441_v19 = vsel %vm1411_vm0, 0.0, %v1376_v30  ;;  %v1594_v58 = vsel %vm1512_vm2, %v10755_v43, 0.0 }
 0x141   : > { %1586 = vadd.xlane.f32.xlu0 %v1585_v52  ;;  %1589 = vadd.xlane.f32.xlu1 %v1588_v53  ;;  %v1346_v36 = vld.sshfl [vmem:[#allocation1 + $0x30] sm:$0xff pattern:$0x75316420]  ;;  %v1474_v56 = vsel %vm1444_vm1, %v1441_v19, 0.0  ;;  %v1610_v16 = vmul.f32 32.0, %v9710_v11  ;;  %vm1614_vm3 = vweird.f32 %v9710_v11 }
 0x142   : > { %v1378_v42 = vrot.slane %v1346_v36, 7  ;;  %v1442_v44 = vsel %vm1411_vm0, 0.0, %v1377_v41  ;;  %v1597_v59 = vsel %vm1512_vm2, %v10758_v47, 0.0  ;;  %v10773_v0 = vadd.f32 %v10541_v13, %v1474_v56 }
 0x143   : > { %v1475_v60 = vsel %vm1444_vm1, %v1442_v44, 0.0  ;;  %v1611_v7 = vsub.f32 1.0, %v1610_v16 }
 0x144   : > { %v1443_v45 = vsel %vm1411_vm0, 0.0, %v1378_v42  ;;  %v10776_v2 = vadd.f32 %v10541_v13, %v1475_v60  ;;  %v1600_v3 = vsel %vm1512_vm2, %v10773_v0, 0.0 }
 0x145   : > { %v1476_v62 = vsel %vm1444_vm1, %v1443_v45, 0.0  ;;  %v1612_v8 = vmul.f32 %v9710_v11, %v1611_v7 }
 0x146   : > { %v10779_v10 = vadd.f32 %v10541_v13, %v1476_v62  ;;  %v1603_v6 = vsel %vm1512_vm2, %v10776_v2, 0.0 }
 0x147   : > { %1592 = vadd.xlane.f32.xlu2 %v1591_v55  ;;  %v1613_v24 = vadd.f32 %v9710_v11, %v1612_v8 }
 0x148   : > { %v1606_v14 = vsel %vm1512_vm2, %v10779_v10, 0.0 }
 0x149   : > { %1595 = vadd.xlane.f32.xlu0 %v1594_v58  ;;  %1598 = vadd.xlane.f32.xlu1 %v1597_v59  ;;  %v10787_v13 = vsel %vm1614_vm3, %v9710_v11, %v1613_v24 }
 0x14f   : > { %1601 = vadd.xlane.f32.xlu2 %v1600_v3 }
 0x151   : > { %1604 = vadd.xlane.f32.xlu0 %v1603_v6  ;;  %1607 = vadd.xlane.f32.xlu1 %v1606_v14 }
 0x162   : > { %v1515_v31 = vpop.xlane.xlu0 %1514 }
 0x163   : > { %v1616_v32 = vmul.f32 %v10787_v13, %v1515_v31 }
 0x165   : > { %v10791_v25 = vsub.f32 %v10546_v17, %v1616_v32 }
 0x167   : > { %v1680_v26 = vmul.f32 %v10791_v25, %v10791_v25 }
 0x169   : > { %v1712_v28 = vsel %vm1512_vm2, %v1680_v26, 0.0 }
 0x16a   : > { %v1521_v52 = vpop.xlane.xlu1 %1520  ;;  %v1518_v53 = vpop.xlane.xlu0 %1517  ;;  %1713 = vadd.xlane.f32.xlu2 %v1712_v28 }
 0x16b   : > { %v1618_v30 = vmul.f32 %v10787_v13, %v1521_v52  ;;  %v1617_v33 = vmul.f32 %v10787_v13, %v1518_v53 }
 0x16d   : > { %v10799_v35 = vsub.f32 %v10562_v34, %v1618_v30  ;;  %v10802_v36 = vsub.f32 %v10554_v29, %v1617_v33 }
 0x16f   : > { %v1681_v17 = vmul.f32 %v10802_v36, %v10802_v36  ;;  %v1682_v41 = vmul.f32 %v10799_v35, %v10799_v35 }
 0x171   : > { %v1715_v42 = vsel %vm1512_vm2, %v1681_v17, 0.0  ;;  %v1718_v19 = vsel %vm1512_vm2, %v1682_v41, 0.0 }
 0x172   : > { %v1524_v55 = vpop.xlane.xlu1 %1523  ;;  %v1527_v44 = vpop.xlane.xlu2 %1526  ;;  %1716 = vadd.xlane.f32.xlu0 %v1715_v42  ;;  %1719 = vadd.xlane.f32.xlu1 %v1718_v19 }
 0x173   : > { %v1619_v34 = vmul.f32 %v10787_v13, %v1524_v55  ;;  %v1620_v45 = vmul.f32 %v10787_v13, %v1527_v44 }
 0x175   : > { %v10813_v29 = vsub.f32 %v10571_v46, %v1619_v34  ;;  %v10816_v56 = vsub.f32 %v10576_v50, %v1620_v45 }
 0x177   : > { %v1684_v57 = vmul.f32 %v10816_v56, %v10816_v56  ;;  %v1683_v58 = vmul.f32 %v10813_v29, %v10813_v29 }
 0x179   : > { %v1724_v59 = vsel %vm1512_vm2, %v1684_v57, 0.0  ;;  %v1721_v60 = vsel %vm1512_vm2, %v1683_v58, 0.0 }
 0x17a   : > { %v1533_v62 = vpop.xlane.xlu0 %1532  ;;  %v1530_v11 = vpop.xlane.xlu2 %1529  ;;  %1725 = vadd.xlane.f32.xlu0 %v1724_v59  ;;  %1722 = vadd.xlane.f32.xlu2 %v1721_v60 }
 0x17b   : > { %v1622_v46 = vmul.f32 %v10787_v13, %v1533_v62  ;;  %v1621_v3 = vmul.f32 %v10787_v13, %v1530_v11 }
 0x17c   : > { %v1536_v50 = vpop.xlane.xlu1 %1535 }
 0x17d   : > { %v10827_v6 = vsub.f32 %v10594_v4, %v1622_v46  ;;  %v10830_v14 = vsub.f32 %v10590_v1, %v1621_v3  ;;  %v1623_v16 = vmul.f32 %v10787_v13, %v1536_v50 }
 0x17f   : > { %v10834_v7 = vsub.f32 %v10603_v15, %v1623_v16  ;;  %v1685_v8 = vmul.f32 %v10830_v14, %v10830_v14  ;;  %v1686_v24 = vmul.f32 %v10827_v6, %v10827_v6 }
 0x181   : > { %v1727_v31 = vsel %vm1512_vm2, %v1685_v8, 0.0  ;;  %v1730_v32 = vsel %vm1512_vm2, %v1686_v24, 0.0  ;;  %v1687_v4 = vmul.f32 %v10834_v7, %v10834_v7 }
 0x182   : > { %v1539_v1 = vpop.xlane.xlu2 %1538  ;;  %1728 = vadd.xlane.f32.xlu1 %v1727_v31  ;;  %1731 = vadd.xlane.f32.xlu2 %v1730_v32 }
 0x183   : > { %v1624_v26 = vmul.f32 %v10787_v13, %v1539_v1  ;;  %v1733_v15 = vsel %vm1512_vm2, %v1687_v4, 0.0 }
 0x184   : > { %v1542_v28 = vpop.xlane.xlu0 %1541  ;;  %1734 = vadd.xlane.f32.xlu0 %v1733_v15 }
 0x185   : > { %v10847_v52 = vsub.f32 %v10614_v27, %v1624_v26  ;;  %v1625_v53 = vmul.f32 %v10787_v13, %v1542_v28 }
 0x187   : > { %v10851_v30 = vsub.f32 %v10621_v38, %v1625_v53  ;;  %v1688_v33 = vmul.f32 %v10847_v52, %v10847_v52 }
 0x189   : > { %v1736_v17 = vsel %vm1512_vm2, %v1688_v33, 0.0  ;;  %v1689_v41 = vmul.f32 %v10851_v30, %v10851_v30 }
 0x18a   : > { %v1545_v42 = vpop.xlane.xlu1 %1544  ;;  %1737 = vadd.xlane.f32.xlu1 %v1736_v17 }
 0x18b   : > { %v1626_v19 = vmul.f32 %v10787_v13, %v1545_v42  ;;  %v1739_v27 = vsel %vm1512_vm2, %v1689_v41, 0.0 }
 0x18c   : > { %v1548_v55 = vpop.xlane.xlu2 %1547  ;;  %1740 = vadd.xlane.f32.xlu2 %v1739_v27 }
 0x18d   : > { %v10861_v44 = vsub.f32 %v10628_v51, %v1626_v19  ;;  %v1627_v38 = vmul.f32 %v10787_v13, %v1548_v55 }
 0x18f   : > { %v10865_v34 = vsub.f32 %v10637_v61, %v1627_v38  ;;  %v1690_v45 = vmul.f32 %v10861_v44, %v10861_v44 }
 0x191   : > { %v1742_v57 = vsel %vm1512_vm2, %v1690_v45, 0.0  ;;  %v1691_v58 = vmul.f32 %v10865_v34, %v10865_v34 }
 0x192   : > { %v1551_v59 = vpop.xlane.xlu0 %1550  ;;  %1743 = vadd.xlane.f32.xlu0 %v1742_v57 }
 0x193   : > { %v1628_v60 = vmul.f32 %v10787_v13, %v1551_v59  ;;  %v1745_v51 = vsel %vm1512_vm2, %v1691_v58, 0.0 }
 0x194   : > { %v1554_v62 = vpop.xlane.xlu1 %1553  ;;  %1746 = vadd.xlane.f32.xlu1 %v1745_v51 }
 0x195   : > { %v10875_v11 = vsub.f32 %v10646_v12, %v1628_v60  ;;  %v1629_v61 = vmul.f32 %v10787_v13, %v1554_v62 }
 0x197   : > { %v10879_v46 = vsub.f32 %v10655_v22, %v1629_v61  ;;  %v1692_v3 = vmul.f32 %v10875_v11, %v10875_v11 }
 0x199   : > { %v1748_v50 = vsel %vm1512_vm2, %v1692_v3, 0.0  ;;  %v1693_v16 = vmul.f32 %v10879_v46, %v10879_v46 }
 0x19a   : > { %v1557_v8 = vpop.xlane.xlu2 %1556  ;;  %1749 = vadd.xlane.f32.xlu2 %v1748_v50 }
 0x19b   : > { %v1630_v24 = vmul.f32 %v10787_v13, %v1557_v8  ;;  %v1751_v12 = vsel %vm1512_vm2, %v1693_v16, 0.0 }
 0x19c   : > { %v1560_v31 = vpop.xlane.xlu0 %1559  ;;  %v1563_v32 = vpop.xlane.xlu1 %1562  ;;  %1752 = vadd.xlane.f32.xlu0 %v1751_v12 }
 0x19d   : > { %v10889_v22 = vsub.f32 %v10664_v37, %v1630_v24  ;;  %v1631_v4 = vmul.f32 %v10787_v13, %v1560_v31  ;;  %v1632_v1 = vmul.f32 %v10787_v13, %v1563_v32 }
 0x19f   : > { %v10894_v26 = vsub.f32 %v10673_v49, %v1631_v4  ;;  %v10897_v15 = vsub.f32 %v10676_v54, %v1632_v1  ;;  %v1694_v28 = vmul.f32 %v10889_v22, %v10889_v22 }
 0x1a1   : > { %v1754_v53 = vsel %vm1512_vm2, %v1694_v28, 0.0  ;;  %v1696_v33 = vmul.f32 %v10897_v15, %v10897_v15  ;;  %v1695_v37 = vmul.f32 %v10894_v26, %v10894_v26 }
 0x1a2   : > { %v1566_v17 = vpop.xlane.xlu2 %1565  ;;  %1755 = vadd.xlane.f32.xlu1 %v1754_v53 }
 0x1a3   : > { %v1633_v41 = vmul.f32 %v10787_v13, %v1566_v17  ;;  %v1760_v49 = vsel %vm1512_vm2, %v1696_v33, 0.0  ;;  %v1757_v54 = vsel %vm1512_vm2, %v1695_v37, 0.0 }
 0x1a4   : > { %v1569_v42 = vpop.xlane.xlu0 %1568  ;;  %v1572_v19 = vpop.xlane.xlu1 %1571  ;;  %1761 = vadd.xlane.f32.xlu0 %v1760_v49  ;;  %1758 = vadd.xlane.f32.xlu2 %v1757_v54 }
 0x1a5   : > { %v10910_v27 = vsub.f32 %v10685_v63, %v1633_v41  ;;  %v1634_v55 = vmul.f32 %v10787_v13, %v1569_v42  ;;  %v1635_v38 = vmul.f32 %v10787_v13, %v1572_v19 }
 0x1a7   : > { %v10915_v45 = vsub.f32 %v10690_v5, %v1634_v55  ;;  %v10918_v57 = vsub.f32 %v10697_v23, %v1635_v38  ;;  %v1697_v58 = vmul.f32 %v10910_v27, %v10910_v27 }
 0x1a9   : > { %v1763_v59 = vsel %vm1512_vm2, %v1697_v58, 0.0  ;;  %v1699_v60 = vmul.f32 %v10918_v57, %v10918_v57  ;;  %v1698_v63 = vmul.f32 %v10915_v45, %v10915_v45 }
 0x1aa   : > { %v1575_v51 = vpop.xlane.xlu2 %1574  ;;  %1764 = vadd.xlane.f32.xlu1 %v1763_v59 }
 0x1ab   : > { %v1636_v62 = vmul.f32 %v10787_v13, %v1575_v51  ;;  %v1769_v5 = vsel %vm1512_vm2, %v1699_v60, 0.0  ;;  %v1766_v23 = vsel %vm1512_vm2, %v1698_v63, 0.0 }
 0x1ac   : > { %v1581_v61 = vpop.xlane.xlu1 %1580  ;;  %1770 = vadd.xlane.f32.xlu0 %v1769_v5  ;;  %v1578_v3 = vpop.xlane.xlu0 %1577  ;;  %1767 = vadd.xlane.f32.xlu2 %v1766_v23 }
 0x1ad   : > { %v10931_v50 = vsub.f32 %v10708_v40, %v1636_v62  ;;  %v1638_v16 = vmul.f32 %v10787_v13, %v1581_v61  ;;  %v1637_v8 = vmul.f32 %v10787_v13, %v1578_v3 }
 0x1af   : > { %v10936_v24 = vsub.f32 %v10713_v48, %v1638_v16  ;;  %v10939_v12 = vsub.f32 %v10716_v18, %v1637_v8  ;;  %v1700_v31 = vmul.f32 %v10931_v50, %v10931_v50 }
 0x1b1   : > { %v1772_v32 = vsel %vm1512_vm2, %v1700_v31, 0.0  ;;  %v1702_v4 = vmul.f32 %v10936_v24, %v10936_v24  ;;  %v1701_v40 = vmul.f32 %v10939_v12, %v10939_v12 }
 0x1b2   : > { %v1584_v1 = vpop.xlane.xlu2 %1583  ;;  %1773 = vadd.xlane.f32.xlu1 %v1772_v32 }
 0x1b3   : > { %v1639_v28 = vmul.f32 %v10787_v13, %v1584_v1  ;;  %v1778_v48 = vsel %vm1512_vm2, %v1702_v4, 0.0  ;;  %v1775_v18 = vsel %vm1512_vm2, %v1701_v40, 0.0 }
 0x1b4   : > { %1779 = vadd.xlane.f32.xlu0 %v1778_v48  ;;  %v1587_v53 = vpop.xlane.xlu0 %1586  ;;  %v1590_v33 = vpop.xlane.xlu1 %1589  ;;  %1776 = vadd.xlane.f32.xlu2 %v1775_v18 }
 0x1b5   : > { %v10952_v37 = vsub.f32 %v10731_v9, %v1639_v28  ;;  %v1640_v17 = vmul.f32 %v10787_v13, %v1587_v53  ;;  %v1641_v41 = vmul.f32 %v10787_v13, %v1590_v33 }
 0x1b7   : > { %v10957_v49 = vsub.f32 %v10734_v20, %v1640_v17  ;;  %v10960_v54 = vsub.f32 %v10737_v21, %v1641_v41  ;;  %v1703_v42 = vmul.f32 %v10952_v37, %v10952_v37 }
 0x1b9   : > { %v1781_v19 = vsel %vm1512_vm2, %v1703_v42, 0.0  ;;  %v1705_v55 = vmul.f32 %v10960_v54, %v10960_v54  ;;  %v1704_v9 = vmul.f32 %v10957_v49, %v10957_v49 }
 0x1ba   : > { %v1593_v38 = vpop.xlane.xlu2 %1592  ;;  %1782 = vadd.xlane.f32.xlu1 %v1781_v19 }
 0x1bb   : > { %v1642_v58 = vmul.f32 %v10787_v13, %v1593_v38  ;;  %v1787_v20 = vsel %vm1512_vm2, %v1705_v55, 0.0  ;;  %v1784_v21 = vsel %vm1512_vm2, %v1704_v9, 0.0 }
 0x1bc   : > { %v1596_v59 = vpop.xlane.xlu0 %1595  ;;  %1788 = vadd.xlane.f32.xlu0 %v1787_v20  ;;  %v1599_v60 = vpop.xlane.xlu1 %1598  ;;  %1785 = vadd.xlane.f32.xlu2 %v1784_v21 }
 0x1bd   : > { %v10973_v63 = vsub.f32 %v10752_v39, %v1642_v58  ;;  %v1643_v51 = vmul.f32 %v10787_v13, %v1596_v59  ;;  %v1644_v62 = vmul.f32 %v10787_v13, %v1599_v60 }
 0x1bf   : > { %v10978_v5 = vsub.f32 %v10755_v43, %v1643_v51  ;;  %v10981_v23 = vsub.f32 %v10758_v47, %v1644_v62  ;;  %v1706_v61 = vmul.f32 %v10973_v63, %v10973_v63 }
 0x1c1   : > { %v1790_v3 = vsel %vm1512_vm2, %v1706_v61, 0.0  ;;  %v1708_v16 = vmul.f32 %v10981_v23, %v10981_v23  ;;  %v1707_v39 = vmul.f32 %v10978_v5, %v10978_v5 }
 0x1c2   : > { %1791 = vadd.xlane.f32.xlu1 %v1790_v3  ;;  %v1602_v8 = vpop.xlane.xlu2 %1601 }
 0x1c3   : > { %v1645_v31 = vmul.f32 %v10787_v13, %v1602_v8  ;;  %v1796_v43 = vsel %vm1512_vm2, %v1708_v16, 0.0  ;;  %v1793_v47 = vsel %vm1512_vm2, %v1707_v39, 0.0 }
 0x1c4   : > { %v1605_v32 = vpop.xlane.xlu0 %1604  ;;  %1797 = vadd.xlane.f32.xlu0 %v1796_v43  ;;  %v1608_v4 = vpop.xlane.xlu1 %1607  ;;  %1794 = vadd.xlane.f32.xlu2 %v1793_v47 }
 0x1c5   : > { %v10994_v40 = vsub.f32 %v10773_v0, %v1645_v31  ;;  %v1646_v1 = vmul.f32 %v10787_v13, %v1605_v32  ;;  %v1647_v28 = vmul.f32 %v10787_v13, %v1608_v4 }
 0x1c7   : > { %v10999_v48 = vsub.f32 %v10776_v2, %v1646_v1  ;;  %v11002_v18 = vsub.f32 %v10779_v10, %v1647_v28  ;;  %v1709_v53 = vmul.f32 %v10994_v40, %v10994_v40  ;;  %v11025_v28 = vld [vmem:[%s15668_s28] ss:$0 sm:$0xff] }
 0x1c9   : > { %v1799_v33 = vsel %vm1512_vm2, %v1709_v53, 0.0  ;;  %v1711_v17 = vmul.f32 %v11002_v18, %v11002_v18  ;;  %v1710_v0 = vmul.f32 %v10999_v48, %v10999_v48 }
 0x1ca   : > { %1800 = vadd.xlane.f32.xlu1 %v1799_v33 }
 0x1cb   : > { %v1805_v41 = vsel %vm1512_vm2, %v1711_v17, 0.0  ;;  %v1802_v2 = vsel %vm1512_vm2, %v1710_v0, 0.0  ;;  %v11032_v0 = vld [vmem:[%s15669_s24] ss:$0 sm:$0xff] }
 0x1cc   : > { %1806 = vadd.xlane.f32.xlu0 %v1805_v41  ;;  %1803 = vadd.xlane.f32.xlu2 %v1802_v2 }
 0x1dd   : > { %v1714_v10 = vpop.xlane.xlu2 %1713 }
 0x1de   : > { %v1808_v42 = vmul.f32 %v1714_v10, %v10787_v13 }
 0x1e0   : > { %v1840_v19 = vadd.f32 1e-05, %v1808_v42 }
 0x1e2   : > { %9711 = vrsqrt.f32 %v1840_v19  ;;  %vm1878_vm5 = vweird.f32 %v1840_v19 }
 0x1e5   : > { %v1717_v55 = vpop.xlane.xlu0 %1716  ;;  %v1720_v9 = vpop.xlane.xlu1 %1719 }
 0x1e6   : > { %v1809_v38 = vmul.f32 %v1717_v55, %v10787_v13  ;;  %v1810_v58 = vmul.f32 %v1720_v9, %v10787_v13 }
 0x1e8   : > { %v9712_v20 = vpop.eup %9711  ;;  %v1841_v21 = vadd.f32 1e-05, %v1809_v38  ;;  %v1842_v59 = vadd.f32 1e-05, %v1810_v58 }
 0x1e9   : > { %v1873_v60 = vmul.f32 %v9712_v20, %v1840_v19  ;;  %vm1879_vm4 = vweird.f32 %v9712_v20 }
 0x1ea   : > { %9713 = vrsqrt.f32 %v1841_v21  ;;  %vm1880_vm6 = vmor %vm1878_vm5, %vm1879_vm4  ;;  %vm1888_vm9 = vweird.f32 %v1841_v21  ;;  %vm1898_vm11 = vweird.f32 %v1842_v59 }
 0x1eb   : > { %v1874_v51 = vmul.f32 %v9712_v20, %v1873_v60  ;;  %9715 = vrsqrt.f32 %v1842_v59 }
 0x1ed   : > { %v1875_v62 = vmul.f32 0.5, %v1874_v51  ;;  %v1726_v61 = vpop.xlane.xlu0 %1725  ;;  %v1723_v3 = vpop.xlane.xlu2 %1722 }
 0x1ee   : > { %v1812_v16 = vmul.f32 %v1726_v61, %v10787_v13  ;;  %v1811_v39 = vmul.f32 %v1723_v3, %v10787_v13 }
 0x1ef   : > { %v1876_v8 = vsub.f32 1.5, %v1875_v62 }
 0x1f0   : > { %v9714_v31 = vpop.eup %9713  ;;  %v11018_v43 = vadd.f32 1e-05, %v1812_v16  ;;  %v11020_v47 = vadd.f32 1e-05, %v1811_v39 }
 0x1f1   : > { %v9716_v32 = vpop.eup %9715  ;;  %v1877_v4 = vmul.f32 %v9712_v20, %v1876_v8  ;;  %v1883_v1 = vmul.f32 %v9714_v31, %v1841_v21  ;;  %vm1889_vm7 = vweird.f32 %v9714_v31 }
 0x1f2   : > { %v1893_v53 = vmul.f32 %v9716_v32, %v1842_v59  ;;  %9717 = vrsqrt.f32 %v11018_v43  ;;  %vm1899_vm8 = vweird.f32 %v9716_v32  ;;  %vm1890_vm10 = vmor %vm1888_vm9, %vm1889_vm7  ;;  %vm1918_vm15 = vweird.f32 %v11018_v43 }
 0x1f3   : > { %v1881_v33 = vsel %vm1880_vm6, %v9712_v20, %v1877_v4  ;;  %v1884_v17 = vmul.f32 %v9714_v31, %v1883_v1  ;;  %9719 = vrsqrt.f32 %v11020_v47  ;;  %vm1900_vm12 = vmor %vm1898_vm11, %vm1899_vm8  ;;  %vm1908_vm1 = vweird.f32 %v11020_v47 }
 0x1f4   : > { %v2192_v41 = vmul.f32 %v1881_v33, %v10791_v25  ;;  %v1894_v2 = vmul.f32 %v9716_v32, %v1893_v53 }
 0x1f5   : > { %v1885_v10 = vmul.f32 0.5, %v1884_v17  ;;  %v1729_v42 = vpop.xlane.xlu1 %1728  ;;  %v1732_v19 = vpop.xlane.xlu2 %1731 }
 0x1f6   : > { %v2227_v55 = vmul.f32 %v11025_v28, %v2192_v41  ;;  %v1895_v9 = vmul.f32 0.5, %v1894_v2  ;;  %v1813_v38 = vmul.f32 %v1729_v42, %v10787_v13  ;;  %v1814_v58 = vmul.f32 %v1732_v19, %v10787_v13 }
 0x1f7   : > { %v1886_v20 = vsub.f32 1.5, %v1885_v10  ;;  %v1735_v60 = vpop.xlane.xlu0 %1734 }
 0x1f8   : > { %v9718_v51 = vpop.eup %9717  ;;  %v2262_v62 = vadd.f32 %v11032_v0, %v2227_v55  ;;  %v1896_v61 = vsub.f32 1.5, %v1895_v9  ;;  %v11039_v25 = vadd.f32 1e-05, %v1813_v38  ;;  %v11041_v3 = vadd.f32 1e-05, %v1814_v58 }
 0x1f9   : > { %v9720_v16 = vpop.eup %9719  ;;  %v1887_v39 = vmul.f32 %v9714_v31, %v1886_v20  ;;  %v1913_v8 = vmul.f32 %v9718_v51, %v11018_v43  ;;  %v1815_v4 = vmul.f32 %v1735_v60, %v10787_v13  ;;  %vm1919_vm13 = vweird.f32 %v9718_v51 }
 0x1fa   : > { %2294 = vst.msk [vmem:[#allocation2] sm:$0xff] %vm1512_vm2, %v2262_v62  ;;  %v1897_v1 = vmul.f32 %v9716_v32, %v1896_v61  ;;  %v1903_v53 = vmul.f32 %v9720_v16, %v11020_v47  ;;  %9721 = vrsqrt.f32 %v11039_v25  ;;  %vm1909_vm14 = vweird.f32 %v9720_v16  ;;  %vm1920_vm0 = vmor %vm1918_vm15, %vm1919_vm13 }
 0x1fb   : > { %v1891_v33 = vsel %vm1890_vm10, %v9714_v31, %v1887_v39  ;;  %v1914_v17 = vmul.f32 %v9718_v51, %v1913_v8  ;;  %9723 = vrsqrt.f32 %v11041_v3  ;;  %v11052_v19 = vadd.f32 1e-05, %v1815_v4  ;;  %vm1910_vm3 = vmor %vm1908_vm1, %vm1909_vm14 }
 0x1fc   : > { %v2193_v21 = vmul.f32 %v1891_v33, %v10802_v36  ;;  %v1901_v41 = vsel %vm1900_vm12, %v9716_v32, %v1897_v1  ;;  %v1904_v2 = vmul.f32 %v9720_v16, %v1903_v53  ;;  %vm1928_vm6 = vweird.f32 %v11039_v25 }
 0x1fd   : > { %v2194_v10 = vmul.f32 %v1901_v41, %v10799_v35  ;;  %v1915_v42 = vmul.f32 0.5, %v1914_v17  ;;  %v1738_v59 = vpop.xlane.xlu1 %1737  ;;  %9725 = vrsqrt.f32 %v11052_v19  ;;  %vm1938_vm8 = vweird.f32 %v11041_v3 }
 0x1fe   : > { %v2228_v55 = vmul.f32 %v11025_v28, %v2193_v21  ;;  %v1905_v9 = vmul.f32 0.5, %v1904_v2  ;;  %v1816_v31 = vmul.f32 %v1738_v59, %v10787_v13  ;;  %vm1948_vm11 = vweird.f32 %v11052_v19 }
 0x1ff   : > { %v2229_v38 = vmul.f32 %v11025_v28, %v2194_v10  ;;  %v1916_v58 = vsub.f32 1.5, %v1915_v42  ;;  %v1741_v36 = vpop.xlane.xlu2 %1740 }
 0x200   : > { %v9722_v32 = vpop.eup %9721  ;;  %v2263_v35 = vadd.f32 %v11032_v0, %v2228_v55  ;;  %v1906_v20 = vsub.f32 1.5, %v1905_v9  ;;  %v11059_v60 = vadd.f32 1e-05, %v1816_v31  ;;  %v1817_v62 = vmul.f32 %v1741_v36, %v10787_v13 }
 0x201   : > { %v9724_v61 = vpop.eup %9723  ;;  %v2264_v39 = vadd.f32 %v11032_v0, %v2229_v38  ;;  %v1917_v8 = vmul.f32 %v9718_v51, %v1916_v58  ;;  %v1923_v4 = vmul.f32 %v9722_v32, %v11039_v25  ;;  %vm1929_vm4 = vweird.f32 %v9722_v32 }
 0x202   : > { %2295 = vst.msk [vmem:[#allocation2 + $0x8] sm:$0xff] %vm1512_vm2, %v2263_v35  ;;  %v1907_v1 = vmul.f32 %v9720_v16, %v1906_v20  ;;  %v1933_v53 = vmul.f32 %v9724_v61, %v11041_v3  ;;  %9727 = vrsqrt.f32 %v11059_v60  ;;  %v11072_v43 = vadd.f32 1e-05, %v1817_v62  ;;  %vm1930_vm7 = vmor %vm1928_vm6, %vm1929_vm4 }
 0x203   : > { %2296 = vst.msk [vmem:[#allocation2 + $0x10] sm:$0xff] %vm1512_vm2, %v2264_v39  ;;  %v1921_v33 = vsel %vm1920_vm0, %v9718_v51, %v1917_v8  ;;  %v1924_v17 = vmul.f32 %v9722_v32, %v1923_v4  ;;  %v9726_v10 = vpop.eup %9725  ;;  %vm1939_vm5 = vweird.f32 %v9724_v61  ;;  %vm1958_vm12 = vweird.f32 %v11059_v60 }
 0x204   : > { %v2196_v21 = vmul.f32 %v1921_v33, %v10816_v56  ;;  %v1911_v41 = vsel %vm1910_vm3, %v9720_v16, %v1907_v1  ;;  %v1934_v2 = vmul.f32 %v9724_v61, %v1933_v53  ;;  %9729 = vrsqrt.f32 %v11072_v43  ;;  %vm1940_vm9 = vmor %vm1938_vm8, %vm1939_vm5 }
 0x205   : > { %v2195_v42 = vmul.f32 %v1911_v41, %v10813_v29  ;;  %v1925_v47 = vmul.f32 0.5, %v1924_v17  ;;  %v1744_v59 = vpop.xlane.xlu0 %1743  ;;  %v1943_v9 = vmul.f32 %v9726_v10, %v11052_v19  ;;  %vm1949_vm10 = vweird.f32 %v9726_v10 }
 0x206   : > { %v2231_v55 = vmul.f32 %v11025_v28, %v2196_v21  ;;  %v1935_v51 = vmul.f32 0.5, %v1934_v2  ;;  %v1818_v56 = vmul.f32 %v1744_v59, %v10787_v13  ;;  %vm1950_vm13 = vmor %vm1948_vm11, %vm1949_vm10  ;;  %vm1968_vm1 = vweird.f32 %v11072_v43 }
 0x207   : > { %v2230_v31 = vmul.f32 %v11025_v28, %v2195_v42  ;;  %v1926_v38 = vsub.f32 1.5, %v1925_v47  ;;  %v1747_v16 = vpop.xlane.xlu1 %1746  ;;  %v1944_v35 = vmul.f32 %v9726_v10, %v1943_v9 }
 0x208   : > { %v9728_v58 = vpop.eup %9727  ;;  %v2266_v29 = vadd.f32 %v11032_v0, %v2231_v55  ;;  %v1936_v36 = vsub.f32 1.5, %v1935_v51  ;;  %v1819_v20 = vmul.f32 %v1747_v16, %v10787_v13  ;;  %v11089_v53 = vadd.f32 1e-05, %v1818_v56 }
 0x209   : > { %v2265_v62 = vadd.f32 %v11032_v0, %v2230_v31  ;;  %v1927_v39 = vmul.f32 %v9722_v32, %v1926_v38  ;;  %v1953_v8 = vmul.f32 %v9728_v58, %v11059_v60  ;;  %v1945_v1 = vmul.f32 0.5, %v1944_v35 }
 0x20a   : > { %2298 = vst.msk [vmem:[#allocation2 + $0x20] sm:$0xff] %vm1512_vm2, %v2266_v29  ;;  %v1937_v4 = vmul.f32 %v9724_v61, %v1936_v36  ;;  %v9730_v33 = vpop.eup %9729  ;;  %v11093_v21 = vadd.f32 1e-05, %v1819_v20  ;;  %9731 = vrsqrt.f32 %v11089_v53  ;;  %vm1959_vm14 = vweird.f32 %v9728_v58 }
 0x20b   : > { %2297 = vst.msk [vmem:[#allocation2 + $0x18] sm:$0xff] %vm1512_vm2, %v2265_v62  ;;  %v1931_v17 = vsel %vm1930_vm7, %v9722_v32, %v1927_v39  ;;  %v1954_v25 = vmul.f32 %v9728_v58, %v1953_v8  ;;  %v1946_v42 = vsub.f32 1.5, %v1945_v1  ;;  %v1963_v47 = vmul.f32 %v9730_v33, %v11072_v43  ;;  %vm1960_vm15 = vmor %vm1958_vm12, %vm1959_vm14 }
 0x20c   : > { %v2197_v41 = vmul.f32 %v1931_v17, %v10830_v14  ;;  %v1941_v2 = vsel %vm1940_vm9, %v9724_v61, %v1937_v4  ;;  %9733 = vrsqrt.f32 %v11093_v21  ;;  %vm1969_vm0 = vweird.f32 %v9730_v33 }
 0x20d   : > { %v2198_v3 = vmul.f32 %v1941_v2, %v10827_v6  ;;  %v1955_v59 = vmul.f32 0.5, %v1954_v25  ;;  %v1750_v32 = vpop.xlane.xlu2 %1749  ;;  %v1947_v51 = vmul.f32 %v9726_v10, %v1946_v42  ;;  %v1964_v9 = vmul.f32 %v9730_v33, %v1963_v47  ;;  %vm1970_vm3 = vmor %vm1968_vm1, %vm1969_vm0 }
 0x20e   : > { %v2232_v55 = vmul.f32 %v11025_v28, %v2197_v41  ;;  %v1820_v56 = vmul.f32 %v1750_v32, %v10787_v13  ;;  %vm1978_vm5 = vweird.f32 %v11089_v53  ;;  %vm1988_vm8 = vweird.f32 %v11093_v21 }
 0x20f   : > { %v2233_v14 = vmul.f32 %v11025_v28, %v2198_v3  ;;  %v1956_v61 = vsub.f32 1.5, %v1955_v59  ;;  %v1753_v6 = vpop.xlane.xlu0 %1752  ;;  %v1951_v31 = vsel %vm1950_vm13, %v9726_v10, %v1947_v51  ;;  %v1965_v38 = vmul.f32 0.5, %v1964_v9 }
 0x210   : > { %v2267_v19 = vadd.f32 %v11032_v0, %v2232_v55  ;;  %v2199_v29 = vmul.f32 %v1951_v31, %v10834_v7  ;;  %v1821_v35 = vmul.f32 %v1753_v6, %v10787_v13  ;;  %v11113_v62 = vadd.f32 1e-05, %v1820_v56  ;;  %v9732_v10 = vpop.eup %9731 }
 0x211   : > { %v2268_v16 = vadd.f32 %v11032_v0, %v2233_v14  ;;  %v1957_v36 = vmul.f32 %v9728_v58, %v1956_v61  ;;  %v1966_v20 = vsub.f32 1.5, %v1965_v38  ;;  %v1973_v60 = vmul.f32 %v9732_v10, %v11089_v53 }
 0x212   : > { %2299 = vst.msk [vmem:[#allocation2 + $0x28] sm:$0xff] %vm1512_vm2, %v2267_v19  ;;  %v2234_v39 = vmul.f32 %v11025_v28, %v2199_v29  ;;  %v11117_v4 = vadd.f32 1e-05, %v1821_v35  ;;  %v9734_v17 = vpop.eup %9733  ;;  %9735 = vrsqrt.f32 %v11113_v62  ;;  %vm1979_vm4 = vweird.f32 %v9732_v10 }
 0x213   : > { %2300 = vst.msk [vmem:[#allocation2 + $0x30] sm:$0xff] %vm1512_vm2, %v2268_v16  ;;  %v1961_v8 = vsel %vm1960_vm15, %v9728_v58, %v1957_v36  ;;  %v1967_v1 = vmul.f32 %v9730_v33, %v1966_v20  ;;  %v1974_v58 = vmul.f32 %v9732_v10, %v1973_v60  ;;  %v1983_v47 = vmul.f32 %v9734_v17, %v11093_v21  ;;  %vm1980_vm7 = vmor %vm1978_vm5, %vm1979_vm4 }
 0x214   : > { %v2200_v7 = vmul.f32 %v1961_v8, %v10847_v52  ;;  %v2269_v25 = vadd.f32 %v11032_v0, %v2234_v39  ;;  %9737 = vrsqrt.f32 %v11117_v4  ;;  %vm1989_vm6 = vweird.f32 %v9734_v17 }
 0x215   : > { %v1756_v41 = vpop.xlane.xlu1 %1755  ;;  %v1971_v42 = vsel %vm1970_vm3, %v9730_v33, %v1967_v1  ;;  %v1975_v55 = vmul.f32 0.5, %v1974_v58  ;;  %v1984_v51 = vmul.f32 %v9734_v17, %v1983_v47  ;;  %vm1998_vm9 = vweird.f32 %v11113_v62  ;;  %vm1990_vm10 = vmor %vm1988_vm8, %vm1989_vm6 }
 0x216   : > { %v2235_v2 = vmul.f32 %v11025_v28, %v2200_v7  ;;  %2301 = vst.msk [vmem:[#allocation2 + $0x38] sm:$0xff] %vm1512_vm2, %v2269_v25  ;;  %v2201_v52 = vmul.f32 %v1971_v42, %v10851_v30  ;;  %v1822_v43 = vmul.f32 %v1756_v41, %v10787_v13  ;;  %vm2008_vm11 = vweird.f32 %v11117_v4 }
 0x217   : > { %v1762_v3 = vpop.xlane.xlu0 %1761  ;;  %v1759_v59 = vpop.xlane.xlu2 %1758  ;;  %v1976_v30 = vsub.f32 1.5, %v1975_v55  ;;  %v1985_v6 = vmul.f32 0.5, %v1984_v51 }
 0x218   : > { %v2270_v32 = vadd.f32 %v11032_v0, %v2235_v2  ;;  %v1824_v9 = vmul.f32 %v1762_v3, %v10787_v13  ;;  %v2236_v33 = vmul.f32 %v11025_v28, %v2201_v52  ;;  %v11133_v14 = vadd.f32 1e-05, %v1822_v43  ;;  %v11139_v31 = vpop.eup %9735 }
 0x219   : > { %v1823_v61 = vmul.f32 %v1759_v59, %v10787_v13  ;;  %v1977_v16 = vmul.f32 %v9732_v10, %v1976_v30  ;;  %v1986_v29 = vsub.f32 1.5, %v1985_v6  ;;  %v1993_v36 = vmul.f32 %v11139_v31, %v11113_v62 }
 0x21a   : > { %2302 = vst.msk [vmem:[#allocation2 + $0x40] sm:$0xff] %vm1512_vm2, %v2270_v32  ;;  %v11137_v19 = vadd.f32 1e-05, %v1824_v9  ;;  %v2271_v38 = vadd.f32 %v11032_v0, %v2236_v33  ;;  %9739 = vrsqrt.f32 %v11133_v14  ;;  %v11148_v35 = vpop.eup %9737  ;;  %vm1999_vm12 = vweird.f32 %v11139_v31 }
 0x21b   : > { %v11144_v56 = vadd.f32 1e-05, %v1823_v61  ;;  %v1981_v20 = vsel %vm1980_vm7, %v9732_v10, %v1977_v16  ;;  %v1987_v39 = vmul.f32 %v9734_v17, %v1986_v29  ;;  %v1994_v8 = vmul.f32 %v11139_v31, %v1993_v36  ;;  %vm2000_vm15 = vmor %vm1998_vm9, %vm1999_vm12 }
 0x21c   : > { %2303 = vst.msk [vmem:[#allocation2 + $0x48] sm:$0xff] %vm1512_vm2, %v2271_v38  ;;  %9741 = vrsqrt.f32 %v11137_v19  ;;  %v2003_v7 = vmul.f32 %v11148_v35, %v11117_v4  ;;  %v2202_v1 = vmul.f32 %v1981_v20, %v10861_v44  ;;  %vm2018_vm13 = vweird.f32 %v11133_v14 }
 0x21d   : > { %v1765_v53 = vpop.xlane.xlu1 %1764  ;;  %9743 = vrsqrt.f32 %v11144_v56  ;;  %v1991_v41 = vsel %vm1990_vm10, %v9734_v17, %v1987_v39  ;;  %v1995_v2 = vmul.f32 0.5, %v1994_v8  ;;  %vm2009_vm14 = vweird.f32 %v11148_v35 }
 0x21e   : > { %v1825_v21 = vmul.f32 %v1765_v53, %v10787_v13  ;;  %v2004_v10 = vmul.f32 %v11148_v35, %v2003_v7  ;;  %v2237_v47 = vmul.f32 %v11025_v28, %v2202_v1  ;;  %v2203_v44 = vmul.f32 %v1991_v41, %v10865_v34  ;;  %vm2010_vm1 = vmor %vm2008_vm11, %vm2009_vm14 }
 0x21f   : > { %v1771_v60 = vpop.xlane.xlu0 %1770  ;;  %v1768_v25 = vpop.xlane.xlu2 %1767  ;;  %v1996_v3 = vsub.f32 1.5, %v1995_v2  ;;  %vm2038_vm0 = vweird.f32 %v11137_v19  ;;  %vm2028_vm3 = vweird.f32 %v11144_v56 }
 0x220   : > { %v1827_v42 = vmul.f32 %v1771_v60, %v10787_v13  ;;  %v11163_v58 = vpop.eup %9739  ;;  %v11167_v52 = vadd.f32 1e-05, %v1825_v21  ;;  %v1826_v43 = vmul.f32 %v1768_v25, %v10787_v13  ;;  %v2005_v59 = vmul.f32 0.5, %v2004_v10 }
 0x221   : > { %v2013_v17 = vmul.f32 %v11163_v58, %v11133_v14  ;;  %v2272_v55 = vadd.f32 %v11032_v0, %v2237_v47  ;;  %v2238_v51 = vmul.f32 %v11025_v28, %v2203_v44  ;;  %v1997_v34 = vmul.f32 %v11139_v31, %v1996_v3 }
 0x222   : > { %v11174_v32 = vpop.eup %9741  ;;  %9745 = vrsqrt.f32 %v11167_v52  ;;  %v2006_v9 = vsub.f32 1.5, %v2005_v59  ;;  %v11193_v38 = vadd.f32 1e-05, %v1827_v42  ;;  %v11195_v16 = vadd.f32 1e-05, %v1826_v43 }
 0x223   : > { %v2014_v33 = vmul.f32 %v11163_v58, %v2013_v17  ;;  %v2033_v61 = vmul.f32 %v11174_v32, %v11137_v19  ;;  %v11184_v30 = vpop.eup %9743  ;;  %2304 = vst.msk [vmem:[#allocation2 + $0x50] sm:$0xff] %vm1512_vm2, %v2272_v55  ;;  %v2273_v6 = vadd.f32 %v11032_v0, %v2238_v51  ;;  %v2001_v36 = vsel %vm2000_vm15, %v11139_v31, %v1997_v34 }
 0x224   : > { %v2007_v53 = vmul.f32 %v11148_v35, %v2006_v9  ;;  %v2204_v8 = vmul.f32 %v2001_v36, %v10875_v11  ;;  %v2023_v62 = vmul.f32 %v11184_v30, %v11144_v56  ;;  %9747 = vrsqrt.f32 %v11193_v38 }
 0x225   : > { %v1774_v29 = vpop.xlane.xlu1 %1773  ;;  %v2015_v20 = vmul.f32 0.5, %v2014_v33  ;;  %v2034_v39 = vmul.f32 %v11174_v32, %v2033_v61  ;;  %2305 = vst.msk [vmem:[#allocation2 + $0x58] sm:$0xff] %vm1512_vm2, %v2273_v6  ;;  %vm2019_vm4 = vweird.f32 %v11163_v58  ;;  %9749 = vrsqrt.f32 %v11195_v16 }
 0x226   : > { %v2011_v31 = vsel %vm2010_vm1, %v11148_v35, %v2007_v53  ;;  %v2239_v11 = vmul.f32 %v11025_v28, %v2204_v8  ;;  %v2024_v60 = vmul.f32 %v11184_v30, %v2023_v62  ;;  %vm2039_vm5 = vweird.f32 %v11174_v32  ;;  %vm2020_vm6 = vmor %vm2018_vm13, %vm2019_vm4 }
 0x227   : > { %v2016_v7 = vsub.f32 1.5, %v2015_v20  ;;  %v2035_v1 = vmul.f32 0.5, %v2034_v39  ;;  %v2205_v4 = vmul.f32 %v2011_v31, %v10879_v46  ;;  %v1780_v2 = vpop.xlane.xlu0 %1779  ;;  %vm2048_vm7 = vweird.f32 %v11167_v52  ;;  %v1777_v59 = vpop.xlane.xlu2 %1776  ;;  %vm2040_vm8 = vmor %vm2038_vm0, %vm2039_vm5 }
 0x228   : > { %v11212_v21 = vpop.eup %9745  ;;  %v2274_v10 = vadd.f32 %v11032_v0, %v2239_v11  ;;  %v2025_v46 = vmul.f32 0.5, %v2024_v60  ;;  %v1828_v3 = vmul.f32 %v1774_v29, %v10787_v13  ;;  %vm2029_vm9 = vweird.f32 %v11184_v30 }
 0x229   : > { %v2017_v25 = vmul.f32 %v11163_v58, %v2016_v7  ;;  %v2036_v41 = vsub.f32 1.5, %v2035_v1  ;;  %v2043_v35 = vmul.f32 %v11212_v21, %v11167_v52  ;;  %v2240_v42 = vmul.f32 %v11025_v28, %v2205_v4  ;;  %vm2030_vm11 = vmor %vm2028_vm3, %vm2029_vm9 }
 0x22a   : > { %v11231_v17 = vpop.eup %9747  ;;  %2306 = vst.msk [vmem:[#allocation2 + $0x60] sm:$0xff] %vm1512_vm2, %v2274_v10  ;;  %vm2068_vm10 = vweird.f32 %v11193_v38  ;;  %v1830_v61 = vmul.f32 %v1780_v2, %v10787_v13  ;;  %v11252_v36 = vadd.f32 1e-05, %v1828_v3  ;;  %vm2049_vm12 = vweird.f32 %v11212_v21 }
 0x22b   : > { %v2021_v47 = vsel %vm2020_vm6, %v11163_v58, %v2017_v25  ;;  %v2037_v44 = vmul.f32 %v11174_v32, %v2036_v41  ;;  %v2044_v43 = vmul.f32 %v11212_v21, %v2043_v35  ;;  %v2275_v55 = vadd.f32 %v11032_v0, %v2240_v42  ;;  %vm2050_vm13 = vmor %vm2048_vm7, %vm2049_vm12 }
 0x22c   : > { %v2206_v14 = vmul.f32 %v2021_v47, %v10889_v22  ;;  %v2026_v58 = vsub.f32 1.5, %v2025_v46  ;;  %v2063_v33 = vmul.f32 %v11231_v17, %v11193_v38  ;;  %v11246_v22 = vpop.eup %9749  ;;  %9751 = vrsqrt.f32 %v11252_v36 }
 0x22d   : > { %v1783_v51 = vpop.xlane.xlu1 %1782  ;;  %v2041_v34 = vsel %vm2040_vm8, %v11174_v32, %v2037_v44  ;;  %v2045_v9 = vmul.f32 0.5, %v2044_v43  ;;  %2307 = vst.msk [vmem:[#allocation2 + $0x68] sm:$0xff] %vm1512_vm2, %v2275_v55  ;;  %v2053_v20 = vmul.f32 %v11246_v22, %v11195_v16  ;;  %vm2069_vm14 = vweird.f32 %v11231_v17 }
 0x22e   : > { %v2241_v19 = vmul.f32 %v11025_v28, %v2206_v14  ;;  %v2208_v6 = vmul.f32 %v2041_v34, %v10897_v15  ;;  %v2027_v29 = vmul.f32 %v11184_v30, %v2026_v58  ;;  %v2064_v53 = vmul.f32 %v11231_v17, %v2063_v33  ;;  %vm2070_vm0 = vmor %vm2068_vm10, %vm2069_vm14 }
 0x22f   : > { %v2046_v32 = vsub.f32 1.5, %v2045_v9  ;;  %v2054_v7 = vmul.f32 %v11246_v22, %v2053_v20  ;;  %v11272_v11 = vadd.f32 1e-05, %v1830_v61  ;;  %v1789_v41 = vpop.xlane.xlu0 %1788  ;;  %vm2059_vm15 = vweird.f32 %v11246_v22  ;;  %v1786_v46 = vpop.xlane.xlu2 %1785 }
 0x230   : > { %v2276_v39 = vadd.f32 %v11032_v0, %v2241_v19  ;;  %v2243_v8 = vmul.f32 %v11025_v28, %v2208_v6  ;;  %v2031_v15 = vsel %vm2030_vm11, %v11184_v30, %v2027_v29  ;;  %v2065_v31 = vmul.f32 0.5, %v2064_v53 }
 0x231   : > { %v2207_v62 = vmul.f32 %v2031_v15, %v10894_v26  ;;  %v2047_v56 = vmul.f32 %v11212_v21, %v2046_v32  ;;  %v1829_v30 = vmul.f32 %v1777_v59, %v10787_v13  ;;  %v2055_v25 = vmul.f32 0.5, %v2054_v7 }
 0x232   : > { %2308 = vst.msk [vmem:[#allocation2 + $0x70] sm:$0xff] %vm1512_vm2, %v2276_v39  ;;  %v2278_v1 = vadd.f32 %v11032_v0, %v2243_v8  ;;  %v2066_v60 = vsub.f32 1.5, %v2065_v31  ;;  %9753 = vrsqrt.f32 %v11272_v11  ;;  %v9752_v44 = vpop.eup %9751  ;;  %vm2058_vm1 = vweird.f32 %v11195_v16 }
 0x233   : > { %v2242_v26 = vmul.f32 %v11025_v28, %v2207_v62  ;;  %v2051_v4 = vsel %vm2050_vm13, %v11212_v21, %v2047_v56  ;;  %v11281_v52 = vadd.f32 1e-05, %v1829_v30  ;;  %v2056_v42 = vsub.f32 1.5, %v2055_v25  ;;  %vm2060_vm3 = vmor %vm2058_vm1, %vm2059_vm15 }
 0x234   : > { %2310 = vst.msk [vmem:[#allocation2 + $0x80] sm:$0xff] %vm1512_vm2, %v2278_v1  ;;  %v2209_v35 = vmul.f32 %v2051_v4, %v10910_v27  ;;  %v2067_v10 = vmul.f32 %v11231_v17, %v2066_v60  ;;  %v1831_v21 = vmul.f32 %v1783_v51, %v10787_v13  ;;  %v1833_v27 = vmul.f32 %v1789_v41, %v10787_v13 }
 0x235   : > { %v2277_v2 = vadd.f32 %v11032_v0, %v2242_v26  ;;  %v1792_v47 = vpop.xlane.xlu1 %1791  ;;  %9755 = vrsqrt.f32 %v11281_v52  ;;  %v2057_v59 = vmul.f32 %v11246_v22, %v2056_v42  ;;  %v2073_v55 = vmul.f32 %v9752_v44, %v11252_v36 }
 0x236   : > { %v2244_v43 = vmul.f32 %v11025_v28, %v2209_v35  ;;  %v2071_v3 = vsel %vm2070_vm0, %v11231_v17, %v2067_v10  ;;  %v11302_v38 = vadd.f32 1e-05, %v1831_v21  ;;  %v11304_v51 = vadd.f32 1e-05, %v1833_v27 }
 0x237   : > { %2309 = vst.msk [vmem:[#allocation2 + $0x78] sm:$0xff] %vm1512_vm2, %v2277_v2  ;;  %v2211_v58 = vmul.f32 %v2071_v3, %v10918_v57  ;;  %v2061_v34 = vsel %vm2060_vm3, %v11246_v22, %v2057_v59  ;;  %v2074_v17 = vmul.f32 %v9752_v44, %v2073_v55  ;;  %v1832_v9 = vmul.f32 %v1786_v46, %v10787_v13  ;;  %v1798_v8 = vpop.xlane.xlu0 %1797  ;;  %v1795_v1 = vpop.xlane.xlu2 %1794 }
 0x238   : > { %v2279_v14 = vadd.f32 %v11032_v0, %v2244_v43  ;;  %v11308_v33 = vpop.eup %9753  ;;  %v2210_v57 = vmul.f32 %v2061_v34, %v10915_v45  ;;  %9757 = vrsqrt.f32 %v11302_v38  ;;  %v1834_v61 = vmul.f32 %v1792_v47, %v10787_v13 }
 0x239   : > { %v2246_v16 = vmul.f32 %v11025_v28, %v2211_v58  ;;  %v2075_v19 = vmul.f32 0.5, %v2074_v17  ;;  %v2093_v6 = vmul.f32 %v11308_v33, %v11272_v11  ;;  %9759 = vrsqrt.f32 %v11304_v51 }
 0x23a   : > { %2311 = vst.msk [vmem:[#allocation2 + $0x88] sm:$0xff] %vm1512_vm2, %v2279_v14  ;;  %v2245_v32 = vmul.f32 %v11025_v28, %v2210_v57  ;;  %vm2078_vm4 = vweird.f32 %v11252_v36  ;;  %v11323_v53 = vadd.f32 1e-05, %v1832_v9  ;;  %vm2079_vm5 = vweird.f32 %v9752_v44 }
 0x23b   : > { %v11318_v22 = vpop.eup %9755  ;;  %v2281_v29 = vadd.f32 %v11032_v0, %v2246_v16  ;;  %v2076_v45 = vsub.f32 1.5, %v2075_v19  ;;  %v2094_v20 = vmul.f32 %v11308_v33, %v2093_v6  ;;  %vm2098_vm6 = vweird.f32 %v11272_v11  ;;  %vm2080_vm8 = vmor %vm2078_vm4, %vm2079_vm5 }
 0x23c   : > { %v2083_v39 = vmul.f32 %v11318_v22, %v11281_v52  ;;  %v2280_v15 = vadd.f32 %v11032_v0, %v2245_v32  ;;  %9761 = vrsqrt.f32 %v11323_v53  ;;  %v11332_v62 = vadd.f32 1e-05, %v1834_v61 }
 0x23d   : > { %2313 = vst.msk [vmem:[#allocation2 + $0x98] sm:$0xff] %vm1512_vm2, %v2281_v29  ;;  %v2077_v56 = vmul.f32 %v9752_v44, %v2076_v45  ;;  %v2095_v31 = vmul.f32 0.5, %v2094_v20  ;;  %vm2088_vm7 = vweird.f32 %v11281_v52  ;;  %v1801_v30 = vpop.xlane.xlu1 %1800  ;;  %vm2099_vm9 = vweird.f32 %v11308_v33 }
 0x23e   : > { %v2084_v7 = vmul.f32 %v11318_v22, %v2083_v39  ;;  %v11336_v26 = vpop.eup %9757  ;;  %2312 = vst.msk [vmem:[#allocation2 + $0x90] sm:$0xff] %vm1512_vm2, %v2280_v15  ;;  %vm2089_vm10 = vweird.f32 %v11318_v22  ;;  %9763 = vrsqrt.f32 %v11332_v62  ;;  %v1836_v4 = vmul.f32 %v1798_v8, %v10787_v13  ;;  %vm2100_vm14 = vmor %vm2098_vm6, %vm2099_vm9 }
 0x23f   : > { %v11346_v60 = vpop.eup %9759  ;;  %v2081_v25 = vsel %vm2080_vm8, %v9752_v44, %v2077_v56  ;;  %v2096_v41 = vsub.f32 1.5, %v2095_v31  ;;  %v2103_v2 = vmul.f32 %v11336_v26, %v11302_v38  ;;  %vm2108_vm11 = vweird.f32 %v11302_v38  ;;  %vm2090_vm1 = vmor %vm2088_vm7, %vm2089_vm10  ;;  %v1807_v31 = vpop.xlane.xlu0 %1806 }
 0x240   : > { %v2085_v35 = vmul.f32 0.5, %v2084_v7  ;;  %v2212_v36 = vmul.f32 %v2081_v25, %v10931_v50  ;;  %v2123_v10 = vmul.f32 %v11346_v60, %v11304_v51  ;;  %vm2128_vm12 = vweird.f32 %v11304_v51  ;;  %v1804_v7 = vpop.xlane.xlu2 %1803 }
 0x241   : > { %v1835_v42 = vmul.f32 %v1795_v1, %v10787_v13  ;;  %v1837_v21 = vmul.f32 %v1801_v30, %v10787_v13  ;;  %v2097_v46 = vmul.f32 %v11308_v33, %v2096_v41  ;;  %v2104_v44 = vmul.f32 %v11336_v26, %v2103_v2 }
 0x242   : > { %v2086_v47 = vsub.f32 1.5, %v2085_v35  ;;  %vm2109_vm13 = vweird.f32 %v11336_v26  ;;  %v11360_v43 = vpop.eup %9761  ;;  %v2247_v50 = vmul.f32 %v11025_v28, %v2212_v36  ;;  %v2124_v27 = vmul.f32 %v11346_v60, %v2123_v10 }
 0x243   : > { %vm2129_vm15 = vweird.f32 %v11346_v60  ;;  %v11369_v3 = vadd.f32 1e-05, %v1836_v4  ;;  %v2101_v59 = vsel %vm2100_vm14, %v11308_v33, %v2097_v46  ;;  %v2105_v14 = vmul.f32 0.5, %v2104_v44  ;;  %vm2110_vm3 = vmor %vm2108_vm11, %vm2109_vm13 }
 0x244   : > { %v2087_v55 = vmul.f32 %v11318_v22, %v2086_v47  ;;  %v2113_v58 = vmul.f32 %v11360_v43, %v11323_v53  ;;  %vm2118_vm0 = vweird.f32 %v11323_v53  ;;  %v9764_v34 = vpop.eup %9763  ;;  %v2282_v11 = vadd.f32 %v11032_v0, %v2247_v50  ;;  %vm2130_vm5 = vmor %vm2128_vm12, %vm2129_vm15 }
 0x245   : > { %v2214_v17 = vmul.f32 %v2101_v59, %v10936_v24  ;;  %v2125_v9 = vmul.f32 0.5, %v2124_v27  ;;  %v11382_v33 = vadd.f32 1e-05, %v1835_v42  ;;  %v2106_v57 = vsub.f32 1.5, %v2105_v14 }
 0x246   : > { %v2091_v16 = vsel %vm2090_vm1, %v11318_v22, %v2087_v55  ;;  %v2114_v61 = vmul.f32 %v11360_v43, %v2113_v58  ;;  %v2133_v19 = vmul.f32 %v9764_v34, %v11332_v62  ;;  %2314 = vst.msk [vmem:[#allocation2 + $0xa0] sm:$0xff] %vm1512_vm2, %v2282_v11  ;;  %v11390_v32 = vadd.f32 1e-05, %v1837_v21 }
 0x247   : > { %v2249_v6 = vmul.f32 %v11025_v28, %v2214_v17  ;;  %v2213_v24 = vmul.f32 %v2091_v16, %v10939_v12  ;;  %v2126_v29 = vsub.f32 1.5, %v2125_v9  ;;  %v2107_v52 = vmul.f32 %v11336_v26, %v2106_v57 }
 0x248   : > { %v2115_v45 = vmul.f32 0.5, %v2114_v61  ;;  %v2134_v20 = vmul.f32 %v9764_v34, %v2133_v19  ;;  %9765 = vrsqrt.f32 %v11369_v3  ;;  %vm2119_vm4 = vweird.f32 %v11360_v43 }
 0x249   : > { %v2284_v22 = vadd.f32 %v11032_v0, %v2249_v6  ;;  %v2248_v39 = vmul.f32 %v11025_v28, %v2213_v24  ;;  %v2127_v12 = vmul.f32 %v11346_v60, %v2126_v29  ;;  %v2111_v8 = vsel %vm2110_vm3, %v11336_v26, %v2107_v52  ;;  %vm2120_vm7 = vmor %vm2118_vm0, %vm2119_vm4 }
 0x24a   : > { %v2116_v15 = vsub.f32 1.5, %v2115_v45  ;;  %v2135_v56 = vmul.f32 0.5, %v2134_v20  ;;  %9767 = vrsqrt.f32 %v11382_v33  ;;  %v2215_v1 = vmul.f32 %v2111_v8, %v10952_v37 }
 0x24b   : > { %2316 = vst.msk [vmem:[#allocation2 + $0xb0] sm:$0xff] %vm1512_vm2, %v2284_v22  ;;  %v2283_v38 = vadd.f32 %v11032_v0, %v2248_v39  ;;  %v2131_v30 = vsel %vm2130_vm5, %v11346_v60, %v2127_v12  ;;  %vm2139_vm6 = vweird.f32 %v9764_v34  ;;  %9769 = vrsqrt.f32 %v11390_v32 }
 0x24c   : > { %v2217_v26 = vmul.f32 %v2131_v30, %v10960_v54  ;;  %v2117_v51 = vmul.f32 %v11360_v43, %v2116_v15  ;;  %v2136_v4 = vsub.f32 1.5, %v2135_v56  ;;  %v2250_v25 = vmul.f32 %v11025_v28, %v2215_v1 }
 0x24d   : > { %2315 = vst.msk [vmem:[#allocation2 + $0xa8] sm:$0xff] %vm1512_vm2, %v2283_v38  ;;  %v1839_v37 = vmul.f32 %v1807_v31, %v10787_v13  ;;  %v1838_v60 = vmul.f32 %v1804_v7, %v10787_v13  ;;  %vm2138_vm8 = vweird.f32 %v11332_v62  ;;  %vm2158_vm11 = vweird.f32 %v11369_v3 }
 0x24e   : > { %v9766_v41 = vpop.eup %9765  ;;  %v2252_v54 = vmul.f32 %v11025_v28, %v2217_v26  ;;  %v2121_v35 = vsel %vm2120_vm7, %v11360_v43, %v2117_v51  ;;  %v2137_v2 = vmul.f32 %v9764_v34, %v2136_v4  ;;  %v2285_v36 = vadd.f32 %v11032_v0, %v2250_v25  ;;  %vm2140_vm9 = vmor %vm2138_vm8, %vm2139_vm6 }
 0x24f   : > { %v2216_v10 = vmul.f32 %v2121_v35, %v10957_v49  ;;  %v2153_v53 = vmul.f32 %v9766_v41, %v11369_v3  ;;  %v11431_v46 = vadd.f32 1e-05, %v1839_v37  ;;  %v11433_v47 = vadd.f32 1e-05, %v1838_v60 }
 0x250   : > { %v9768_v42 = vpop.eup %9767  ;;  %v2287_v21 = vadd.f32 %v11032_v0, %v2252_v54  ;;  %v2141_v13 = vsel %vm2140_vm9, %v9764_v34, %v2137_v2  ;;  %2317 = vst.msk [vmem:[#allocation2 + $0xb8] sm:$0xff] %vm1512_vm2, %v2285_v36  ;;  %vm2159_vm10 = vweird.f32 %v9766_v41  ;;  %vm2148_vm14 = vweird.f32 %v11382_v33 }
 0x251   : > { %v2251_v62 = vmul.f32 %v11025_v28, %v2216_v10  ;;  %v2218_v44 = vmul.f32 %v2141_v13, %v10973_v63  ;;  %v2154_v43 = vmul.f32 %v9766_v41, %v2153_v53  ;;  %v2143_v49 = vmul.f32 %v9768_v42, %v11382_v33  ;;  %v9770_v50 = vpop.eup %9769  ;;  %vm2160_vm13 = vmor %vm2158_vm11, %vm2159_vm10 }
 0x252   : > { %2319 = vst.msk [vmem:[#allocation2 + $0xc8] sm:$0xff] %vm1512_vm2, %v2287_v21  ;;  %9771 = vrsqrt.f32 %v11431_v46  ;;  %v2163_v58 = vmul.f32 %v9770_v50, %v11390_v32  ;;  %vm2149_vm12 = vweird.f32 %v9768_v42  ;;  %vm2169_vm0 = vweird.f32 %v9770_v50 }
 0x253   : > { %v2286_v27 = vadd.f32 %v11032_v0, %v2251_v62  ;;  %v2253_v59 = vmul.f32 %v11025_v28, %v2218_v44  ;;  %v2155_v55 = vmul.f32 0.5, %v2154_v43  ;;  %v2144_v14 = vmul.f32 %v9768_v42, %v2143_v49  ;;  %vm2150_vm15 = vmor %vm2148_vm14, %vm2149_vm12 }
 0x254   : > { %9773 = vrsqrt.f32 %v11433_v47  ;;  %v2164_v17 = vmul.f32 %v9770_v50, %v2163_v58  ;;  %vm2168_vm1 = vweird.f32 %v11390_v32  ;;  %vm2188_vm5 = vweird.f32 %v11431_v46 }
 0x255   : > { %2318 = vst.msk [vmem:[#allocation2 + $0xc0] sm:$0xff] %vm1512_vm2, %v2286_v27  ;;  %v2288_v63 = vadd.f32 %v11032_v0, %v2253_v59  ;;  %v2156_v34 = vsub.f32 1.5, %v2155_v55  ;;  %v2145_v11 = vmul.f32 0.5, %v2144_v14  ;;  %vm2170_vm3 = vmor %vm2168_vm1, %vm2169_vm0  ;;  %vm2178_vm8 = vweird.f32 %v11433_v47 }
 0x256   : > { %v2165_v61 = vmul.f32 0.5, %v2164_v17 }
 0x257   : > { %2320 = vst.msk [vmem:[#allocation2 + $0xd0] sm:$0xff] %vm1512_vm2, %v2288_v63  ;;  %v2157_v9 = vmul.f32 %v9766_v41, %v2156_v34  ;;  %v2146_v16 = vsub.f32 1.5, %v2145_v11 }
 0x258   : > { %v9772_v57 = vpop.eup %9771  ;;  %v2166_v45 = vsub.f32 1.5, %v2165_v61 }
 0x259   : > { %v2161_v19 = vsel %vm2160_vm13, %v9766_v41, %v2157_v9  ;;  %v2147_v6 = vmul.f32 %v9768_v42, %v2146_v16  ;;  %v2183_v24 = vmul.f32 %v9772_v57, %v11431_v46  ;;  %vm2189_vm4 = vweird.f32 %v9772_v57 }
 0x25a   : > { %v9774_v29 = vpop.eup %9773  ;;  %v2220_v52 = vmul.f32 %v2161_v19, %v10981_v23  ;;  %v2167_v8 = vmul.f32 %v9770_v50, %v2166_v45  ;;  %v9775_v23 = vld [vmem:[%s15668_s28] ss:$0 sm:$0xff]  ;;  %vm2190_vm7 = vmor %vm2188_vm5, %vm2189_vm4 }
 0x25b   : > { %v2151_v20 = vsel %vm2150_vm15, %v9768_v42, %v2147_v6  ;;  %v2184_v22 = vmul.f32 %v9772_v57, %v2183_v24  ;;  %v2173_v3 = vmul.f32 %v9774_v29, %v11433_v47  ;;  %vm2179_vm6 = vweird.f32 %v9774_v29 }
 0x25c   : > { %v2255_v39 = vmul.f32 %v11025_v28, %v2220_v52  ;;  %v2219_v12 = vmul.f32 %v2151_v20, %v10978_v5  ;;  %v2171_v7 = vsel %vm2170_vm3, %v9770_v50, %v2167_v8  ;;  %v9776_v5 = vld [vmem:[%s15670_s16] ss:$0 sm:$0xff]  ;;  %vm2180_vm9 = vmor %vm2178_vm8, %vm2179_vm6 }
 0x25d   : > { %v2185_v33 = vmul.f32 0.5, %v2184_v22  ;;  %v2174_v15 = vmul.f32 %v9774_v29, %v2173_v3  ;;  %v2221_v38 = vmul.f32 %v2171_v7, %v10994_v40 }
 0x25e   : > { %v2290_v56 = vadd.f32 %v11032_v0, %v2255_v39  ;;  %v2254_v31 = vmul.f32 %v9775_v23, %v2219_v12 }
 0x25f   : > { %v2186_v1 = vsub.f32 1.5, %v2185_v33  ;;  %v2175_v28 = vmul.f32 0.5, %v2174_v15  ;;  %v2256_v0 = vmul.f32 %v9775_v23, %v2221_v38 }
 0x260   : > { %2322 = vst.msk [vmem:[#allocation2 + $0xe0] sm:$0xff] %vm1512_vm2, %v2290_v56  ;;  %v2289_v32 = vadd.f32 %v9776_v5, %v2254_v31 }
 0x261   : > { %v2187_v30 = vmul.f32 %v9772_v57, %v2186_v1  ;;  %v2176_v26 = vsub.f32 1.5, %v2175_v28  ;;  %v2291_v40 = vadd.f32 %v9776_v5, %v2256_v0 }
 0x262   : > { %2321 = vst.msk [vmem:[#allocation2 + $0xd8] sm:$0xff] %vm1512_vm2, %v2289_v32 }
 0x263   : > { %v2191_v51 = vsel %vm2190_vm7, %v9772_v57, %v2187_v30  ;;  %v2177_v4 = vmul.f32 %v9774_v29, %v2176_v26  ;;  %2323 = vst.msk [vmem:[#allocation2 + $0xe8] sm:$0xff] %vm1512_vm2, %v2291_v40 }
 0x264   : > { %v2223_v25 = vmul.f32 %v2191_v51, %v11002_v18 }
 0x265   : > { %v2181_v37 = vsel %vm2180_vm9, %v9774_v29, %v2177_v4 }
 0x266   : > { %v2258_v60 = vmul.f32 %v9775_v23, %v2223_v25  ;;  %v2222_v41 = vmul.f32 %v2181_v37, %v10999_v48 }
 0x268   : > { %v2293_v54 = vadd.f32 %v9776_v5, %v2258_v60  ;;  %v2257_v35 = vmul.f32 %v9775_v23, %v2222_v41 }
 0x26a   : > { %2325 = vst.msk [vmem:[#allocation2 + $0xf8] sm:$0xff] %vm1512_vm2, %v2293_v54  ;;  %v2292_v2 = vadd.f32 %v9776_v5, %v2257_v35 }
 0x26c   : > { %2324 = vst.msk [vmem:[#allocation2 + $0xf0] sm:$0xff] %vm1512_vm2, %v2292_v2 }
 0x26d PF: > { %v2328_v36 = vld [vmem:[#allocation2 + $0x10] sm:$0xff]  ;;  %vm2360_vm10 = vcmask 261120   ;;  %v2326_v10 = vld [vmem:[#allocation2] sm:$0xff]  ;;  %v2329_v21 = vld [vmem:[#allocation2 + $0x18] sm:$0xff]  ;;  %v10221_v50 = vmov 32.0   ;;  %s15689_s18 = sld [smem:[#allocation52_spill]] }
 0x26e   : > { %v2367_v18 = vsel %vm2360_vm10, %v2328_v36, 0.0  ;;  %v2361_v53 = vsel %vm2360_vm10, %v2326_v10, 0.0  ;;  %v2330_v42 = vld [vmem:[#allocation2 + $0x20] sm:$0xff]  ;;  %v2327_v48 = vld [vmem:[#allocation2 + $0x8] sm:$0xff]  ;;  %v2370_v47 = vsel %vm2360_vm10, %v2329_v21, 0.0  ;;  %v2332_v43 = vld [vmem:[#allocation2 + $0x30] sm:$0xff]  ;;  %9806 = vrcp.f32 %v10221_v50 }
 0x26f   : > { %2368 = vadd.xlane.f32.xlu1 %v2367_v18  ;;  %2362 = vadd.xlane.f32.xlu0 %v2361_v53  ;;  %v2373_v13 = vsel %vm2360_vm10, %v2330_v42, 0.0  ;;  %v2331_v46 = vld [vmem:[#allocation2 + $0x28] sm:$0xff]  ;;  %v2364_v62 = vsel %vm2360_vm10, %v2327_v48, 0.0  ;;  %v2379_v49 = vsel %vm2360_vm10, %v2332_v43, 0.0  ;;  %v11492_v20 = vld [vmem:[#allocation2 + $0x38] sm:$0xff]  ;;  %v11513_v1 = vld [vmem:[#allocation2 + $0x40] sm:$0xff] }
 0x270   : > { %2374 = vadd.xlane.f32.xlu2 %v2373_v13  ;;  %v2376_v44 = vsel %vm2360_vm10, %v2331_v46, 0.0  ;;  %v2382_v33 = vsel %vm2360_vm10, %v11492_v20, 0.0  ;;  %v2385_v0 = vsel %vm2360_vm10, %v11513_v1, 0.0  ;;  %v11526_v4 = vld [vmem:[#allocation2 + $0x58] sm:$0xff]  ;;  %v11528_v25 = vld [vmem:[#allocation2 + $0x48] sm:$0xff]  ;;  %v11539_v2 = vld [vmem:[#allocation2 + $0x60] sm:$0xff] }
 0x271   : > { %v2394_v60 = vsel %vm2360_vm10, %v11526_v4, 0.0  ;;  %v2388_v54 = vsel %vm2360_vm10, %v11528_v25, 0.0  ;;  %s10222_s15 = smov 32   ;;  %s10224_s8 = smov 64  }
 0x272   : > { %s15747_s13 = sld [smem:[#allocation53_spill]] }
 0x274   : > { %v9807_v27 = vpop.eup %9806 }
 0x275   : > { %v2458_v59 = vmul.f32 32.0, %v9807_v27  ;;  %vm2462_vm2 = vweird.f32 %v9807_v27 }
 0x277   : > { %2371 = vadd.xlane.f32.xlu1 %v2370_v47  ;;  %2365 = vadd.xlane.f32.xlu0 %v2364_v62  ;;  %v2459_v55 = vsub.f32 1.0, %v2458_v59  ;;  %v9623_v47 = vld [vmem:[%s10401_s4 + $0x8] sm:$0xff] }
 0x278   : > { %2377 = vadd.xlane.f32.xlu2 %v2376_v44  ;;  %3232 = vmatpush.bf16.msra.mxu0 %v9623_v47 }
 0x279   : > { %v2460_v14 = vmul.f32 %v9807_v27, %v2459_v55  ;;  %9654 = vmatpush.bf16.msra.mxu3 %v9623_v47 }
 0x27b   : > { %v2461_v58 = vadd.f32 %v9807_v27, %v2460_v14 }
 0x27d   : > { %v11480_v63 = vsel %vm2462_vm2, %v9807_v27, %v2461_v58 }
 0x27e   : > { %15671 = vst [vmem:[#allocation10_spill] sm:$0xff] %v11480_v63 }
 0x280   : > { %2380 = vadd.xlane.f32.xlu2 %v2379_v49 }
 0x2e2   : > { %v2369_v34 = vpop.xlane.xlu1 %2368  ;;  %v2363_v11 = vpop.xlane.xlu0 %2362 }
 0x2e3   : > { %v2464_v17 = vmul.f32 %v11480_v63, %v2363_v11  ;;  %v2375_v9 = vpop.xlane.xlu2 %2374  ;;  %v2466_v45 = vmul.f32 %v11480_v63, %v2369_v34 }
 0x2e4   : > { %v2468_v52 = vmul.f32 %v11480_v63, %v2375_v9 }
 0x2e5   : > { %v11483_v16 = vsub.f32 %v2326_v10, %v2464_v17  ;;  %v11506_v56 = vsub.f32 %v2328_v36, %v2466_v45  ;;  %v11541_v36 = vld [vmem:[#allocation2 + $0x50] sm:$0xff]  ;;  %v2397_v10 = vsel %vm2360_vm10, %v11539_v2, 0.0 }
 0x2e6   : > { %v11498_v12 = vsub.f32 %v2330_v42, %v2468_v52  ;;  %v2391_v53 = vsel %vm2360_vm10, %v11541_v36, 0.0  ;;  %v11548_v42 = vld [vmem:[#allocation2 + $0x68] sm:$0xff] }
 0x2e7   : > { %v2528_v57 = vmul.f32 %v11483_v16, %v11483_v16  ;;  %v2530_v28 = vmul.f32 %v11506_v56, %v11506_v56 }
 0x2e8   : > { %v2532_v38 = vmul.f32 %v11498_v12, %v11498_v12 }
 0x2e9   : > { %v2560_v61 = vsel %vm2360_vm10, %v2528_v57, 0.0  ;;  %v2566_v30 = vsel %vm2360_vm10, %v2530_v28, 0.0 }
 0x2ea   : > { %v2372_v19 = vpop.xlane.xlu1 %2371  ;;  %2561 = vadd.xlane.f32.xlu0 %v2560_v61  ;;  %v2366_v6 = vpop.xlane.xlu0 %2365  ;;  %v2572_v32 = vsel %vm2360_vm10, %v2532_v38, 0.0 }
 0x2eb   : > { %v2467_v24 = vmul.f32 %v11480_v63, %v2372_v19  ;;  %v2465_v29 = vmul.f32 %v11480_v63, %v2366_v6  ;;  %v2378_v39 = vpop.xlane.xlu2 %2377 }
 0x2ec   : > { %v2469_v7 = vmul.f32 %v11480_v63, %v2378_v39 }
 0x2ed   : > { %v11494_v22 = vsub.f32 %v2329_v21, %v2467_v24  ;;  %v11496_v3 = vsub.f32 %v2327_v48, %v2465_v29  ;;  %v2400_v21 = vsel %vm2360_vm10, %v11548_v42, 0.0  ;;  %v11552_v48 = vld [vmem:[#allocation2 + $0x70] sm:$0xff] }
 0x2ee   : > { %v11517_v5 = vsub.f32 %v2331_v46, %v2469_v7  ;;  %v2403_v13 = vsel %vm2360_vm10, %v11552_v48, 0.0 }
 0x2ef   : > { %v2531_v8 = vmul.f32 %v11494_v22, %v11494_v22  ;;  %v2529_v15 = vmul.f32 %v11496_v3, %v11496_v3 }
 0x2f0   : > { %v2533_v51 = vmul.f32 %v11517_v5, %v11517_v5 }
 0x2f1   : > { %v2569_v23 = vsel %vm2360_vm10, %v2531_v8, 0.0  ;;  %v2563_v31 = vsel %vm2360_vm10, %v2529_v15, 0.0 }
 0x2f2   : > { %2570 = vadd.xlane.f32.xlu2 %v2569_v23  ;;  %2383 = vadd.xlane.f32.xlu0 %v2382_v33  ;;  %v2575_v41 = vsel %vm2360_vm10, %v2533_v51, 0.0 }
 0x2f3   : > { %2564 = vadd.xlane.f32.xlu1 %v2563_v31  ;;  %v2381_v26 = vpop.xlane.xlu2 %2380 }
 0x2f4   : > { %v2470_v40 = vmul.f32 %v11480_v63, %v2381_v26 }
 0x2f6   : > { %v11530_v37 = vsub.f32 %v2332_v43, %v2470_v40  ;;  %v9622_v43 = vld [vmem:[%s10401_s4] sm:$0xff]  ;;  %s15674_s4 = sld [smem:[#allocation9_spill]] }
 0x2f7   : > { %3233 = vmatpush.bf16.msra.mxu0 %v9622_v43  ;;  %9655 = vmatpush.bf16.msra.mxu3 %v9622_v43 }
 0x2f8   : > { %v2534_v35 = vmul.f32 %v11530_v37, %v11530_v37 }
 0x2fa   : > { %2573 = vadd.xlane.f32.xlu2 %v2572_v32  ;;  %2386 = vadd.xlane.f32.xlu0 %v2385_v0  ;;  %v2578_v18 = vsel %vm2360_vm10, %v2534_v35, 0.0 }
 0x2fb   : > { %2567 = vadd.xlane.f32.xlu1 %v2566_v30 }
 0x302   : > { %2395 = vadd.xlane.f32.xlu2 %v2394_v60  ;;  %2576 = vadd.xlane.f32.xlu0 %v2575_v41 }
 0x303   : > { %2389 = vadd.xlane.f32.xlu1 %v2388_v54 }
 0x30a   : > { %2398 = vadd.xlane.f32.xlu2 %v2397_v10  ;;  %2579 = vadd.xlane.f32.xlu0 %v2578_v18 }
 0x30b   : > { %2392 = vadd.xlane.f32.xlu1 %v2391_v53 }
 0x312   : > { %2401 = vadd.xlane.f32.xlu0 %v2400_v21 }
 0x31a   : > { %2404 = vadd.xlane.f32.xlu0 %v2403_v13 }
 0x35d   : > { %v2562_v46 = vpop.xlane.xlu0 %2561 }
 0x35e   : > { %v2656_v62 = vmul.f32 %v2562_v46, %v11480_v63 }
 0x360   : > { %v2688_v44 = vadd.f32 1e-05, %v2656_v62 }
 0x362   : > { %9808 = vrsqrt.f32 %v2688_v44  ;;  %vm2726_vm12 = vweird.f32 %v2688_v44 }
 0x365   : > { %v2571_v49 = vpop.xlane.xlu2 %2570  ;;  %v2384_v50 = vpop.xlane.xlu0 %2383 }
 0x366   : > { %v2659_v27 = vmul.f32 %v2571_v49, %v11480_v63  ;;  %v2565_v59 = vpop.xlane.xlu1 %2564  ;;  %v2471_v55 = vmul.f32 %v11480_v63, %v2384_v50  ;;  %v11617_v50 = vld [vmem:[%s10386_s29] ss:$0 sm:$0xff] }
 0x367   : > { %v2657_v14 = vmul.f32 %v2565_v59, %v11480_v63 }
 0x368   : > { %v9809_v58 = vpop.eup %9808  ;;  %v11562_v34 = vadd.f32 1e-05, %v2659_v27  ;;  %v11565_v11 = vsub.f32 %v11492_v20, %v2471_v55 }
 0x369   : > { %v2721_v17 = vmul.f32 %v9809_v58, %v2688_v44  ;;  %v2689_v9 = vadd.f32 1e-05, %v2657_v14  ;;  %vm2727_vm11 = vweird.f32 %v9809_v58  ;;  %v11610_v44 = vld [vmem:[#allocation2 + $0x78] sm:$0xff] }
 0x36a   : > { %9810 = vrsqrt.f32 %v11562_v34  ;;  %v2535_v57 = vmul.f32 %v11565_v11, %v11565_v11  ;;  %vm11588_vm13 = vmor %vm2726_vm12, %vm2727_vm11  ;;  %vm2756_vm1 = vweird.f32 %v11562_v34 }
 0x36b   : > { %v2722_v61 = vmul.f32 %v9809_v58, %v2721_v17  ;;  %9812 = vrsqrt.f32 %v2689_v9  ;;  %vm2736_vm15 = vweird.f32 %v2689_v9 }
 0x36c   : > { %v2581_v19 = vsel %vm2360_vm10, %v2535_v57, 0.0 }
 0x36d   : > { %v2723_v6 = vmul.f32 0.5, %v2722_v61  ;;  %v2574_v24 = vpop.xlane.xlu2 %2573  ;;  %2582 = vadd.xlane.f32.xlu1 %v2581_v19  ;;  %v2387_v29 = vpop.xlane.xlu0 %2386 }
 0x36e   : > { %v2568_v52 = vpop.xlane.xlu1 %2567  ;;  %v2472_v45 = vmul.f32 %v11480_v63, %v2387_v29  ;;  %v2660_v23 = vmul.f32 %v2574_v24, %v11480_v63 }
 0x36f   : > { %v2724_v20 = vsub.f32 1.5, %v2723_v6  ;;  %v2658_v39 = vmul.f32 %v2568_v52, %v11480_v63  ;;  %v11634_v52 = vld [vmem:[%s15674_s4] ss:$0 sm:$0xff] }
 0x370   : > { %v11573_v8 = vpop.eup %9810  ;;  %v11576_v33 = vsub.f32 %v11513_v1, %v2472_v45  ;;  %v11586_v1 = vadd.f32 1e-05, %v2660_v23 }
 0x371   : > { %v9813_v15 = vpop.eup %9812  ;;  %v11579_v31 = vadd.f32 1e-05, %v2658_v39  ;;  %v2725_v38 = vmul.f32 %v9809_v58, %v2724_v20  ;;  %v2751_v28 = vmul.f32 %v11573_v8, %v11562_v34  ;;  %vm2757_vm3 = vweird.f32 %v11573_v8 }
 0x372   : > { %v2731_v7 = vmul.f32 %v9813_v15, %v2689_v9  ;;  %v2536_v0 = vmul.f32 %v11576_v33, %v11576_v33  ;;  %vm2737_vm14 = vweird.f32 %v9813_v15  ;;  %vm11660_vm6 = vmor %vm2756_vm1, %vm2757_vm3  ;;  %vm2766_vm2 = vweird.f32 %v11586_v1 }
 0x373   : > { %9814 = vrsqrt.f32 %v11579_v31  ;;  %v2729_v10 = vsel %vm11588_vm13, %v9809_v58, %v2725_v38  ;;  %v2752_v18 = vmul.f32 %v11573_v8, %v2751_v28  ;;  %vm2738_vm0 = vmor %vm2736_vm15, %vm2737_vm14  ;;  %v2406_v58 = vsel %vm2360_vm10, %v11610_v44, 0.0 }
 0x374   : > { %v2732_v32 = vmul.f32 %v9813_v15, %v2731_v7  ;;  %v2584_v54 = vsel %vm2360_vm10, %v2536_v0, 0.0  ;;  %9816 = vrsqrt.f32 %v11586_v1  ;;  %vm2746_vm5 = vweird.f32 %v11579_v31 }
 0x375   : > { %v2396_v30 = vpop.xlane.xlu2 %2395  ;;  %v2577_v26 = vpop.xlane.xlu0 %2576  ;;  %2585 = vadd.xlane.f32.xlu1 %v2584_v54  ;;  %v2753_v27 = vmul.f32 0.5, %v2752_v18 }
 0x376   : > { %v2733_v51 = vmul.f32 0.5, %v2732_v32  ;;  %v2475_v60 = vmul.f32 %v11480_v63, %v2396_v30  ;;  %v2390_v41 = vpop.xlane.xlu1 %2389  ;;  %v2661_v35 = vmul.f32 %v2577_v26, %v11480_v63  ;;  %v11653_v32 = vld [vmem:[#allocation2 + $0x80] sm:$0xff] }
 0x377   : > { %v2473_v53 = vmul.f32 %v11480_v63, %v2390_v41  ;;  %v2754_v20 = vsub.f32 1.5, %v2753_v27  ;;  %v2409_v41 = vsel %vm2360_vm10, %v11653_v32, 0.0 }
 0x378   : > { %v2734_v21 = vsub.f32 1.5, %v2733_v51  ;;  %v11600_v13 = vsub.f32 %v11526_v4, %v2475_v60  ;;  %v11602_v46 = vadd.f32 1e-05, %v2661_v35  ;;  %v3040_v4 = vmul.f32 %v2729_v10, %v11483_v16 }
 0x379   : > { %v11604_v47 = vpop.eup %9814  ;;  %v11608_v62 = vsub.f32 %v11528_v25, %v2473_v53 }
 0x37a   : > { %v2735_v43 = vmul.f32 %v9813_v15, %v2734_v21  ;;  %v2741_v49 = vmul.f32 %v11604_v47, %v11579_v31  ;;  %9818 = vrsqrt.f32 %v11602_v46  ;;  %v2539_v59 = vmul.f32 %v11600_v13, %v11600_v13  ;;  %v11636_v45 = vpop.eup %9816 }
 0x37b   : > { %v2537_v14 = vmul.f32 %v11608_v62, %v11608_v62  ;;  %v3075_v29 = vmul.f32 %v11617_v50, %v3040_v4  ;;  %vm2747_vm4 = vweird.f32 %v11604_v47  ;;  %vm2776_vm8 = vweird.f32 %v11602_v46 }
 0x37c   : > { %v2739_v25 = vsel %vm2738_vm0, %v9813_v15, %v2735_v43  ;;  %v2742_v55 = vmul.f32 %v11604_v47, %v2741_v49  ;;  %v2593_v16 = vsel %vm2360_vm10, %v2539_v59, 0.0  ;;  %vm11670_vm7 = vmor %vm2746_vm5, %vm2747_vm4  ;;  %v11687_v49 = vld [vmem:[#allocation2 + $0x98] sm:$0xff]  ;;  %v11691_v59 = vld [vmem:[#allocation2 + $0x88] sm:$0xff]  ;;  %vm2767_vm11 = vweird.f32 %v11636_v45 }
 0x37d   : > { %v2399_v17 = vpop.xlane.xlu2 %2398  ;;  %v11627_v9 = vpop.xlane.xlu0 %2579  ;;  %v3041_v57 = vmul.f32 %v2739_v25, %v11496_v3  ;;  %2594 = vadd.xlane.f32.xlu0 %v2593_v16  ;;  %v2587_v6 = vsel %vm2360_vm10, %v2537_v14, 0.0  ;;  %2407 = vadd.xlane.f32.xlu1 %v2406_v58  ;;  %v3110_v34 = vadd.f32 %v11634_v52, %v3075_v29  ;;  %v11693_v25 = vld [vmem:[#allocation2 + $0xa8] sm:$0xff]  ;;  %v2412_v58 = vsel %vm2360_vm10, %v11691_v59, 0.0  ;;  %vm2768_vm13 = vmor %vm2766_vm2, %vm2767_vm11 }
 0x37e   : > { %v2743_v61 = vmul.f32 0.5, %v2742_v55  ;;  %v2476_v19 = vmul.f32 %v11480_v63, %v2399_v17  ;;  %v2393_v24 = vpop.xlane.xlu1 %2392  ;;  %2588 = vadd.xlane.f32.xlu2 %v2587_v6  ;;  %v2424_v17 = vsel %vm2360_vm10, %v11693_v25, 0.0 }
 0x37f   : > { %v2474_v39 = vmul.f32 %v11480_v63, %v2393_v24  ;;  %v3076_v3 = vmul.f32 %v11617_v50, %v3041_v57  ;;  %v11710_v24 = vld [vmem:[#allocation2 + $0xa0] sm:$0xff] }
 0x380   : > { %v11640_v15 = vpop.eup %9818  ;;  %v2744_v23 = vsub.f32 1.5, %v2743_v61  ;;  %v11645_v7 = vsub.f32 %v11539_v2, %v2476_v19  ;;  %v2755_v2 = vmul.f32 %v11573_v8, %v2754_v20 }
 0x381   : > { %v2771_v38 = vmul.f32 %v11640_v15, %v11602_v46  ;;  %v11651_v28 = vsub.f32 %v11541_v36, %v2474_v39  ;;  %v3111_v30 = vadd.f32 %v11634_v52, %v3076_v3  ;;  %v2761_v36 = vmul.f32 %v11636_v45, %v11586_v1  ;;  %v11718_v46 = vld [vmem:[#allocation2 + $0x90] sm:$0xff] }
 0x382   : > { %v2745_v0 = vmul.f32 %v11604_v47, %v2744_v23  ;;  %v2540_v40 = vmul.f32 %v11645_v7, %v11645_v7  ;;  %v2759_v21 = vsel %vm11660_vm6, %v11573_v8, %v2755_v2  ;;  %v2418_v8 = vsel %vm2360_vm10, %v11687_v49, 0.0 }
 0x383   : > { %v2538_v51 = vmul.f32 %v11651_v28, %v11651_v28  ;;  %v3142_v60 = vpack.c.bf16 %v3111_v30, %v3110_v34  ;;  %v2772_v35 = vmul.f32 %v11640_v15, %v2771_v38  ;;  %v2762_v43 = vmul.f32 %v11636_v45, %v2761_v36  ;;  %v11739_v36 = vld [vmem:[#allocation2 + $0xc8] sm:$0xff] }
 0x384   : > { %v2749_v54 = vsel %vm11670_vm7, %v11604_v47, %v2745_v0  ;;  %v2596_v10 = vsel %vm2360_vm10, %v2540_v40, 0.0  ;;  %v3043_v55 = vmul.f32 %v2759_v21, %v11494_v22  ;;  %vm2777_vm9 = vweird.f32 %v11640_v15 }
 0x385   : > { %v2590_v18 = vsel %vm2360_vm10, %v2538_v51, 0.0  ;;  %v2402_v53 = vpop.xlane.xlu0 %2401  ;;  %9380 = vmatmul.msk.bf16.vlgmr.msra.gmra.mxu0 %vm2360_vm10, %v3142_v60  ;;  %2597 = vadd.xlane.f32.xlu0 %v2596_v10  ;;  %v3042_v4 = vmul.f32 %v2749_v54, %v11506_v56  ;;  %v2773_v27 = vmul.f32 0.5, %v2772_v35  ;;  %v2763_v14 = vmul.f32 0.5, %v2762_v43  ;;  %vm11720_vm12 = vmor %vm2776_vm8, %vm2777_vm9  ;;  %v11751_v54 = vld [vmem:[#allocation2 + $0xb0] sm:$0xff]  ;;  %v11757_v10 = vld [vmem:[#allocation2 + $0xd8] sm:$0xff] }
 0x386   : > { %2591 = vadd.xlane.f32.xlu2 %v2590_v18  ;;  %2410 = vadd.xlane.f32.xlu1 %v2409_v41  ;;  %v2477_v47 = vmul.f32 %v11480_v63, %v2402_v53  ;;  %v3078_v22 = vmul.f32 %v11617_v50, %v3043_v55  ;;  %v2421_v38 = vsel %vm2360_vm10, %v11710_v24, 0.0  ;;  %v2415_v1 = vsel %vm2360_vm10, %v11718_v46, 0.0  ;;  %v11761_v53 = vld [vmem:[#allocation2 + $0xe0] sm:$0xff] }
 0x387   : > { %v3077_v56 = vmul.f32 %v11617_v50, %v3042_v4  ;;  %v2774_v57 = vsub.f32 1.5, %v2773_v27  ;;  %v2764_v19 = vsub.f32 1.5, %v2763_v14  ;;  %v2436_v31 = vsel %vm2360_vm10, %v11739_v36, 0.0  ;;  %v11767_v4 = vld [vmem:[#allocation2 + $0xb8] sm:$0xff] }
 0x388   : > { %v11703_v16 = vsub.f32 %v11548_v42, %v2477_v47  ;;  %v3113_v3 = vadd.f32 %v11634_v52, %v3078_v22  ;;  %v2442_v18 = vsel %vm2360_vm10, %v11757_v10, 0.0  ;;  %v2445_v21 = vsel %vm2360_vm10, %v11761_v53, 0.0 }
 0x389   : > { %v3112_v6 = vadd.f32 %v11634_v52, %v3077_v56  ;;  %v2775_v20 = vmul.f32 %v11640_v15, %v2774_v57  ;;  %v2765_v23 = vmul.f32 %v11636_v45, %v2764_v19  ;;  %v2662_v43 = vmul.f32 %v11627_v9, %v11480_v63 }
 0x38a   : > { %v2541_v42 = vmul.f32 %v11703_v16, %v11703_v16  ;;  %v2430_v27 = vsel %vm2360_vm10, %v11767_v4, 0.0 }
 0x38b   : > { %v3143_v0 = vpack.c.bf16 %v3113_v3, %v3112_v6  ;;  %v2779_v2 = vsel %vm11720_vm12, %v11640_v15, %v2775_v20  ;;  %v2769_v26 = vsel %vm2768_vm13, %v11636_v45, %v2765_v23  ;;  %v2694_v47 = vadd.f32 1e-05, %v2662_v43 }
 0x38c   : > { %v2599_v34 = vsel %vm2360_vm10, %v2541_v42, 0.0  ;;  %v3045_v51 = vmul.f32 %v2779_v2, %v11517_v5 }
 0x38d   : > { %v2405_v61 = vpop.xlane.xlu0 %2404  ;;  %2419 = vadd.xlane.f32.xlu0 %v2418_v8  ;;  %9820 = vrsqrt.f32 %v2694_v47  ;;  %vm2786_vm14 = vweird.f32 %v2694_v47 }
 0x38e   : > { %2413 = vadd.xlane.f32.xlu2 %v2412_v58  ;;  %2425 = vadd.xlane.f32.xlu1 %v2424_v17  ;;  %v2478_v29 = vmul.f32 %v11480_v63, %v2405_v61  ;;  %v3080_v60 = vmul.f32 %v11617_v50, %v3045_v51 }
 0x390   : > { %v11732_v30 = vsub.f32 %v11552_v48, %v2478_v29  ;;  %v3044_v48 = vmul.f32 %v2769_v26, %v11498_v12  ;;  %v3115_v41 = vadd.f32 %v11634_v52, %v3080_v60  ;;  %v2427_v12 = vsel %vm2360_vm10, %v11751_v54, 0.0 }
 0x392   : > { %v2542_v40 = vmul.f32 %v11732_v30, %v11732_v30  ;;  %v3079_v45 = vmul.f32 %v11617_v50, %v3044_v48 }
 0x393   : > { %v9821_v55 = vpop.eup %9820 }
 0x394   : > { %v2602_v15 = vsel %vm2360_vm10, %v2542_v40, 0.0  ;;  %v3114_v35 = vadd.f32 %v11634_v52, %v3079_v45  ;;  %v2781_v14 = vmul.f32 %v9821_v55, %v2694_v47  ;;  %vm2787_vm15 = vweird.f32 %v9821_v55 }
 0x395   : > { %9381 = vmatmul.msk.bf16.gmra.mxu0 %vm2360_vm10, %v3143_v0  ;;  %2422 = vadd.xlane.f32.xlu0 %v2421_v38  ;;  %vm11773_vm0 = vmor %vm2786_vm14, %vm2787_vm15 }
 0x396   : > { %2416 = vadd.xlane.f32.xlu2 %v2415_v1  ;;  %2600 = vadd.xlane.f32.xlu1 %v2599_v34  ;;  %v3144_v5 = vpack.c.bf16 %v3115_v41, %v3114_v35  ;;  %v2782_v17 = vmul.f32 %v9821_v55, %v2781_v14 }
 0x398   : > { %v2783_v57 = vmul.f32 0.5, %v2782_v17 }
 0x39a   : > { %v2784_v9 = vsub.f32 1.5, %v2783_v57 }
 0x39c   : > { %v2785_v20 = vmul.f32 %v9821_v55, %v2784_v9 }
 0x39d   : > { %2437 = vadd.xlane.f32.xlu0 %v2436_v31 }
 0x39e   : > { %2603 = vadd.xlane.f32.xlu1 %v2602_v15  ;;  %v2789_v2 = vsel %vm11773_vm0, %v9821_v55, %v2785_v20 }
 0x39f   : > { %v3046_v35 = vmul.f32 %v2789_v2, %v11530_v37 }
 0x3a1   : > { %v3081_v55 = vmul.f32 %v11617_v50, %v3046_v35 }
 0x3a5   : > { %9382 = vmatmul.msk.bf16.gmra.mxu0 %vm2360_vm10, %v3144_v5  ;;  %2428 = vadd.xlane.f32.xlu0 %v2427_v12 }
 0x3a6   : > { %2431 = vadd.xlane.f32.xlu1 %v2430_v27 }
 0x3ad   : > { %2443 = vadd.xlane.f32.xlu0 %v2442_v18 }
 0x3b5   : > { %2446 = vadd.xlane.f32.xlu0 %v2445_v21 }
 0x3e0   : > { %v2583_v8 = vpop.xlane.xlu1 %2582 }
 0x3e1   : > { %v2663_v58 = vmul.f32 %v2583_v8, %v11480_v63 }
 0x3e3   : > { %v2695_v56 = vadd.f32 1e-05, %v2663_v58 }
 0x3e5   : > { %9822 = vrsqrt.f32 %v2695_v56  ;;  %vm2796_vm3 = vweird.f32 %v2695_v56 }
 0x3e8   : > { %v2586_v61 = vpop.xlane.xlu1 %2585 }
 0x3e9   : > { %v2664_v19 = vmul.f32 %v2586_v61, %v11480_v63 }
 0x3eb   : > { %v9823_v22 = vpop.eup %9822  ;;  %v2696_v42 = vadd.f32 1e-05, %v2664_v19 }
 0x3ec   : > { %v2791_v6 = vmul.f32 %v9823_v22, %v2695_v56  ;;  %vm2797_vm1 = vweird.f32 %v9823_v22  ;;  %v11803_v56 = vld [vmem:[#allocation2 + $0xc0] sm:$0xff] }
 0x3ed   : > { %9824 = vrsqrt.f32 %v2696_v42  ;;  %vm2798_vm4 = vmor %vm2796_vm3, %vm2797_vm1  ;;  %v2433_v39 = vsel %vm2360_vm10, %v11803_v56, 0.0  ;;  %vm2806_vm6 = vweird.f32 %v2696_v42 }
 0x3ee   : > { %v2792_v29 = vmul.f32 %v9823_v22, %v2791_v6 }
 0x3f0   : > { %v2793_v3 = vmul.f32 0.5, %v2792_v29  ;;  %v2595_v23 = vpop.xlane.xlu0 %2594  ;;  %v2408_v1 = vpop.xlane.xlu1 %2407  ;;  %v3116_v29 = vadd.f32 %v11634_v52, %v3081_v55 }
 0x3f1   : > { %v2589_v0 = vpop.xlane.xlu2 %2588  ;;  %v2667_v34 = vmul.f32 %v2595_v23, %v11480_v63  ;;  %v2479_v40 = vmul.f32 %v11480_v63, %v2408_v1 }
 0x3f2   : > { %v2794_v38 = vsub.f32 1.5, %v2793_v3  ;;  %v2665_v26 = vmul.f32 %v2589_v0, %v11480_v63 }
 0x3f3   : > { %v11782_v48 = vadd.f32 1e-05, %v2667_v34  ;;  %v9825_v31 = vpop.eup %9824  ;;  %v11787_v60 = vsub.f32 %v11610_v44, %v2479_v40 }
 0x3f4   : > { %v2795_v51 = vmul.f32 %v9823_v22, %v2794_v38  ;;  %v11784_v15 = vadd.f32 1e-05, %v2665_v26  ;;  %v2801_v41 = vmul.f32 %v9825_v31, %v2696_v42  ;;  %vm2807_vm5 = vweird.f32 %v9825_v31 }
 0x3f5   : > { %9826 = vrsqrt.f32 %v11782_v48  ;;  %v2543_v12 = vmul.f32 %v11787_v60, %v11787_v60  ;;  %vm11820_vm7 = vmor %vm2806_vm6, %vm2807_vm5  ;;  %vm2836_vm11 = vweird.f32 %v11782_v48 }
 0x3f6   : > { %v2799_v45 = vsel %vm2798_vm4, %v9823_v22, %v2795_v51  ;;  %9828 = vrsqrt.f32 %v11784_v15  ;;  %v2802_v5 = vmul.f32 %v9825_v31, %v2801_v41  ;;  %vm2816_vm9 = vweird.f32 %v11784_v15 }
 0x3f7   : > { %v3047_v18 = vmul.f32 %v2799_v45, %v11565_v11  ;;  %v2605_v21 = vsel %vm2360_vm10, %v2543_v12, 0.0 }
 0x3f8   : > { %v2598_v43 = vpop.xlane.xlu0 %2597  ;;  %v2803_v47 = vmul.f32 0.5, %v2802_v5  ;;  %2606 = vadd.xlane.f32.xlu2 %v2605_v21 }
 0x3f9   : > { %v2592_v44 = vpop.xlane.xlu2 %2591  ;;  %v2411_v27 = vpop.xlane.xlu1 %2410  ;;  %v3082_v14 = vmul.f32 %v11617_v50, %v3047_v18  ;;  %v2668_v9 = vmul.f32 %v2598_v43, %v11480_v63 }
 0x3fa   : > { %v2666_v37 = vmul.f32 %v2592_v44, %v11480_v63  ;;  %v2480_v8 = vmul.f32 %v11480_v63, %v2411_v27  ;;  %v2804_v17 = vsub.f32 1.5, %v2803_v47 }
 0x3fb   : > { %v11800_v58 = vpop.eup %9826  ;;  %v3117_v11 = vadd.f32 %v11634_v52, %v3082_v14  ;;  %v11824_v0 = vadd.f32 1e-05, %v2668_v9 }
 0x3fc   : > { %v9829_v57 = vpop.eup %9828  ;;  %v11805_v61 = vadd.f32 1e-05, %v2666_v37  ;;  %v11808_v22 = vsub.f32 %v11653_v32, %v2480_v8  ;;  %v2805_v19 = vmul.f32 %v9825_v31, %v2804_v17  ;;  %v2831_v20 = vmul.f32 %v11800_v58, %v11782_v48 }
 0x3fd   : > { %v2811_v6 = vmul.f32 %v9829_v57, %v11784_v15  ;;  %v3145_v32 = vpack.c.bf16 %v3117_v11, %v3116_v29  ;;  %vm2817_vm8 = vweird.f32 %v9829_v57  ;;  %vm2837_vm12 = vweird.f32 %v11800_v58 }
 0x3fe   : > { %9830 = vrsqrt.f32 %v11805_v61  ;;  %v2544_v23 = vmul.f32 %v11808_v22, %v11808_v22  ;;  %v2809_v34 = vsel %vm11820_vm7, %v9825_v31, %v2805_v19  ;;  %v2832_v51 = vmul.f32 %v11800_v58, %v2831_v20  ;;  %vm2818_vm2 = vmor %vm2816_vm9, %vm2817_vm8  ;;  %v11857_v20 = vld [vmem:[#allocation2 + $0xd0] sm:$0xff] }
 0x3ff   : > { %v2812_v3 = vmul.f32 %v9829_v57, %v2811_v6  ;;  %9383 = vmatmul.msk.bf16.gmra.mxu0 %vm2360_vm10, %v3145_v32  ;;  %9832 = vrsqrt.f32 %v11824_v0  ;;  %v3048_v5 = vmul.f32 %v2809_v34, %v11576_v33  ;;  %vm2826_vm14 = vweird.f32 %v11805_v61  ;;  %vm11872_vm15 = vmor %vm2836_vm11, %vm2837_vm12 }
 0x400   : > { %v2420_v1 = vpop.xlane.xlu0 %2419  ;;  %2434 = vadd.xlane.f32.xlu2 %v2433_v39  ;;  %v2608_v40 = vsel %vm2360_vm10, %v2544_v23, 0.0  ;;  %v2833_v47 = vmul.f32 0.5, %v2832_v51  ;;  %v2439_v48 = vsel %vm2360_vm10, %v11857_v20, 0.0  ;;  %vm2846_vm4 = vweird.f32 %v11824_v0 }
 0x401   : > { %v2813_v2 = vmul.f32 0.5, %v2812_v3  ;;  %v2414_v26 = vpop.xlane.xlu2 %2413  ;;  %v2426_v42 = vpop.xlane.xlu1 %2425  ;;  %2609 = vadd.xlane.f32.xlu1 %v2608_v40  ;;  %v3083_v37 = vmul.f32 %v11617_v50, %v3048_v5 }
 0x402   : > { %v2481_v45 = vmul.f32 %v11480_v63, %v2414_v26  ;;  %v2485_v41 = vmul.f32 %v11480_v63, %v2426_v42  ;;  %v2834_v19 = vsub.f32 1.5, %v2833_v47 }
 0x403   : > { %v2814_v35 = vsub.f32 1.5, %v2813_v2  ;;  %v3118_v23 = vadd.f32 %v11634_v52, %v3083_v37 }
 0x404   : > { %v9831_v12 = vpop.eup %9830  ;;  %v11835_v31 = vsub.f32 %v11691_v59, %v2481_v45  ;;  %v11841_v43 = vsub.f32 %v11693_v25, %v2485_v41  ;;  %v2483_v25 = vmul.f32 %v11480_v63, %v2420_v1  ;;  %v2835_v2 = vmul.f32 %v11800_v58, %v2834_v19 }
 0x405   : > { %v2815_v18 = vmul.f32 %v9829_v57, %v2814_v35  ;;  %v2821_v21 = vmul.f32 %v9831_v12, %v11805_v61  ;;  %vm2827_vm13 = vweird.f32 %v9831_v12 }
 0x406   : > { %v2545_v44 = vmul.f32 %v11835_v31, %v11835_v31  ;;  %v2549_v59 = vmul.f32 %v11841_v43, %v11841_v43  ;;  %vm2828_vm0 = vmor %vm2826_vm14, %vm2827_vm13 }
 0x407   : > { %v2819_v27 = vsel %vm2818_vm2, %v9829_v57, %v2815_v18  ;;  %v2822_v55 = vmul.f32 %v9831_v12, %v2821_v21  ;;  %v11852_v57 = vpop.eup %9832  ;;  %v11891_v21 = vld [vmem:[#allocation2 + $0xe8] sm:$0xff] }
 0x408   : > { %v2611_v33 = vsel %vm2360_vm10, %v2545_v44, 0.0  ;;  %v2423_v14 = vpop.xlane.xlu0 %2422  ;;  %v3049_v15 = vmul.f32 %v2819_v27, %v11608_v62  ;;  %v2623_v11 = vsel %vm2360_vm10, %v2549_v59, 0.0  ;;  %v2841_v34 = vmul.f32 %v11852_v57, %v11824_v0 }
 0x409   : > { %v2823_v8 = vmul.f32 0.5, %v2822_v55  ;;  %v2417_v17 = vpop.xlane.xlu2 %2416  ;;  %2612 = vadd.xlane.f32.xlu2 %v2611_v33  ;;  %v2601_v9 = vpop.xlane.xlu1 %2600  ;;  %2624 = vadd.xlane.f32.xlu0 %v2623_v11  ;;  %v2484_v35 = vmul.f32 %v11480_v63, %v2423_v14  ;;  %v2448_v33 = vsel %vm2360_vm10, %v11891_v21, 0.0  ;;  %vm2847_vm5 = vweird.f32 %v11852_v57 }
 0x40a   : > { %v2482_v6 = vmul.f32 %v11480_v63, %v2417_v17  ;;  %v2669_v29 = vmul.f32 %v2601_v9, %v11480_v63  ;;  %v3084_v62 = vmul.f32 %v11617_v50, %v3049_v15  ;;  %v2842_v45 = vmul.f32 %v11852_v57, %v2841_v34  ;;  %vm2848_vm7 = vmor %vm2846_vm4, %vm2847_vm5 }
 0x40b   : > { %v2824_v39 = vsub.f32 1.5, %v2823_v8  ;;  %v11895_v55 = vsub.f32 %v11710_v24, %v2484_v35 }
 0x40c   : > { %v11862_v3 = vsub.f32 %v11718_v46, %v2482_v6  ;;  %v2701_v32 = vadd.f32 1e-05, %v2669_v29  ;;  %v3119_v38 = vadd.f32 %v11634_v52, %v3084_v62  ;;  %v11877_v46 = vsub.f32 %v11687_v49, %v2483_v25 }
 0x40d   : > { %v2825_v1 = vmul.f32 %v9831_v12, %v2824_v39  ;;  %v2839_v49 = vsel %vm11872_vm15, %v11800_v58, %v2835_v2  ;;  %v2843_v47 = vmul.f32 0.5, %v2842_v45  ;;  %v2548_v24 = vmul.f32 %v11895_v55, %v11895_v55 }
 0x40e   : > { %9834 = vrsqrt.f32 %v2701_v32  ;;  %v3146_v42 = vpack.c.bf16 %v3119_v38, %v3118_v23  ;;  %v2546_v61 = vmul.f32 %v11862_v3, %v11862_v3  ;;  %v2547_v5 = vmul.f32 %v11877_v46, %v11877_v46 }
 0x40f   : > { %v2829_v40 = vsel %vm2828_vm0, %v9831_v12, %v2825_v1  ;;  %v3051_v27 = vmul.f32 %v2839_v49, %v11600_v13  ;;  %vm2856_vm1 = vweird.f32 %v2701_v32 }
 0x410   : > { %v2438_v51 = vpop.xlane.xlu0 %2437  ;;  %9384 = vmatmul.msk.bf16.gmra.mxu0 %vm2360_vm10, %v3146_v42  ;;  %v2614_v41 = vsel %vm2360_vm10, %v2546_v61, 0.0  ;;  %v3050_v12 = vmul.f32 %v2829_v40, %v11651_v28  ;;  %v2617_v58 = vsel %vm2360_vm10, %v2547_v5, 0.0  ;;  %v2844_v28 = vsub.f32 1.5, %v2843_v47 }
 0x411   : > { %2440 = vadd.xlane.f32.xlu2 %v2439_v48  ;;  %2615 = vadd.xlane.f32.xlu1 %v2614_v41  ;;  %v3086_v25 = vmul.f32 %v11617_v50, %v3051_v27  ;;  %v2489_v13 = vmul.f32 %v11480_v63, %v2438_v51 }
 0x412   : > { %v3085_v14 = vmul.f32 %v11617_v50, %v3050_v12  ;;  %v2845_v62 = vmul.f32 %v11852_v57, %v2844_v28 }
 0x413   : > { %v3121_v29 = vadd.f32 %v11634_v52, %v3086_v25  ;;  %v11919_v39 = vsub.f32 %v11739_v36, %v2489_v13 }
 0x414   : > { %v9835_v18 = vpop.eup %9834  ;;  %v3120_v9 = vadd.f32 %v11634_v52, %v3085_v14  ;;  %v2849_v36 = vsel %vm2848_vm7, %v11852_v57, %v2845_v62 }
 0x415   : > { %v2851_v44 = vmul.f32 %v9835_v18, %v2701_v32  ;;  %vm2857_vm3 = vweird.f32 %v9835_v18  ;;  %v2553_v48 = vmul.f32 %v11919_v39, %v11919_v39  ;;  %v3052_v61 = vmul.f32 %v2849_v36, %v11645_v7 }
 0x416   : > { %vm11912_vm6 = vmor %vm2856_vm1, %vm2857_vm3  ;;  %v3147_v0 = vpack.c.bf16 %v3121_v29, %v3120_v9 }
 0x417   : > { %v2852_v59 = vmul.f32 %v9835_v18, %v2851_v44  ;;  %v2635_v40 = vsel %vm2360_vm10, %v2553_v48, 0.0 }
 0x418   : > { %v2429_v15 = vpop.xlane.xlu0 %2428 }
 0x419   : > { %v2853_v37 = vmul.f32 0.5, %v2852_v59  ;;  %2618 = vadd.xlane.f32.xlu2 %v2617_v58  ;;  %v2486_v8 = vmul.f32 %v11480_v63, %v2429_v15  ;;  %2449 = vadd.xlane.f32.xlu1 %v2448_v33  ;;  %v2604_v15 = vpop.xlane.xlu1 %2603 }
 0x41a   : > { %v2670_v28 = vmul.f32 %v2604_v15, %v11480_v63 }
 0x41b   : > { %v2854_v17 = vsub.f32 1.5, %v2853_v37  ;;  %v11907_v11 = vsub.f32 %v11751_v54, %v2486_v8  ;;  %v2620_v54 = vsel %vm2360_vm10, %v2548_v24, 0.0 }
 0x41c   : > { %v2702_v37 = vadd.f32 1e-05, %v2670_v28 }
 0x41d   : > { %v2855_v19 = vmul.f32 %v9835_v18, %v2854_v17  ;;  %v2550_v32 = vmul.f32 %v11907_v11, %v11907_v11 }
 0x41e   : > { %9836 = vrsqrt.f32 %v2702_v37  ;;  %vm2866_vm8 = vweird.f32 %v2702_v37 }
 0x41f   : > { %v2859_v23 = vsel %vm11912_vm6, %v9835_v18, %v2855_v19  ;;  %v2626_v38 = vsel %vm2360_vm10, %v2550_v32, 0.0  ;;  %v3347_v18 = vld [vmem:[%s15689_s18] sm:$0x1] }
 0x420   : > { %v2444_v1 = vpop.xlane.xlu0 %2443  ;;  %9385 = vmatmul.msk.bf16.gmra.mxu0 %vm2360_vm10, %v3147_v0  ;;  %2627 = vadd.xlane.f32.xlu0 %v2626_v38  ;;  %v3053_v26 = vmul.f32 %v2859_v23, %v11703_v16  ;;  %v3352_v47 = vpack.i.b16 %v3347_v18, %v3347_v18 }
 0x421   : > { %2621 = vadd.xlane.f32.xlu2 %v2620_v54  ;;  %v2491_v34 = vmul.f32 %v11480_v63, %v2444_v1  ;;  %v2432_v13 = vpop.xlane.xlu1 %2431 }
 0x422   : > { %v3088_v57 = vmul.f32 %v11617_v50, %v3053_v26  ;;  %v3354_v27 = vperm.slane %v3352_v47, 0  ;;  %v2487_v54 = vmul.f32 %v11480_v63, %v2432_v13 }
 0x423   : > { %v11933_v2 = vsub.f32 %v11757_v10, %v2491_v34  ;;  %v3087_v10 = vmul.f32 %v11617_v50, %v3052_v61 }
 0x424   : > { %v3123_v49 = vadd.f32 %v11634_v52, %v3088_v57  ;;  %v3399_v59 = vunpack.c.l.bf16 %v3354_v27  ;;  %v9837_v8 = vpop.eup %9836  ;;  %v11972_v26 = vsub.f32 %v11767_v4, %v2487_v54 }
 0x425   : > { %v2555_v42 = vmul.f32 %v11933_v2, %v11933_v2  ;;  %v3122_v7 = vadd.f32 %v11634_v52, %v3087_v10  ;;  %v2861_v25 = vmul.f32 %v9837_v8, %v2702_v37  ;;  %vm2867_vm9 = vweird.f32 %v9837_v8 }
 0x426   : > { %vm11976_vm2 = vmor %vm2866_vm8, %vm2867_vm9 }
 0x427   : > { %v2641_v51 = vsel %vm2360_vm10, %v2555_v42, 0.0  ;;  %v3148_v5 = vpack.c.bf16 %v3123_v49, %v3122_v7  ;;  %v2862_v17 = vmul.f32 %v9837_v8, %v2861_v25 }
 0x428   : > { %v2447_v45 = vpop.xlane.xlu0 %2446  ;;  %2642 = vadd.xlane.f32.xlu0 %v2641_v51 }
 0x429   : > { %2636 = vadd.xlane.f32.xlu2 %v2635_v40  ;;  %v2492_v41 = vmul.f32 %v11480_v63, %v2447_v45  ;;  %v2863_v6 = vmul.f32 0.5, %v2862_v17 }
 0x42b   : > { %v11945_v16 = vsub.f32 %v11761_v53, %v2492_v41  ;;  %v3348_v53 = vld [vmem:[%s15689_s18 + $0x1] sm:$0x1]  ;;  %v2864_v62 = vsub.f32 1.5, %v2863_v6  ;;  %v2551_v41 = vmul.f32 %v11972_v26, %v11972_v26 }
 0x42c   : > { %v3356_v44 = vpack.i.b16 %v3348_v53, %v3348_v53 }
 0x42d   : > { %v2556_v35 = vmul.f32 %v11945_v16, %v11945_v16  ;;  %v2865_v48 = vmul.f32 %v9837_v8, %v2864_v62  ;;  %v2629_v18 = vsel %vm2360_vm10, %v2551_v41, 0.0  ;;  %v12021_v41 = vld [vmem:[#allocation2 + $0xf8] sm:$0xff] }
 0x42e   : > { %v3358_v58 = vperm.slane %v3356_v44, 0 }
 0x42f   : > { %v2644_v12 = vsel %vm2360_vm10, %v2556_v35, 0.0  ;;  %v2869_v45 = vsel %vm11976_vm2, %v9837_v8, %v2865_v48  ;;  %v11993_v8 = vld [vmem:[#allocation2 + $0xf0] sm:$0xff] }
 0x430   : > { %9386 = vmatmul.msk.bf16.gmra.mxu0 %vm2360_vm10, %v3148_v5  ;;  %2645 = vadd.xlane.f32.xlu0 %v2644_v12  ;;  %v3400_v33 = vunpack.c.l.bf16 %v3358_v58  ;;  %v3054_v5 = vmul.f32 %v2869_v45, %v11732_v30  ;;  %v2451_v62 = vsel %vm2360_vm10, %v11993_v8, 0.0 }
 0x432   : > { %v11959_v14 = vpack.i.bf16 %v3400_v33, %v3399_v59  ;;  %v3089_v58 = vmul.f32 %v11617_v50, %v3054_v5 }
 0x434   : > { %v3124_v6 = vadd.f32 %v11634_v52, %v3089_v58 }
 0x444   : > { %9783 = vrot.lane.b32.xlu0 %v11959_v14, %s10222_s15 }
 0x46b   : > { %v2607_v24 = vpop.xlane.xlu2 %2606 }
 0x46c   : > { %v2671_v9 = vmul.f32 %v2607_v24, %v11480_v63 }
 0x46e   : > { %v2703_v19 = vadd.f32 1e-05, %v2671_v9 }
 0x470   : > { %9838 = vrsqrt.f32 %v2703_v19  ;;  %vm2876_vm12 = vweird.f32 %v2703_v19 }
 0x473   : > { %v2435_v29 = vpop.xlane.xlu2 %2434 }
 0x474   : > { %v2488_v32 = vmul.f32 %v11480_v63, %v2435_v29  ;;  %v2610_v0 = vpop.xlane.xlu1 %2609 }
 0x475   : > { %v2672_v23 = vmul.f32 %v2610_v0, %v11480_v63 }
 0x476   : > { %v9839_v38 = vpop.eup %9838  ;;  %v11969_v1 = vsub.f32 %v11803_v56, %v2488_v32 }
 0x477   : > { %v2871_v34 = vmul.f32 %v9839_v38, %v2703_v19  ;;  %v2704_v36 = vadd.f32 1e-05, %v2672_v23  ;;  %vm2877_vm11 = vweird.f32 %v9839_v38 }
 0x478   : > { %v2552_v42 = vmul.f32 %v11969_v1, %v11969_v1  ;;  %vm2878_vm13 = vmor %vm2876_vm12, %vm2877_vm11 }
 0x479   : > { %v2872_v40 = vmul.f32 %v9839_v38, %v2871_v34  ;;  %9840 = vrsqrt.f32 %v2704_v36  ;;  %vm2886_vm14 = vweird.f32 %v2704_v36 }
 0x47a   : > { %v2632_v51 = vsel %vm2360_vm10, %v2552_v42, 0.0 }
 0x47b   : > { %v2873_v57 = vmul.f32 0.5, %v2872_v40  ;;  %2633 = vadd.xlane.f32.xlu1 %v2632_v51 }
 0x47c   : > { %v2613_v56 = vpop.xlane.xlu2 %2612  ;;  %v2625_v33 = vpop.xlane.xlu0 %2624 }
 0x47d   : > { %v2673_v4 = vmul.f32 %v2613_v56, %v11480_v63  ;;  %v2874_v10 = vsub.f32 1.5, %v2873_v57  ;;  %v2677_v9 = vmul.f32 %v2625_v33, %v11480_v63 }
 0x47f   : > { %v2705_v49 = vadd.f32 1e-05, %v2673_v4  ;;  %v9841_v7 = vpop.eup %9840  ;;  %v2875_v35 = vmul.f32 %v9839_v38, %v2874_v10 }
 0x480   : > { %v2881_v12 = vmul.f32 %v9841_v7, %v2704_v36  ;;  %vm2887_vm15 = vweird.f32 %v9841_v7 }
 0x481   : > { %9842 = vrsqrt.f32 %v2705_v49  ;;  %v2879_v53 = vsel %vm2878_vm13, %v9839_v38, %v2875_v35  ;;  %vm12003_vm0 = vmor %vm2886_vm14, %vm2887_vm15  ;;  %v12009_v38 = vadd.f32 1e-05, %v2677_v9  ;;  %vm2896_vm3 = vweird.f32 %v2705_v49  ;;  %v3350_v9 = vld [vmem:[%s15689_s18 + $0x3] sm:$0x1] }
 0x482   : > { %v2882_v47 = vmul.f32 %v9841_v7, %v2881_v12  ;;  %v3055_v44 = vmul.f32 %v2879_v53, %v11787_v60  ;;  %v2454_v12 = vsel %vm2360_vm10, %v12021_v41, 0.0 }
 0x483   : > { %2630 = vadd.xlane.f32.xlu1 %v2629_v18  ;;  %vm2936_vm13 = vweird.f32 %v12009_v38 }
 0x484   : > { %v2441_v27 = vpop.xlane.xlu2 %2440  ;;  %v2883_v59 = vmul.f32 0.5, %v2882_v47  ;;  %v2616_v28 = vpop.xlane.xlu1 %2615  ;;  %v3090_v30 = vmul.f32 %v11617_v50, %v3055_v44 }
 0x485   : > { %v2490_v15 = vmul.f32 %v11480_v63, %v2441_v27  ;;  %v2674_v37 = vmul.f32 %v2616_v28, %v11480_v63 }
 0x486   : > { %v2884_v13 = vsub.f32 1.5, %v2883_v59  ;;  %v3125_v24 = vadd.f32 %v11634_v52, %v3090_v30 }
 0x487   : > { %v9843_v25 = vpop.eup %9842  ;;  %v11996_v60 = vsub.f32 %v11857_v20, %v2490_v15  ;;  %v2706_v19 = vadd.f32 1e-05, %v2674_v37 }
 0x488   : > { %v2891_v17 = vmul.f32 %v9843_v25, %v2705_v49  ;;  %v2885_v29 = vmul.f32 %v9841_v7, %v2884_v13  ;;  %v3149_v20 = vpack.c.bf16 %v3125_v24, %v3124_v6  ;;  %vm2897_vm1 = vweird.f32 %v9843_v25  ;;  %v3349_v24 = vld [vmem:[%s15689_s18 + $0x2] sm:$0x1] }
 0x489   : > { %9844 = vrsqrt.f32 %v2706_v19  ;;  %v2554_v0 = vmul.f32 %v11996_v60, %v11996_v60  ;;  %vm2898_vm4 = vmor %vm2896_vm3, %vm2897_vm1  ;;  %vm2906_vm5 = vweird.f32 %v2706_v19 }
 0x48a   : > { %v2892_v32 = vmul.f32 %v9843_v25, %v2891_v17  ;;  %9387 = vmatmul.msk.bf16.gmra.mxu0 %vm2360_vm10, %v3149_v20  ;;  %v2889_v36 = vsel %vm12003_vm0, %v9841_v7, %v2885_v29  ;;  %9846 = vrsqrt.f32 %v12009_v38  ;;  %v3364_v20 = vpack.i.b16 %v3350_v9, %v3350_v9 }
 0x48b   : > { %2452 = vadd.xlane.f32.xlu1 %v2451_v62  ;;  %v2638_v61 = vsel %vm2360_vm10, %v2554_v0, 0.0  ;;  %v3056_v10 = vmul.f32 %v2889_v36, %v11808_v22  ;;  %v3360_v62 = vpack.i.b16 %v3349_v24, %v3349_v24 }
 0x48c   : > { %v2893_v23 = vmul.f32 0.5, %v2892_v32  ;;  %v2619_v34 = vpop.xlane.xlu2 %2618  ;;  %v2450_v48 = vpop.xlane.xlu1 %2449  ;;  %2639 = vadd.xlane.f32.xlu2 %v2638_v61 }
 0x48d   : > { %v2675_v42 = vmul.f32 %v2619_v34, %v11480_v63  ;;  %v2493_v51 = vmul.f32 %v11480_v63, %v2450_v48  ;;  %v3091_v47 = vmul.f32 %v11617_v50, %v3056_v10 }
 0x48e   : > { %v2894_v40 = vsub.f32 1.5, %v2893_v23 }
 0x48f   : > { %v2707_v57 = vadd.f32 1e-05, %v2675_v42  ;;  %v9845_v56 = vpop.eup %9844  ;;  %v12019_v4 = vsub.f32 %v11891_v21, %v2493_v51  ;;  %v3126_v30 = vadd.f32 %v11634_v52, %v3091_v47  ;;  %v3362_v42 = vperm.slane %v3360_v62, 0 }
 0x490   : > { %v2895_v45 = vmul.f32 %v9843_v25, %v2894_v40  ;;  %v2901_v7 = vmul.f32 %v9845_v56, %v2706_v19  ;;  %v12033_v58 = vpop.eup %9846  ;;  %vm2907_vm6 = vweird.f32 %v9845_v56  ;;  %v3366_v51 = vperm.slane %v3364_v20, 0 }
 0x491   : > { %9848 = vrsqrt.f32 %v2707_v57  ;;  %v2557_v5 = vmul.f32 %v12019_v4, %v12019_v4  ;;  %v2931_v37 = vmul.f32 %v12033_v58, %v12009_v38  ;;  %vm12042_vm7 = vmor %vm2906_vm5, %vm2907_vm6  ;;  %vm2916_vm8 = vweird.f32 %v2707_v57 }
 0x492   : > { %v2899_v35 = vsel %vm2898_vm4, %v9843_v25, %v2895_v45  ;;  %v2902_v49 = vmul.f32 %v9845_v56, %v2901_v7  ;;  %v12058_v7 = vld [vmem:[%s10386_s29] ss:$0 sm:$0xff]  ;;  %vm2937_vm14 = vweird.f32 %v12033_v58  ;;  %s10223_s29 = smov 96  }
 0x493   : > { %v3057_v18 = vmul.f32 %v2899_v35, %v11835_v31  ;;  %v2647_v21 = vsel %vm2360_vm10, %v2557_v5, 0.0  ;;  %v12049_v6 = vpop.xlane.xlu0 %2627  ;;  %v2932_v29 = vmul.f32 %v12033_v58, %v2931_v37  ;;  %v3401_v5 = vunpack.c.l.bf16 %v3362_v42  ;;  %vm2938_vm0 = vmor %vm2936_vm13, %vm2937_vm14 }
 0x494   : > { %v2622_v53 = vpop.xlane.xlu2 %2621  ;;  %v2903_v44 = vmul.f32 0.5, %v2902_v49  ;;  %2648 = vadd.xlane.f32.xlu1 %v2647_v21  ;;  %2455 = vadd.xlane.f32.xlu2 %v2454_v12  ;;  %v3402_v12 = vunpack.c.l.bf16 %v3366_v51 }
 0x495   : > { %v2676_v22 = vmul.f32 %v2622_v53, %v11480_v63  ;;  %v3092_v27 = vmul.f32 %v11617_v50, %v3057_v18  ;;  %v2933_v36 = vmul.f32 0.5, %v2932_v29 }
 0x496   : > { %v2904_v33 = vsub.f32 1.5, %v2903_v44  ;;  %v12067_v47 = vpack.i.bf16 %v3402_v12, %v3401_v5 }
 0x497   : > { %v9849_v59 = vpop.eup %9848  ;;  %v2708_v15 = vadd.f32 1e-05, %v2676_v22  ;;  %v3127_v28 = vadd.f32 %v11634_v52, %v3092_v27  ;;  %v2934_v10 = vsub.f32 1.5, %v2933_v36  ;;  %v12070_v27 = vld [vmem:[%s10406_s11] ss:$0 sm:$0xff]  ;;  %v2678_v36 = vmul.f32 %v12049_v6, %v11480_v63 }
 0x498   : > { %v2911_v31 = vmul.f32 %v9849_v59, %v2707_v57  ;;  %v2905_v25 = vmul.f32 %v9845_v56, %v2904_v33  ;;  %vm2917_vm9 = vweird.f32 %v9849_v59 }
 0x499   : > { %9850 = vrsqrt.f32 %v2708_v15  ;;  %v3150_v50 = vpack.c.bf16 %v3127_v28, %v3126_v30  ;;  %vm2918_vm2 = vmor %vm2916_vm8, %vm2917_vm9  ;;  %vm2926_vm11 = vweird.f32 %v2708_v15  ;;  %v2935_v53 = vmul.f32 %v12033_v58, %v2934_v10 }
 0x49a   : > { %v2912_v13 = vmul.f32 %v9849_v59, %v2911_v31  ;;  %v2909_v54 = vsel %vm12042_vm7, %v9845_v56, %v2905_v25  ;;  %v12084_v25 = vld [vmem:[%s15674_s4] ss:$0 sm:$0xff] }
 0x49b   : > { %9388 = vmatmul.msk.bf16.gmra.mxu0 %vm2360_vm10, %v3150_v50  ;;  %v3058_v48 = vmul.f32 %v2909_v54, %v11862_v3  ;;  %v2643_v3 = vpop.xlane.xlu0 %2642  ;;  %v2939_v38 = vsel %vm2938_vm0, %v12033_v58, %v2935_v53 }
 0x49c   : > { %v2913_v19 = vmul.f32 0.5, %v2912_v13  ;;  %v3061_v28 = vmul.f32 %v2939_v38, %v11841_v43  ;;  %v2683_v42 = vmul.f32 %v2643_v3, %v11480_v63 }
 0x49d   : > { %v3093_v56 = vmul.f32 %v12058_v7, %v3058_v48  ;;  %v2710_v48 = vadd.f32 1e-05, %v2678_v36 }
 0x49e   : > { %v2914_v32 = vsub.f32 1.5, %v2913_v19  ;;  %v3096_v37 = vmul.f32 %v12058_v7, %v3061_v28  ;;  %v12105_v51 = vadd.f32 1e-05, %v2683_v42 }
 0x49f   : > { %v9851_v0 = vpop.eup %9850  ;;  %v3128_v21 = vadd.f32 %v11634_v52, %v3093_v56  ;;  %vm2946_vm5 = vweird.f32 %v2710_v48 }
 0x4a0   : > { %v2915_v23 = vmul.f32 %v9849_v59, %v2914_v32  ;;  %v2921_v34 = vmul.f32 %v9851_v0, %v2708_v15  ;;  %vm2927_vm12 = vweird.f32 %v9851_v0  ;;  %v3131_v43 = vadd.f32 %v12084_v25, %v3096_v37 }
 0x4a1   : > { %vm2928_vm15 = vmor %vm2926_vm11, %vm2927_vm12  ;;  %vm2996_vm11 = vweird.f32 %v12105_v51 }
 0x4a2   : > { %v2919_v61 = vsel %vm2918_vm2, %v9849_v59, %v2915_v23  ;;  %v2922_v40 = vmul.f32 %v9851_v0, %v2921_v34  ;;  %v3235_v59 = vpop.f32.mrf.mxu0 }
 0x4a3   : > { %v3059_v57 = vmul.f32 %v2919_v61, %v11877_v46  ;;  %v2646_v33 = vpop.xlane.xlu0 %2645  ;;  %v3236_v15 = vadd.f32 %v12070_v27, %v3235_v59 }
 0x4a4   : > { %v2923_v45 = vmul.f32 0.5, %v2922_v40 }
 0x4a5   : > { %v3094_v35 = vmul.f32 %v12058_v7, %v3059_v57  ;;  %v12080_v30 = vpack.c.bf16 %v3236_v15, %v3236_v15 }
 0x4a6   : > { %v2924_v49 = vsub.f32 1.5, %v2923_v45 }
 0x4a7   : > { %v3129_v18 = vadd.f32 %v11634_v52, %v3094_v35  ;;  %v12088_v50 = vunpack.c.l.bf16 %v12080_v30 }
 0x4a8   : > { %v2925_v46 = vmul.f32 %v9851_v0, %v2924_v49 }
 0x4a9   : > { %v3151_v44 = vpack.c.bf16 %v3129_v18, %v3128_v21  ;;  %15696 = vst [vmem:[#allocation11_spill] sm:$0xff] %v12088_v50  ;;  %v2684_v18 = vmul.f32 %v2646_v33, %v11480_v63 }
 0x4aa   : > { %v2929_v22 = vsel %vm2928_vm15, %v9851_v0, %v2925_v46  ;;  %v2637_v0 = vpop.xlane.xlu2 %2636 }
 0x4ab   : > { %9389 = vmatmul.msk.bf16.gmra.mxu0 %vm2360_vm10, %v3151_v44  ;;  %v3060_v52 = vmul.f32 %v2929_v22, %v11895_v55  ;;  %v2681_v23 = vmul.f32 %v2637_v0, %v11480_v63  ;;  %v3237_v22 = vpop.f32.mrf.mxu0  ;;  %v12119_v15 = vadd.f32 1e-05, %v2684_v18 }
 0x4ac   : > { %9778 = vrot.lane.b32.xlu2 %v12067_v47, %s10222_s15  ;;  %v3238_v42 = vadd.f32 %v12070_v27, %v3237_v22 }
 0x4ad   : > { %v3095_v31 = vmul.f32 %v12058_v7, %v3060_v52  ;;  %v2713_v34 = vadd.f32 1e-05, %v2681_v23 }
 0x4af   : > { %v3130_v58 = vadd.f32 %v12084_v25, %v3095_v31  ;;  %9852 = vrsqrt.f32 %v2713_v34  ;;  %vm2976_vm1 = vweird.f32 %v2713_v34 }
 0x4b0   : > { %9854 = vrsqrt.f32 %v2710_v48 }
 0x4b1   : > { %v3152_v17 = vpack.c.bf16 %v3131_v43, %v3130_v58  ;;  %9856 = vrsqrt.f32 %v12105_v51 }
 0x4b5   : > { %v9853_v61 = vpop.eup %9852 }
 0x4b6   : > { %v9784_v13 = vpop.permute.xlu0 %9783  ;;  %v2971_v40 = vmul.f32 %v9853_v61, %v2713_v34  ;;  %v12108_v10 = vpop.eup %9854  ;;  %vm2977_vm3 = vweird.f32 %v9853_v61 }
 0x4b7   : > { %v12090_v55 = vunpack.i.h.bf16 %v9784_v13  ;;  %v12092_v24 = vunpack.i.l.bf16 %v9784_v13  ;;  %v2941_v6 = vmul.f32 %v12108_v10, %v2710_v48  ;;  %v12112_v49 = vpop.eup %9856  ;;  %vm12121_vm4 = vmor %vm2976_vm1, %vm2977_vm3  ;;  %vm2947_vm6 = vweird.f32 %v12108_v10 }
 0x4b8   : > { %v2972_v57 = vmul.f32 %v9853_v61, %v2971_v40  ;;  %v2991_v21 = vmul.f32 %v12112_v49, %v12105_v51  ;;  %vm12137_vm8 = vmor %vm2946_vm5, %vm2947_vm6  ;;  %vm2997_vm12 = vweird.f32 %v12112_v49  ;;  %vm3006_vm1 = vweird.f32 %v12119_v15 }
 0x4b9   : > { %15697 = vst [vmem:[#allocation12_spill] sm:$0xff] %v12090_v55  ;;  %v3419_v9 = vmul.f32 %v12092_v24, %v12088_v50  ;;  %v3420_v19 = vmul.f32 %v12090_v55, %v12088_v50  ;;  %v2942_v3 = vmul.f32 %v12108_v10, %v2941_v6  ;;  %vm12166_vm15 = vmor %vm2996_vm11, %vm2997_vm12 }
 0x4ba   : > { %15698 = vst [vmem:[#allocation13_spill] sm:$0xff] %v12092_v24  ;;  %v2973_v5 = vmul.f32 0.5, %v2972_v57  ;;  %v2992_v33 = vmul.f32 %v12112_v49, %v2991_v21 }
 0x4bb   : > { %9390 = vmatmul.msk.bf16.gmra.mxu0 %vm2360_vm10, %v3152_v17  ;;  %v3547_v29 = vpack.c.bf16 %v3419_v9, %v3419_v9  ;;  %v3548_v62 = vpack.c.bf16 %v3420_v19, %v3420_v19  ;;  %v2943_v38 = vmul.f32 0.5, %v2942_v3 }
 0x4bc   : > { %v2974_v12 = vsub.f32 1.5, %v2973_v5  ;;  %v2993_v9 = vmul.f32 0.5, %v2992_v33  ;;  %v12179_v33 = vpack.c.bf16 %v3238_v42, %v3238_v42 }
 0x4bd   : > { %v3951_v54 = vunpack.c.l.b16 %v3547_v29  ;;  %v3952_v32 = vunpack.c.l.b16 %v3548_v62  ;;  %v2944_v58 = vsub.f32 1.5, %v2943_v38 }
 0x4be   : > { %v2975_v52 = vmul.f32 %v9853_v61, %v2974_v12  ;;  %v2994_v40 = vsub.f32 1.5, %v2993_v9  ;;  %v12207_v42 = vunpack.c.l.bf16 %v12179_v33 }
 0x4bf   : > { %v3955_v20 = vpack.c.b16 %v3952_v32, %v3951_v54  ;;  %v2945_v23 = vmul.f32 %v12108_v10, %v2944_v58 }
 0x4c0   : > { %v2979_v13 = vsel %vm12121_vm4, %v9853_v61, %v2975_v52  ;;  %v3240_v61 = vpop.f32.mrf.mxu0  ;;  %v2995_v18 = vmul.f32 %v12112_v49, %v2994_v40  ;;  %15707 = vst [vmem:[#allocation14_spill] sm:$0xff] %v12207_v42 }
 0x4c1   : > { %3957 = vrot.lane.b32.xlu0 %v3955_v20, %s10223_s29  ;;  %v3065_v0 = vmul.f32 %v2979_v13, %v11919_v39  ;;  %v2949_v3 = vsel %vm12137_vm8, %v12108_v10, %v2945_v23 }
 0x4c2   : > { %v3062_v51 = vmul.f32 %v2949_v3, %v11907_v11 }
 0x4c3   : > { %v3100_v5 = vmul.f32 %v12058_v7, %v3065_v0 }
 0x4c4   : > { %v3097_v0 = vmul.f32 %v12058_v7, %v3062_v51 }
 0x4c5   : > { %v3135_v31 = vadd.f32 %v12084_v25, %v3100_v5 }
 0x4ee   : > { %v2634_v45 = vpop.xlane.xlu1 %2633 }
 0x4ef   : > { %v2680_v56 = vmul.f32 %v2634_v45, %v11480_v63 }
 0x4f1   : > { %v2712_v35 = vadd.f32 1e-05, %v2680_v56 }
 0x4f3   : > { %9858 = vrsqrt.f32 %v2712_v35  ;;  %vm2966_vm9 = vweird.f32 %v2712_v35 }
 0x4f6   : > { %v2631_v46 = vpop.xlane.xlu1 %2630 }
 0x4f7   : > { %v2679_v53 = vmul.f32 %v2631_v46, %v11480_v63 }
 0x4f9   : > { %v9859_v44 = vpop.eup %9858  ;;  %v2711_v59 = vadd.f32 1e-05, %v2679_v53 }
 0x4fa   : > { %v2961_v28 = vmul.f32 %v9859_v44, %v2712_v35  ;;  %vm2967_vm7 = vweird.f32 %v9859_v44 }
 0x4fb   : > { %9860 = vrsqrt.f32 %v2711_v59  ;;  %vm2968_vm2 = vmor %vm2966_vm9, %vm2967_vm7  ;;  %vm2956_vm13 = vweird.f32 %v2711_v59 }
 0x4fc   : > { %v2962_v37 = vmul.f32 %v9859_v44, %v2961_v28  ;;  %9862 = vrsqrt.f32 %v12119_v15 }
 0x4fe   : > { %v2963_v43 = vmul.f32 0.5, %v2962_v37  ;;  %v2453_v17 = vpop.xlane.xlu1 %2452 }
 0x4ff   : > { %v2494_v19 = vmul.f32 %v11480_v63, %v2453_v17  ;;  %v2640_v62 = vpop.xlane.xlu2 %2639 }
 0x500   : > { %v2964_v29 = vsub.f32 1.5, %v2963_v43  ;;  %v2682_v20 = vmul.f32 %v2640_v62, %v11480_v63  ;;  %v2999_v43 = vsel %vm12166_vm15, %v12112_v49, %v2995_v18 }
 0x501   : > { %v9861_v54 = vpop.eup %9860  ;;  %v12132_v32 = vsub.f32 %v11993_v8, %v2494_v19  ;;  %v3067_v34 = vmul.f32 %v2999_v43, %v11933_v2  ;;  %v3132_v2 = vadd.f32 %v12084_v25, %v3097_v0 }
 0x502   : > { %v2965_v36 = vmul.f32 %v9859_v44, %v2964_v29  ;;  %v2951_v48 = vmul.f32 %v9861_v54, %v2711_v59  ;;  %v12142_v8 = vadd.f32 1e-05, %v2682_v20  ;;  %v12146_v39 = vpop.eup %9862  ;;  %vm2957_vm14 = vweird.f32 %v9861_v54  ;;  %v12196_v20 = vpop.f32.mrf.mxu0 }
 0x503   : > { %v2558_v57 = vmul.f32 %v12132_v32, %v12132_v32  ;;  %v3001_v46 = vmul.f32 %v12146_v39, %v12119_v15  ;;  %vm12171_vm0 = vmor %vm2956_vm13, %vm2957_vm14  ;;  %vm3007_vm3 = vweird.f32 %v12146_v39  ;;  %v3102_v5 = vmul.f32 %v12058_v7, %v3067_v34 }
 0x504   : > { %v2969_v45 = vsel %vm2968_vm2, %v9859_v44, %v2965_v36  ;;  %v2952_v56 = vmul.f32 %v9861_v54, %v2951_v48  ;;  %9864 = vrsqrt.f32 %v12142_v8  ;;  %vm2986_vm5 = vweird.f32 %v12142_v8  ;;  %vm12264_vm2 = vmor %vm3006_vm1, %vm3007_vm3 }
 0x505   : > { %v2650_v35 = vsel %vm2360_vm10, %v2558_v57, 0.0  ;;  %v3064_v6 = vmul.f32 %v2969_v45, %v11969_v1  ;;  %v3241_v1 = vadd.f32 %v12070_v27, %v3240_v61  ;;  %v3002_v17 = vmul.f32 %v12146_v39, %v3001_v46 }
 0x506   : > { %v2953_v12 = vmul.f32 0.5, %v2952_v56  ;;  %2651 = vadd.xlane.f32.xlu1 %v2650_v35 }
 0x507   : > { %v2649_v21 = vpop.xlane.xlu1 %2648  ;;  %v3099_v53 = vmul.f32 %v12058_v7, %v3064_v6  ;;  %v2456_v59 = vpop.xlane.xlu2 %2455  ;;  %v12190_v29 = vpack.c.bf16 %v3241_v1, %v3241_v1  ;;  %v3003_v36 = vmul.f32 0.5, %v3002_v17 }
 0x508   : > { %v2954_v44 = vsub.f32 1.5, %v2953_v12  ;;  %v2685_v22 = vmul.f32 %v2649_v21, %v11480_v63  ;;  %v2495_v52 = vmul.f32 %v11480_v63, %v2456_v59 }
 0x509   : > { %v3134_v28 = vadd.f32 %v12084_v25, %v3099_v53  ;;  %v12210_v61 = vunpack.c.l.bf16 %v12190_v29  ;;  %v3004_v3 = vsub.f32 1.5, %v3003_v36 }
 0x50a   : > { %v2955_v37 = vmul.f32 %v9861_v54, %v2954_v44  ;;  %v12181_v58 = vadd.f32 1e-05, %v2685_v22  ;;  %v9865_v13 = vpop.eup %9864  ;;  %v12188_v9 = vsub.f32 %v12021_v41, %v2495_v52  ;;  %v3423_v44 = vmul.f32 %v12092_v24, %v12207_v42 }
 0x50b   : > { %v3154_v19 = vpack.c.bf16 %v3135_v31, %v3134_v28  ;;  %v2981_v62 = vmul.f32 %v9865_v13, %v12142_v8  ;;  %15708 = vst [vmem:[#allocation15_spill] sm:$0xff] %v12210_v61  ;;  %vm2987_vm4 = vweird.f32 %v9865_v13  ;;  %v3424_v22 = vmul.f32 %v12090_v55, %v12207_v42  ;;  %v3245_v31 = vpop.f32.mrf.mxu0 }
 0x50c   : > { %v2959_v11 = vsel %vm12171_vm0, %v9861_v54, %v2955_v37  ;;  %9866 = vrsqrt.f32 %v12181_v58  ;;  %v2559_v49 = vmul.f32 %v12188_v9, %v12188_v9  ;;  %vm2988_vm6 = vmor %vm2986_vm5, %vm2987_vm4  ;;  %vm3016_vm7 = vweird.f32 %v12181_v58 }
 0x50d   : > { %9392 = vmatmul.msk.bf16.vlgmr.msra.gmra.mxu3 %vm2360_vm10, %v3154_v19  ;;  %v3063_v41 = vmul.f32 %v2959_v11, %v11972_v26  ;;  %v2982_v23 = vmul.f32 %v9865_v13, %v2981_v62  ;;  %v3552_v34 = vpack.c.bf16 %v3424_v22, %v3424_v22 }
 0x50e   : > { %v2653_v54 = vsel %vm2360_vm10, %v2559_v49, 0.0 }
 0x50f   : > { %v3098_v48 = vmul.f32 %v12058_v7, %v3063_v41  ;;  %v2983_v40 = vmul.f32 0.5, %v2982_v23  ;;  %2654 = vadd.xlane.f32.xlu1 %v2653_v54  ;;  %v9779_v57 = vpop.permute.xlu2 %9778  ;;  %v3551_v23 = vpack.c.bf16 %v3423_v44, %v3423_v44 }
 0x510   : > { %v12212_v26 = vunpack.i.h.bf16 %v9779_v57  ;;  %v12214_v45 = vunpack.i.l.bf16 %v9779_v57 }
 0x511   : > { %v3133_v56 = vadd.f32 %v12084_v25, %v3098_v48  ;;  %v2984_v6 = vsub.f32 1.5, %v2983_v40 }
 0x512   : > { %v12218_v35 = vpop.eup %9866  ;;  %v3425_v21 = vmul.f32 %v12214_v45, %v12207_v42  ;;  %v3426_v53 = vmul.f32 %v12212_v26, %v12207_v42  ;;  %v3429_v1 = vmul.f32 %v12214_v45, %v12210_v61  ;;  %v3430_v8 = vmul.f32 %v12212_v26, %v12210_v61 }
 0x513   : > { %v3011_v12 = vmul.f32 %v12218_v35, %v12181_v58  ;;  %v3153_v18 = vpack.c.bf16 %v3133_v56, %v3132_v2  ;;  %v2985_v46 = vmul.f32 %v9865_v13, %v2984_v6  ;;  %vm3017_vm8 = vweird.f32 %v12218_v35 }
 0x514   : > { %v3553_v38 = vpack.c.bf16 %v3425_v21, %v3425_v21  ;;  %v3554_v52 = vpack.c.bf16 %v3426_v53, %v3426_v53  ;;  %v3557_v28 = vpack.c.bf16 %v3429_v1, %v3429_v1  ;;  %v3558_v37 = vpack.c.bf16 %v3430_v8, %v3430_v8  ;;  %vm12250_vm9 = vmor %vm3016_vm7, %vm3017_vm8 }
 0x515   : > { %v3012_v10 = vmul.f32 %v12218_v35, %v3011_v12  ;;  %9391 = vmatmul.msk.bf16.gmra.mxu0 %vm2360_vm10, %v3153_v18  ;;  %v2989_v59 = vsel %vm2988_vm6, %v9865_v13, %v2985_v46  ;;  %v3137_v13 = vadd.f32 %v12084_v25, %v3102_v5  ;;  %v3421_v36 = vmul.f32 %v12214_v45, %v12088_v50 }
 0x516   : > { %v3066_v43 = vmul.f32 %v2989_v59, %v11996_v60  ;;  %v3989_v17 = vunpack.c.l.b16 %v3553_v38  ;;  %v3990_v19 = vunpack.c.l.b16 %v3554_v52  ;;  %v4025_v11 = vunpack.c.l.b16 %v3557_v28 }
 0x517   : > { %v3013_v51 = vmul.f32 0.5, %v3012_v10  ;;  %v4026_v49 = vunpack.c.l.b16 %v3558_v37  ;;  %v3422_v57 = vmul.f32 %v12212_v26, %v12088_v50  ;;  %v3246_v2 = vadd.f32 %v12070_v27, %v3245_v31  ;;  %v3247_v10 = vpop.f32.mrf.mxu0 }
 0x518   : > { %v3101_v41 = vmul.f32 %v12058_v7, %v3066_v43  ;;  %v3992_v0 = vpack.c.b16 %v3990_v19, %v3989_v17  ;;  %v3005_v56 = vmul.f32 %v12146_v39, %v3004_v3  ;;  %v3427_v5 = vmul.f32 %v12092_v24, %v12210_v61 }
 0x519   : > { %v3014_v62 = vsub.f32 1.5, %v3013_v51  ;;  %v4028_v48 = vpack.c.b16 %v4026_v49, %v4025_v11  ;;  %v3987_v12 = vunpack.c.l.b16 %v3551_v23  ;;  %v3988_v18 = vunpack.c.l.b16 %v3552_v34 }
 0x51a   : > { %v3136_v40 = vadd.f32 %v12084_v25, %v3101_v41  ;;  %3995 = vrot.lane.b32.xlu2 %v3992_v0, %s10223_s29  ;;  %v3428_v46 = vmul.f32 %v12090_v55, %v12210_v61  ;;  %v3549_v15 = vpack.c.bf16 %v3421_v36, %v3421_v36  ;;  %v3550_v21 = vpack.c.bf16 %v3422_v57, %v3422_v57 }
 0x51b   : > { %v3015_v54 = vmul.f32 %v12218_v35, %v3014_v62  ;;  %4031 = vrot.lane.b32.xlu0 %v4028_v48, %s10223_s29  ;;  %v12277_v53 = vpack.c.bf16 %v3246_v2, %v3246_v2  ;;  %v3009_v1 = vsel %vm12264_vm2, %v12146_v39, %v3005_v56  ;;  %v3991_v44 = vpack.c.b16 %v3988_v18, %v3987_v12 }
 0x51c   : > { %v3155_v6 = vpack.c.bf16 %v3137_v13, %v3136_v40  ;;  %v3556_v22 = vpack.c.bf16 %v3428_v46, %v3428_v46  ;;  %v3953_v59 = vunpack.c.l.b16 %v3549_v15  ;;  %v3954_v38 = vunpack.c.l.b16 %v3550_v21 }
 0x51d   : > { %v3019_v3 = vsel %vm12250_vm9, %v12218_v35, %v3015_v54  ;;  %v3555_v35 = vpack.c.bf16 %v3427_v5, %v3427_v5  ;;  %v3068_v52 = vmul.f32 %v3009_v1, %v11945_v16  ;;  %v12285_v28 = vunpack.c.l.bf16 %v12277_v53 }
 0x51e   : > { %9393 = vmatmul.msk.bf16.gmra.mxu3 %vm2360_vm10, %v3155_v6  ;;  %v3069_v8 = vmul.f32 %v3019_v3, %v12019_v4  ;;  %v3248_v31 = vadd.f32 %v12070_v27, %v3247_v10  ;;  %v4024_v37 = vunpack.c.l.b16 %v3556_v22  ;;  %v3956_v17 = vpack.c.b16 %v3954_v38, %v3953_v59 }
 0x51f   : > { %15713 = vst [vmem:[#allocation16_spill] sm:$0xff] %v12285_v28  ;;  %v4023_v39 = vunpack.c.l.b16 %v3555_v35  ;;  %v3437_v4 = vmul.f32 %v12214_v45, %v12285_v28  ;;  %v3438_v43 = vmul.f32 %v12212_v26, %v12285_v28  ;;  %v3103_v16 = vmul.f32 %v12058_v7, %v3068_v52  ;;  %v12311_v6 = vpop.f32.mrf.mxu0 }
 0x520   : > { %v3104_v51 = vmul.f32 %v12058_v7, %v3069_v8  ;;  %v12295_v19 = vpack.c.bf16 %v3248_v31, %v3248_v31 }
 0x521   : > { %v4027_v62 = vpack.c.b16 %v4024_v37, %v4023_v39  ;;  %v3565_v49 = vpack.c.bf16 %v3437_v4, %v3437_v4  ;;  %v3566_v41 = vpack.c.bf16 %v3438_v43, %v3438_v43  ;;  %v3138_v13 = vadd.f32 %v12084_v25, %v3103_v16 }
 0x522   : > { %3993 = vrot.lane.b32.xlu2 %v3991_v44, %s10223_s29  ;;  %v3139_v11 = vadd.f32 %v12084_v25, %v3104_v51  ;;  %v12301_v0 = vunpack.c.l.bf16 %v12295_v19 }
 0x523   : > { %v4097_v34 = vunpack.c.l.b16 %v3565_v49  ;;  %v4098_v36 = vunpack.c.l.b16 %v3566_v41 }
 0x524   : > { %15714 = vst [vmem:[#allocation17_spill] sm:$0xff] %v12301_v0  ;;  %v3156_v23 = vpack.c.bf16 %v3139_v11, %v3138_v13  ;;  %v3441_v54 = vmul.f32 %v12214_v45, %v12301_v0  ;;  %v3442_v60 = vmul.f32 %v12212_v26, %v12301_v0 }
 0x525   : > { %v4100_v48 = vpack.c.b16 %v4098_v36, %v4097_v34 }
 0x526   : > { %v3569_v40 = vpack.c.bf16 %v3441_v54, %v3441_v54  ;;  %v3570_v57 = vpack.c.bf16 %v3442_v60, %v3442_v60 }
 0x527   : > { %v12313_v5 = vpop.f32.mrf.mxu0 }
 0x528   : > { %3959 = vrot.lane.b32.xlu1 %v3956_v17, %s10223_s29  ;;  %v4133_v2 = vunpack.c.l.b16 %v3569_v40  ;;  %v4134_v56 = vunpack.c.l.b16 %v3570_v57 }
 0x52a   : > { %4029 = vrot.lane.b32.xlu2 %v4027_v62, %s10223_s29  ;;  %v4136_v58 = vpack.c.b16 %v4134_v56, %v4133_v2 }
 0x52e   : > { %9394 = vmatmul.msk.bf16.gmra.mxu3 %vm2360_vm10, %v3156_v23 }
 0x52f   : > { %v12317_v21 = vpop.f32.mrf.mxu0 }
 0x532   : > { %4103 = vrot.lane.b32.xlu2 %v4100_v48, %s10223_s29 }
 0x533   : > { %v12321_v52 = vpop.permute.xlu0 %3957 }
 0x537   : > { %v12325_v51 = vpop.f32.mrf.mxu0 }
 0x53a   : > { %4139 = vrot.lane.b32.xlu2 %v4136_v58, %s10223_s29 }
 0x53f   : > { %v12336_v36 = vpop.f32.mrf.mxu0 }
 0x574   : > { %v3996_v3 = vpop.permute.xlu2 %3995 }
 0x575   : > { %v4004_v12 = vsel %vm2360_vm10, %v3996_v3, 0 }
 0x576   : > { %4012 = vmatpush.bf16.xpose.msra.mxu2 %v4004_v12 }
 0x579   : > { %v2652_v18 = vpop.xlane.xlu1 %2651 }
 0x57a   : > { %v2686_v46 = vmul.f32 %v2652_v18, %v11480_v63 }
 0x57c   : > { %v2718_v15 = vadd.f32 1e-05, %v2686_v46  ;;  %v3994_v1 = vpop.permute.xlu2 %3993 }
 0x57d   : > { %v4001_v10 = vsel %vm2360_vm10, %v3994_v1, 0 }
 0x57e   : > { %9868 = vrsqrt.f32 %v2718_v15  ;;  %4013 = vmatpush.bf16.xpose.msra.mxu2 %v4001_v10  ;;  %vm3026_vm11 = vweird.f32 %v2718_v15 }
 0x582   : > { %v2655_v8 = vpop.xlane.xlu1 %2654 }
 0x583   : > { %v2687_v35 = vmul.f32 %v2655_v8, %v11480_v63 }
 0x584   : > { %v9869_v44 = vpop.eup %9868  ;;  %v4030_v38 = vpop.permute.xlu2 %4029 }
 0x585   : > { %v3021_v22 = vmul.f32 %v9869_v44, %v2718_v15  ;;  %v2719_v59 = vadd.f32 1e-05, %v2687_v35  ;;  %9397 = vmatmul.msk.bf16.vlgmr.msra.gmra.mxu2 %vm2360_vm10, %v12179_v33  ;;  %vm3027_vm12 = vweird.f32 %v9869_v44  ;;  %v4037_v18 = vsel %vm2360_vm10, %v4030_v38, 0 }
 0x586   : > { %vm12327_vm13 = vmor %vm3026_vm11, %vm3027_vm12 }
 0x587   : > { %v3022_v31 = vmul.f32 %v9869_v44, %v3021_v22  ;;  %9870 = vrsqrt.f32 %v2719_v59  ;;  %vm3036_vm14 = vweird.f32 %v2719_v59 }
 0x589   : > { %v3023_v39 = vmul.f32 0.5, %v3022_v31 }
 0x58b   : > { %v3024_v37 = vsub.f32 1.5, %v3023_v39 }
 0x58c   : > { %v4104_v16 = vpop.permute.xlu2 %4103 }
 0x58d   : > { %v3025_v4 = vmul.f32 %v9869_v44, %v3024_v37  ;;  %v9871_v43 = vpop.eup %9870  ;;  %v4032_v62 = vpop.permute.xlu0 %4031  ;;  %v4112_v49 = vsel %vm2360_vm10, %v4104_v16, 0 }
 0x58e   : > { %v3031_v11 = vmul.f32 %v9871_v43, %v2719_v59  ;;  %v4040_v33 = vsel %vm2360_vm10, %v4032_v62, 0  ;;  %4120 = vmatpush.bf16.xpose.msrb.mxu2 %v4112_v49  ;;  %vm3037_vm15 = vweird.f32 %v9871_v43  ;;  %v12365_v37 = vpop.f32.mrf.mxu0 }
 0x58f   : > { %v3029_v13 = vsel %vm12327_vm13, %v9869_v44, %v3025_v4  ;;  %4048 = vmatpush.bf16.xpose.msrb.mxu3 %v4040_v33  ;;  %vm12344_vm0 = vmor %vm3036_vm14, %vm3037_vm15 }
 0x590   : > { %v3295_v41 = vpop.f32.mrf.mxu3  ;;  %v3032_v23 = vmul.f32 %v9871_v43, %v3031_v11  ;;  %v3070_v48 = vmul.f32 %v3029_v13, %v12132_v32 }
 0x591   : > { %v3296_v34 = vadd.f32 %v12070_v27, %v3295_v41  ;;  %v3243_v41 = vadd.f32 %v12070_v27, %v12196_v20  ;;  %v3965_v20 = vsel %vm2360_vm10, %v12321_v52, 0 }
 0x592   : > { %v3033_v54 = vmul.f32 0.5, %v3032_v23  ;;  %v3105_v15 = vmul.f32 %v12058_v7, %v3070_v48 }
 0x593   : > { %v12338_v60 = vpack.c.bf16 %v3296_v34, %v3296_v34 }
 0x594   : > { %v3034_v40 = vsub.f32 1.5, %v3033_v54  ;;  %v4140_v56 = vpop.permute.xlu2 %4139  ;;  %v3140_v16 = vadd.f32 %v12084_v25, %v3105_v15 }
 0x595   : > { %v12342_v57 = vunpack.c.l.bf16 %v12338_v60  ;;  %v4148_v3 = vsel %vm2360_vm10, %v4140_v56, 0 }
 0x596   : > { %v3035_v58 = vmul.f32 %v9871_v43, %v3034_v40  ;;  %v12383_v40 = vpack.c.bf16 %v3243_v41, %v3243_v41  ;;  %v12389_v56 = vpop.f32.mrf.mxu0 }
 0x597   : > { %15717 = vst [vmem:[#allocation18_spill] sm:$0xff] %v12342_v57  ;;  %v3517_v12 = vmul.f32 %v12214_v45, %v12342_v57  ;;  %v3518_v32 = vmul.f32 %v12212_v26, %v12342_v57  ;;  %4049 = vmatpush.bf16.xpose.msrb.mxu3 %v4037_v18  ;;  %v3515_v44 = vmul.f32 %v12092_v24, %v12342_v57 }
 0x598   : > { %v3297_v46 = vpop.f32.mrf.mxu3  ;;  %v3039_v1 = vsel %vm12344_vm0, %v9871_v43, %v3035_v58  ;;  %v3516_v59 = vmul.f32 %v12090_v55, %v12342_v57 }
 0x599   : > { %v3298_v10 = vadd.f32 %v12070_v27, %v3297_v46  ;;  %v3645_v8 = vpack.c.bf16 %v3517_v12, %v3517_v12  ;;  %v3646_v35 = vpack.c.bf16 %v3518_v32, %v3518_v32  ;;  %v3071_v22 = vmul.f32 %v3039_v1, %v12188_v9 }
 0x59a   : > { %v3960_v31 = vpop.permute.xlu1 %3959  ;;  %v3643_v11 = vpack.c.bf16 %v3515_v44, %v3515_v44  ;;  %v3644_v33 = vpack.c.bf16 %v3516_v59, %v3516_v59  ;;  %v12395_v46 = vunpack.c.l.bf16 %v12383_v40 }
 0x59b   : > { %v12363_v38 = vpack.c.bf16 %v3298_v10, %v3298_v10  ;;  %v4817_v39 = vunpack.c.l.b16 %v3645_v8  ;;  %v3968_v4 = vsel %vm2360_vm10, %v3960_v31, 0  ;;  %v4818_v43 = vunpack.c.l.b16 %v3646_v35 }
 0x59c   : > { %v3106_v17 = vmul.f32 %v12058_v7, %v3071_v22  ;;  %3976 = vmatpush.bf16.xpose.msra.mxu1 %v3968_v4  ;;  %v4815_v7 = vunpack.c.l.b16 %v3643_v11  ;;  %v4816_v34 = vunpack.c.l.b16 %v3644_v33  ;;  %15722 = vst [vmem:[#allocation21_spill] sm:$0xff] %v12395_v46  ;;  %v3431_v8 = vmul.f32 %v12092_v24, %v12395_v46 }
 0x59d   : > { %v12371_v9 = vunpack.c.l.bf16 %v12363_v38  ;;  %v4820_v62 = vpack.c.b16 %v4818_v43, %v4817_v39  ;;  %v3432_v44 = vmul.f32 %v12090_v55, %v12395_v46  ;;  %v3256_v33 = vadd.f32 %v12070_v27, %v12317_v21 }
 0x59e   : > { %v3141_v49 = vadd.f32 %v12084_v25, %v3106_v17  ;;  %v4819_v58 = vpack.c.b16 %v4816_v34, %v4815_v7  ;;  %v3559_v17 = vpack.c.bf16 %v3431_v8, %v3431_v8  ;;  %v12416_v41 = vpop.f32.mrf.mxu0  ;;  %v3439_v7 = vmul.f32 %v12092_v24, %v12301_v0 }
 0x59f   : > { %4156 = vmatpush.bf16.xpose.msra.mxu3 %v4148_v3  ;;  %15720 = vst [vmem:[#allocation19_spill] sm:$0xff] %v12371_v9  ;;  %4823 = vrot.lane.b32.xlu1 %v4820_v62, %s10223_s29  ;;  %v3521_v54 = vmul.f32 %v12214_v45, %v12371_v9  ;;  %v3522_v48 = vmul.f32 %v12212_v26, %v12371_v9 }
 0x5a0   : > { %v3157_v13 = vpack.c.bf16 %v3141_v49, %v3140_v16  ;;  %v3560_v16 = vpack.c.bf16 %v3432_v44, %v3432_v44  ;;  %v3440_v34 = vmul.f32 %v12090_v55, %v12301_v0  ;;  %v3435_v44 = vmul.f32 %v12092_v24, %v12285_v28 }
 0x5a1   : > { %v3300_v23 = vpop.f32.mrf.mxu3  ;;  %v3649_v3 = vpack.c.bf16 %v3521_v54, %v3521_v54  ;;  %v3650_v12 = vpack.c.bf16 %v3522_v48, %v3522_v48  ;;  %v3433_v48 = vmul.f32 %v12214_v45, %v12395_v46 }
 0x5a2   : > { %9395 = vmatmul.msk.bf16.gmra.mxu3 %vm2360_vm10, %v3157_v13  ;;  %v3301_v25 = vadd.f32 %v12070_v27, %v3300_v23  ;;  %v4060_v23 = vunpack.c.l.b16 %v3560_v16 }
 0x5a3   : > { %v4853_v1 = vunpack.c.l.b16 %v3649_v3  ;;  %v4854_v10 = vunpack.c.l.b16 %v3650_v12  ;;  %v3568_v3 = vpack.c.bf16 %v3440_v34, %v3440_v34  ;;  %v3251_v12 = vadd.f32 %v12070_v27, %v12311_v6 }
 0x5a4   : > { %v12387_v2 = vpack.c.bf16 %v3301_v25, %v3301_v25  ;;  %3977 = vmatpush.bf16.xpose.msra.mxu1 %v3965_v20  ;;  %v3434_v25 = vmul.f32 %v12212_v26, %v12395_v46  ;;  %v12432_v20 = vpack.c.bf16 %v3256_v33, %v3256_v33 }
 0x5a5   : > { %v4856_v43 = vpack.c.b16 %v4854_v10, %v4853_v1 }
 0x5a6   : > { %v12392_v18 = vunpack.c.l.bf16 %v12387_v2  ;;  %v3562_v1 = vpack.c.bf16 %v3434_v25, %v3434_v25  ;;  %v12437_v10 = vunpack.c.l.bf16 %v12432_v20  ;;  %v12439_v8 = vpop.f32.mrf.mxu0 }
 0x5a7   : > { %4821 = vrot.lane.b32.xlu1 %v4819_v58, %s10223_s29 }
 0x5a8   : > { %15721 = vst [vmem:[#allocation20_spill] sm:$0xff] %v12392_v18  ;;  %v3525_v32 = vmul.f32 %v12214_v45, %v12392_v18  ;;  %v3526_v52 = vmul.f32 %v12212_v26, %v12392_v18  ;;  %v3523_v59 = vmul.f32 %v12092_v24, %v12392_v18  ;;  %v3524_v31 = vmul.f32 %v12090_v55, %v12392_v18 }
 0x5a9   : > { %v12402_v15 = vpop.f32.mrf.mxu3  ;;  %15723 = vst [vmem:[#allocation22_spill] sm:$0xff] %v12437_v10  ;;  %v4062_v16 = vunpack.c.l.b16 %v3562_v1  ;;  %v3451_v25 = vmul.f32 %v12092_v24, %v12437_v10  ;;  %v3258_v18 = vadd.f32 %v12070_v27, %v12325_v51 }
 0x5aa   : > { %v3653_v35 = vpack.c.bf16 %v3525_v32, %v3525_v32  ;;  %v3654_v22 = vpack.c.bf16 %v3526_v52, %v3526_v52  ;;  %v3651_v62 = vpack.c.bf16 %v3523_v59, %v3523_v59  ;;  %v3652_v49 = vpack.c.bf16 %v3524_v31, %v3524_v31 }
 0x5ab   : > { %9396 = vmatmul.msk.bf16.vlgmr.msra.gmra.mxu1 %vm2360_vm10, %v12080_v30  ;;  %v4059_v30 = vunpack.c.l.b16 %v3559_v17  ;;  %v3561_v52 = vpack.c.bf16 %v3433_v48, %v3433_v48  ;;  %v4132_v59 = vunpack.c.l.b16 %v3568_v3  ;;  %v3453_v31 = vmul.f32 %v12214_v45, %v12437_v10 }
 0x5ac   : > { %v4889_v39 = vunpack.c.l.b16 %v3653_v35  ;;  %v4890_v4 = vunpack.c.l.b16 %v3654_v22  ;;  %v4887_v21 = vunpack.c.l.b16 %v3651_v62  ;;  %v4888_v54 = vunpack.c.l.b16 %v3652_v49 }
 0x5ad   : > { %v4063_v58 = vpack.c.b16 %v4060_v23, %v4059_v30  ;;  %v3436_v35 = vmul.f32 %v12090_v55, %v12285_v28  ;;  %v4061_v17 = vunpack.c.l.b16 %v3561_v52  ;;  %v3563_v62 = vpack.c.bf16 %v3435_v44, %v3435_v44 }
 0x5ae   : > { %v4892_v11 = vpack.c.b16 %v4890_v4, %v4889_v39  ;;  %v4891_v32 = vpack.c.b16 %v4888_v54, %v4887_v21  ;;  %v3454_v39 = vmul.f32 %v12212_v26, %v12437_v10  ;;  %v12451_v4 = vpack.c.bf16 %v3251_v12, %v3251_v12 }
 0x5af   : > { %4859 = vrot.lane.b32.xlu1 %v4856_v43, %s10223_s29  ;;  %v3564_v49 = vpack.c.bf16 %v3436_v35, %v3436_v35  ;;  %v3581_v30 = vpack.c.bf16 %v3453_v31, %v3453_v31  ;;  %v4064_v21 = vpack.c.b16 %v4062_v16, %v4061_v17  ;;  %v3253_v54 = vadd.f32 %v12070_v27, %v12313_v5 }
 0x5b0   : > { %4895 = vrot.lane.b32.xlu0 %v4892_v11, %s10223_s29  ;;  %v3582_v23 = vpack.c.bf16 %v3454_v39, %v3454_v39  ;;  %v3261_v48 = vadd.f32 %v12070_v27, %v12336_v36  ;;  %v4095_v5 = vunpack.c.l.b16 %v3563_v62  ;;  %v3579_v16 = vpack.c.bf16 %v3451_v25, %v3451_v25 }
 0x5b1   : > { %v12420_v13 = vpop.f32.mrf.mxu3  ;;  %v4096_v12 = vunpack.c.l.b16 %v3564_v49  ;;  %v4241_v36 = vunpack.c.l.b16 %v3581_v30  ;;  %v12486_v31 = vpack.c.bf16 %v3253_v54, %v3253_v54  ;;  %v3263_v54 = vadd.f32 %v12070_v27, %v12365_v37 }
 0x5b2   : > { %9398 = vmatmul.msk.bf16.vlgmr.msrb.gmra.mxu3 %vm2360_vm10, %v12190_v29  ;;  %v3567_v29 = vpack.c.bf16 %v3439_v7, %v3439_v7  ;;  %v12457_v7 = vunpack.c.l.bf16 %v12451_v4  ;;  %v4242_v52 = vunpack.c.l.b16 %v3582_v23  ;;  %v12488_v39 = vpack.c.bf16 %v3261_v48, %v3261_v48 }
 0x5b3   : > { %v12491_v63 = vunpack.c.l.bf16 %v12486_v31  ;;  %v4239_v48 = vunpack.c.l.b16 %v3579_v16 }
 0x5b4   : > { %v4131_v6 = vunpack.c.l.b16 %v3567_v29  ;;  %15725 = vst [vmem:[#allocation24_spill] sm:$0xff] %v12457_v7  ;;  %v3445_v1 = vmul.f32 %v12214_v45, %v12457_v7  ;;  %v3446_v44 = vmul.f32 %v12212_v26, %v12457_v7  ;;  %v4244_v49 = vpack.c.b16 %v4242_v52, %v4241_v36 }
 0x5b5   : > { %15727 = vst [vmem:[#allocation26_spill] sm:$0xff] %v12491_v63  ;;  %v12494_v57 = vunpack.c.l.bf16 %v12488_v39  ;;  %v3449_v36 = vmul.f32 %v12214_v45, %v12491_v63  ;;  %v3450_v52 = vmul.f32 %v12212_v26, %v12491_v63  ;;  %v3447_v51 = vmul.f32 %v12092_v24, %v12491_v63 }
 0x5b6   : > { %v4135_v33 = vpack.c.b16 %v4132_v59, %v4131_v6  ;;  %v3573_v30 = vpack.c.bf16 %v3445_v1, %v3445_v1 }
 0x5b7   : > { %4065 = vrot.lane.b32.xlu1 %v4063_v58, %s10223_s29  ;;  %v3452_v58 = vmul.f32 %v12090_v55, %v12437_v10  ;;  %15728 = vst [vmem:[#allocation27_spill] sm:$0xff] %v12494_v57  ;;  %v3462_v37 = vmul.f32 %v12212_v26, %v12494_v57  ;;  %v3578_v10 = vpack.c.bf16 %v3450_v52, %v3450_v52 }
 0x5b8   : > { %4893 = vrot.lane.b32.xlu0 %v4891_v32, %s10223_s29  ;;  %v12476_v32 = vpop.f32.mrf.mxu0 }
 0x5b9   : > { %v3307_v22 = vpop.f32.mrf.mxu3  ;;  %v3580_v62 = vpack.c.bf16 %v3452_v58, %v3452_v58  ;;  %v3443_v58 = vmul.f32 %v12092_v24, %v12457_v7 }
 0x5ba   : > { %v3308_v43 = vadd.f32 %v12070_v27, %v3307_v22 }
 0x5bb   : > { %v4240_v25 = vunpack.c.l.b16 %v3580_v62  ;;  %v3590_v62 = vpack.c.bf16 %v3462_v37, %v3462_v37 }
 0x5bc   : > { %v12454_v11 = vpack.c.bf16 %v3308_v43, %v3308_v43 }
 0x5be   : > { %15724 = vst [vmem:[#allocation23_spill] sm:$0xff] %v12454_v11  ;;  %v12460_v34 = vunpack.c.l.bf16 %v12454_v11 }
 0x5bf   : > { %4137 = vrot.lane.b32.xlu1 %v4135_v33, %s10223_s29  ;;  %v4099_v33 = vpack.c.b16 %v4096_v12, %v4095_v5  ;;  %v3444_v5 = vmul.f32 %v12090_v55, %v12457_v7  ;;  %v3461_v12 = vmul.f32 %v12214_v45, %v12494_v57 }
 0x5c0   : > { %15726 = vst [vmem:[#allocation25_spill] sm:$0xff] %v12460_v34  ;;  %4067 = vrot.lane.b32.xlu0 %v4064_v21, %s10223_s29  ;;  %v3537_v29 = vmul.f32 %v12214_v45, %v12460_v34  ;;  %v3538_v3 = vmul.f32 %v12212_v26, %v12460_v34  ;;  %v3535_v6 = vmul.f32 %v12092_v24, %v12460_v34 }
 0x5c1   : > { %v3536_v59 = vmul.f32 %v12090_v55, %v12460_v34  ;;  %v3589_v16 = vpack.c.bf16 %v3461_v12, %v3461_v12  ;;  %v3577_v34 = vpack.c.bf16 %v3449_v36, %v3449_v36  ;;  %v12539_v36 = vpack.c.bf16 %v3258_v18, %v3258_v18  ;;  %v12552_v18 = vld [vmem:[%s10406_s11] ss:$0 sm:$0xff] }
 0x5c2   : > { %v3665_v35 = vpack.c.bf16 %v3537_v29, %v3537_v29  ;;  %v3666_v22 = vpack.c.bf16 %v3538_v3, %v3538_v3  ;;  %v3663_v21 = vpack.c.bf16 %v3535_v6, %v3535_v6  ;;  %v3574_v3 = vpack.c.bf16 %v3446_v44, %v3446_v44 }
 0x5c3   : > { %v3664_v29 = vpack.c.bf16 %v3536_v59, %v3536_v59  ;;  %v12513_v6 = vpack.c.bf16 %v3263_v54, %v3263_v54  ;;  %v12515_v59 = vpop.f32.mrf.mxu0  ;;  %v3460_v54 = vmul.f32 %v12090_v55, %v12494_v57 }
 0x5c4   : > { %v4997_v43 = vunpack.c.l.b16 %v3665_v35  ;;  %v4998_v17 = vunpack.c.l.b16 %v3666_v22  ;;  %v4995_v1 = vunpack.c.l.b16 %v3663_v21  ;;  %v4169_v35 = vunpack.c.l.b16 %v3573_v30 }
 0x5c5   : > { %v4996_v44 = vunpack.c.l.b16 %v3664_v29  ;;  %v4170_v22 = vunpack.c.l.b16 %v3574_v3  ;;  %v12520_v21 = vunpack.c.l.bf16 %v12513_v6  ;;  %v3266_v30 = vadd.f32 %v12070_v27, %v12389_v56 }
 0x5c6   : > { %v5000_v23 = vpack.c.b16 %v4998_v17, %v4997_v43  ;;  %v3571_v43 = vpack.c.bf16 %v3443_v58, %v3443_v58  ;;  %v4243_v17 = vpack.c.b16 %v4240_v25, %v4239_v48  ;;  %v3459_v3 = vmul.f32 %v12092_v24, %v12494_v57 }
 0x5c7   : > { %4247 = vrot.lane.b32.xlu1 %v4244_v49, %s10223_s29  ;;  %v3572_v49 = vpack.c.bf16 %v3444_v5, %v3444_v5  ;;  %15729 = vst [vmem:[#allocation28_spill] sm:$0xff] %v12520_v21  ;;  %v4313_v48 = vunpack.c.l.b16 %v3589_v16  ;;  %v4314_v25 = vunpack.c.l.b16 %v3590_v62  ;;  %v3448_v27 = vmul.f32 %v12090_v55, %v12491_v63 }
 0x5c8   : > { %5003 = vrot.lane.b32.xlu2 %v5000_v23, %s10223_s29  ;;  %4101 = vrot.lane.b32.xlu0 %v4099_v33, %s10223_s29  ;;  %v4999_v33 = vpack.c.b16 %v4996_v44, %v4995_v1  ;;  %v4172_v23 = vpack.c.b16 %v4170_v22, %v4169_v35  ;;  %v4167_v29 = vunpack.c.l.b16 %v3571_v43  ;;  %v4205_v56 = vunpack.c.l.b16 %v3577_v34 }
 0x5c9   : > { %v4168_v58 = vunpack.c.l.b16 %v3572_v49  ;;  %v4206_v5 = vunpack.c.l.b16 %v3578_v10  ;;  %v3465_v12 = vmul.f32 %v12214_v45, %v12520_v21  ;;  %v3466_v37 = vmul.f32 %v12212_v26, %v12520_v21 }
 0x5ca   : > { %v12541_v52 = vpack.c.bf16 %v3266_v30, %v3266_v30  ;;  %v3587_v1 = vpack.c.bf16 %v3459_v3, %v3459_v3  ;;  %v3588_v44 = vpack.c.bf16 %v3460_v54, %v3460_v54  ;;  %v4316_v22 = vpack.c.b16 %v4314_v25, %v4313_v48 }
 0x5cb   : > { %v12543_v35 = vpop.f32.mrf.mxu0  ;;  %v3575_v43 = vpack.c.bf16 %v3447_v51, %v3447_v51  ;;  %v4208_v34 = vpack.c.b16 %v4206_v5, %v4205_v56  ;;  %v4171_v10 = vpack.c.b16 %v4168_v58, %v4167_v29  ;;  %v3593_v16 = vpack.c.bf16 %v3465_v12, %v3465_v12 }
 0x5cc   : > { %v3594_v62 = vpack.c.bf16 %v3466_v37, %v3466_v37  ;;  %v12546_v49 = vunpack.c.l.bf16 %v12539_v36  ;;  %v4311_v30 = vunpack.c.l.b16 %v3587_v1  ;;  %v4312_v29 = vunpack.c.l.b16 %v3588_v44 }
 0x5cd   : > { %v3463_v3 = vmul.f32 %v12092_v24, %v12520_v21  ;;  %v3464_v54 = vmul.f32 %v12090_v55, %v12520_v21  ;;  %v4203_v51 = vunpack.c.l.b16 %v3575_v43  ;;  %v4349_v58 = vunpack.c.l.b16 %v3593_v16 }
 0x5ce   : > { %15730 = vst [vmem:[#allocation29_spill] sm:$0xff] %v12546_v49  ;;  %v3457_v56 = vmul.f32 %v12214_v45, %v12546_v49  ;;  %v3458_v5 = vmul.f32 %v12212_v26, %v12546_v49  ;;  %v3271_v37 = vadd.f32 %v12552_v18, %v12439_v8  ;;  %v4315_v43 = vpack.c.b16 %v4312_v29, %v4311_v30 }
 0x5cf   : > { %4245 = vrot.lane.b32.xlu1 %v4243_v17, %s10223_s29  ;;  %v3576_v17 = vpack.c.bf16 %v3448_v27, %v3448_v27  ;;  %v4350_v27 = vunpack.c.l.b16 %v3594_v62  ;;  %v3591_v1 = vpack.c.bf16 %v3463_v3, %v3463_v3  ;;  %v3592_v44 = vpack.c.bf16 %v3464_v54, %v3464_v54 }
 0x5d0   : > { %5001 = vrot.lane.b32.xlu2 %v4999_v33, %s10223_s29  ;;  %4175 = vrot.lane.b32.xlu0 %v4172_v23, %s10223_s29  ;;  %v12549_v33 = vunpack.c.l.bf16 %v12541_v52  ;;  %v3268_v23 = vadd.f32 %v12552_v18, %v12416_v41  ;;  %v3585_v62 = vpack.c.bf16 %v3457_v56, %v3457_v56  ;;  %v3586_v57 = vpack.c.bf16 %v3458_v5, %v3458_v5 }
 0x5d1   : > { %v4204_v48 = vunpack.c.l.b16 %v3576_v17  ;;  %v4352_v16 = vpack.c.b16 %v4350_v27, %v4349_v58  ;;  %v12587_v30 = vpack.c.bf16 %v3271_v37, %v3271_v37  ;;  %v4347_v29 = vunpack.c.l.b16 %v3591_v1 }
 0x5d2   : > { %15731 = vst [vmem:[#allocation30_spill] sm:$0xff] %v12549_v33  ;;  %v3469_v25 = vmul.f32 %v12214_v45, %v12549_v33  ;;  %v3470_v41 = vmul.f32 %v12212_v26, %v12549_v33  ;;  %v12571_v12 = vpack.c.bf16 %v3268_v23, %v3268_v23  ;;  %v3467_v8 = vmul.f32 %v12092_v24, %v12549_v33 }
 0x5d3   : > { %v12580_v23 = vpop.f32.mrf.mxu0  ;;  %v4348_v3 = vunpack.c.l.b16 %v3592_v44  ;;  %v3455_v54 = vmul.f32 %v12092_v24, %v12546_v49  ;;  %v4277_v58 = vunpack.c.l.b16 %v3585_v62  ;;  %v4278_v27 = vunpack.c.l.b16 %v3586_v57 }
 0x5d4   : > { %v3597_v17 = vpack.c.bf16 %v3469_v25, %v3469_v25  ;;  %v12578_v0 = vunpack.c.l.bf16 %v12571_v12  ;;  %v12602_v37 = vunpack.c.l.bf16 %v12587_v30  ;;  %v3276_v1 = vadd.f32 %v12552_v18, %v12515_v59 }
 0x5d5   : > { %v3595_v44 = vpack.c.bf16 %v3467_v8, %v3467_v8  ;;  %v3583_v57 = vpack.c.bf16 %v3455_v54, %v3455_v54 }
 0x5d6   : > { %15732 = vst [vmem:[#allocation31_spill] sm:$0xff] %v12578_v0  ;;  %v3473_v56 = vmul.f32 %v12214_v45, %v12578_v0  ;;  %v3474_v5 = vmul.f32 %v12212_v26, %v12578_v0  ;;  %v3472_v59 = vmul.f32 %v12090_v55, %v12578_v0  ;;  %v12614_v8 = vpack.c.bf16 %v3276_v1, %v3276_v1 }
 0x5d7   : > { %4319 = vrot.lane.b32.xlu1 %v4316_v22, %s10223_s29  ;;  %v3306_v22 = vadd.f32 %v12552_v18, %v12420_v13  ;;  %v3468_v13 = vmul.f32 %v12090_v55, %v12549_v33  ;;  %15734 = vst [vmem:[#allocation33_spill] sm:$0xff] %v12602_v37 }
 0x5d8   : > { %4211 = vrot.lane.b32.xlu2 %v4208_v34, %s10223_s29  ;;  %4173 = vrot.lane.b32.xlu0 %v4171_v10, %s10223_s29  ;;  %v3598_v34 = vpack.c.bf16 %v3470_v41, %v3470_v41  ;;  %v4207_v10 = vpack.c.b16 %v4204_v48, %v4203_v51  ;;  %v4385_v48 = vunpack.c.l.b16 %v3597_v17  ;;  %v3456_v41 = vmul.f32 %v12090_v55, %v12546_v49 }
 0x5d9   : > { %v12593_v51 = vpack.c.bf16 %v3306_v22, %v3306_v22  ;;  %v3596_v22 = vpack.c.bf16 %v3468_v13, %v3468_v13  ;;  %v3601_v62 = vpack.c.bf16 %v3473_v56, %v3473_v56  ;;  %v3602_v33 = vpack.c.bf16 %v3474_v5, %v3474_v5 }
 0x5da   : > { %v4386_v25 = vunpack.c.l.b16 %v3598_v34  ;;  %v4351_v34 = vpack.c.b16 %v4348_v3, %v4347_v29  ;;  %v3471_v49 = vmul.f32 %v12092_v24, %v12578_v0  ;;  %v4383_v13 = vunpack.c.l.b16 %v3595_v44 }
 0x5db   : > { %15733 = vst [vmem:[#allocation32_spill] sm:$0xff] %v12593_v51  ;;  %v3475_v29 = vmul.f32 %v12092_v24, %v12602_v37  ;;  %v3282_v3 = vpop.f32.mrf.mxu0  ;;  %v4384_v54 = vunpack.c.l.b16 %v3596_v22  ;;  %v4422_v56 = vunpack.c.l.b16 %v3602_v33  ;;  %v3476_v5 = vmul.f32 %v12090_v55, %v12602_v37 }
 0x5dc   : > { %v4388_v17 = vpack.c.b16 %v4386_v25, %v4385_v48  ;;  %v4275_v48 = vunpack.c.l.b16 %v3583_v57  ;;  %v3599_v1 = vpack.c.bf16 %v3471_v49, %v3471_v49  ;;  %v3600_v44 = vpack.c.bf16 %v3472_v59, %v3472_v59 }
 0x5dd   : > { %v12629_v22 = vunpack.c.l.bf16 %v12614_v8  ;;  %v3603_v57 = vpack.c.bf16 %v3475_v29, %v3475_v29  ;;  %v3604_v33 = vpack.c.bf16 %v3476_v5, %v3476_v5 }
 0x5de   : > { %v4419_v42 = vunpack.c.l.b16 %v3599_v1  ;;  %v4420_v49 = vunpack.c.l.b16 %v3600_v44 }
 0x5df   : > { %4317 = vrot.lane.b32.xlu1 %v4315_v43, %s10223_s29  ;;  %v12607_v43 = vunpack.c.l.bf16 %v12593_v51  ;;  %15736 = vst [vmem:[#allocation35_spill] sm:$0xff] %v12629_v22 }
 0x5e0   : > { %4209 = vrot.lane.b32.xlu2 %v4207_v10, %s10223_s29  ;;  %4355 = vrot.lane.b32.xlu0 %v4352_v16, %s10223_s29  ;;  %v4280_v10 = vpack.c.b16 %v4278_v27, %v4277_v58  ;;  %v3584_v16 = vpack.c.bf16 %v3456_v41, %v3456_v41  ;;  %v4421_v27 = vunpack.c.l.b16 %v3601_v62 }
 0x5e1   : > { %15735 = vst [vmem:[#allocation34_spill] sm:$0xff] %v12607_v43  ;;  %v3533_v25 = vmul.f32 %v12214_v45, %v12607_v43  ;;  %v3534_v41 = vmul.f32 %v12212_v26, %v12607_v43 }
 0x5e2   : > { %v4276_v58 = vunpack.c.l.b16 %v3584_v16  ;;  %v4424_v62 = vpack.c.b16 %v4422_v56, %v4421_v27  ;;  %v3478_v27 = vmul.f32 %v12212_v26, %v12602_v37  ;;  %v4423_v56 = vpack.c.b16 %v4420_v49, %v4419_v42 }
 0x5e3   : > { %v3661_v0 = vpack.c.bf16 %v3533_v25, %v3533_v25  ;;  %v3662_v63 = vpack.c.bf16 %v3534_v41, %v3534_v41  ;;  %v4456_v25 = vunpack.c.l.b16 %v3604_v33  ;;  %v3486_v41 = vmul.f32 %v12212_v26, %v12629_v22 }
 0x5e4   : > { %v4279_v16 = vpack.c.b16 %v4276_v58, %v4275_v48  ;;  %v3532_v48 = vmul.f32 %v12090_v55, %v12607_v43  ;;  %v3477_v58 = vmul.f32 %v12214_v45, %v12602_v37  ;;  %v3484_v49 = vmul.f32 %v12090_v55, %v12629_v22 }
 0x5e5   : > { %v4961_v29 = vunpack.c.l.b16 %v3661_v0  ;;  %v3278_v0 = vadd.f32 %v12552_v18, %v12543_v35  ;;  %v3483_v35 = vmul.f32 %v12092_v24, %v12629_v22 }
 0x5e7   : > { %4391 = vrot.lane.b32.xlu1 %v4388_v17, %s10223_s29  ;;  %v3273_v17 = vadd.f32 %v12552_v18, %v12476_v32  ;;  %v4455_v32 = vunpack.c.l.b16 %v3603_v57  ;;  %v12659_v33 = vpack.c.bf16 %v3278_v0, %v3278_v0  ;;  %v3611_v0 = vpack.c.bf16 %v3483_v35, %v3483_v35 }
 0x5e8   : > { %4283 = vrot.lane.b32.xlu2 %v4280_v10, %s10223_s29  ;;  %4353 = vrot.lane.b32.xlu0 %v4351_v34, %s10223_s29  ;;  %v3283_v34 = vadd.f32 %v12552_v18, %v3282_v3  ;;  %v4387_v10 = vpack.c.b16 %v4384_v54, %v4383_v13  ;;  %v3485_v13 = vmul.f32 %v12214_v45, %v12629_v22  ;;  %v4962_v3 = vunpack.c.l.b16 %v3662_v63 }
 0x5e9   : > { %v12633_v59 = vpack.c.bf16 %v3273_v17, %v3273_v17  ;;  %v3531_v54 = vmul.f32 %v12092_v24, %v12607_v43  ;;  %v4459_v57 = vpack.c.b16 %v4456_v25, %v4455_v32  ;;  %v3285_v43 = vpop.f32.mrf.mxu0  ;;  %v3303_v22 = vadd.f32 %v12552_v18, %v12402_v15 }
 0x5ea   : > { %v12635_v21 = vpack.c.bf16 %v3283_v34, %v3283_v34  ;;  %v3613_v5 = vpack.c.bf16 %v3485_v13, %v3485_v13  ;;  %v4964_v44 = vpack.c.b16 %v4962_v3, %v4961_v29  ;;  %v3660_v34 = vpack.c.bf16 %v3532_v48, %v3532_v48 }
 0x5eb   : > { %v12654_v63 = vunpack.c.l.bf16 %v12633_v59  ;;  %v3659_v17 = vpack.c.bf16 %v3531_v54, %v3531_v54  ;;  %v4527_v37 = vunpack.c.l.b16 %v3611_v0 }
 0x5ec   : > { %v12657_v1 = vunpack.c.l.bf16 %v12635_v21  ;;  %v4529_v42 = vunpack.c.l.b16 %v3613_v5  ;;  %v4960_v29 = vunpack.c.l.b16 %v3660_v34  ;;  %v3612_v5 = vpack.c.bf16 %v3484_v49, %v3484_v49 }
 0x5ed   : > { %15737 = vst [vmem:[#allocation36_spill] sm:$0xff] %v12654_v63  ;;  %v3481_v32 = vmul.f32 %v12214_v45, %v12654_v63  ;;  %v4959_v13 = vunpack.c.l.b16 %v3659_v17 }
 0x5ee   : > { %15738 = vst [vmem:[#allocation37_spill] sm:$0xff] %v12657_v1  ;;  %v3497_v3 = vmul.f32 %v12214_v45, %v12657_v1  ;;  %v3498_v54 = vmul.f32 %v12212_v26, %v12657_v1  ;;  %v3495_v15 = vmul.f32 %v12092_v24, %v12657_v1 }
 0x5ef   : > { %4389 = vrot.lane.b32.xlu1 %v4387_v10, %s10223_s29  ;;  %v3614_v10 = vpack.c.bf16 %v3486_v41, %v3486_v41  ;;  %v4963_v17 = vpack.c.b16 %v4960_v29, %v4959_v13  ;;  %v3496_v13 = vmul.f32 %v12090_v55, %v12657_v1 }
 0x5f0   : > { %4281 = vrot.lane.b32.xlu2 %v4279_v16, %s10223_s29  ;;  %4427 = vrot.lane.b32.xlu0 %v4424_v62, %s10223_s29  ;;  %v3605_v16 = vpack.c.bf16 %v3477_v58, %v3477_v58  ;;  %v3606_v62 = vpack.c.bf16 %v3478_v27, %v3478_v27  ;;  %v3482_v58 = vmul.f32 %v12212_v26, %v12654_v63  ;;  %v12677_v27 = vunpack.c.l.bf16 %v12659_v33 }
 0x5f1   : > { %v4530_v48 = vunpack.c.l.b16 %v3614_v10  ;;  %v3625_v34 = vpack.c.bf16 %v3497_v3, %v3497_v3  ;;  %v3287_v3 = vpop.f32.mrf.mxu0 }
 0x5f2   : > { %v4457_v25 = vunpack.c.l.b16 %v3605_v16  ;;  %v4458_v41 = vunpack.c.l.b16 %v3606_v62  ;;  %15739 = vst [vmem:[#allocation38_spill] sm:$0xff] %v12677_v27  ;;  %v3610_v62 = vpack.c.bf16 %v3482_v58, %v3482_v58  ;;  %v3489_v46 = vmul.f32 %v12214_v45, %v12677_v27 }
 0x5f3   : > { %v4532_v10 = vpack.c.b16 %v4530_v48, %v4529_v42  ;;  %v4637_v42 = vunpack.c.l.b16 %v3625_v34  ;;  %v3490_v29 = vmul.f32 %v12212_v26, %v12677_v27 }
 0x5f4   : > { %v4460_v16 = vpack.c.b16 %v4458_v41, %v4457_v25  ;;  %v4494_v48 = vunpack.c.l.b16 %v3610_v62  ;;  %v3479_v25 = vmul.f32 %v12092_v24, %v12654_v63  ;;  %v3480_v41 = vmul.f32 %v12090_v55, %v12654_v63 }
 0x5f5   : > { %v3618_v34 = vpack.c.bf16 %v3490_v29, %v3490_v29  ;;  %v3487_v62 = vmul.f32 %v12092_v24, %v12677_v27 }
 0x5f7   : > { %4967 = vrot.lane.b32.xlu1 %v4964_v44, %s10223_s29  ;;  %v3609_v44 = vpack.c.bf16 %v3481_v32, %v3481_v32 }
 0x5f8   : > { %4461 = vrot.lane.b32.xlu2 %v4459_v57, %s10223_s29  ;;  %4425 = vrot.lane.b32.xlu0 %v4423_v56, %s10223_s29  ;;  %v3286_v56 = vadd.f32 %v12552_v18, %v3285_v43  ;;  %v3626_v57 = vpack.c.bf16 %v3498_v54, %v3498_v54  ;;  %v4528_v43 = vunpack.c.l.b16 %v3612_v5  ;;  %v12695_v54 = vpack.c.bf16 %v3303_v22, %v3303_v22 }
 0x5f9   : > { %v4493_v49 = vunpack.c.l.b16 %v3609_v44  ;;  %v3624_v44 = vpack.c.bf16 %v3496_v13, %v3496_v13  ;;  %v3290_v29 = vpop.f32.mrf.mxu0 }
 0x5fa   : > { %v12685_v35 = vpack.c.bf16 %v3286_v56, %v3286_v56  ;;  %v4638_v32 = vunpack.c.l.b16 %v3626_v57  ;;  %15740 = vst [vmem:[#allocation39_spill] sm:$0xff] %v12695_v54  ;;  %v4531_v0 = vpack.c.b16 %v4528_v43, %v4527_v37  ;;  %v3623_v56 = vpack.c.bf16 %v3495_v15, %v3495_v15 }
 0x5fb   : > { %v12705_v57 = vunpack.c.l.bf16 %v12695_v54  ;;  %v4496_v22 = vpack.c.b16 %v4494_v48, %v4493_v49  ;;  %v3488_v43 = vmul.f32 %v12090_v55, %v12677_v27  ;;  %v4636_v49 = vunpack.c.l.b16 %v3624_v44 }
 0x5fc   : > { %v12702_v58 = vunpack.c.l.bf16 %v12685_v35  ;;  %v4640_v5 = vpack.c.b16 %v4638_v32, %v4637_v42  ;;  %v4635_v37 = vunpack.c.l.b16 %v3623_v56  ;;  %v4566_v32 = vunpack.c.l.b16 %v3618_v34 }
 0x5fd   : > { %15742 = vst [vmem:[#allocation41_spill] sm:$0xff] %v12705_v57  ;;  %v3281_v56 = vadd.f32 %v12552_v18, %v12580_v23  ;;  %v3615_v44 = vpack.c.bf16 %v3487_v62, %v3487_v62  ;;  %v3616_v34 = vpack.c.bf16 %v3488_v43, %v3488_v43 }
 0x5fe   : > { %15741 = vst [vmem:[#allocation40_spill] sm:$0xff] %v12702_v58  ;;  %v3502_v13 = vmul.f32 %v12212_v26, %v12702_v58  ;;  %v4639_v1 = vpack.c.b16 %v4636_v49, %v4635_v37  ;;  %v3499_v37 = vmul.f32 %v12092_v24, %v12702_v58 }
 0x5ff   : > { %4965 = vrot.lane.b32.xlu1 %v4963_v17, %s10223_s29  ;;  %v3617_v17 = vpack.c.bf16 %v3489_v46, %v3489_v46  ;;  %v3501_v46 = vmul.f32 %v12214_v45, %v12702_v58  ;;  %v12728_v7 = vpack.c.bf16 %v3281_v56, %v3281_v56  ;;  %v4563_v23 = vunpack.c.l.b16 %v3615_v44 }
 0x600   : > { %4535 = vrot.lane.b32.xlu2 %v4532_v10, %s10223_s29  ;;  %4463 = vrot.lane.b32.xlu0 %v4460_v16, %s10223_s29  ;;  %v3607_v10 = vpack.c.bf16 %v3479_v25, %v3479_v25  ;;  %v3608_v16 = vpack.c.bf16 %v3480_v41, %v3480_v41  ;;  %v3529_v41 = vmul.f32 %v12214_v45, %v12705_v57  ;;  %v4564_v62 = vunpack.c.l.b16 %v3616_v34 }
 0x601   : > { %v4565_v42 = vunpack.c.l.b16 %v3617_v17  ;;  %v3629_v17 = vpack.c.bf16 %v3501_v46, %v3501_v46  ;;  %v3630_v63 = vpack.c.bf16 %v3502_v13, %v3502_v13  ;;  %v3500_v46 = vmul.f32 %v12090_v55, %v12702_v58 }
 0x602   : > { %v4491_v48 = vunpack.c.l.b16 %v3607_v10  ;;  %v4492_v25 = vunpack.c.l.b16 %v3608_v16  ;;  %v3657_v27 = vpack.c.bf16 %v3529_v41, %v3529_v41  ;;  %v3520_v13 = vmul.f32 %v12090_v55, %v12371_v9 }
 0x603   : > { %v4568_v10 = vpack.c.b16 %v4566_v32, %v4565_v42  ;;  %v4674_v32 = vunpack.c.l.b16 %v3630_v63  ;;  %v3528_v41 = vmul.f32 %v12090_v55, %v12705_v57  ;;  %v3627_v63 = vpack.c.bf16 %v3499_v37, %v3499_v37 }
 0x604   : > { %v4495_v16 = vpack.c.b16 %v4492_v25, %v4491_v48  ;;  %v3527_v25 = vmul.f32 %v12092_v24, %v12705_v57 }
 0x607   : > { %4643 = vrot.lane.b32.xlu1 %v4640_v5, %s10223_s29  ;;  %v3288_v5 = vadd.f32 %v12552_v18, %v3287_v3  ;;  %v4673_v3 = vunpack.c.l.b16 %v3629_v17 }
 0x608   : > { %4533 = vrot.lane.b32.xlu2 %v4531_v0, %s10223_s29  ;;  %4499 = vrot.lane.b32.xlu0 %v4496_v22, %s10223_s29  ;;  %v12716_v15 = vpop.f32.mrf.mxu2  ;;  %v3530_v0 = vmul.f32 %v12212_v26, %v12705_v57  ;;  %v3291_v22 = vadd.f32 %v12552_v18, %v3290_v29  ;;  %v4925_v29 = vunpack.c.l.b16 %v3657_v27  ;;  %v4567_v27 = vpack.c.b16 %v4564_v62, %v4563_v23 }
 0x609   : > { %v12730_v61 = vpack.c.bf16 %v3288_v5, %v3288_v5  ;;  %v3628_v5 = vpack.c.bf16 %v3500_v46, %v3500_v46  ;;  %v4676_v17 = vpack.c.b16 %v4674_v32, %v4673_v3 }
 0x60a   : > { %v3658_v28 = vpack.c.bf16 %v3530_v0, %v3530_v0  ;;  %v12739_v43 = vpack.c.bf16 %v3291_v22, %v3291_v22  ;;  %v12752_v0 = vunpack.c.l.bf16 %v12728_v7  ;;  %v3648_v22 = vpack.c.bf16 %v3520_v13, %v3520_v13  ;;  %v3292_v13 = vpop.f32.mrf.mxu0 }
 0x60b   : > { %v12755_v56 = vunpack.c.l.bf16 %v12730_v61  ;;  %v4672_v57 = vunpack.c.l.b16 %v3628_v5 }
 0x60c   : > { %v4926_v48 = vunpack.c.l.b16 %v3658_v28  ;;  %15743 = vst [vmem:[#allocation42_spill] sm:$0xff] %v12752_v0  ;;  %v12758_v44 = vunpack.c.l.bf16 %v12739_v43  ;;  %v3493_v37 = vmul.f32 %v12214_v45, %v12752_v0  ;;  %v3494_v3 = vmul.f32 %v12212_v26, %v12752_v0 }
 0x60d   : > { %15744 = vst [vmem:[#allocation43_spill] sm:$0xff] %v12755_v56  ;;  %v3505_v62 = vmul.f32 %v12214_v45, %v12755_v56  ;;  %v3506_v46 = vmul.f32 %v12212_v26, %v12755_v56  ;;  %v3491_v54 = vmul.f32 %v12092_v24, %v12752_v0 }
 0x60e   : > { %15745 = vst [vmem:[#allocation44_spill] sm:$0xff] %v12758_v44  ;;  %v4928_v34 = vpack.c.b16 %v4926_v48, %v4925_v29  ;;  %v3509_v32 = vmul.f32 %v12214_v45, %v12758_v44  ;;  %v4852_v48 = vunpack.c.l.b16 %v3648_v22  ;;  %v3622_v5 = vpack.c.bf16 %v3494_v3, %v3494_v3 }
 0x60f   : > { %4641 = vrot.lane.b32.xlu1 %v4639_v1, %s10223_s29  ;;  %v3519_v1 = vmul.f32 %v12092_v24, %v12371_v9  ;;  %v3634_v9 = vpack.c.bf16 %v3506_v46, %v3506_v46 }
 0x610   : > { %4571 = vrot.lane.b32.xlu2 %v4568_v10, %s10223_s29  ;;  %4497 = vrot.lane.b32.xlu0 %v4495_v16, %s10223_s29  ;;  %v4017_v49 = vpop.f32.mrf.mxu2  ;;  %v3655_v10 = vpack.c.bf16 %v3527_v25, %v3527_v25  ;;  %v3656_v16 = vpack.c.bf16 %v3528_v41, %v3528_v41  ;;  %v3637_v11 = vpack.c.bf16 %v3509_v32, %v3509_v32  ;;  %v4602_v22 = vunpack.c.l.b16 %v3622_v5 }
 0x611   : > { %v12741_v42 = vpop.permute.xlu1 %4823  ;;  %v3647_v28 = vpack.c.bf16 %v3519_v1, %v3519_v1  ;;  %v4671_v49 = vunpack.c.l.b16 %v3627_v63  ;;  %v3510_v1 = vmul.f32 %v12212_v26, %v12758_v44  ;;  %v3621_v63 = vpack.c.bf16 %v3493_v37, %v3493_v37 }
 0x612   : > { %v4923_v25 = vunpack.c.l.b16 %v3655_v10  ;;  %v4924_v41 = vunpack.c.l.b16 %v3656_v16  ;;  %v3492_v10 = vmul.f32 %v12090_v55, %v12752_v0  ;;  %v4710_v3 = vunpack.c.l.b16 %v3634_v9 }
 0x613   : > { %v4851_v29 = vunpack.c.l.b16 %v3647_v28  ;;  %v3638_v51 = vpack.c.bf16 %v3510_v1, %v3510_v1  ;;  %v4601_v28 = vunpack.c.l.b16 %v3621_v63  ;;  %v4745_v46 = vunpack.c.l.b16 %v3637_v11 }
 0x614   : > { %v4927_v50 = vpack.c.b16 %v4924_v41, %v4923_v25  ;;  %v3507_v1 = vmul.f32 %v12092_v24, %v12758_v44  ;;  %v3620_v25 = vpack.c.bf16 %v3492_v10, %v3492_v10 }
 0x615   : > { %v4855_v58 = vpack.c.b16 %v4852_v48, %v4851_v29  ;;  %v4746_v32 = vunpack.c.l.b16 %v3638_v51  ;;  %v3619_v48 = vpack.c.bf16 %v3491_v54, %v3491_v54 }
 0x616   : > { %v3635_v11 = vpack.c.bf16 %v3507_v1, %v3507_v1  ;;  %v4600_v10 = vunpack.c.l.b16 %v3620_v25 }
 0x617   : > { %4679 = vrot.lane.b32.xlu1 %v4676_v17, %s10223_s29  ;;  %v3293_v17 = vadd.f32 %v12552_v18, %v3292_v13  ;;  %v3508_v13 = vmul.f32 %v12090_v55, %v12758_v44  ;;  %v4599_v54 = vunpack.c.l.b16 %v3619_v48 }
 0x618   : > { %4569 = vrot.lane.b32.xlu2 %v4567_v27, %s10223_s29  ;;  %4931 = vrot.lane.b32.xlu0 %v4928_v34, %s10223_s29  ;;  %v4675_v27 = vpack.c.b16 %v4672_v57, %v4671_v49  ;;  %v3633_v34 = vpack.c.bf16 %v3505_v62, %v3505_v62  ;;  %v3503_v57 = vmul.f32 %v12092_v24, %v12755_v56 }
 0x619   : > { %v12767_v23 = vpop.permute.xlu1 %4821  ;;  %v12787_v16 = vpack.c.bf16 %v3293_v17, %v3293_v17  ;;  %v3504_v62 = vmul.f32 %v12090_v55, %v12755_v56  ;;  %v4604_v17 = vpack.c.b16 %v4602_v22, %v4601_v28  ;;  %v3636_v51 = vpack.c.bf16 %v3508_v13, %v3508_v13 }
 0x61a   : > { %v4709_v37 = vunpack.c.l.b16 %v3633_v34  ;;  %v3631_v63 = vpack.c.bf16 %v3503_v57, %v3503_v57 }
 0x61b   : > { %v12804_v9 = vunpack.c.l.bf16 %v12787_v16  ;;  %v3632_v5 = vpack.c.bf16 %v3504_v62, %v3504_v62  ;;  %v4744_v62 = vunpack.c.l.b16 %v3636_v51 }
 0x61c   : > { %v4712_v41 = vpack.c.b16 %v4710_v3, %v4709_v37  ;;  %v4707_v56 = vunpack.c.l.b16 %v3631_v63  ;;  %v4743_v3 = vunpack.c.l.b16 %v3635_v11 }
 0x61d   : > { %15746 = vst [vmem:[#allocation45_spill] sm:$0xff] %v12804_v9  ;;  %v4708_v0 = vunpack.c.l.b16 %v3632_v5  ;;  %v3513_v57 = vmul.f32 %v12214_v45, %v12804_v9  ;;  %v3514_v28 = vmul.f32 %v12212_v26, %v12804_v9 }
 0x61e   : > { %v4747_v63 = vpack.c.b16 %v4744_v62, %v4743_v3 }
 0x61f   : > { %4677 = vrot.lane.b32.xlu1 %v4675_v27, %s10223_s29  ;;  %v4748_v27 = vpack.c.b16 %v4746_v32, %v4745_v46  ;;  %v3511_v46 = vmul.f32 %v12092_v24, %v12804_v9  ;;  %v3512_v32 = vmul.f32 %v12090_v55, %v12804_v9  ;;  %v4711_v13 = vpack.c.b16 %v4708_v0, %v4707_v56 }
 0x620   : > { %4857 = vrot.lane.b32.xlu2 %v4855_v58, %s10223_s29  ;;  %4929 = vrot.lane.b32.xlu0 %v4927_v50, %s10223_s29  ;;  %v3641_v48 = vpack.c.bf16 %v3513_v57, %v3513_v57  ;;  %v3642_v25 = vpack.c.bf16 %v3514_v28, %v3514_v28 }
 0x621   : > { %v12789_v49 = vpop.permute.xlu1 %4859  ;;  %v3639_v5 = vpack.c.bf16 %v3511_v46, %v3511_v46 }
 0x622   : > { %v12793_v58 = vpop.permute.xlu2 %5003  ;;  %v12795_v50 = vpop.permute.xlu0 %4895  ;;  %v4781_v51 = vunpack.c.l.b16 %v3641_v48  ;;  %v4782_v24 = vunpack.c.l.b16 %v3642_v25 }
 0x623   : > { %v4779_v56 = vunpack.c.l.b16 %v3639_v5 }
 0x624   : > { %v4784_v28 = vpack.c.b16 %v4782_v24, %v4781_v51  ;;  %v12859_v51 = vld [vmem:[%s15747_s13] ss:$0 sm:$0xff] }
 0x625   : > { %v12801_v29 = vpop.f32.mrf.mxu3 }
 0x627   : > { %4715 = vrot.lane.b32.xlu1 %v4712_v41, %s10223_s29  ;;  %v4603_v41 = vpack.c.b16 %v4600_v10, %v4599_v54 }
 0x628   : > { %4607 = vrot.lane.b32.xlu2 %v4604_v17, %s10223_s29  ;;  %4751 = vrot.lane.b32.xlu0 %v4748_v27, %s10223_s29  ;;  %v12809_v34 = vpop.f32.mrf.mxu1  ;;  %v3640_v17 = vpack.c.bf16 %v3512_v32, %v3512_v32 }
 0x629   : > { %v4066_v44 = vpop.permute.xlu1 %4065 }
 0x62a   : > { %v12815_v22 = vpop.permute.xlu2 %5001  ;;  %v12817_v37 = vpop.permute.xlu0 %4893  ;;  %v4780_v57 = vunpack.c.l.b16 %v3640_v17 }
 0x62c   : > { %v4783_v3 = vpack.c.b16 %v4780_v57, %v4779_v56 }
 0x62d   : > { %v12823_v1 = vpop.f32.mrf.mxu3 }
 0x62f   : > { %4713 = vrot.lane.b32.xlu1 %v4711_v13, %s10223_s29 }
 0x630   : > { %4605 = vrot.lane.b32.xlu2 %v4603_v41, %s10223_s29  ;;  %4749 = vrot.lane.b32.xlu0 %v4747_v63, %s10223_s29  ;;  %v3981_v27 = vpop.f32.mrf.mxu1 }
 0x631   : > { %v4138_v11 = vpop.permute.xlu1 %4137 }
 0x632   : > { %v4212_v9 = vpop.permute.xlu2 %4211  ;;  %v4068_v55 = vpop.permute.xlu0 %4067  ;;  %v4145_v0 = vsel %vm2360_vm10, %v4138_v11, 0 }
 0x633   : > { %v4076_v54 = vsel %vm2360_vm10, %v4068_v55, 0  ;;  %4157 = vmatpush.bf16.xpose.msra.mxu3 %v4145_v0  ;;  %v4073_v55 = vsel %vm2360_vm10, %v4066_v44, 0  ;;  %v4220_v24 = vsel %vm2360_vm10, %v4212_v9, 0 }
 0x634   : > { %4084 = vmatpush.bf16.xpose.msrb.mxu1 %v4076_v54  ;;  %v12871_v54 = vadd.f32 %v12859_v51, %v12809_v34 }
 0x635   : > { %v12830_v10 = vpop.f32.mrf.mxu3 }
 0x637   : > { %4787 = vrot.lane.b32.xlu1 %v4784_v28, %s10223_s29 }
 0x638   : > { %4785 = vrot.lane.b32.xlu0 %v4783_v3, %s10223_s29  ;;  %v3311_v3 = vadd.f32 %v12552_v18, %v12801_v29 }
 0x639   : > { %v4248_v62 = vpop.permute.xlu1 %4247 }
 0x63a   : > { %v4256_v46 = vsel %vm2360_vm10, %v4248_v62, 0  ;;  %v4210_v32 = vpop.permute.xlu2 %4209  ;;  %v4102_v13 = vpop.permute.xlu0 %4101  ;;  %9401 = vmatmul.msk.bf16.vlgmr.msra.gmra.mxu3 %vm2360_vm10, %v12295_v19  ;;  %v5099_v62 = vsel %vm2360_vm10, %v12871_v54, -inf }
 0x63b   : > { %v4109_v48 = vsel %vm2360_vm10, %v4102_v13, 0  ;;  %4264 = vmatpush.bf16.xpose.msrb.mxu3 %v4256_v46  ;;  %v12879_v13 = vpack.c.bf16 %v3311_v3, %v3311_v3 }
 0x63c   : > { %4085 = vmatpush.bf16.xpose.msrb.mxu1 %v4073_v55  ;;  %4121 = vmatpush.bf16.xpose.msrb.mxu2 %v4109_v48 }
 0x63d   : > { %v4053_v25 = vpop.f32.mrf.mxu3  ;;  %v12883_v55 = vunpack.c.l.bf16 %v12879_v13 }
 0x63f   : > { %9793 = vrot.lane.b32.xlu1 %v11959_v14, %s10224_s8  ;;  %v4217_v14 = vsel %vm2360_vm10, %v4210_v32, 0  ;;  %15748 = vst [vmem:[#allocation46_spill] sm:$0xff] %v12883_v55 }
 0x640   : > { %9788 = vrot.lane.b32.xlu0 %v12067_v47, %s10224_s8 }
 0x641   : > { %v4246_v41 = vpop.permute.xlu1 %4245 }
 0x642   : > { %v4284_v19 = vpop.permute.xlu2 %4283  ;;  %v4176_v63 = vpop.permute.xlu0 %4175  ;;  %v4253_v44 = vsel %vm2360_vm10, %v4246_v41, 0  ;;  %v3541_v41 = vmul.f32 %v12214_v45, %v12883_v55 }
 0x643   : > { %v4184_v5 = vsel %vm2360_vm10, %v4176_v63, 0  ;;  %9399 = vmatmul.msk.bf16.vlgmr.msrb.gmra.mxu1 %vm2360_vm10, %v12383_v40  ;;  %9400 = vmatmul.msk.bf16.vlgmr.msrb.gmra.mxu2 %vm2360_vm10, %v12277_v53  ;;  %v4292_v40 = vsel %vm2360_vm10, %v4284_v19, 0  ;;  %v3542_v19 = vmul.f32 %v12212_v26, %v12883_v55  ;;  %v12897_v63 = vadd.f32 %v12859_v51, %v12830_v10 }
 0x644   : > { %4228 = vmatpush.bf16.xpose.msra.mxu2 %v4220_v24  ;;  %4192 = vmatpush.bf16.xpose.msra.mxu1 %v4184_v5 }
 0x645   : > { %4265 = vmatpush.bf16.xpose.msrb.mxu3 %v4253_v44  ;;  %v3670_v44 = vpack.c.bf16 %v3542_v19, %v3542_v19  ;;  %v5105_v5 = vsel %vm2360_vm10, %v12897_v63, -inf }
 0x649   : > { %v4320_v9 = vpop.permute.xlu1 %4319 }
 0x64a   : > { %v4328_v47 = vsel %vm2360_vm10, %v4320_v9, 0  ;;  %v4282_v17 = vpop.permute.xlu2 %4281  ;;  %v4174_v27 = vpop.permute.xlu0 %4173 }
 0x64b   : > { %v4181_v11 = vsel %vm2360_vm10, %v4174_v27, 0  ;;  %v4289_v28 = vsel %vm2360_vm10, %v4282_v17, 0 }
 0x64c   : > { %4229 = vmatpush.bf16.xpose.msra.mxu2 %v4217_v14  ;;  %9404 = vmatmul.msk.bf16.vlgmr.msrb.gmra.mxu3 %vm2360_vm10, %v12432_v20 }
 0x64d   : > { %4193 = vmatpush.bf16.xpose.msra.mxu1 %v4181_v11 }
 0x651   : > { %v4318_v53 = vpop.permute.xlu1 %4317 }
 0x652   : > { %v12861_v0 = vpop.permute.xlu2 %4461  ;;  %v4356_v56 = vpop.permute.xlu0 %4355  ;;  %v4325_v57 = vsel %vm2360_vm10, %v4318_v53, 0 }
 0x653   : > { %v4364_v20 = vsel %vm2360_vm10, %v4356_v56, 0  ;;  %9403 = vmatmul.msk.bf16.vlgmr.msra.gmra.mxu2 %vm2360_vm10, %v12486_v31 }
 0x654   : > { %4336 = vmatpush.bf16.xpose.msrb.mxu2 %v4328_v47  ;;  %9402 = vmatmul.msk.bf16.vlgmr.msra.gmra.mxu1 %vm2360_vm10, %v12451_v4 }
 0x655   : > { %4300 = vmatpush.bf16.xpose.msrb.mxu1 %v4292_v40  ;;  %4372 = vmatpush.bf16.xpose.msra.mxu3 %v4364_v20 }
 0x659   : > { %5100 = vmax.xlane.f32.xlu2 %v5099_v62  ;;  %v4392_v4 = vpop.permute.xlu1 %4391 }
 0x65a   : > { %v4400_v46 = vsel %vm2360_vm10, %v4392_v4, 0  ;;  %v4536_v31 = vpop.permute.xlu2 %4535  ;;  %v4354_v32 = vpop.permute.xlu0 %4353 }
 0x65b   : > { %v4361_v34 = vsel %vm2360_vm10, %v4354_v32, 0  ;;  %v4544_v27 = vsel %vm2360_vm10, %v4536_v31, 0  ;;  %v4469_v31 = vsel %vm2360_vm10, %v12861_v0, 0 }
 0x65c   : > { %4337 = vmatpush.bf16.xpose.msrb.mxu2 %v4325_v57 }
 0x65d   : > { %4301 = vmatpush.bf16.xpose.msrb.mxu1 %v4289_v28  ;;  %4373 = vmatpush.bf16.xpose.msra.mxu3 %v4361_v34 }
 0x661   : > { %v4390_v48 = vpop.permute.xlu1 %4389 }
 0x662   : > { %v4534_v18 = vpop.permute.xlu2 %4533  ;;  %v4428_v29 = vpop.permute.xlu0 %4427  ;;  %v4397_v24 = vsel %vm2360_vm10, %v4390_v48, 0 }
 0x663   : > { %v4436_v25 = vsel %vm2360_vm10, %v4428_v29, 0  ;;  %9406 = vmatmul.msk.bf16.vlgmr.msrb.gmra.mxu2 %vm2360_vm10, %v12488_v39  ;;  %v3669_v39 = vpack.c.bf16 %v3541_v41, %v3541_v41  ;;  %v4541_v20 = vsel %vm2360_vm10, %v4534_v18, 0 }
 0x664   : > { %9405 = vmatmul.msk.bf16.vlgmr.msrb.gmra.mxu1 %vm2360_vm10, %v12539_v36  ;;  %9407 = vmatmul.msk.bf16.vlgmr.msra.gmra.mxu3 %vm2360_vm10, %v12513_v6  ;;  %v12903_v36 = vadd.f32 %v12859_v51, %v12716_v15  ;;  %v5034_v15 = vunpack.c.l.b16 %v3670_v44 }
 0x665   : > { %4408 = vmatpush.bf16.xpose.msra.mxu1 %v4400_v46  ;;  %4444 = vmatpush.bf16.xpose.msra.mxu2 %v4436_v25  ;;  %v5033_v17 = vunpack.c.l.b16 %v3669_v39 }
 0x666   : > { %v5102_v10 = vsel %vm2360_vm10, %v12903_v36, -inf }
 0x667   : > { %v5036_v11 = vpack.c.b16 %v5034_v15, %v5033_v17  ;;  %v4868_v15 = vsel %vm2360_vm10, %v12789_v49, 0 }
 0x669   : > { %v12907_v14 = vpop.permute.xlu1 %4967  ;;  %5106 = vmax.xlane.f32.xlu1 %v5105_v5 }
 0x66a   : > { %v4572_v9 = vpop.permute.xlu2 %4571  ;;  %5103 = vmax.xlane.f32.xlu0 %v5102_v10  ;;  %v4426_v6 = vpop.permute.xlu0 %4425  ;;  %v4976_v49 = vsel %vm2360_vm10, %v12907_v14, 0  ;;  %v5012_v14 = vsel %vm2360_vm10, %v12793_v58, 0 }
 0x66b   : > { %v4433_v47 = vsel %vm2360_vm10, %v4426_v6, 0 }
 0x66d   : > { %4409 = vmatpush.bf16.xpose.msra.mxu1 %v4397_v24  ;;  %4445 = vmatpush.bf16.xpose.msra.mxu2 %v4433_v47 }
 0x671   : > { %5039 = vrot.lane.b32.xlu2 %v5036_v11, %s10223_s29  ;;  %v12914_v40 = vpop.permute.xlu1 %4965 }
 0x672   : > { %v4570_v53 = vpop.permute.xlu2 %4569  ;;  %v4464_v56 = vpop.permute.xlu0 %4463 }
 0x673   : > { %v4472_v57 = vsel %vm2360_vm10, %v4464_v56, 0  ;;  %v4577_v0 = vsel %vm2360_vm10, %v4570_v53, 0  ;;  %v4973_v56 = vsel %vm2360_vm10, %v12914_v40, 0 }
 0x674   : > { %9408 = vmatmul.msk.bf16.vlgmr.msra.gmra.mxu1 %vm2360_vm10, %v12541_v52  ;;  %9409 = vmatmul.msk.bf16.vlgmr.msra.gmra.mxu2 %vm2360_vm10, %v12571_v12  ;;  %v4580_v52 = vsel %vm2360_vm10, %v4572_v9, 0 }
 0x675   : > { %4552 = vmatpush.bf16.xpose.msrb.mxu2 %v4544_v27  ;;  %4480 = vmatpush.bf16.xpose.msrb.mxu3 %v4472_v57 }
 0x679   : > { %v4644_v28 = vpop.permute.xlu1 %4643 }
 0x67a   : > { %v4652_v3 = vsel %vm2360_vm10, %v4644_v28, 0  ;;  %v4858_v62 = vpop.permute.xlu2 %4857  ;;  %v4500_v4 = vpop.permute.xlu0 %4499  ;;  %v10131_v28 = vld [vmem:[%s10406_s11] ss:$0 sm:$0xff]  ;;  %s15749_s11 = sld [smem:[#allocation54_spill]] }
 0x67b   : > { %v4508_v46 = vsel %vm2360_vm10, %v4500_v4, 0 }
 0x67c   : > { %4516 = vmatpush.bf16.xpose.msrb.mxu1 %v4508_v46 }
 0x67d   : > { %4553 = vmatpush.bf16.xpose.msrb.mxu2 %v4541_v20  ;;  %4481 = vmatpush.bf16.xpose.msrb.mxu3 %v4469_v31 }
 0x681   : > { %v4642_v12 = vpop.permute.xlu1 %4641 }
 0x682   : > { %v4608_v32 = vpop.permute.xlu2 %4607  ;;  %v4498_v34 = vpop.permute.xlu0 %4497  ;;  %v4649_v48 = vsel %vm2360_vm10, %v4642_v12, 0  ;;  %v15751_v12 = vld [vmem:[#allocation32_spill] sm:$0xff] }
 0x683   : > { %v4616_v18 = vsel %vm2360_vm10, %v4608_v32, 0  ;;  %v4505_v29 = vsel %vm2360_vm10, %v4498_v34, 0  ;;  %v5293_v34 = vld [vmem:[%s15749_s11 + $0x10] sm:$0xff] }
 0x684   : > { %9410 = vmatmul.msk.bf16.vlgmr.msrb.gmra.mxu3 %vm2360_vm10, %v12587_v30  ;;  %9412 = vmatmul.msk.bf16.vlgmr.msrb.gmra.mxu2 %vm2360_vm10, %v12614_v8 }
 0x685   : > { %4660 = vmatpush.bf16.xpose.msra.mxu2 %v4652_v3  ;;  %4588 = vmatpush.bf16.xpose.msra.mxu3 %v4580_v52 }
 0x686   : > { %4517 = vmatpush.bf16.xpose.msrb.mxu1 %v4505_v29  ;;  %v5292_v29 = vld [vmem:[%s15749_s11 + $0x8] sm:$0xff] }
 0x689   : > { %v4680_v24 = vpop.permute.xlu1 %4679 }
 0x68a   : > { %v4688_v25 = vsel %vm2360_vm10, %v4680_v24, 0  ;;  %v4606_v41 = vpop.permute.xlu2 %4605  ;;  %v4932_v19 = vpop.permute.xlu0 %4931  ;;  %v5291_v24 = vld [vmem:[%s15749_s11] sm:$0xff] }
 0x68b   : > { %v4613_v30 = vsel %vm2360_vm10, %v4606_v41, 0  ;;  %v4940_v11 = vsel %vm2360_vm10, %v4932_v19, 0 }
 0x68d   : > { %4661 = vmatpush.bf16.xpose.msra.mxu2 %v4649_v48  ;;  %4589 = vmatpush.bf16.xpose.msra.mxu3 %v4577_v0 }
 0x68e   : > { %4624 = vmatpush.bf16.xpose.msra.mxu1 %v4616_v18 }
 0x68f   : > { %9411 = vmatmul.msk.bf16.vlgmr.msrb.gmra.mxu1 %vm2360_vm10, %v12633_v59 }
 0x691   : > { %v4678_v39 = vpop.permute.xlu1 %4677 }
 0x692   : > { %v4930_v44 = vpop.permute.xlu0 %4929  ;;  %v4685_v8 = vsel %vm2360_vm10, %v4678_v39, 0 }
 0x694   : > { %9413 = vmatmul.msk.bf16.vlgmr.msra.gmra.mxu3 %vm2360_vm10, %v12659_v33  ;;  %9415 = vmatmul.msk.bf16.vlgmr.msra.gmra.mxu2 %vm2360_vm10, %v12635_v21  ;;  %v4832_v33 = vsel %vm2360_vm10, %v12741_v42, 0  ;;  %v4865_v42 = vsel %vm2360_vm10, %v4858_v62, 0 }
 0x695   : > { %4696 = vmatpush.bf16.xpose.msrb.mxu3 %v4688_v25 }
 0x696   : > { %4625 = vmatpush.bf16.xpose.msra.mxu1 %v4613_v30 }
 0x699   : > { %v4716_v5 = vpop.permute.xlu1 %4715 }
 0x69a   : > { %v4724_v10 = vsel %vm2360_vm10, %v4716_v5, 0  ;;  %v4752_v9 = vpop.permute.xlu0 %4751 }
 0x69b   : > { %v4760_v59 = vsel %vm2360_vm10, %v4752_v9, 0 }
 0x69c   : > { %4768 = vmatpush.bf16.xpose.msrb.mxu2 %v4760_v59 }
 0x69d   : > { %4697 = vmatpush.bf16.xpose.msrb.mxu3 %v4685_v8 }
 0x69e   : > { %4732 = vmatpush.bf16.xpose.msrb.mxu1 %v4724_v10 }
 0x69f   : > { %9414 = vmatmul.msk.bf16.vlgmr.msra.gmra.mxu1 %vm2360_vm10, %v12728_v7 }
 0x6a1   : > { %v4714_v6 = vpop.permute.xlu1 %4713 }
 0x6a2   : > { %v4750_v47 = vpop.permute.xlu0 %4749  ;;  %v4721_v17 = vsel %vm2360_vm10, %v4714_v6, 0 }
 0x6a3   : > { %v4757_v21 = vsel %vm2360_vm10, %v4750_v47, 0 }
 0x6a4   : > { %9416 = vmatmul.msk.bf16.vlgmr.msrb.gmra.mxu3 %vm2360_vm10, %v12685_v35  ;;  %4769 = vmatpush.bf16.xpose.msrb.mxu2 %v4757_v21  ;;  %v4829_v35 = vsel %vm2360_vm10, %v12767_v23, 0  ;;  %v4937_v23 = vsel %vm2360_vm10, %v4930_v44, 0  ;;  %v15752_v21 = vld [vmem:[#allocation23_spill] sm:$0xff] }
 0x6a6   : > { %4733 = vmatpush.bf16.xpose.msrb.mxu1 %v4721_v17 }
 0x6a9   : > { %v4788_v7 = vpop.permute.xlu1 %4787 }
 0x6aa   : > { %v4796_v27 = vsel %vm2360_vm10, %v4788_v7, 0  ;;  %v4786_v53 = vpop.permute.xlu0 %4785 }
 0x6ab   : > { %9418 = vmatmul.msk.bf16.vlgmr.msrb.gmra.mxu2 %vm2360_vm10, %v12739_v43  ;;  %4804 = vmatpush.bf16.xpose.msra.mxu3 %v4796_v27  ;;  %v4904_v43 = vsel %vm2360_vm10, %v12795_v50, 0  ;;  %v4901_v50 = vsel %vm2360_vm10, %v12817_v37, 0  ;;  %v3313_v37 = vadd.f32 %v10131_v28, %v12823_v1  ;;  %v15750_v1 = vld [vmem:[#allocation39_spill] sm:$0xff] }
 0x6ac   : > { %4876 = vmatpush.bf16.xpose.msra.mxu2 %v4868_v15 }
 0x6ad   : > { %v13000_v31 = vpack.c.bf16 %v3313_v37, %v3313_v37 }
 0x6ae   : > { %4840 = vmatpush.bf16.xpose.msra.mxu1 %v4832_v33 }
 0x6af   : > { %9417 = vmatmul.msk.bf16.vlgmr.msrb.gmra.mxu1 %vm2360_vm10, %v12730_v61  ;;  %v4793_v61 = vsel %vm2360_vm10, %v4786_v53, 0  ;;  %v13017_v48 = vunpack.c.l.bf16 %v13000_v31 }
 0x6b1   : > { %v3545_v41 = vmul.f32 %v12214_v45, %v13017_v48  ;;  %v3546_v19 = vmul.f32 %v12212_v26, %v13017_v48 }
 0x6b2   : > { %v13038_v6 = vpop.permute.xlu0 %9788 }
 0x6b3   : > { %4805 = vmatpush.bf16.xpose.msra.mxu3 %v4793_v61  ;;  %v3673_v10 = vpack.c.bf16 %v3545_v41, %v3545_v41  ;;  %v3674_v9 = vpack.c.bf16 %v3546_v19, %v3546_v19 }
 0x6b4   : > { %4877 = vmatpush.bf16.xpose.msra.mxu2 %v4865_v42 }
 0x6b5   : > { %v5069_v47 = vunpack.c.l.b16 %v3673_v10  ;;  %v5070_v17 = vunpack.c.l.b16 %v3674_v9  ;;  %v15753_v9 = vld [vmem:[#allocation13_spill] sm:$0xff] }
 0x6b6   : > { %4841 = vmatpush.bf16.xpose.msra.mxu1 %v4829_v35 }
 0x6b7   : > { %v5072_v27 = vpack.c.b16 %v5070_v17, %v5069_v47 }
 0x6ba   : > { %9419 = vmatmul.msk.bf16.vlgmr.msra.gmra.mxu3 %vm2360_vm10, %v12787_v16 }
 0x6bb   : > { %4912 = vmatpush.bf16.xpose.msrb.mxu3 %v4904_v43  ;;  %9421 = vmatmul.msk.bf16.vlgmr.msra.gmra.mxu2 %vm2360_vm10, %v12363_v38  ;;  %v5009_v38 = vsel %vm2360_vm10, %v12815_v22, 0  ;;  %v5294_v22 = vld [vmem:[%s15749_s11 + $0x18] sm:$0xff] }
 0x6bc   : > { %4984 = vmatpush.bf16.xpose.msrb.mxu2 %v4976_v49  ;;  %v13049_v49 = vpop.permute.xlu1 %9793 }
 0x6bd   : > { %v4159_v40 = vpop.f32.mrf.mxu3 }
 0x6be   : > { %4948 = vmatpush.bf16.xpose.msrb.mxu1 %v4940_v11  ;;  %v12993_v58 = vadd.f32 %v12859_v51, %v4159_v40 }
 0x6bf   : > { %9420 = vmatmul.msk.bf16.vlgmr.msra.gmra.mxu1 %vm2360_vm10, %v12338_v60 }
 0x6c0   : > { %v4087_v57 = vpop.f32.mrf.mxu1  ;;  %v5114_v52 = vsel %vm2360_vm10, %v12993_v58, -inf }
 0x6c1   : > { %v12984_v20 = vadd.f32 %v12859_v51, %v4087_v57 }
 0x6c3   : > { %4913 = vmatpush.bf16.xpose.msrb.mxu3 %v4901_v50  ;;  %v5108_v16 = vsel %vm2360_vm10, %v12984_v20, -inf }
 0x6c4   : > { %4985 = vmatpush.bf16.xpose.msrb.mxu2 %v4973_v56  ;;  %5109 = vmax.xlane.f32.xlu0 %v5108_v16 }
 0x6c5   : > { %v4161_v60 = vpop.f32.mrf.mxu3 }
 0x6c6   : > { %4949 = vmatpush.bf16.xpose.msrb.mxu1 %v4937_v23  ;;  %v4123_v3 = vpop.f32.mrf.mxu2 }
 0x6c7   : > { %v12996_v62 = vadd.f32 %v12859_v51, %v4123_v3 }
 0x6c8   : > { %v4089_v4 = vpop.f32.mrf.mxu1 }
 0x6c9   : > { %v5111_v46 = vsel %vm2360_vm10, %v12996_v62, -inf }
 0x6ca   : > { %5112 = vmax.xlane.f32.xlu2 %v5111_v46  ;;  %9422 = vmatmul.msk.bf16.vlgmr.msrb.gmra.mxu3 %vm2360_vm10, %v12387_v2 }
 0x6cb   : > { %5020 = vmatpush.bf16.xpose.msra.mxu3 %v5012_v14  ;;  %9424 = vmatmul.msk.bf16.vlgmr.msrb.gmra.mxu2 %vm2360_vm10, %v15751_v12 }
 0x6cc   : > { %v5101_v32 = vpop.xlane.xlu2 %5100  ;;  %5115 = vmax.xlane.f32.xlu0 %v5114_v52 }
 0x6cd   : > { %v5195_v33 = vsub.f32 %v12871_v54, %v5101_v32 }
 0x6ce   : > { %v4125_v2 = vpop.f32.mrf.mxu2 }
 0x6cf   : > { %9423 = vmatmul.msk.bf16.vlgmr.msrb.gmra.mxu1 %vm2360_vm10, %v15750_v1  ;;  %v4267_v18 = vpop.f32.mrf.mxu3  ;;  %v5227_v35 = vmul.f32 1.442695, %v5195_v33  ;;  %v3543_v33 = vmul.f32 %v15753_v9, %v13017_v48 }
 0x6d0   : > { %v13046_v15 = vadd.f32 %v12859_v51, %v4267_v18 }
 0x6d1   : > { %v4195_v0 = vpop.f32.mrf.mxu1  ;;  %9872 = vpow2.f32 %v5227_v35 }
 0x6d2   : > { %v13026_v25 = vadd.f32 %v12859_v51, %v4195_v0  ;;  %v5123_v53 = vsel %vm2360_vm10, %v13046_v15, -inf }
 0x6d3   : > { %5021 = vmatpush.bf16.xpose.msra.mxu3 %v5009_v38 }
 0x6d4   : > { %v5117_v30 = vsel %vm2360_vm10, %v13026_v25, -inf  ;;  %v5040_v39 = vpop.permute.xlu2 %5039 }
 0x6d5   : > { %5118 = vmax.xlane.f32.xlu1 %v5117_v30  ;;  %v5048_v44 = vsel %vm2360_vm10, %v5040_v39, 0 }
 0x6d6   : > { %v4231_v8 = vpop.f32.mrf.mxu2  ;;  %5056 = vmatpush.bf16.xpose.msra.mxu1 %v5048_v44 }
 0x6d7   : > { %v4269_v5 = vpop.f32.mrf.mxu3  ;;  %v13036_v59 = vadd.f32 %v12859_v51, %v4231_v8  ;;  %v13059_v57 = vpop.eup %9872 }
 0x6d9   : > { %v4197_v45 = vpop.f32.mrf.mxu1  ;;  %v5120_v26 = vsel %vm2360_vm10, %v13036_v59, -inf }
 0x6da   : > { %5121 = vmax.xlane.f32.xlu2 %v5120_v26  ;;  %9425 = vmatmul.msk.bf16.vlgmr.msra.gmra.mxu3 %vm2360_vm10, %v15752_v21  ;;  %v3539_v45 = vmul.f32 %v15753_v9, %v12883_v55  ;;  %v15754_v26 = vld [vmem:[#allocation12_spill] sm:$0xff] }
 0x6db   : > { %5403 = vmatpush.msrb.mxu3 %v5294_v22  ;;  %v3540_v47 = vmul.f32 %v15754_v26, %v12883_v55 }
 0x6dc   : > { %v5107_v14 = vpop.xlane.xlu1 %5106 }
 0x6dd   : > { %5404 = vmatpush.msrb.mxu3 %v5293_v34  ;;  %v5104_v11 = vpop.xlane.xlu0 %5103  ;;  %v5197_v16 = vsub.f32 %v12897_v63, %v5107_v14 }
 0x6de   : > { %v4233_v7 = vpop.f32.mrf.mxu2  ;;  %v5196_v61 = vsub.f32 %v12903_v36, %v5104_v11  ;;  %v3668_v11 = vpack.c.bf16 %v3540_v47, %v3540_v47 }
 0x6df   : > { %5405 = vmatpush.msrb.mxu3 %v5292_v29  ;;  %v5231_v28 = vmul.f32 1.442695, %v5197_v16  ;;  %v3544_v7 = vmul.f32 %v15754_v26, %v13017_v48 }
 0x6e0   : > { %5075 = vrot.lane.b32.xlu0 %v5072_v27, %s10223_s29  ;;  %v5229_v56 = vmul.f32 1.442695, %v5196_v61 }
 0x6e1   : > { %5406 = vmatpush.msrb.mxu3 %v5291_v24  ;;  %v4303_v42 = vpop.f32.mrf.mxu1  ;;  %v3672_v61 = vpack.c.bf16 %v3544_v7, %v3544_v7 }
 0x6e2   : > { %5124 = vmax.xlane.f32.xlu2 %v5123_v53  ;;  %v13055_v54 = vadd.f32 %v12859_v51, %v4303_v42  ;;  %9874 = vpow2.f32 %v5229_v56  ;;  %v3667_v42 = vpack.c.bf16 %v3539_v45, %v3539_v45  ;;  %v3671_v53 = vpack.c.bf16 %v3543_v33, %v3543_v33 }
 0x6e3   : > { %9876 = vpow2.f32 %v5231_v28  ;;  %v5032_v56 = vunpack.c.l.b16 %v3668_v11  ;;  %v5068_v16 = vunpack.c.l.b16 %v3672_v61 }
 0x6e4   : > { %v5126_v40 = vsel %vm2360_vm10, %v13055_v54, -inf }
 0x6e6   : > { %v4339_v43 = vpop.f32.mrf.mxu2 }
 0x6e7   : > { %v4375_v23 = vpop.f32.mrf.mxu3  ;;  %v13083_v32 = vadd.f32 %v12859_v51, %v4339_v43 }
 0x6e8   : > { %v13065_v36 = vadd.f32 %v12859_v51, %v4375_v23  ;;  %v13069_v4 = vpop.eup %9874  ;;  %v5031_v23 = vunpack.c.l.b16 %v3667_v42 }
 0x6e9   : > { %v4305_v50 = vpop.f32.mrf.mxu1  ;;  %v13076_v1 = vpop.eup %9876  ;;  %v5129_v24 = vsel %vm2360_vm10, %v13083_v32, -inf }
 0x6ea   : > { %5127 = vmax.xlane.f32.xlu2 %v5126_v40  ;;  %9428 = vmatmul.msk.f32.vlgmr.msrb.gmra.mxu3 %vm2360_vm10, %v13059_v57  ;;  %v5132_v3 = vsel %vm2360_vm10, %v13065_v36, -inf  ;;  %v5067_v40 = vunpack.c.l.b16 %v3671_v53 }
 0x6ee   : > { %v4341_v60 = vpop.f32.mrf.mxu2 }
 0x6ef   : > { %v4377_v38 = vpop.f32.mrf.mxu3 }
 0x6f0   : > { %v5035_v38 = vpack.c.b16 %v5032_v56, %v5031_v23 }
 0x6f1   : > { %v4411_v37 = vpop.f32.mrf.mxu1 }
 0x6f2   : > { %5133 = vmax.xlane.f32.xlu2 %v5132_v3  ;;  %9429 = vmatmul.msk.f32.gmra.mxu3 %vm2360_vm10, %v13069_v4  ;;  %v13098_v30 = vadd.f32 %v12859_v51, %v4411_v37  ;;  %v5071_v37 = vpack.c.b16 %v5068_v16, %v5067_v40 }
 0x6f4   : > { %v5135_v5 = vsel %vm2360_vm10, %v13098_v30, -inf }
 0x6f7   : > { %v4447_v46 = vpop.f32.mrf.mxu2 }
 0x6f8   : > { %v13074_v63 = vadd.f32 %v12859_v51, %v4447_v46 }
 0x6f9   : > { %v4413_v22 = vpop.f32.mrf.mxu1 }
 0x6fa   : > { %v5138_v52 = vsel %vm2360_vm10, %v13074_v63, -inf  ;;  %9430 = vmatmul.msk.f32.gmra.mxu3 %vm2360_vm10, %v13076_v1 }
 0x6fb   : > { %5139 = vmax.xlane.f32.xlu2 %v5138_v52 }
 0x6ff   : > { %v4449_v12 = vpop.f32.mrf.mxu2 }
 0x700   : > { %v13130_v12 = vunpack.i.h.bf16 %v13049_v49 }
 0x707   : > { %v4483_v34 = vpop.f32.mrf.mxu3  ;;  %v4555_v2 = vpop.f32.mrf.mxu2 }
 0x708   : > { %v13086_v18 = vadd.f32 %v12859_v51, %v4555_v2  ;;  %v13103_v10 = vadd.f32 %v12859_v51, %v4483_v34  ;;  %v13133_v34 = vunpack.i.l.bf16 %v13049_v49 }
 0x70a   : > { %5130 = vmax.xlane.f32.xlu0 %v5129_v24  ;;  %v5147_v41 = vsel %vm2360_vm10, %v13086_v18, -inf  ;;  %v5141_v35 = vsel %vm2360_vm10, %v13103_v10, -inf }
 0x70b   : > { %5148 = vmax.xlane.f32.xlu2 %v5147_v41  ;;  %v15755_v41 = vld [vmem:[#allocation11_spill] sm:$0xff] }
 0x70c   : > { %v4519_v29 = vpop.f32.mrf.mxu1 }
 0x70d   : > { %v13089_v0 = vadd.f32 %v12859_v51, %v4519_v29 }
 0x70f   : > { %v5144_v19 = vsel %vm2360_vm10, %v13089_v0, -inf  ;;  %v4485_v39 = vpop.f32.mrf.mxu3  ;;  %v4557_v44 = vpop.f32.mrf.mxu2 }
 0x710   : > { %5145 = vmax.xlane.f32.xlu1 %v5144_v19  ;;  %v3687_v19 = vmul.f32 %v13133_v34, %v15755_v41  ;;  %v3688_v39 = vmul.f32 %v13130_v12, %v15755_v41 }
 0x712   : > { %5136 = vmax.xlane.f32.xlu0 %v5135_v5  ;;  %v3816_v5 = vpack.c.bf16 %v3688_v39, %v3688_v39 }
 0x714   : > { %v4521_v8 = vpop.f32.mrf.mxu1 }
 0x715   : > { %v3815_v8 = vpack.c.bf16 %v3687_v19, %v3687_v19 }
 0x717   : > { %v4591_v17 = vpop.f32.mrf.mxu3  ;;  %v4663_v21 = vpop.f32.mrf.mxu2  ;;  %v5636_v49 = vunpack.c.l.b16 %v3815_v8 }
 0x718   : > { %v13118_v43 = vadd.f32 %v12859_v51, %v4591_v17  ;;  %v5637_v17 = vunpack.c.l.b16 %v3816_v5 }
 0x71a   : > { %5142 = vmax.xlane.f32.xlu0 %v5141_v35  ;;  %v5150_v28 = vsel %vm2360_vm10, %v13118_v43, -inf  ;;  %v5640_v42 = vpack.c.b16 %v5637_v17, %v5636_v49 }
 0x71c   : > { %v13113_v27 = vpop.f32.mrf.mxu1 }
 0x71f   : > { %v4593_v50 = vpop.f32.mrf.mxu3  ;;  %v4665_v14 = vpop.f32.mrf.mxu2 }
 0x722   : > { %5151 = vmax.xlane.f32.xlu0 %v5150_v28  ;;  %v13162_v28 = vadd.f32 %v12859_v51, %v13113_v27 }
 0x723   : > { %5037 = vrot.lane.b32.xlu2 %v5035_v38, %s10223_s29 }
 0x724   : > { %v4629_v60 = vpop.f32.mrf.mxu1 }
 0x727   : > { %v4699_v3 = vpop.f32.mrf.mxu3 }
 0x729   : > { %5073 = vrot.lane.b32.xlu1 %v5071_v37, %s10223_s29 }
 0x72c   : > { %v4735_v46 = vpop.f32.mrf.mxu1 }
 0x72d   : > { %v13125_v22 = vadd.f32 %v12859_v51, %v4735_v46 }
 0x72e   : > { %v4771_v29 = vpop.f32.mrf.mxu2 }
 0x72f   : > { %v5162_v52 = vsel %vm2360_vm10, %v13125_v22, -inf  ;;  %v4701_v2 = vpop.f32.mrf.mxu3 }
 0x730   : > { %5163 = vmax.xlane.f32.xlu0 %v5162_v52  ;;  %v5153_v52 = vsel %vm2360_vm10, %v13162_v28, -inf  ;;  %v13174_v2 = vadd.f32 %v12859_v51, %v4771_v29 }
 0x732   : > { %v5165_v5 = vsel %vm2360_vm10, %v13174_v2, -inf }
 0x734   : > { %v4737_v24 = vpop.f32.mrf.mxu1 }
 0x736   : > { %v4773_v44 = vpop.f32.mrf.mxu2 }
 0x737   : > { %v5110_v9 = vpop.xlane.xlu0 %5109  ;;  %v13181_v44 = vadd.f32 %v12859_v51, %v4699_v3 }
 0x738   : > { %v5198_v45 = vsub.f32 %v12984_v20, %v5110_v9 }
 0x73a   : > { %v5233_v47 = vmul.f32 1.442695, %v5198_v45  ;;  %v5159_v45 = vsel %vm2360_vm10, %v13181_v44, -inf }
 0x73c   : > { %v13140_v26 = vpop.f32.mrf.mxu1  ;;  %9878 = vpow2.f32 %v5233_v47 }
 0x73d   : > { %v5113_v33 = vpop.xlane.xlu2 %5112  ;;  %v13143_v35 = vpop.f32.mrf.mxu3 }
 0x73e   : > { %v5199_v7 = vsub.f32 %v12996_v62, %v5113_v33  ;;  %v13145_v11 = vpop.f32.mrf.mxu2  ;;  %v13154_v62 = vadd.f32 %v12859_v51, %v4663_v21  ;;  %v13194_v33 = vunpack.i.h.bf16 %v13038_v6 }
 0x73f   : > { %v5116_v23 = vpop.xlane.xlu0 %5115 }
 0x740   : > { %v5235_v53 = vmul.f32 1.442695, %v5199_v7  ;;  %v5200_v56 = vsub.f32 %v12993_v58, %v5116_v23  ;;  %v5156_v37 = vsel %vm2360_vm10, %v13154_v62, -inf  ;;  %v13197_v7 = vunpack.i.l.bf16 %v13038_v6 }
 0x742   : > { %v13148_v20 = vpop.eup %9878  ;;  %9880 = vpow2.f32 %v5235_v53  ;;  %v5237_v40 = vmul.f32 1.442695, %v5200_v56  ;;  %v3689_v53 = vmul.f32 %v13197_v7, %v15755_v41 }
 0x743   : > { %9431 = vmatmul.msk.f32.gmra.mxu3 %vm2360_vm10, %v13148_v20 }
 0x744   : > { %v4845_v61 = vpop.f32.mrf.mxu1  ;;  %5642 = vrot.lane.b32.xlu0 %v5640_v42, %s10224_s8  ;;  %9882 = vpow2.f32 %v5237_v40  ;;  %v3817_v6 = vpack.c.bf16 %v3689_v53, %v3689_v53  ;;  %v15757_v40 = vld [vmem:[#allocation15_spill] sm:$0xff] }
 0x745   : > { %v4809_v50 = vpop.f32.mrf.mxu3  ;;  %v3690_v61 = vmul.f32 %v13194_v33, %v15755_v41  ;;  %v13219_v41 = vadd.f32 %v12859_v51, %v13140_v26  ;;  %v13230_v26 = vadd.f32 %v12859_v51, %v13145_v11  ;;  %v3695_v53 = vmul.f32 %v13133_v34, %v15757_v40 }
 0x746   : > { %v4881_v14 = vpop.f32.mrf.mxu2  ;;  %v3696_v11 = vmul.f32 %v13130_v12, %v15757_v40 }
 0x747   : > { %v3818_v14 = vpack.c.bf16 %v3690_v61, %v3690_v61  ;;  %v3823_v61 = vpack.c.bf16 %v3695_v53, %v3695_v53 }
 0x748   : > { %v5119_v60 = vpop.xlane.xlu1 %5118  ;;  %v13158_v38 = vpop.eup %9880 }
 0x749   : > { %v5201_v58 = vsub.f32 %v13026_v25, %v5119_v60  ;;  %v3697_v60 = vmul.f32 %v13197_v7, %v15757_v40 }
 0x74a   : > { %v13178_v39 = vpop.eup %9882 }
 0x74b   : > { %9432 = vmatmul.msk.f32.gmra.mxu3 %vm2360_vm10, %v13158_v38  ;;  %v5239_v24 = vmul.f32 1.442695, %v5201_v58 }
 0x74c   : > { %v13156_v16 = vpop.f32.mrf.mxu1  ;;  %5157 = vmax.xlane.f32.xlu2 %v5156_v37 }
 0x74d   : > { %v5122_v21 = vpop.xlane.xlu2 %5121  ;;  %v13169_v46 = vpop.f32.mrf.mxu3  ;;  %9884 = vpow2.f32 %v5239_v24  ;;  %v3825_v24 = vpack.c.bf16 %v3697_v60, %v3697_v60 }
 0x74e   : > { %v13176_v27 = vpop.f32.mrf.mxu2  ;;  %v5202_v29 = vsub.f32 %v13036_v59, %v5122_v21  ;;  %v5638_v21 = vunpack.c.l.b16 %v3817_v6 }
 0x750   : > { %v5241_v49 = vmul.f32 1.442695, %v5202_v29 }
 0x752   : > { %v5076_v25 = vpop.permute.xlu0 %5075  ;;  %9886 = vpow2.f32 %v5241_v49 }
 0x753   : > { %5154 = vmax.xlane.f32.xlu1 %v5153_v52  ;;  %v5084_v8 = vsel %vm2360_vm10, %v5076_v25, 0  ;;  %9433 = vmatmul.msk.f32.gmra.mxu3 %vm2360_vm10, %v13178_v39  ;;  %v13191_v17 = vpop.eup %9884  ;;  %v5639_v52 = vunpack.c.l.b16 %v3818_v14 }
 0x754   : > { %v4953_v19 = vpop.f32.mrf.mxu1  ;;  %5166 = vmax.xlane.f32.xlu2 %v5165_v5  ;;  %5092 = vmatpush.bf16.xpose.msra.mxu2 %v5084_v8  ;;  %v5171_v8 = vsel %vm2360_vm10, %v13219_v41, -inf }
 0x755   : > { %v4917_v9 = vpop.f32.mrf.mxu3  ;;  %v5125_v3 = vpop.xlane.xlu2 %5124  ;;  %v5641_v29 = vpack.c.b16 %v5639_v52, %v5638_v21 }
 0x756   : > { %v4989_v47 = vpop.f32.mrf.mxu2  ;;  %v5203_v59 = vsub.f32 %v13046_v15, %v5125_v3  ;;  %v3698_v15 = vmul.f32 %v13194_v33, %v15757_v40  ;;  %v5702_v9 = vunpack.c.l.b16 %v3825_v24 }
 0x757   : > { %v5174_v47 = vsel %vm2360_vm10, %v13230_v26, -inf }
 0x758   : > { %v5243_v23 = vmul.f32 1.442695, %v5203_v59  ;;  %v13208_v50 = vpop.eup %9886  ;;  %v3826_v19 = vpack.c.bf16 %v3698_v15, %v3698_v15  ;;  %v5700_v15 = vunpack.c.l.b16 %v3823_v61 }
 0x759   : > { %15756 = vst [vmem:[#allocation39_spill] sm:$0xff] %v13208_v50 }
 0x75a   : > { %9888 = vpow2.f32 %v5243_v23  ;;  %v3824_v23 = vpack.c.bf16 %v3696_v11, %v3696_v11  ;;  %v15760_v11 = vld [vmem:[#allocation24_spill] sm:$0xff] }
 0x75b   : > { %5160 = vmax.xlane.f32.xlu1 %v5159_v45  ;;  %9434 = vmatmul.msk.f32.gmra.mxu3 %vm2360_vm10, %v13191_v17  ;;  %v5703_v45 = vunpack.c.l.b16 %v3826_v19  ;;  %v3711_v61 = vmul.f32 %v13133_v34, %v15760_v11 }
 0x75d   : > { %v13202_v42 = vpop.f32.mrf.mxu3  ;;  %v5128_v56 = vpop.xlane.xlu2 %5127  ;;  %v5705_v3 = vpack.c.b16 %v5703_v45, %v5702_v9  ;;  %v13260_v9 = vadd.f32 %v12859_v51, %v13176_v27 }
 0x75e   : > { %v5204_v37 = vsub.f32 %v13055_v54, %v5128_v56 }
 0x760   : > { %v5245_v25 = vmul.f32 1.442695, %v5204_v37  ;;  %v13223_v5 = vpop.eup %9888  ;;  %v5701_v37 = vunpack.c.l.b16 %v3824_v23  ;;  %v3712_v23 = vmul.f32 %v13130_v12, %v15760_v11 }
 0x762   : > { %9890 = vpow2.f32 %v5245_v25  ;;  %v5704_v21 = vpack.c.b16 %v5701_v37, %v5700_v15  ;;  %v15762_v15 = vld [vmem:[#allocation16_spill] sm:$0xff] }
 0x763   : > { %9435 = vmatmul.msk.f32.gmra.mxu3 %vm2360_vm10, %v13208_v50  ;;  %v3705_v37 = vmul.f32 %v13197_v7, %v15762_v15 }
 0x765   : > { %v5025_v58 = vpop.f32.mrf.mxu3  ;;  %v5134_v54 = vpop.xlane.xlu2 %5133 }
 0x766   : > { %v5206_v58 = vsub.f32 %v13065_v36, %v5134_v54  ;;  %v13269_v54 = vadd.f32 %v12859_v51, %v13143_v35 }
 0x768   : > { %v13235_v49 = vpop.eup %9890  ;;  %v5249_v52 = vmul.f32 1.442695, %v5206_v58  ;;  %v3706_v58 = vmul.f32 %v13194_v33, %v15762_v15 }
 0x769   : > { %15758 = vst [vmem:[#allocation32_spill] sm:$0xff] %v13235_v49 }
 0x76b   : > { %9436 = vmatmul.msk.f32.gmra.mxu3 %vm2360_vm10, %v13223_v5 }
 0x76c   : > { %5644 = vrot.lane.b32.xlu2 %v5641_v29, %s10224_s8 }
 0x76e   : > { %5172 = vmax.xlane.f32.xlu0 %v5171_v8  ;;  %v5140_v59 = vpop.xlane.xlu2 %5139 }
 0x76f   : > { %v5208_v45 = vsub.f32 %v13074_v63, %v5140_v59  ;;  %v5168_v63 = vsel %vm2360_vm10, %v13269_v54, -inf }
 0x773   : > { %9437 = vmatmul.msk.f32.gmra.mxu3 %vm2360_vm10, %v13235_v49 }
 0x774   : > { %5708 = vrot.lane.b32.xlu1 %v5705_v3, %s10224_s8 }
 0x776   : > { %5175 = vmax.xlane.f32.xlu0 %v5174_v47 }
 0x77d   : > { %v5131_v56 = vpop.xlane.xlu0 %5130 }
 0x77e   : > { %v13243_v6 = vpop.xlane.xlu2 %5148  ;;  %v5205_v14 = vsub.f32 %v13083_v32, %v5131_v56 }
 0x780   : > { %v5247_v60 = vmul.f32 1.442695, %v5205_v14 }
 0x782   : > { %9892 = vpow2.f32 %v5247_v60  ;;  %v3840_v60 = vpack.c.bf16 %v3712_v23, %v3712_v23 }
 0x783   : > { %9894 = vpow2.f32 %v5249_v52  ;;  %v5146_v36 = vpop.xlane.xlu1 %5145  ;;  %v15763_v52 = vld [vmem:[#allocation21_spill] sm:$0xff] }
 0x784   : > { %v5210_v14 = vsub.f32 %v13089_v0, %v5146_v36  ;;  %v3833_v0 = vpack.c.bf16 %v3705_v37, %v3705_v37  ;;  %v5211_v36 = vsub.f32 %v13086_v18, %v13243_v6 }
 0x785   : > { %v5137_v19 = vpop.xlane.xlu0 %5136 }
 0x786   : > { %v5038_v24 = vpop.permute.xlu2 %5037  ;;  %v5207_v32 = vsub.f32 %v13098_v30, %v5137_v19  ;;  %v5183_v30 = vsel %vm2360_vm10, %v13260_v9, -inf }
 0x787   : > { %v5045_v40 = vsel %vm2360_vm10, %v5038_v24, 0  ;;  %v3701_v24 = vmul.f32 %v13197_v7, %v15763_v52 }
 0x788   : > { %v13249_v25 = vpop.eup %9892  ;;  %5057 = vmatpush.bf16.xpose.msra.mxu1 %v5045_v40  ;;  %v5251_v8 = vmul.f32 1.442695, %v5207_v32  ;;  %v3702_v40 = vmul.f32 %v13194_v33, %v15763_v52 }
 0x789   : > { %9438 = vmatmul.msk.f32.gmra.mxu3 %vm2360_vm10, %v13249_v25  ;;  %v13256_v29 = vpop.eup %9894 }
 0x78a   : > { %5706 = vrot.lane.b32.xlu0 %v5704_v21, %s10224_s8  ;;  %9896 = vpow2.f32 %v5251_v8  ;;  %v5257_v21 = vmul.f32 1.442695, %v5210_v14  ;;  %v3834_v8 = vpack.c.bf16 %v3706_v58, %v3706_v58 }
 0x78d   : > { %v5143_v3 = vpop.xlane.xlu0 %5142 }
 0x78e   : > { %v5209_v59 = vsub.f32 %v13103_v10, %v5143_v3  ;;  %v3839_v10 = vpack.c.bf16 %v3711_v61, %v3711_v61  ;;  %v3830_v3 = vpack.c.bf16 %v3702_v40, %v3702_v40 }
 0x78f   : > { %9426 = vmatmul.msk.bf16.vlgmr.msra.gmra.mxu1 %vm2360_vm10, %v12879_v13  ;;  %v5253_v13 = vmul.f32 1.442695, %v5208_v45  ;;  %v3829_v45 = vpack.c.bf16 %v3701_v24, %v3701_v24 }
 0x790   : > { %v13271_v53 = vpop.eup %9896  ;;  %v5255_v35 = vmul.f32 1.442695, %v5209_v59  ;;  %v5828_v19 = vunpack.c.l.b16 %v3839_v10  ;;  %v3704_v59 = vmul.f32 %v13130_v12, %v15762_v15 }
 0x791   : > { %9439 = vmatmul.msk.f32.gmra.mxu3 %vm2360_vm10, %v13256_v29  ;;  %15759 = vst [vmem:[#allocation23_spill] sm:$0xff] %v13271_v53  ;;  %9898 = vpow2.f32 %v5253_v13  ;;  %v5734_v18 = vunpack.c.l.b16 %v3829_v45  ;;  %v15766_v45 = vld [vmem:[#allocation14_spill] sm:$0xff] }
 0x792   : > { %9900 = vpow2.f32 %v5255_v35  ;;  %v5259_v35 = vmul.f32 1.442695, %v5211_v36  ;;  %v3832_v37 = vpack.c.bf16 %v3704_v59, %v3704_v59 }
 0x793   : > { %9902 = vpow2.f32 %v5257_v21 }
 0x794   : > { %9904 = vpow2.f32 %v5259_v35  ;;  %v5765_v40 = vunpack.c.l.b16 %v3832_v37 }
 0x795   : > { %5184 = vmax.xlane.f32.xlu2 %v5183_v30  ;;  %v13306_v30 = vadd.f32 %v12859_v51, %v13202_v42  ;;  %v5152_v6 = vpop.xlane.xlu0 %5151  ;;  %v5735_v51 = vunpack.c.l.b16 %v3830_v3  ;;  %v15764_v42 = vld [vmem:[#allocation28_spill] sm:$0xff] }
 0x796   : > { %v3731_v23 = vmul.f32 %v13133_v34, %v15764_v42  ;;  %v3732_v14 = vmul.f32 %v13130_v12, %v15764_v42  ;;  %v5212_v58 = vsub.f32 %v13118_v43, %v5152_v6  ;;  %v3692_v43 = vmul.f32 %v13130_v12, %v15766_v45 }
 0x797   : > { %v13283_v56 = vpop.eup %9898  ;;  %v5186_v61 = vsel %vm2360_vm10, %v13306_v30, -inf  ;;  %v5737_v21 = vpack.c.b16 %v5735_v51, %v5734_v18 }
 0x798   : > { %15761 = vst [vmem:[#allocation13_spill] sm:$0xff] %v13283_v56  ;;  %v13298_v32 = vpop.eup %9900  ;;  %v3859_v24 = vpack.c.bf16 %v3731_v23, %v3731_v23  ;;  %v5261_v36 = vmul.f32 1.442695, %v5212_v58  ;;  %v3820_v51 = vpack.c.bf16 %v3692_v43, %v3692_v43  ;;  %v3733_v58 = vmul.f32 %v13197_v7, %v15764_v42 }
 0x799   : > { %9440 = vmatmul.msk.f32.gmra.mxu3 %vm2360_vm10, %v13271_v53  ;;  %v13319_v10 = vpop.eup %9902 }
 0x79a   : > { %15765 = vst [vmem:[#allocation12_spill] sm:$0xff] %v13319_v10  ;;  %v5988_v3 = vunpack.c.l.b16 %v3859_v24  ;;  %v13338_v35 = vpop.eup %9904  ;;  %9906 = vpow2.f32 %v5261_v36  ;;  %v5669_v24 = vunpack.c.l.b16 %v3820_v51 }
 0x79b   : > { %v5074_v47 = vpop.permute.xlu1 %5073  ;;  %15768 = vst [vmem:[#allocation11_spill] sm:$0xff] %v13338_v35 }
 0x79c   : > { %v5081_v27 = vsel %vm2360_vm10, %v5074_v47, 0  ;;  %v5766_v47 = vunpack.c.l.b16 %v3833_v0  ;;  %v3713_v0 = vmul.f32 %v13197_v7, %v15760_v11 }
 0x79d   : > { %5093 = vmatpush.bf16.xpose.msra.mxu2 %v5081_v27  ;;  %v5767_v27 = vunpack.c.l.b16 %v3834_v8  ;;  %v3714_v8 = vmul.f32 %v13194_v33, %v15760_v11 }
 0x79e   : > { %5169 = vmax.xlane.f32.xlu1 %v5168_v63  ;;  %v3703_v63 = vmul.f32 %v13133_v34, %v15762_v15  ;;  %v3841_v18 = vpack.c.bf16 %v3713_v0, %v3713_v0 }
 0x79f   : > { %v3842_v6 = vpack.c.bf16 %v3714_v8, %v3714_v8 }
 0x7a0   : > { %v3831_v15 = vpack.c.bf16 %v3703_v63, %v3703_v63  ;;  %v13352_v43 = vpop.eup %9906 }
 0x7a1   : > { %9441 = vmatmul.msk.f32.gmra.mxu3 %vm2360_vm10, %v13283_v56  ;;  %v5831_v37 = vunpack.c.l.b16 %v3842_v6  ;;  %15770 = vst [vmem:[#allocation15_spill] sm:$0xff] %v13352_v43 }
 0x7a4   : > { %9427 = vmatmul.msk.bf16.vlgmr.msra.gmra.mxu2 %vm2360_vm10, %v13000_v31  ;;  %v5829_v31 = vunpack.c.l.b16 %v3840_v60  ;;  %v5769_v60 = vpack.c.b16 %v5767_v27, %v5766_v47  ;;  %v15767_v27 = vld [vmem:[#allocation33_spill] sm:$0xff] }
 0x7a5   : > { %v3745_v63 = vmul.f32 %v13197_v7, %v15767_v27  ;;  %v3746_v59 = vmul.f32 %v13194_v33, %v15767_v27 }
 0x7a6   : > { %v5832_v13 = vpack.c.b16 %v5829_v31, %v5828_v19  ;;  %v3860_v19 = vpack.c.bf16 %v3732_v14, %v3732_v14  ;;  %v5764_v31 = vunpack.c.l.b16 %v3831_v15  ;;  %v5830_v15 = vunpack.c.l.b16 %v3841_v18 }
 0x7a7   : > { %v3873_v14 = vpack.c.bf16 %v3745_v63, %v3745_v63  ;;  %v3861_v63 = vpack.c.bf16 %v3733_v58, %v3733_v58 }
 0x7a8   : > { %v5989_v47 = vunpack.c.l.b16 %v3860_v19  ;;  %v5768_v11 = vpack.c.b16 %v5765_v40, %v5764_v31  ;;  %v3734_v19 = vmul.f32 %v13194_v33, %v15764_v42  ;;  %v15769_v31 = vld [vmem:[#allocation26_spill] sm:$0xff] }
 0x7a9   : > { %9442 = vmatmul.msk.f32.gmra.mxu3 %vm2360_vm10, %v13298_v32  ;;  %v3715_v40 = vmul.f32 %v13133_v34, %v15769_v31  ;;  %v6086_v8 = vunpack.c.l.b16 %v3873_v14 }
 0x7aa   : > { %v5992_v23 = vpack.c.b16 %v5989_v47, %v5988_v3  ;;  %v5408_v3 = vpop.f32.mrf.mxu3  ;;  %v5833_v47 = vpack.c.b16 %v5831_v37, %v5830_v15  ;;  %v3862_v42 = vpack.c.bf16 %v3734_v19, %v3734_v19 }
 0x7ab   : > { %v3843_v18 = vpack.c.bf16 %v3715_v40, %v3715_v40 }
 0x7ac   : > { %v5991_v37 = vunpack.c.l.b16 %v3862_v42 }
 0x7ad   : > { %5834 = vrot.lane.b32.xlu2 %v5832_v13, %s10224_s8  ;;  %v3691_v13 = vmul.f32 %v13133_v34, %v15766_v45  ;;  %v5860_v58 = vunpack.c.l.b16 %v3843_v18 }
 0x7b1   : > { %9443 = vmatmul.msk.f32.gmra.mxu3 %vm2360_vm10, %v13319_v10 }
 0x7b4   : > { %5187 = vmax.xlane.f32.xlu0 %v5186_v61  ;;  %v3819_v61 = vpack.c.bf16 %v3691_v13, %v3691_v13  ;;  %v3716_v13 = vmul.f32 %v13130_v12, %v15769_v31 }
 0x7b5   : > { %5740 = vrot.lane.b32.xlu2 %v5737_v21, %s10224_s8 }
 0x7b6   : > { %v5668_v21 = vunpack.c.l.b16 %v3819_v61  ;;  %v3844_v51 = vpack.c.bf16 %v3716_v13, %v3716_v13 }
 0x7b7   : > { %5772 = vrot.lane.b32.xlu1 %v5769_v60, %s10224_s8  ;;  %v3874_v60 = vpack.c.bf16 %v3746_v59, %v3746_v59 }
 0x7b9   : > { %9444 = vmatmul.msk.f32.gmra.mxu3 %vm2360_vm10, %v13338_v35  ;;  %v6087_v36 = vunpack.c.l.b16 %v3874_v60  ;;  %v5990_v60 = vunpack.c.l.b16 %v3861_v63  ;;  %v15771_v35 = vld [vmem:[#allocation17_spill] sm:$0xff]  ;;  %v5164_v63 = vpop.xlane.xlu0 %5163 }
 0x7ba   : > { %v3707_v15 = vmul.f32 %v13133_v34, %v15771_v35 }
 0x7bb   : > { %v6089_v61 = vpack.c.b16 %v6087_v36, %v6086_v8  ;;  %v5861_v8 = vunpack.c.l.b16 %v3844_v51 }
 0x7bc   : > { %v3835_v13 = vpack.c.bf16 %v3707_v15, %v3707_v15 }
 0x7bd   : > { %5994 = vrot.lane.b32.xlu2 %v5992_v23, %s10224_s8  ;;  %v5504_v23 = vadd.f32 1e-20, %v5408_v3  ;;  %v5993_v3 = vpack.c.b16 %v5991_v37, %v5990_v60  ;;  %v15774_v60 = vld [vmem:[#allocation40_spill] sm:$0xff] }
 0x7be   : > { %v3767_v15 = vmul.f32 %v13133_v34, %v15774_v60  ;;  %v3768_v37 = vmul.f32 %v13130_v12, %v15774_v60 }
 0x7bf   : > { %5770 = vrot.lane.b32.xlu1 %v5768_v11, %s10224_s8  ;;  %v5158_v0 = vpop.xlane.xlu2 %5157  ;;  %v5672_v11 = vpack.c.b16 %v5669_v24, %v5668_v21  ;;  %v3708_v21 = vmul.f32 %v13130_v12, %v15771_v35 }
 0x7c0   : > { %v5214_v19 = vsub.f32 %v13154_v62, %v5158_v0  ;;  %v5796_v0 = vunpack.c.l.b16 %v3835_v13 }
 0x7c1   : > { %9445 = vmatmul.msk.f32.gmra.mxu3 %vm2360_vm10, %v13352_v43 }
 0x7c5   : > { %6092 = vrot.lane.b32.xlu2 %v6089_v61, %s10224_s8  ;;  %v3717_v61 = vmul.f32 %v13197_v7, %v15769_v31 }
 0x7c6   : > { %v5155_v59 = vpop.xlane.xlu1 %5154 }
 0x7c7   : > { %v5213_v6 = vsub.f32 %v13162_v28, %v5155_v59  ;;  %5836 = vrot.lane.b32.xlu1 %v5833_v47, %s10224_s8  ;;  %v15772_v28 = vld [vmem:[#allocation29_spill] sm:$0xff]  ;;  %v13367_v40 = vpop.xlane.xlu2 %5166  ;;  %v3836_v47 = vpack.c.bf16 %v3708_v21, %v3708_v21  ;;  %v5265_v59 = vmul.f32 1.442695, %v5214_v19 }
 0x7c8   : > { %5674 = vrot.lane.b32.xlu0 %v5672_v11, %s10224_s8  ;;  %v3725_v24 = vmul.f32 %v13197_v7, %v15772_v28  ;;  %v3726_v36 = vmul.f32 %v13194_v33, %v15772_v28  ;;  %v5864_v11 = vpack.c.b16 %v5861_v8, %v5860_v58 }
 0x7c9   : > { %v5263_v14 = vmul.f32 1.442695, %v5213_v6 }
 0x7ca   : > { %v3853_v42 = vpack.c.bf16 %v3725_v24, %v3725_v24  ;;  %v3854_v18 = vpack.c.bf16 %v3726_v36, %v3726_v36  ;;  %v3845_v36 = vpack.c.bf16 %v3717_v61, %v3717_v61 }
 0x7cb   : > { %9908 = vpow2.f32 %v5263_v14  ;;  %v3718_v14 = vmul.f32 %v13194_v33, %v15769_v31  ;;  %v3896_v31 = vpack.c.bf16 %v3768_v37, %v3768_v37 }
 0x7cc   : > { %9910 = vrcp.f32 %v5504_v23  ;;  %v5797_v23 = vunpack.c.l.b16 %v3836_v47  ;;  %v5926_v24 = vunpack.c.l.b16 %v3853_v42  ;;  %v5927_v19 = vunpack.c.l.b16 %v3854_v18  ;;  %v15776_v18 = vld [vmem:[#allocation38_spill] sm:$0xff] }
 0x7cd   : > { %5866 = vrot.lane.b32.xlu2 %v5864_v11, %s10224_s8  ;;  %9912 = vpow2.f32 %v5265_v59  ;;  %v3895_v47 = vpack.c.bf16 %v3767_v15, %v3767_v15  ;;  %v5643_v11 = vpop.permute.xlu0 %5642  ;;  %v5862_v42 = vunpack.c.l.b16 %v3845_v36  ;;  %v6277_v61 = vunpack.c.l.b16 %v3896_v31  ;;  %v15779_v31 = vld [vmem:[#allocation27_spill] sm:$0xff] }
 0x7ce   : > { %v5161_v6 = vpop.xlane.xlu1 %5160  ;;  %v5800_v13 = vpack.c.b16 %v5797_v23, %v5796_v0  ;;  %v5216_v23 = vsub.f32 %v13125_v22, %v5164_v63  ;;  %v3769_v63 = vmul.f32 %v13197_v7, %v15774_v60 }
 0x7cf   : > { %v5215_v58 = vsub.f32 %v13181_v44, %v5161_v6  ;;  %v5645_v21 = vpop.permute.xlu2 %5644  ;;  %v6276_v0 = vunpack.c.l.b16 %v3895_v47  ;;  %v3770_v47 = vmul.f32 %v13194_v33, %v15774_v60 }
 0x7d0   : > { %5996 = vrot.lane.b32.xlu0 %v5993_v3, %s10224_s8  ;;  %5657 = vmatpush.bf16.msrb.mxu1 %v5645_v21  ;;  %v3846_v3 = vpack.c.bf16 %v3718_v14, %v3718_v14  ;;  %v15777_v14 = vld [vmem:[#allocation45_spill] sm:$0xff] }
 0x7d1   : > { %v13372_v62 = vpop.eup %9908  ;;  %v5267_v56 = vmul.f32 1.442695, %v5215_v58  ;;  %v3782_v15 = vmul.f32 %v13194_v33, %v15777_v14 }
 0x7d2   : > { %15773 = vst [vmem:[#allocation24_spill] sm:$0xff] %v13372_v62  ;;  %v9911_v51 = vpop.eup %9910  ;;  %9446 = vmatmul.msk.f32.gmra.mxu3 %vm2360_vm10, %v13372_v62  ;;  %v5929_v62 = vpack.c.b16 %v5927_v19, %v5926_v24  ;;  %v5863_v6 = vunpack.c.l.b16 %v3846_v3  ;;  %v5269_v24 = vmul.f32 1.442695, %v5216_v23  ;;  %v6280_v19 = vpack.c.b16 %v6277_v61, %v6276_v0 }
 0x7d3   : > { %v5568_v8 = vmul.f32 %v9911_v51, %v13059_v57  ;;  %v13388_v59 = vpop.eup %9912  ;;  %v3755_v57 = vmul.f32 %v13133_v34, %v15776_v18  ;;  %v3756_v51 = vmul.f32 %v13130_v12, %v15776_v18  ;;  %9914 = vpow2.f32 %v5267_v56 }
 0x7d4   : > { %5658 = vmatpush.bf16.msrb.mxu1 %v5643_v11  ;;  %15775 = vst [vmem:[#allocation16_spill] sm:$0xff] %v13388_v59  ;;  %v5865_v58 = vpack.c.b16 %v5863_v6, %v5862_v42  ;;  %v3910_v36 = vpack.c.bf16 %v3782_v15, %v3782_v15  ;;  %v3727_v11 = vmul.f32 %v13133_v34, %v15779_v31  ;;  %9916 = vpow2.f32 %v5269_v24 }
 0x7d5   : > { %v5600_v44 = vpack.c.bf16 %v5568_v8, %v5568_v8  ;;  %5932 = vrot.lane.b32.xlu2 %v5929_v62, %s10224_s8  ;;  %v3781_v62 = vmul.f32 %v13197_v7, %v15777_v14  ;;  %v3883_v37 = vpack.c.bf16 %v3755_v57, %v3755_v57  ;;  %v3884_v21 = vpack.c.bf16 %v3756_v51, %v3756_v51 }
 0x7d6   : > { %v5217_v42 = vsub.f32 %v13174_v2, %v13367_v40  ;;  %v6375_v6 = vunpack.c.l.b16 %v3910_v36  ;;  %v3897_v51 = vpack.c.bf16 %v3769_v63, %v3769_v63  ;;  %v3898_v23 = vpack.c.bf16 %v3770_v47, %v3770_v47  ;;  %v13440_v47 = vld [vmem:[%s15747_s13] ss:$0 sm:$0xff] }
 0x7d7   : > { %9460 = vmatmul.msk.bf16.vlgmr.msrb.gmra.mxu1 %vm2360_vm10, %v5600_v44  ;;  %v3909_v8 = vpack.c.bf16 %v3781_v62, %v3781_v62  ;;  %v6180_v56 = vunpack.c.l.b16 %v3883_v37  ;;  %v6181_v3 = vunpack.c.l.b16 %v3884_v21  ;;  %v3728_v44 = vmul.f32 %v13130_v12, %v15779_v31 }
 0x7d8   : > { %5802 = vrot.lane.b32.xlu0 %v5800_v13, %s10224_s8  ;;  %v13403_v13 = vpop.f32.mrf.mxu3  ;;  %v3855_v62 = vpack.c.bf16 %v3727_v11, %v3727_v11  ;;  %v5271_v15 = vmul.f32 1.442695, %v5217_v42  ;;  %v3729_v2 = vmul.f32 %v13197_v7, %v15779_v31  ;;  %v6278_v24 = vunpack.c.l.b16 %v3897_v51 }
 0x7d9   : > { %v13406_v22 = vpop.eup %9914  ;;  %v6374_v57 = vunpack.c.l.b16 %v3909_v8  ;;  %v6184_v61 = vpack.c.b16 %v6181_v3, %v6180_v56  ;;  %v3856_v37 = vpack.c.bf16 %v3728_v44, %v3728_v44  ;;  %v3730_v36 = vmul.f32 %v13194_v33, %v15779_v31 }
 0x7da   : > { %9447 = vmatmul.msk.f32.gmra.mxu3 %vm2360_vm10, %v13388_v59  ;;  %15778 = vst [vmem:[#allocation21_spill] sm:$0xff] %v13406_v22  ;;  %v5956_v8 = vunpack.c.l.b16 %v3855_v62  ;;  %9918 = vpow2.f32 %v5271_v15  ;;  %v3779_v63 = vmul.f32 %v13133_v34, %v15777_v14  ;;  %v3780_v3 = vmul.f32 %v13130_v12, %v15777_v14  ;;  %v15782_v62 = vld [vmem:[#allocation20_spill] sm:$0xff] }
 0x7db   : > { %v6377_v60 = vpack.c.b16 %v6375_v6, %v6374_v57  ;;  %v5957_v56 = vunpack.c.l.b16 %v3856_v37  ;;  %v13444_v11 = vadd.f32 %v13440_v47, %v13156_v16  ;;  %v3857_v31 = vpack.c.bf16 %v3729_v2, %v3729_v2 }
 0x7dc   : > { %v3858_v57 = vpack.c.bf16 %v3730_v36, %v3730_v36  ;;  %v3791_v15 = vmul.f32 %v13133_v34, %v15782_v62 }
 0x7dd   : > { %6282 = vrot.lane.b32.xlu2 %v6280_v19, %s10224_s8  ;;  %v6279_v19 = vunpack.c.l.b16 %v3898_v23  ;;  %v5960_v6 = vpack.c.b16 %v5957_v56, %v5956_v8  ;;  %v5180_v14 = vsel %vm2360_vm10, %v13444_v11, -inf  ;;  %v5958_v16 = vunpack.c.l.b16 %v3857_v31 }
 0x7de   : > { %v5959_v23 = vunpack.c.l.b16 %v3858_v57  ;;  %v13464_v8 = vadd.f32 %v13440_v47, %v13169_v46 }
 0x7df   : > { %v6281_v42 = vpack.c.b16 %v6279_v19, %v6278_v24 }
 0x7e0   : > { %5868 = vrot.lane.b32.xlu0 %v5865_v58, %s10224_s8  ;;  %v13422_v58 = vpop.eup %9916  ;;  %v5414_v40 = vpop.f32.mrf.mxu3  ;;  %v5961_v56 = vpack.c.b16 %v5959_v23, %v5958_v16 }
 0x7e1   : > { %15780 = vst [vmem:[#allocation28_spill] sm:$0xff] %v13422_v58  ;;  %v13427_v21 = vpop.xlane.xlu0 %5172  ;;  %v5506_v44 = vadd.f32 1e-20, %v5414_v40  ;;  %v13449_v51 = vpop.eup %9918  ;;  %v15783_v40 = vld [vmem:[#allocation30_spill] sm:$0xff] }
 0x7e2   : > { %9448 = vmatmul.msk.f32.gmra.mxu3 %vm2360_vm10, %v13406_v22  ;;  %15781 = vst [vmem:[#allocation14_spill] sm:$0xff] %v13449_v51  ;;  %v3737_v24 = vmul.f32 %v13197_v7, %v15783_v40  ;;  %v3738_v19 = vmul.f32 %v13194_v33, %v15783_v40  ;;  %v3735_v23 = vmul.f32 %v13133_v34, %v15783_v40 }
 0x7e3   : > { %9920 = vrcp.f32 %v5506_v44 }
 0x7e4   : > { %v3865_v31 = vpack.c.bf16 %v3737_v24, %v3737_v24  ;;  %v3866_v57 = vpack.c.bf16 %v3738_v19, %v3738_v19  ;;  %v3863_v19 = vpack.c.bf16 %v3735_v23, %v3735_v23 }
 0x7e5   : > { %6380 = vrot.lane.b32.xlu2 %v6377_v60, %s10224_s8  ;;  %v3792_v60 = vmul.f32 %v13130_v12, %v15782_v62 }
 0x7e6   : > { %v5709_v0 = vpop.permute.xlu1 %5708  ;;  %v6023_v16 = vunpack.c.l.b16 %v3866_v57 }
 0x7e7   : > { %5721 = vmatpush.bf16.msra.mxu1 %v5709_v0  ;;  %v3907_v0 = vpack.c.bf16 %v3779_v63, %v3779_v63  ;;  %v3919_v63 = vpack.c.bf16 %v3791_v15, %v3791_v15  ;;  %v3736_v15 = vmul.f32 %v13130_v12, %v15783_v40  ;;  %v3794_v40 = vmul.f32 %v13194_v33, %v15782_v62 }
 0x7e8   : > { %6186 = vrot.lane.b32.xlu0 %v6184_v61, %s10224_s8  ;;  %v3908_v61 = vpack.c.bf16 %v3780_v3, %v3780_v3  ;;  %v3920_v3 = vpack.c.bf16 %v3792_v60, %v3792_v60 }
 0x7e9   : > { %v6372_v37 = vunpack.c.l.b16 %v3907_v0  ;;  %v13466_v36 = vpop.xlane.xlu0 %5175  ;;  %v9921_v44 = vpop.eup %9920  ;;  %v6468_v0 = vunpack.c.l.b16 %v3919_v63 }
 0x7ea   : > { %9449 = vmatmul.msk.f32.gmra.mxu3 %vm2360_vm10, %v13422_v58  ;;  %v6373_v2 = vunpack.c.l.b16 %v3908_v61  ;;  %v5570_v46 = vmul.f32 %v9921_v44, %v13076_v1  ;;  %v6469_v61 = vunpack.c.l.b16 %v3920_v3  ;;  %v6020_v1 = vunpack.c.l.b16 %v3863_v19 }
 0x7eb   : > { %v3793_v3 = vmul.f32 %v13197_v7, %v15782_v62  ;;  %v3693_v44 = vmul.f32 %v13197_v7, %v15766_v45 }
 0x7ed   : > { %5962 = vrot.lane.b32.xlu2 %v5960_v6, %s10224_s8  ;;  %v5177_v6 = vsel %vm2360_vm10, %v13464_v8, -inf  ;;  %v3921_v57 = vpack.c.bf16 %v3793_v3, %v3793_v3 }
 0x7f0   : > { %6284 = vrot.lane.b32.xlu0 %v6281_v42, %s10224_s8  ;;  %v6376_v42 = vpack.c.b16 %v6373_v2, %v6372_v37  ;;  %v5602_v37 = vpack.c.bf16 %v5570_v46, %v5570_v46  ;;  %v6472_v2 = vpack.c.b16 %v6469_v61, %v6468_v0  ;;  %v3821_v46 = vpack.c.bf16 %v3693_v44, %v3693_v44  ;;  %v15784_v61 = vld [vmem:[#allocation31_spill] sm:$0xff] }
 0x7f1   : > { %5181 = vmax.xlane.f32.xlu1 %v5180_v14  ;;  %v6022_v14 = vunpack.c.l.b16 %v3865_v31  ;;  %v3740_v62 = vmul.f32 %v13130_v12, %v15784_v61 }
 0x7f2   : > { %9450 = vmatmul.msk.f32.gmra.mxu3 %vm2360_vm10, %v13449_v51 }
 0x7f3   : > { %v6025_v24 = vpack.c.b16 %v6023_v16, %v6022_v14  ;;  %v3739_v14 = vmul.f32 %v13133_v34, %v15784_v61  ;;  %v6470_v16 = vunpack.c.l.b16 %v3921_v57 }
 0x7f5   : > { %6378 = vrot.lane.b32.xlu2 %v6376_v42, %s10224_s8  ;;  %v3694_v42 = vmul.f32 %v13194_v33, %v15766_v45 }
 0x7f7   : > { %v3822_v0 = vpack.c.bf16 %v3694_v42, %v3694_v42 }
 0x7f8   : > { %5964 = vrot.lane.b32.xlu0 %v5961_v56, %s10224_s8  ;;  %v3864_v56 = vpack.c.bf16 %v3736_v15, %v3736_v15  ;;  %v15785_v15 = vld [vmem:[#allocation22_spill] sm:$0xff] }
 0x7f9   : > { %5178 = vmax.xlane.f32.xlu1 %v5177_v6  ;;  %v3922_v6 = vpack.c.bf16 %v3794_v40, %v3794_v40  ;;  %v5671_v45 = vunpack.c.l.b16 %v3822_v0  ;;  %v15786_v0 = vld [vmem:[#allocation36_spill] sm:$0xff] }
 0x7fa   : > { %v6021_v63 = vunpack.c.l.b16 %v3864_v56  ;;  %v3868_v56 = vpack.c.bf16 %v3740_v62, %v3740_v62 }
 0x7fb   : > { %v6471_v23 = vunpack.c.l.b16 %v3922_v6 }
 0x7fc   : > { %v5707_v60 = vpop.permute.xlu0 %5706  ;;  %v6024_v31 = vpack.c.b16 %v6021_v63, %v6020_v1  ;;  %v13497_v63 = vpop.f32.mrf.mxu3  ;;  %v6053_v6 = vunpack.c.l.b16 %v3868_v56 }
 0x7fd   : > { %5722 = vmatpush.bf16.msra.mxu1 %v5707_v60  ;;  %6028 = vrot.lane.b32.xlu2 %v6025_v24, %s10224_s8  ;;  %v3721_v60 = vmul.f32 %v13197_v7, %v15785_v15  ;;  %v3867_v24 = vpack.c.bf16 %v3739_v14, %v3739_v14  ;;  %v6473_v19 = vpack.c.b16 %v6471_v23, %v6470_v16 }
 0x7fe   : > { %v3749_v14 = vmul.f32 %v13197_v7, %v15786_v0  ;;  %v3750_v16 = vmul.f32 %v13194_v33, %v15786_v0 }
 0x7ff   : > { %v3849_v1 = vpack.c.bf16 %v3721_v60, %v3721_v60  ;;  %v6052_v57 = vunpack.c.l.b16 %v3867_v24 }
 0x800   : > { %6474 = vrot.lane.b32.xlu0 %v6472_v2, %s10224_s8  ;;  %9462 = vmatmul.msk.bf16.vlgmr.msra.gmra.mxu1 %vm2360_vm10, %v5602_v37  ;;  %v5670_v37 = vunpack.c.l.b16 %v3821_v46  ;;  %v3722_v2 = vmul.f32 %v13194_v33, %v15785_v15  ;;  %v3877_v24 = vpack.c.bf16 %v3749_v14, %v3749_v14  ;;  %v3700_v14 = vmul.f32 %v13130_v12, %v15763_v52 }
 0x801   : > { %v5894_v46 = vunpack.c.l.b16 %v3849_v1 }
 0x802   : > { %v5673_v40 = vpack.c.b16 %v5671_v45, %v5670_v37  ;;  %v3850_v44 = vpack.c.bf16 %v3722_v2, %v3722_v2  ;;  %v3719_v37 = vmul.f32 %v13133_v34, %v15785_v15  ;;  %v5219_v45 = vsub.f32 %v13219_v41, %v13427_v21 }
 0x803   : > { %v6056_v2 = vpack.c.b16 %v6053_v6, %v6052_v57  ;;  %v6118_v51 = vunpack.c.l.b16 %v3877_v24  ;;  %v3748_v41 = vmul.f32 %v13130_v12, %v15786_v0 }
 0x804   : > { %v5895_v60 = vunpack.c.l.b16 %v3850_v44  ;;  %v5420_v44 = vpop.f32.mrf.mxu3 }
 0x805   : > { %6026 = vrot.lane.b32.xlu2 %v6024_v31, %s10224_s8  ;;  %v5508_v24 = vadd.f32 1e-20, %v5420_v44  ;;  %v3709_v44 = vmul.f32 %v13197_v7, %v15771_v35 }
 0x806   : > { %v5897_v1 = vpack.c.b16 %v5895_v60, %v5894_v46  ;;  %v3699_v46 = vmul.f32 %v13133_v34, %v15763_v52 }
 0x808   : > { %v13508_v23 = vpop.xlane.xlu2 %5184 }
 0x80c   : > { %v13499_v3 = vpop.f32.mrf.mxu1 }
 0x80d   : > { %6476 = vrot.lane.b32.xlu2 %v6473_v19, %s10224_s8  ;;  %v3878_v19 = vpack.c.bf16 %v3750_v16, %v3750_v16  ;;  %v5220_v16 = vsub.f32 %v13230_v26, %v13466_v36 }
 0x80f   : > { %v6119_v59 = vunpack.c.l.b16 %v3878_v19  ;;  %v5277_v19 = vmul.f32 1.442695, %v5220_v16 }
 0x811   : > { %v5170_v42 = vpop.xlane.xlu1 %5169 }
 0x812   : > { %v5218_v31 = vsub.f32 %v13269_v54, %v5170_v42  ;;  %5676 = vrot.lane.b32.xlu1 %v5673_v40, %s10224_s8  ;;  %v3720_v54 = vmul.f32 %v13130_v12, %v15785_v15  ;;  %v3847_v40 = vpack.c.bf16 %v3719_v37, %v3719_v37  ;;  %v3747_v15 = vmul.f32 %v13133_v34, %v15786_v0 }
 0x813   : > { %v6121_v0 = vpack.c.b16 %v6119_v59, %v6118_v51  ;;  %v3876_v37 = vpack.c.bf16 %v3748_v41, %v3748_v41  ;;  %v13542_v51 = vpop.f32.mrf.mxu3 }
 0x814   : > { %v5273_v62 = vmul.f32 1.442695, %v5218_v31  ;;  %v5061_v56 = vpop.f32.mrf.mxu1  ;;  %v3848_v42 = vpack.c.bf16 %v3720_v54, %v3720_v54  ;;  %v5275_v31 = vmul.f32 1.442695, %v5219_v45  ;;  %v5892_v57 = vunpack.c.l.b16 %v3847_v40 }
 0x815   : > { %6058 = vrot.lane.b32.xlu2 %v6056_v2, %s10224_s8  ;;  %v3875_v60 = vpack.c.bf16 %v3747_v15, %v3747_v15  ;;  %v3827_v45 = vpack.c.bf16 %v3699_v46, %v3699_v46  ;;  %v3828_v2 = vpack.c.bf16 %v3700_v14, %v3700_v14  ;;  %v6117_v56 = vunpack.c.l.b16 %v3876_v37 }
 0x816   : > { %9922 = vpow2.f32 %v5273_v62  ;;  %v5893_v6 = vunpack.c.l.b16 %v3848_v42  ;;  %v13532_v62 = vpop.permute.xlu2 %5834 }
 0x817   : > { %9924 = vpow2.f32 %v5275_v31  ;;  %v6116_v52 = vunpack.c.l.b16 %v3875_v60  ;;  %v5732_v36 = vunpack.c.l.b16 %v3827_v45  ;;  %v5733_v42 = vunpack.c.l.b16 %v3828_v2 }
 0x818   : > { %v5896_v54 = vpack.c.b16 %v5893_v6, %v5892_v57  ;;  %v3710_v31 = vmul.f32 %v13194_v33, %v15771_v35  ;;  %9926 = vrcp.f32 %v5508_v24 }
 0x819   : > { %9928 = vpow2.f32 %v5277_v19  ;;  %v6120_v41 = vpack.c.b16 %v6117_v56, %v6116_v52  ;;  %v5736_v16 = vpack.c.b16 %v5733_v42, %v5732_v36  ;;  %v3743_v36 = vmul.f32 %v13133_v34, %v15767_v27 }
 0x81a   : > { %5900 = vrot.lane.b32.xlu1 %v5897_v1, %s10224_s8  ;;  %v15788_v1 = vld [vmem:[#allocation35_spill] sm:$0xff]  ;;  %v3838_v60 = vpack.c.bf16 %v3710_v31, %v3710_v31  ;;  %v3744_v42 = vmul.f32 %v13130_v12, %v15767_v27 }
 0x81b   : > { %v3753_v40 = vmul.f32 %v13197_v7, %v15788_v1  ;;  %v3754_v26 = vmul.f32 %v13194_v33, %v15788_v1 }
 0x81c   : > { %v13522_v21 = vpop.eup %9922 }
 0x81d   : > { %15787 = vst [vmem:[#allocation33_spill] sm:$0xff] %v13522_v21  ;;  %9451 = vmatmul.msk.f32.gmra.mxu3 %vm2360_vm10, %v13522_v21  ;;  %6124 = vrot.lane.b32.xlu2 %v6121_v0, %s10224_s8  ;;  %v13540_v59 = vpop.eup %9924  ;;  %v3881_v57 = vpack.c.bf16 %v3753_v40, %v3753_v40  ;;  %v3882_v6 = vpack.c.bf16 %v3754_v26, %v3754_v26  ;;  %v5799_v26 = vunpack.c.l.b16 %v3838_v60 }
 0x81e   : > { %15789 = vst [vmem:[#allocation26_spill] sm:$0xff] %v13540_v59  ;;  %v13550_v46 = vpop.permute.xlu2 %5740  ;;  %v3837_v0 = vpack.c.bf16 %v3709_v44, %v3709_v44  ;;  %v9927_v2 = vpop.eup %9926 }
 0x81f   : > { %v6150_v24 = vunpack.c.l.b16 %v3881_v57  ;;  %v6151_v19 = vunpack.c.l.b16 %v3882_v6  ;;  %v13563_v56 = vpop.eup %9928  ;;  %v5426_v44 = vpop.f32.mrf.mxu3 }
 0x820   : > { %15792 = vst [vmem:[#allocation29_spill] sm:$0xff] %v13563_v56  ;;  %v5798_v40 = vunpack.c.l.b16 %v3837_v0  ;;  %v3872_v0 = vpack.c.bf16 %v3744_v42, %v3744_v42  ;;  %v3757_v42 = vmul.f32 %v13197_v7, %v15776_v18 }
 0x821   : > { %v6153_v57 = vpack.c.b16 %v6151_v19, %v6150_v24  ;;  %v15794_v19 = vld [vmem:[#allocation43_spill] sm:$0xff] }
 0x822   : > { %5898 = vrot.lane.b32.xlu1 %v5896_v54, %s10224_s8  ;;  %v15791_v54 = vld [vmem:[#allocation42_spill] sm:$0xff] }
 0x823   : > { %v3759_v45 = vmul.f32 %v13133_v34, %v15791_v54  ;;  %v3760_v52 = vmul.f32 %v13130_v12, %v15791_v54 }
 0x825   : > { %9452 = vmatmul.msk.f32.gmra.mxu3 %vm2360_vm10, %v13540_v59  ;;  %6122 = vrot.lane.b32.xlu2 %v6120_v41, %s10224_s8  ;;  %v3887_v31 = vpack.c.bf16 %v3759_v45, %v3759_v45  ;;  %v3888_v6 = vpack.c.bf16 %v3760_v52, %v3760_v52  ;;  %v3773_v52 = vmul.f32 %v13197_v7, %v15794_v19 }
 0x826   : > { %v13577_v58 = vpop.permute.xlu2 %5994 }
 0x827   : > { %v5095_v15 = vpop.f32.mrf.mxu2  ;;  %v13579_v45 = vpop.xlane.xlu0 %5187  ;;  %v6213_v24 = vunpack.c.l.b16 %v3888_v6 }
 0x828   : > { %v13553_v14 = vadd.f32 %v13440_v47, %v5095_v15  ;;  %v5572_v15 = vmul.f32 %v9927_v2, %v13158_v38  ;;  %v6212_v38 = vunpack.c.l.b16 %v3887_v31 }
 0x829   : > { %v5773_v35 = vpop.permute.xlu1 %5772 }
 0x82a   : > { %15790 = vst [vmem:[#allocation17_spill] sm:$0xff] %v13553_v14  ;;  %5738 = vrot.lane.b32.xlu1 %v5736_v16, %s10224_s8  ;;  %5785 = vmatpush.bf16.msrb.mxu1 %v5773_v35  ;;  %v5192_v37 = vsel %vm2360_vm10, %v13553_v14, -inf  ;;  %v5801_v16 = vpack.c.b16 %v5799_v26, %v5798_v40  ;;  %v3871_v35 = vpack.c.bf16 %v3743_v36, %v3743_v36  ;;  %v6085_v36 = vunpack.c.l.b16 %v3872_v0 }
 0x82b   : > { %5193 = vmax.xlane.f32.xlu0 %v5192_v37  ;;  %v15793_v37 = vld [vmem:[#allocation25_spill] sm:$0xff]  ;;  %v5604_v2 = vpack.c.bf16 %v5572_v15, %v5572_v15  ;;  %v3774_v40 = vmul.f32 %v13194_v33, %v15794_v19  ;;  %v6216_v15 = vpack.c.b16 %v6213_v24, %v6212_v38  ;;  %v3885_v14 = vpack.c.bf16 %v3757_v42, %v3757_v42 }
 0x82c   : > { %v3803_v59 = vmul.f32 %v13133_v34, %v15793_v37  ;;  %v3804_v27 = vmul.f32 %v13130_v12, %v15793_v37  ;;  %v6084_v26 = vunpack.c.l.b16 %v3871_v35 }
 0x82d   : > { %9453 = vmatmul.msk.f32.gmra.mxu3 %vm2360_vm10, %v13563_v56  ;;  %6156 = vrot.lane.b32.xlu2 %v6153_v57, %s10224_s8  ;;  %v5510_v56 = vadd.f32 1e-20, %v5426_v44  ;;  %v3758_v44 = vmul.f32 %v13194_v33, %v15776_v18  ;;  %v3901_v57 = vpack.c.bf16 %v3773_v52, %v3773_v52  ;;  %v3902_v6 = vpack.c.bf16 %v3774_v40, %v3774_v40 }
 0x82e   : > { %v3932_v31 = vpack.c.bf16 %v3804_v27, %v3804_v27  ;;  %v3761_v18 = vmul.f32 %v13197_v7, %v15791_v54  ;;  %v15795_v27 = vld [vmem:[#allocation44_spill] sm:$0xff] }
 0x82f   : > { %v5097_v41 = vpop.f32.mrf.mxu2  ;;  %9930 = vrcp.f32 %v5510_v56  ;;  %v3886_v35 = vpack.c.bf16 %v3758_v44, %v3758_v44  ;;  %v3775_v38 = vmul.f32 %v13133_v34, %v15795_v27  ;;  %v6311_v24 = vunpack.c.l.b16 %v3902_v6 }
 0x830   : > { %v3931_v41 = vpack.c.bf16 %v3803_v59, %v3803_v59  ;;  %v6565_v21 = vunpack.c.l.b16 %v3932_v31  ;;  %v3762_v59 = vmul.f32 %v13194_v33, %v15791_v54  ;;  %v3776_v52 = vmul.f32 %v13130_v12, %v15795_v27 }
 0x831   : > { %v5771_v60 = vpop.permute.xlu1 %5770  ;;  %v6183_v42 = vunpack.c.l.b16 %v3886_v35  ;;  %v3723_v54 = vmul.f32 %v13133_v34, %v15772_v28  ;;  %v3724_v44 = vmul.f32 %v13130_v12, %v15772_v28  ;;  %v3889_v31 = vpack.c.bf16 %v3761_v18, %v3761_v18  ;;  %v15796_v28 = vld [vmem:[#allocation37_spill] sm:$0xff] }
 0x832   : > { %5804 = vrot.lane.b32.xlu1 %v5801_v16, %s10224_s8  ;;  %5786 = vmatpush.bf16.msrb.mxu1 %v5771_v60  ;;  %v13591_v16 = vpop.f32.mrf.mxu3  ;;  %v6088_v60 = vpack.c.b16 %v6085_v36, %v6084_v26  ;;  %v6564_v10 = vunpack.c.l.b16 %v3931_v41  ;;  %v13605_v26 = vpop.permute.xlu2 %6092  ;;  %v6182_v36 = vunpack.c.l.b16 %v3885_v14 }
 0x833   : > { %v3851_v35 = vpack.c.bf16 %v3723_v54, %v3723_v54  ;;  %v3852_v53 = vpack.c.bf16 %v3724_v44, %v3724_v44  ;;  %v6214_v22 = vunpack.c.l.b16 %v3889_v31 }
 0x834   : > { %v6568_v41 = vpack.c.b16 %v6565_v21, %v6564_v10  ;;  %v6185_v14 = vpack.c.b16 %v6183_v42, %v6182_v36  ;;  %v3763_v10 = vmul.f32 %v13133_v34, %v15796_v28  ;;  %v3764_v21 = vmul.f32 %v13130_v12, %v15796_v28 }
 0x835   : > { %9464 = vmatmul.msk.bf16.vlgmr.msrb.gmra.mxu1 %vm2360_vm10, %v5604_v2  ;;  %6218 = vrot.lane.b32.xlu2 %v6216_v15, %s10224_s8  ;;  %v6310_v2 = vunpack.c.l.b16 %v3901_v57  ;;  %v9931_v40 = vpop.eup %9930  ;;  %v3890_v15 = vpack.c.bf16 %v3762_v59, %v3762_v59  ;;  %v3903_v57 = vpack.c.bf16 %v3775_v38, %v3775_v38  ;;  %v5925_v36 = vunpack.c.l.b16 %v3852_v53 }
 0x836   : > { %v5574_v6 = vmul.f32 %v9931_v40, %v13191_v17  ;;  %v5924_v40 = vunpack.c.l.b16 %v3851_v35  ;;  %v3891_v54 = vpack.c.bf16 %v3763_v10, %v3763_v10  ;;  %v3892_v44 = vpack.c.bf16 %v3764_v21, %v3764_v21  ;;  %v15798_v10 = vld [vmem:[#allocation41_spill] sm:$0xff] }
 0x837   : > { %v6215_v49 = vunpack.c.l.b16 %v3890_v15  ;;  %v6340_v18 = vunpack.c.l.b16 %v3903_v57  ;;  %v3777_v53 = vmul.f32 %v13197_v7, %v15795_v27  ;;  %v3795_v21 = vmul.f32 %v13133_v34, %v15798_v10 }
 0x838   : > { %v5606_v59 = vpack.c.bf16 %v5574_v6, %v5574_v6  ;;  %v5928_v6 = vpack.c.b16 %v5925_v36, %v5924_v40  ;;  %v3797_v43 = vmul.f32 %v13197_v7, %v15798_v10 }
 0x839   : > { %v5837_v0 = vpop.permute.xlu1 %5836  ;;  %v6217_v42 = vpack.c.b16 %v6215_v49, %v6214_v22  ;;  %v3778_v49 = vmul.f32 %v13194_v33, %v15795_v27  ;;  %v3923_v40 = vpack.c.bf16 %v3795_v21, %v3795_v21 }
 0x83a   : > { %v13598_v56 = vpop.permute.xlu0 %5674  ;;  %6090 = vrot.lane.b32.xlu1 %v6088_v60, %s10224_s8  ;;  %5849 = vmatpush.bf16.msra.mxu1 %v5837_v0  ;;  %v6313_v60 = vpack.c.b16 %v6311_v24, %v6310_v2  ;;  %v3904_v0 = vpack.c.bf16 %v3776_v52, %v3776_v52  ;;  %v15797_v2 = vld [vmem:[#allocation19_spill] sm:$0xff] }
 0x83b   : > { %v3789_v24 = vmul.f32 %v13197_v7, %v15797_v2  ;;  %v3790_v52 = vmul.f32 %v13194_v33, %v15797_v2 }
 0x83c   : > { %v6341_v38 = vunpack.c.l.b16 %v3904_v0  ;;  %v6245_v0 = vunpack.c.l.b16 %v3892_v44 }
 0x83d   : > { %6316 = vrot.lane.b32.xlu2 %v6313_v60, %s10224_s8  ;;  %v3917_v15 = vpack.c.bf16 %v3789_v24, %v3789_v24  ;;  %v3918_v57 = vpack.c.bf16 %v3790_v52, %v3790_v52  ;;  %v6244_v60 = vunpack.c.l.b16 %v3891_v54  ;;  %v3905_v24 = vpack.c.bf16 %v3777_v53, %v3777_v53 }
 0x83e   : > { %5850 = vmatpush.bf16.msra.mxu1 %v13532_v62  ;;  %v13619_v62 = vpop.f32.mrf.mxu3  ;;  %v6344_v31 = vpack.c.b16 %v6341_v38, %v6340_v18  ;;  %v3796_v18 = vmul.f32 %v13130_v12, %v15798_v10  ;;  %v3906_v52 = vpack.c.bf16 %v3778_v49, %v3778_v49  ;;  %v3809_v53 = vmul.f32 %v13197_v7, %v12883_v55 }
 0x83f   : > { %6570 = vrot.lane.b32.xlu0 %v6568_v41, %s10224_s8  ;;  %v13629_v41 = vpop.permute.xlu2 %5866  ;;  %v6439_v35 = vunpack.c.l.b16 %v3918_v57  ;;  %v6248_v38 = vpack.c.b16 %v6245_v0, %v6244_v60  ;;  %v6342_v54 = vunpack.c.l.b16 %v3905_v24  ;;  %v6500_v60 = vunpack.c.l.b16 %v3923_v40 }
 0x840   : > { %v3924_v36 = vpack.c.bf16 %v3796_v18, %v3796_v18  ;;  %v6343_v44 = vunpack.c.l.b16 %v3906_v52  ;;  %v3810_v49 = vmul.f32 %v13194_v33, %v12883_v55  ;;  %v3937_v24 = vpack.c.bf16 %v3809_v53, %v3809_v53 }
 0x841   : > { %v3798_v55 = vmul.f32 %v13194_v33, %v15798_v10 }
 0x842   : > { %v13621_v17 = vpop.permute.xlu0 %5996  ;;  %6188 = vrot.lane.b32.xlu1 %v6185_v14, %s10224_s8  ;;  %v6438_v14 = vunpack.c.l.b16 %v3917_v15  ;;  %v6501_v0 = vunpack.c.l.b16 %v3924_v36  ;;  %v3938_v52 = vpack.c.bf16 %v3810_v49, %v3810_v49  ;;  %v3925_v49 = vpack.c.bf16 %v3797_v43, %v3797_v43 }
 0x844   : > { %v6441_v27 = vpack.c.b16 %v6439_v35, %v6438_v14  ;;  %v6345_v35 = vpack.c.b16 %v6343_v44, %v6342_v54 }
 0x845   : > { %9466 = vmatmul.msk.bf16.vlgmr.msra.gmra.mxu1 %vm2360_vm10, %v5606_v59  ;;  %6346 = vrot.lane.b32.xlu2 %v6344_v31, %s10224_s8  ;;  %v15800_v31 = vld [vmem:[#allocation18_spill] sm:$0xff] }
 0x846   : > { %v13644_v59 = vpop.f32.mrf.mxu3  ;;  %v3783_v15 = vmul.f32 %v13133_v34, %v15800_v31  ;;  %v3784_v57 = vmul.f32 %v13130_v12, %v15800_v31 }
 0x847   : > { %6220 = vrot.lane.b32.xlu0 %v6217_v42, %s10224_s8  ;;  %15799 = vst [vmem:[#allocation40_spill] sm:$0xff] %v13644_v59  ;;  %v13647_v42 = vpop.permute.xlu2 %5932  ;;  %v15803_v59 = vld [vmem:[#allocation34_spill] sm:$0xff] }
 0x848   : > { %v3911_v21 = vpack.c.bf16 %v3783_v15, %v3783_v15  ;;  %v3912_v18 = vpack.c.bf16 %v3784_v57, %v3784_v57  ;;  %v6598_v15 = vunpack.c.l.b16 %v3937_v24  ;;  %v6599_v57 = vunpack.c.l.b16 %v3938_v52 }
 0x849   : > { %v6502_v24 = vunpack.c.l.b16 %v3925_v49  ;;  %v3799_v50 = vmul.f32 %v13133_v34, %v15803_v59  ;;  %v3800_v43 = vmul.f32 %v13130_v12, %v15803_v59 }
 0x84a   : > { %v13637_v22 = vpop.permute.xlu0 %5802  ;;  %5930 = vrot.lane.b32.xlu1 %v5928_v6, %s10224_s8  ;;  %v6404_v40 = vunpack.c.l.b16 %v3911_v21  ;;  %v6405_v36 = vunpack.c.l.b16 %v3912_v18  ;;  %v6601_v10 = vpack.c.b16 %v6599_v57, %v6598_v15 }
 0x84c   : > { %v6408_v53 = vpack.c.b16 %v6405_v36, %v6404_v40 }
 0x84d   : > { %6444 = vrot.lane.b32.xlu2 %v6441_v27, %s10224_s8 }
 0x84e   : > { %v5438_v14 = vpop.f32.mrf.mxu3 }
 0x84f   : > { %6250 = vrot.lane.b32.xlu0 %v6248_v38, %s10224_s8  ;;  %v6504_v38 = vpack.c.b16 %v6501_v0, %v6500_v60  ;;  %v13668_v54 = vpop.permute.xlu2 %6282  ;;  %v3811_v60 = vmul.f32 %v13133_v34, %v13017_v48  ;;  %v3812_v0 = vmul.f32 %v13130_v12, %v13017_v48  ;;  %v5514_v18 = vadd.f32 1e-20, %v5438_v14 }
 0x850   : > { %15802 = vst [vmem:[#allocation45_spill] sm:$0xff] %v13668_v54 }
 0x851   : > { %9932 = vrcp.f32 %v5514_v18  ;;  %v3813_v18 = vmul.f32 %v13197_v7, %v13017_v48 }
 0x852   : > { %v13654_v6 = vpop.permute.xlu0 %5868 }
 0x854   : > { %v13661_v27 = vpop.f32.mrf.mxu1 }
 0x855   : > { %15801 = vst [vmem:[#allocation38_spill] sm:$0xff] %v13661_v27  ;;  %6506 = vrot.lane.b32.xlu2 %v6504_v38, %s10224_s8  ;;  %v3939_v38 = vpack.c.bf16 %v3811_v60, %v3811_v60  ;;  %v3940_v27 = vpack.c.bf16 %v3812_v0, %v3812_v0  ;;  %v3928_v60 = vpack.c.bf16 %v3800_v43, %v3800_v43 }
 0x856   : > { %v13676_v21 = vpop.f32.mrf.mxu3 }
 0x857   : > { %6348 = vrot.lane.b32.xlu0 %v6345_v35, %s10224_s8  ;;  %v3926_v35 = vpack.c.bf16 %v3798_v55, %v3798_v55  ;;  %v6628_v14 = vunpack.c.l.b16 %v3939_v38  ;;  %v6629_v40 = vunpack.c.l.b16 %v3940_v27  ;;  %v13686_v36 = vpop.permute.xlu2 %6380  ;;  %v9933_v49 = vpop.eup %9932  ;;  %v3814_v27 = vmul.f32 %v13194_v33, %v13017_v48 }
 0x859   : > { %v6503_v52 = vunpack.c.l.b16 %v3926_v35  ;;  %v6632_v0 = vpack.c.b16 %v6629_v40, %v6628_v14  ;;  %v3941_v14 = vpack.c.bf16 %v3813_v18, %v3813_v18  ;;  %v3942_v40 = vpack.c.bf16 %v3814_v27, %v3814_v27 }
 0x85a   : > { %v13670_v44 = vpop.permute.xlu0 %6186 }
 0x85b   : > { %v6505_v57 = vpack.c.b16 %v6503_v52, %v6502_v24 }
 0x85c   : > { %v5662_v54 = vpop.f32.mrf.mxu1 }
 0x85d   : > { %6604 = vrot.lane.b32.xlu2 %v6601_v10, %s10224_s8  ;;  %v3927_v54 = vpack.c.bf16 %v3799_v50, %v3799_v50  ;;  %v6533_v10 = vunpack.c.l.b16 %v3928_v60  ;;  %v5578_v50 = vmul.f32 %v9933_v49, %v13249_v25  ;;  %v6630_v25 = vunpack.c.l.b16 %v3941_v14 }
 0x85e   : > { %v6631_v49 = vunpack.c.l.b16 %v3942_v40  ;;  %v5512_v14 = vadd.f32 1e-20, %v13619_v62 }
 0x85f   : > { %6410 = vrot.lane.b32.xlu0 %v6408_v53, %s10224_s8  ;;  %v13689_v53 = vpop.f32.mrf.mxu3  ;;  %v6532_v35 = vunpack.c.l.b16 %v3927_v54  ;;  %v13700_v54 = vadd.f32 %v13440_v47, %v13499_v3  ;;  %v5610_v48 = vpack.c.bf16 %v5578_v50, %v5578_v50 }
 0x860   : > { %v6633_v3 = vpack.c.b16 %v6631_v49, %v6630_v25 }
 0x861   : > { %v6536_v43 = vpack.c.b16 %v6533_v10, %v6532_v35 }
 0x862   : > { %v13684_v55 = vpop.permute.xlu0 %6284 }
 0x864   : > { %v5182_v15 = vpop.xlane.xlu1 %5181 }
 0x865   : > { %6634 = vrot.lane.b32.xlu2 %v6632_v0, %s10224_s8  ;;  %v5222_v0 = vsub.f32 %v13444_v11, %v5182_v15  ;;  %v5505_v11 = vadd.f32 1e-20, %v13403_v13  ;;  %v5223_v15 = vsub.f32 %v13260_v9, %v13508_v23  ;;  %v5224_v9 = vsub.f32 %v13306_v30, %v13579_v45 }
 0x866   : > { %v3805_v30 = vmul.f32 %v13197_v7, %v15793_v37  ;;  %v3806_v45 = vmul.f32 %v13194_v33, %v15793_v37 }
 0x867   : > { %6508 = vrot.lane.b32.xlu0 %v6505_v57, %s10224_s8  ;;  %v5963_v57 = vpop.permute.xlu2 %5962  ;;  %v5281_v47 = vmul.f32 1.442695, %v5222_v0  ;;  %v5283_v18 = vmul.f32 1.442695, %v5223_v15 }
 0x86a   : > { %v5965_v38 = vpop.permute.xlu0 %5964 }
 0x86b   : > { %5977 = vmatpush.bf16.msrb.mxu0 %v5965_v38  ;;  %v13704_v38 = vpop.f32.mrf.mxu3 }
 0x86c   : > { %v5179_v24 = vpop.xlane.xlu1 %5178 }
 0x86d   : > { %v5221_v52 = vsub.f32 %v13464_v8, %v5179_v24  ;;  %v5189_v8 = vsel %vm2360_vm10, %v13700_v54, -inf  ;;  %v3741_v24 = vmul.f32 %v13197_v7, %v15784_v61 }
 0x86f   : > { %v5279_v60 = vmul.f32 1.442695, %v5221_v52  ;;  %6538 = vrot.lane.b32.xlu0 %v6536_v43, %s10224_s8  ;;  %5978 = vmatpush.bf16.msrb.mxu0 %v5963_v57  ;;  %v3742_v52 = vmul.f32 %v13194_v33, %v15784_v61  ;;  %v3869_v23 = vpack.c.bf16 %v3741_v24, %v3741_v24  ;;  %v5285_v57 = vmul.f32 1.442695, %v5224_v9 }
 0x871   : > { %9934 = vpow2.f32 %v5279_v60  ;;  %v3870_v43 = vpack.c.bf16 %v3742_v52, %v3742_v52  ;;  %v6054_v25 = vunpack.c.l.b16 %v3869_v23 }
 0x872   : > { %9470 = vmatmul.msk.bf16.vlgmr.msrb.gmra.mxu0 %vm2360_vm10, %v5610_v48  ;;  %9936 = vpow2.f32 %v5281_v47  ;;  %v3934_v47 = vpack.c.bf16 %v3806_v45, %v3806_v45 }
 0x873   : > { %v13717_v10 = vpop.f32.mrf.mxu3  ;;  %9938 = vrcp.f32 %v5505_v11  ;;  %v6055_v49 = vunpack.c.l.b16 %v3870_v43  ;;  %v5507_v11 = vadd.f32 1e-20, %v13497_v63  ;;  %v13759_v43 = vpop.permute.xlu2 %6378 }
 0x874   : > { %5190 = vmax.xlane.f32.xlu1 %v5189_v8  ;;  %9940 = vpow2.f32 %v5283_v18  ;;  %v3933_v8 = vpack.c.bf16 %v3805_v30, %v3805_v30  ;;  %v6567_v24 = vunpack.c.l.b16 %v3934_v47 }
 0x875   : > { %9942 = vrcp.f32 %v5512_v14  ;;  %v6057_v62 = vpack.c.b16 %v6055_v49, %v6054_v25  ;;  %v3766_v25 = vmul.f32 %v13194_v33, %v15796_v28 }
 0x876   : > { %9944 = vpow2.f32 %v5285_v57  ;;  %v6566_v18 = vunpack.c.l.b16 %v3933_v8 }
 0x877   : > { %v13709_v35 = vpop.eup %9934  ;;  %6636 = vrot.lane.b32.xlu0 %v6633_v3, %s10224_s8  ;;  %9946 = vrcp.f32 %v5507_v11  ;;  %v3894_v45 = vpack.c.bf16 %v3766_v25, %v3766_v25 }
 0x878   : > { %9454 = vmatmul.msk.f32.gmra.mxu3 %vm2360_vm10, %v13709_v35  ;;  %v13721_v50 = vpop.eup %9936  ;;  %v6569_v9 = vpack.c.b16 %v6567_v24, %v6566_v18 }
 0x879   : > { %v9939_v13 = vpop.eup %9938 }
 0x87a   : > { %v5569_v48 = vmul.f32 %v9939_v13, %v13069_v4  ;;  %v13735_v61 = vpop.eup %9940 }
 0x87b   : > { %v13733_v0 = vpop.f32.mrf.mxu3  ;;  %v9943_v37 = vpop.eup %9942 }
 0x87c   : > { %v5601_v4 = vpack.c.bf16 %v5569_v48, %v5569_v48  ;;  %v13748_v15 = vpop.eup %9944  ;;  %v5576_v63 = vmul.f32 %v9943_v37, %v13223_v5  ;;  %v3765_v5 = vmul.f32 %v13197_v7, %v15796_v28  ;;  %v13776_v8 = vpop.permute.xlu2 %6028 }
 0x87d   : > { %v13719_v27 = vpop.f32.mrf.mxu1  ;;  %v9947_v57 = vpop.eup %9946 }
 0x87e   : > { %v3893_v30 = vpack.c.bf16 %v3765_v5, %v3765_v5  ;;  %v5511_v5 = vadd.f32 1e-20, %v13591_v16 }
 0x880   : > { %9455 = vmatmul.msk.f32.gmra.mxu3 %vm2360_vm10, %v13721_v50 }
 0x883   : > { %v13754_v52 = vpop.f32.mrf.mxu3 }
 0x884   : > { %v5677_v40 = vpop.permute.xlu1 %5676 }
 0x885   : > { %5689 = vmatpush.bf16.msrb.mxu2 %v5677_v40  ;;  %v5726_v60 = vpop.f32.mrf.mxu1  ;;  %v5515_v40 = vadd.f32 1e-20, %v13676_v21  ;;  %v5571_v21 = vmul.f32 %v9947_v57, %v13148_v20  ;;  %v6246_v20 = vunpack.c.l.b16 %v3893_v30 }
 0x887   : > { %9948 = vrcp.f32 %v5515_v40  ;;  %v5603_v28 = vpack.c.bf16 %v5571_v21, %v5571_v21 }
 0x888   : > { %9456 = vmatmul.msk.f32.gmra.mxu3 %vm2360_vm10, %v13735_v61 }
 0x889   : > { %5690 = vmatpush.bf16.msrb.mxu2 %v13598_v56  ;;  %v3751_v56 = vmul.f32 %v13133_v34, %v15788_v1 }
 0x88b   : > { %v3879_v13 = vpack.c.bf16 %v3751_v56, %v3751_v56  ;;  %v13770_v49 = vpop.f32.mrf.mxu3 }
 0x88c   : > { %9461 = vmatmul.msk.bf16.vlgmr.msrb.gmra.mxu2 %vm2360_vm10, %v5601_v4  ;;  %v5901_v3 = vpop.permute.xlu1 %5900 }
 0x88d   : > { %5753 = vmatpush.bf16.msra.mxu2 %v13550_v46  ;;  %6060 = vrot.lane.b32.xlu1 %v6057_v62, %s10224_s8  ;;  %v3752_v46 = vmul.f32 %v13130_v12, %v15788_v1  ;;  %v5608_v1 = vpack.c.bf16 %v5576_v63, %v5576_v63  ;;  %v6148_v60 = vunpack.c.l.b16 %v3879_v13  ;;  %v5509_v62 = vadd.f32 1e-20, %v13542_v51  ;;  %v9949_v47 = vpop.eup %9948 }
 0x88e   : > { %5913 = vmatpush.bf16.msrb.mxu1 %v5901_v3  ;;  %v6247_v3 = vunpack.c.l.b16 %v3894_v45  ;;  %v5579_v51 = vmul.f32 %v9949_v47, %v13256_v29  ;;  %v3786_v29 = vmul.f32 %v13194_v33, %v15800_v31 }
 0x88f   : > { %v3880_v23 = vpack.c.bf16 %v3752_v46, %v3752_v46  ;;  %9950 = vrcp.f32 %v5509_v62  ;;  %v5518_v46 = vadd.f32 1e-20, %v13717_v10 }
 0x890   : > { %9457 = vmatmul.msk.f32.gmra.mxu3 %vm2360_vm10, %v13748_v15  ;;  %v6249_v37 = vpack.c.b16 %v6247_v3, %v6246_v20  ;;  %v5611_v63 = vpack.c.bf16 %v5579_v51, %v5579_v51  ;;  %v3914_v57 = vpack.c.bf16 %v3786_v29, %v3786_v29 }
 0x891   : > { %v6149_v48 = vunpack.c.l.b16 %v3880_v23  ;;  %v3785_v23 = vmul.f32 %v13197_v7, %v15800_v31  ;;  %9952 = vrcp.f32 %v5518_v46 }
 0x892   : > { %v6407_v21 = vunpack.c.l.b16 %v3914_v57  ;;  %9954 = vrcp.f32 %v5511_v5 }
 0x893   : > { %v13784_v11 = vpop.f32.mrf.mxu3 }
 0x894   : > { %v5899_v14 = vpop.permute.xlu1 %5898 }
 0x895   : > { %6572 = vrot.lane.b32.xlu1 %v6569_v9, %s10224_s8  ;;  %5914 = vmatpush.bf16.msrb.mxu1 %v5899_v14  ;;  %v9951_v9 = vpop.eup %9950  ;;  %v13792_v14 = vpop.permute.xlu2 %6026 }
 0x896   : > { %v5573_v10 = vmul.f32 %v9951_v9, %v13178_v39  ;;  %v3787_v39 = vmul.f32 %v13133_v34, %v15797_v2 }
 0x897   : > { %v9953_v25 = vpop.eup %9952 }
 0x898   : > { %9468 = vmatmul.msk.bf16.vlgmr.msrb.gmra.mxu1 %vm2360_vm10, %v5608_v1  ;;  %v3913_v1 = vpack.c.bf16 %v3785_v23, %v3785_v23  ;;  %v5605_v31 = vpack.c.bf16 %v5573_v10, %v5573_v10  ;;  %v5582_v16 = vmul.f32 %v9953_v25, %v13298_v32  ;;  %v3915_v45 = vpack.c.bf16 %v3787_v39, %v3787_v39  ;;  %v9955_v20 = vpop.eup %9954  ;;  %v15808_v10 = vld [vmem:[#allocation15_spill] sm:$0xff] }
 0x899   : > { %6009 = vmatpush.bf16.msra.mxu1 %v13621_v17  ;;  %v6152_v17 = vpack.c.b16 %v6149_v48, %v6148_v60  ;;  %v3801_v32 = vmul.f32 %v13197_v7, %v15803_v59  ;;  %v15805_v7 = vld [vmem:[#allocation40_spill] sm:$0xff] }
 0x89a   : > { %v6436_v3 = vunpack.c.l.b16 %v3915_v45 }
 0x89b   : > { %v13798_v60 = vpop.f32.mrf.mxu3 }
 0x89c   : > { %v5739_v4 = vpop.permute.xlu1 %5738 }
 0x89d   : > { %6010 = vmatpush.bf16.msra.mxu1 %v13577_v58  ;;  %6154 = vrot.lane.b32.xlu1 %v6152_v17, %s10224_s8  ;;  %v3771_v58 = vmul.f32 %v13133_v34, %v15794_v19  ;;  %v13810_v17 = vpop.permute.xlu2 %6476 }
 0x89e   : > { %5754 = vmatpush.bf16.msra.mxu2 %v5739_v4 }
 0x89f   : > { %v3899_v18 = vpack.c.bf16 %v3771_v58, %v3771_v58  ;;  %v3802_v58 = vmul.f32 %v13194_v33, %v15803_v59  ;;  %v15806_v59 = vld [vmem:[#allocation45_spill] sm:$0xff] }
 0x8a1   : > { %6105 = vmatpush.bf16.msrb.mxu1 %v13605_v26  ;;  %v3772_v26 = vmul.f32 %v13130_v12, %v15794_v19  ;;  %9463 = vmatmul.msk.bf16.vlgmr.msra.gmra.mxu2 %vm2360_vm10, %v5603_v28  ;;  %v6308_v13 = vunpack.c.l.b16 %v3899_v18  ;;  %v5521_v28 = vadd.f32 1e-20, %v13770_v49  ;;  %v15804_v49 = vld [vmem:[#allocation39_spill] sm:$0xff]  ;;  %v3929_v18 = vpack.c.bf16 %v3801_v32, %v3801_v32 }
 0x8a3   : > { %v3900_v24 = vpack.c.bf16 %v3772_v26, %v3772_v26  ;;  %v5468_v47 = vpop.f32.mrf.mxu3  ;;  %9956 = vrcp.f32 %v5521_v28  ;;  %v5575_v26 = vmul.f32 %v9955_v20, %v15804_v49  ;;  %v6534_v9 = vunpack.c.l.b16 %v3929_v18 }
 0x8a4   : > { %v5805_v56 = vpop.permute.xlu1 %5804 }
 0x8a5   : > { %6252 = vrot.lane.b32.xlu1 %v6249_v37, %s10224_s8  ;;  %5817 = vmatpush.bf16.msrb.mxu2 %v5805_v56  ;;  %v6309_v19 = vunpack.c.l.b16 %v3900_v24  ;;  %v3930_v24 = vpack.c.bf16 %v3802_v58, %v3802_v58  ;;  %v13824_v56 = vpop.permute.xlu2 %6058  ;;  %v5607_v33 = vpack.c.bf16 %v5575_v26, %v5575_v26  ;;  %v5519_v26 = vadd.f32 1e-20, %v13733_v0 }
 0x8a7   : > { %v6312_v40 = vpack.c.b16 %v6309_v19, %v6308_v13  ;;  %v6535_v13 = vunpack.c.l.b16 %v3930_v24  ;;  %v15807_v19 = vld [vmem:[#allocation46_spill] sm:$0xff]  ;;  %v15812_v24 = vld [vmem:[#allocation33_spill] sm:$0xff] }
 0x8a8   : > { %9471 = vmatmul.msk.bf16.vlgmr.msra.gmra.mxu1 %vm2360_vm10, %v5611_v63  ;;  %v5513_v63 = vadd.f32 1e-20, %v15805_v7  ;;  %v3808_v23 = vmul.f32 %v13130_v12, %v15807_v19 }
 0x8a9   : > { %5818 = vmatpush.bf16.msrb.mxu2 %v13637_v22  ;;  %v6406_v22 = vunpack.c.l.b16 %v3913_v1  ;;  %v6537_v57 = vpack.c.b16 %v6535_v13, %v6534_v9 }
 0x8aa   : > { %9958 = vrcp.f32 %v5513_v63  ;;  %v3936_v5 = vpack.c.bf16 %v3808_v23, %v3808_v23  ;;  %v5522_v23 = vadd.f32 1e-20, %v13784_v11 }
 0x8ab   : > { %v13833_v29 = vpop.f32.mrf.mxu3 }
 0x8ac   : > { %v6091_v48 = vpop.permute.xlu1 %6090  ;;  %v6597_v39 = vunpack.c.l.b16 %v3936_v5 }
 0x8ad   : > { %5881 = vmatpush.bf16.msra.mxu2 %v13654_v6  ;;  %6314 = vrot.lane.b32.xlu1 %v6312_v40, %s10224_s8  ;;  %v3788_v6 = vmul.f32 %v13130_v12, %v15797_v2  ;;  %v5614_v2 = vpack.c.bf16 %v5582_v16, %v5582_v16  ;;  %v6125_v25 = vpop.permute.xlu2 %6124 }
 0x8ae   : > { %6106 = vmatpush.bf16.msrb.mxu1 %v6091_v48 }
 0x8af   : > { %v3916_v4 = vpack.c.bf16 %v3788_v6, %v3788_v6 }
 0x8b1   : > { %5882 = vmatpush.bf16.msra.mxu2 %v13629_v41  ;;  %v6409_v41 = vpack.c.b16 %v6407_v21, %v6406_v22 }
 0x8b2   : > { %9465 = vmatmul.msk.bf16.vlgmr.msrb.gmra.mxu2 %vm2360_vm10, %v5605_v31  ;;  %v13812_v30 = vpop.f32.mrf.mxu1  ;;  %v5524_v31 = vadd.f32 1e-20, %v5468_v47 }
 0x8b3   : > { %v13845_v16 = vpop.f32.mrf.mxu3 }
 0x8b4   : > { %v6189_v62 = vpop.permute.xlu1 %6188  ;;  %9960 = vrcp.f32 %v5524_v31  ;;  %v5517_v31 = vadd.f32 1e-20, %v13704_v38  ;;  %v15816_v38 = vld [vmem:[#allocation13_spill] sm:$0xff] }
 0x8b5   : > { %5945 = vmatpush.bf16.msrb.mxu2 %v13647_v42  ;;  %6412 = vrot.lane.b32.xlu1 %v6409_v41, %s10224_s8  ;;  %v6437_v42 = vunpack.c.l.b16 %v3916_v4 }
 0x8b6   : > { %6201 = vmatpush.bf16.msra.mxu1 %v6189_v62 }
 0x8b7   : > { %v6440_v37 = vpack.c.b16 %v6437_v42, %v6436_v3 }
 0x8b8   : > { %9474 = vmatmul.msk.bf16.vlgmr.msrb.gmra.mxu1 %vm2360_vm10, %v5614_v2  ;;  %v6123_v2 = vpop.permute.xlu2 %6122 }
 0x8ba   : > { %6202 = vmatpush.bf16.msra.mxu1 %v13670_v44  ;;  %v5790_v51 = vpop.f32.mrf.mxu1  ;;  %v9957_v44 = vpop.eup %9956 }
 0x8bb   : > { %v5585_v40 = vmul.f32 %v9957_v44, %v15808_v10  ;;  %v9959_v22 = vpop.eup %9958  ;;  %v5477_v20 = vpop.f32.mrf.mxu3  ;;  %v15813_v44 = vld [vmem:[#allocation12_spill] sm:$0xff] }
 0x8bc   : > { %v5931_v46 = vpop.permute.xlu1 %5930  ;;  %v9961_v28 = vpop.eup %9960  ;;  %v5527_v3 = vadd.f32 1e-20, %v5477_v20 }
 0x8bd   : > { %6442 = vrot.lane.b32.xlu1 %v6440_v37, %s10224_s8  ;;  %5946 = vmatpush.bf16.msrb.mxu2 %v5931_v46  ;;  %v5617_v12 = vpack.c.bf16 %v5585_v40, %v5585_v40 }
 0x8be   : > { %6297 = vmatpush.bf16.msrb.mxu1 %v13684_v55  ;;  %v3807_v55 = vmul.f32 %v13133_v34, %v15807_v19  ;;  %v6475_v34 = vpop.permute.xlu0 %6474  ;;  %v15814_v19 = vld [vmem:[#allocation17_spill] sm:$0xff] }
 0x8c0   : > { %v3935_v48 = vpack.c.bf16 %v3807_v55, %v3807_v55  ;;  %v6157_v49 = vpop.permute.xlu2 %6156 }
 0x8c2   : > { %6298 = vmatpush.bf16.msrb.mxu1 %v15806_v59  ;;  %9467 = vmatmul.msk.bf16.vlgmr.msra.gmra.mxu2 %vm2360_vm10, %v5607_v33  ;;  %v13838_v1 = vpop.f32.mrf.mxu1  ;;  %v6596_v21 = vunpack.c.l.b16 %v3935_v48 }
 0x8c3   : > { %6041 = vmatpush.bf16.msra.mxu2 %v13776_v8  ;;  %v15809_v8 = vld [vmem:[#allocation32_spill] sm:$0xff]  ;;  %v13862_v0 = vpop.f32.mrf.mxu3 }
 0x8c4   : > { %v5577_v6 = vmul.f32 %v9959_v22, %v15809_v8  ;;  %v6600_v45 = vpack.c.b16 %v6597_v39, %v6596_v21 }
 0x8c5   : > { %6540 = vrot.lane.b32.xlu1 %v6537_v57, %s10224_s8 }
 0x8c6   : > { %v5609_v4 = vpack.c.bf16 %v5577_v6, %v5577_v6  ;;  %v5194_v62 = vpop.xlane.xlu0 %5193 }
 0x8c7   : > { %6042 = vmatpush.bf16.msra.mxu2 %v13792_v14  ;;  %v5516_v14 = vadd.f32 1e-20, %v13689_v53  ;;  %v5226_v55 = vsub.f32 %v15814_v19, %v5194_v62 }
 0x8c8   : > { %9477 = vmatmul.msk.bf16.vlgmr.msra.gmra.mxu1 %vm2360_vm10, %v5617_v12  ;;  %v6219_v7 = vpop.permute.xlu2 %6218 }
 0x8c9   : > { %6393 = vmatpush.bf16.msra.mxu1 %v13686_v36  ;;  %9962 = vrcp.f32 %v5516_v14  ;;  %v15810_v36 = vld [vmem:[#allocation21_spill] sm:$0xff]  ;;  %v5289_v57 = vmul.f32 1.442695, %v5226_v55  ;;  %v9625_v14 = vld [vmem:[%s10411_s2 + $0x8] sm:$0xff] }
 0x8ca   : > { %v5854_v41 = vpop.f32.mrf.mxu1  ;;  %v5588_v47 = vmul.f32 %v9961_v28, %v15810_v36  ;;  %9964 = vrcp.f32 %v5527_v3  ;;  %9656 = vmatpush.bf16.msra.mxu3 %v9625_v14  ;;  %v5520_v28 = vadd.f32 1e-20, %v13754_v52  ;;  %v9624_v3 = vld [vmem:[%s10411_s2] sm:$0xff]  ;;  %s15854_s2 = sld [smem:[#allocation3_spill]] }
 0x8cb   : > { %9966 = vrcp.f32 %v5519_v26  ;;  %v13872_v5 = vpop.f32.mrf.mxu3 }
 0x8cc   : > { %v5620_v42 = vpack.c.bf16 %v5588_v47, %v5588_v47 }
 0x8cd   : > { %6394 = vmatpush.bf16.msra.mxu1 %v13759_v43  ;;  %6602 = vrot.lane.b32.xlu1 %v6600_v45, %s10224_s8  ;;  %v15811_v43 = vld [vmem:[#allocation23_spill] sm:$0xff] }
 0x8ce   : > { %v13852_v32 = vpop.permute.xlu0 %6570  ;;  %9657 = vmatpush.bf16.msra.mxu3 %v9624_v3 }
 0x8cf   : > { %v9963_v53 = vpop.eup %9962 }
 0x8d0   : > { %v5580_v58 = vmul.f32 %v9963_v53, %v15811_v43  ;;  %v9965_v37 = vpop.eup %9964  ;;  %v6317_v48 = vpop.permute.xlu2 %6316  ;;  %v5525_v43 = vadd.f32 1e-20, %v13833_v29  ;;  %p9572_p9 = scmp.ne.s32.totalorder %s15854_s2, 1 }
 0x8d1   : > { %v5591_v46 = vmul.f32 %v9965_v37, %v15812_v24  ;;  %v9967_v33 = vpop.eup %9966  ;;  %s15858_s8 = sld [smem:[#allocation55_spill]] (!%p9572_p9) }
 0x8d2   : > { %9469 = vmatmul.msk.bf16.vlgmr.msrb.gmra.mxu2 %vm2360_vm10, %v5609_v4  ;;  %v5612_v51 = vpack.c.bf16 %v5580_v58, %v5580_v58  ;;  %v5583_v9 = vmul.f32 %v9967_v33, %v15813_v44  ;;  %v15817_v58 = vld [vmem:[#allocation11_spill] sm:$0xff]  ;;  %s15859_s15 = sld [smem:[#allocation56_spill]] (!%p9572_p9) }
 0x8d3   : > { %6137 = vmatpush.bf16.msrb.mxu2 %v6125_v25  ;;  %v5623_v63 = vpack.c.bf16 %v5591_v46, %v5591_v46  ;;  %v15815_v25 = vld [vmem:[#allocation24_spill] sm:$0xff] }
 0x8d4   : > { %v5615_v10 = vpack.c.bf16 %v5583_v9, %v5583_v9 }
 0x8d6   : > { %v6221_v18 = vpop.permute.xlu0 %6220 }
 0x8d7   : > { %6138 = vmatpush.bf16.msrb.mxu2 %v6123_v2 }
 0x8d8   : > { %9480 = vmatmul.msk.bf16.vlgmr.msrb.gmra.mxu1 %vm2360_vm10, %v5620_v42  ;;  %v6347_v24 = vpop.permute.xlu2 %6346 }
 0x8d9   : > { %6489 = vmatpush.bf16.msrb.mxu1 %v13810_v17 }
 0x8dd   : > { %6490 = vmatpush.bf16.msrb.mxu1 %v6475_v34 }
 0x8e2   : > { %9472 = vmatmul.msk.bf16.vlgmr.msra.gmra.mxu2 %vm2360_vm10, %v5612_v51  ;;  %v5523_v51 = vadd.f32 1e-20, %v13798_v60 }
 0x8e3   : > { %6233 = vmatpush.bf16.msra.mxu2 %v6221_v18 }
 0x8e7   : > { %6234 = vmatpush.bf16.msra.mxu2 %v6219_v7  ;;  %v5191_v17 = vpop.xlane.xlu1 %5190 }
 0x8e8   : > { %v5225_v59 = vsub.f32 %v13700_v54, %v5191_v17  ;;  %9483 = vmatmul.msk.bf16.vlgmr.msra.gmra.mxu1 %vm2360_vm10, %v5623_v63  ;;  %v15818_v17 = vld [vmem:[#allocation28_spill] sm:$0xff] }
 0x8ea   : > { %v5287_v13 = vmul.f32 1.442695, %v5225_v59 }
 0x8ec   : > { %9968 = vpow2.f32 %v5287_v13  ;;  %v6445_v13 = vpop.permute.xlu2 %6444 }
 0x8ed   : > { %9970 = vrcp.f32 %v5522_v23  ;;  %v5528_v23 = vadd.f32 1e-20, %v13862_v0 }
 0x8ee   : > { %9972 = vpow2.f32 %v5289_v57 }
 0x8ef   : > { %v13867_v40 = vpop.f32.mrf.mxu0  ;;  %9974 = vrcp.f32 %v5517_v31 }
 0x8f2   : > { %9475 = vmatmul.msk.bf16.vlgmr.msrb.gmra.mxu2 %vm2360_vm10, %v5615_v10  ;;  %v13870_v54 = vpop.eup %9968  ;;  %v15819_v10 = vld [vmem:[#allocation16_spill] sm:$0xff] }
 0x8f3   : > { %6329 = vmatpush.bf16.msrb.mxu2 %v6317_v48  ;;  %9458 = vmatmul.msk.f32.gmra.mxu3 %vm2360_vm10, %v13870_v54  ;;  %v9971_v11 = vpop.eup %9970 }
 0x8f4   : > { %v13877_v34 = vpop.eup %9972  ;;  %v5586_v22 = vmul.f32 %v9971_v11, %v15815_v25 }
 0x8f5   : > { %v9975_v8 = vpop.eup %9974 }
 0x8f6   : > { %v5618_v6 = vpack.c.bf16 %v5586_v22, %v5586_v22  ;;  %v5581_v45 = vmul.f32 %v9975_v8, %v15816_v38 }
 0x8f7   : > { %v5982_v12 = vpop.f32.mrf.mxu0 }
 0x8f8   : > { %v5613_v2 = vpack.c.bf16 %v5581_v45, %v5581_v45 }
 0x8fb   : > { %v5486_v21 = vpop.f32.mrf.mxu3  ;;  %9459 = vmatmul.msk.f32.gmra.mxu3 %vm2360_vm10, %v13877_v34 }
 0x8fc   : > { %v5530_v39 = vadd.f32 1e-20, %v5486_v21  ;;  %v6507_v21 = vpop.permute.xlu2 %6506 }
 0x8fe   : > { %9976 = vrcp.f32 %v5530_v39 }
 0x8ff   : > { %v6061_v41 = vpop.permute.xlu1 %6060  ;;  %9978 = vrcp.f32 %v5520_v28 }
 0x900   : > { %6073 = vmatpush.bf16.msra.mxu0 %v6061_v41  ;;  %9980 = vrcp.f32 %v5525_v43  ;;  %v15820_v41 = vld [vmem:[#allocation26_spill] sm:$0xff] }
 0x902   : > { %9478 = vmatmul.msk.bf16.vlgmr.msra.gmra.mxu2 %vm2360_vm10, %v5618_v6 }
 0x903   : > { %v13885_v4 = vpop.f32.mrf.mxu3 }
 0x904   : > { %v9977_v62 = vpop.eup %9976  ;;  %6074 = vmatpush.bf16.msra.mxu0 %v13824_v56  ;;  %v6251_v56 = vpop.permute.xlu0 %6250 }
 0x905   : > { %v5594_v36 = vmul.f32 %v9977_v62, %v13709_v35  ;;  %v9979_v52 = vpop.eup %9978 }
 0x906   : > { %v9981_v63 = vpop.eup %9980 }
 0x907   : > { %v5626_v47 = vpack.c.bf16 %v5594_v36, %v5594_v36  ;;  %v6573_v20 = vpop.permute.xlu1 %6572  ;;  %9473 = vmatmul.msk.bf16.vlgmr.msra.gmra.mxu0 %vm2360_vm10, %v5613_v2  ;;  %v5589_v59 = vmul.f32 %v9981_v63, %v15818_v17  ;;  %v5531_v2 = vadd.f32 1e-20, %v13885_v4  ;;  %v15822_v36 = vld [vmem:[#allocation14_spill] sm:$0xff] }
 0x908   : > { %6169 = vmatpush.bf16.msrb.mxu0 %v6157_v49  ;;  %6585 = vmatpush.bf16.msra.mxu1 %v6573_v20  ;;  %v5584_v49 = vmul.f32 %v9979_v52, %v15817_v58 }
 0x909   : > { %9486 = vmatmul.msk.bf16.vlgmr.msrb.gmra.mxu1 %vm2360_vm10, %v5626_v47  ;;  %v5621_v48 = vpack.c.bf16 %v5589_v59, %v5589_v59 }
 0x90a   : > { %v5616_v18 = vpack.c.bf16 %v5584_v49, %v5584_v49 }
 0x90b   : > { %v13893_v42 = vpop.f32.mrf.mxu3 }
 0x90c   : > { %6586 = vmatpush.bf16.msra.mxu1 %v13852_v32  ;;  %v6349_v29 = vpop.permute.xlu0 %6348  ;;  %v5532_v63 = vadd.f32 1e-20, %v13893_v42 }
 0x90f   : > { %v13896_v53 = vpop.f32.mrf.mxu2  ;;  %v6155_v35 = vpop.permute.xlu1 %6154 }
 0x910   : > { %6742 = vmatpush.bf16.msrb.mxu1 %v9625_v14  ;;  %6170 = vmatpush.bf16.msrb.mxu0 %v6155_v35  ;;  %v15821_v14 = vld [vmem:[#allocation38_spill] sm:$0xff] }
 0x911   : > { %v6656_v62 = vpack.c.bf16 %v13896_v53, %v15821_v14 }
 0x913   : > { %v5495_v26 = vpop.f32.mrf.mxu3 }
 0x914   : > { %6743 = vmatpush.bf16.msrb.mxu1 %v9624_v3  ;;  %v5533_v37 = vadd.f32 1e-20, %v5495_v26  ;;  %v6411_v31 = vpop.permute.xlu0 %6410  ;;  %v6605_v3 = vpop.permute.xlu2 %6604 }
 0x915   : > { %v13901_v32 = vpop.f32.mrf.mxu1 }
 0x916   : > { %9982 = vrcp.f32 %v5533_v37 }
 0x917   : > { %v5694_v46 = vpop.f32.mrf.mxu2  ;;  %v6253_v7 = vpop.permute.xlu1 %6252  ;;  %9476 = vmatmul.msk.bf16.vlgmr.msrb.gmra.mxu0 %vm2360_vm10, %v5616_v18  ;;  %9984 = vrcp.f32 %v5523_v51 }
 0x918   : > { %6265 = vmatpush.bf16.msra.mxu0 %v6253_v7  ;;  %9986 = vrcp.f32 %v5528_v23 }
 0x91c   : > { %v9983_v33 = vpop.eup %9982  ;;  %6266 = vmatpush.bf16.msra.mxu0 %v6251_v56  ;;  %v6509_v6 = vpop.permute.xlu0 %6508  ;;  %v5529_v56 = vadd.f32 1e-20, %v13872_v5 }
 0x91d   : > { %v5597_v60 = vmul.f32 %v9983_v33, %v13748_v15  ;;  %v5918_v44 = vpop.f32.mrf.mxu1  ;;  %v9985_v9 = vpop.eup %9984  ;;  %v5526_v15 = vadd.f32 1e-20, %v13845_v16 }
 0x91e   : > { %v5587_v57 = vmul.f32 %v9985_v9, %v15819_v10  ;;  %v9987_v39 = vpop.eup %9986 }
 0x91f   : > { %v5629_v19 = vpack.c.bf16 %v5597_v60, %v5597_v60  ;;  %v6315_v55 = vpop.permute.xlu1 %6314  ;;  %9988 = vrcp.f32 %v5526_v15  ;;  %v5592_v16 = vmul.f32 %v9987_v39, %v15820_v41 }
 0x920   : > { %6361 = vmatpush.bf16.msrb.mxu0 %v6349_v29  ;;  %6330 = vmatpush.bf16.msrb.mxu2 %v6315_v55  ;;  %v5619_v12 = vpack.c.bf16 %v5587_v57, %v5587_v57  ;;  %9990 = vrcp.f32 %v5531_v2 }
 0x921   : > { %9489 = vmatmul.msk.bf16.vlgmr.msra.gmra.mxu1 %vm2360_vm10, %v5629_v19  ;;  %v5624_v20 = vpack.c.bf16 %v5592_v16, %v5592_v16  ;;  %9992 = vrcp.f32 %v5529_v56  ;;  %v13960_v56 = vld [vmem:[%s10416_s9] ss:$0 sm:$0xff] }
 0x922   : > { %9994 = vrcp.f32 %v5532_v63 }
 0x923   : > { %9481 = vmatmul.msk.bf16.vlgmr.msrb.gmra.mxu2 %vm2360_vm10, %v5621_v48 }
 0x924   : > { %6362 = vmatpush.bf16.msrb.mxu0 %v6347_v24  ;;  %v5756_v11 = vpop.f32.mrf.mxu2  ;;  %v6539_v58 = vpop.permute.xlu0 %6538  ;;  %v15823_v24 = vld [vmem:[#allocation29_spill] sm:$0xff] }
 0x925   : > { %v13911_v25 = vpop.f32.mrf.mxu1  ;;  %v9989_v45 = vpop.eup %9988  ;;  %v6657_v5 = vpack.c.bf16 %v5756_v11, %v13719_v27 }
 0x926   : > { %v6661_v0 = vpack.c.bf16 %v13911_v25, %v13867_v40  ;;  %v5590_v47 = vmul.f32 %v9989_v45, %v15822_v36  ;;  %v9991_v4 = vpop.eup %9990  ;;  %v6635_v27 = vpop.permute.xlu2 %6634 }
 0x927   : > { %v6413_v22 = vpop.permute.xlu1 %6412  ;;  %9479 = vmatmul.msk.bf16.vlgmr.msra.gmra.mxu0 %vm2360_vm10, %v5619_v12  ;;  %v5595_v26 = vmul.f32 %v9991_v4, %v13721_v50  ;;  %v9993_v37 = vpop.eup %9992 }
 0x928   : > { %6457 = vmatpush.bf16.msra.mxu0 %v6445_v13  ;;  %6425 = vmatpush.bf16.msra.mxu2 %v6413_v22  ;;  %v5622_v35 = vpack.c.bf16 %v5590_v47, %v5590_v47  ;;  %v5593_v46 = vmul.f32 %v9993_v37, %v15823_v24  ;;  %v9995_v44 = vpop.eup %9994 }
 0x929   : > { %v5627_v7 = vpack.c.bf16 %v5595_v26, %v5595_v26  ;;  %v5596_v13 = vmul.f32 %v9995_v44, %v13735_v61 }
 0x92a   : > { %v5625_v33 = vpack.c.bf16 %v5593_v46, %v5593_v46 }
 0x92b   : > { %v5628_v19 = vpack.c.bf16 %v5596_v13, %v5596_v13 }
 0x92c   : > { %v5758_v8 = vpop.f32.mrf.mxu2  ;;  %6426 = vmatpush.bf16.msra.mxu2 %v6411_v31  ;;  %v6637_v50 = vpop.permute.xlu0 %6636 }
 0x92d   : > { %v6014_v38 = vpop.f32.mrf.mxu1 }
 0x92f   : > { %v6443_v28 = vpop.permute.xlu1 %6442 }
 0x930   : > { %6521 = vmatpush.bf16.msrb.mxu2 %v6509_v6  ;;  %6458 = vmatpush.bf16.msra.mxu0 %v6443_v28 }
 0x931   : > { %9500 = vmatmul.msk.bf16.vlgmr.msrb.gmra.mxu1 %vm2360_vm10, %v6656_v62 }
 0x933   : > { %9484 = vmatmul.msk.bf16.vlgmr.msra.gmra.mxu2 %vm2360_vm10, %v5624_v20 }
 0x934   : > { %6522 = vmatpush.bf16.msrb.mxu2 %v6507_v21 }
 0x935   : > { %v5820_v52 = vpop.f32.mrf.mxu2  ;;  %v13924_v53 = vpop.f32.mrf.mxu1 }
 0x936   : > { %v6658_v9 = vpack.c.bf16 %v5820_v52, %v13812_v30 }
 0x937   : > { %v6541_v43 = vpop.permute.xlu1 %6540  ;;  %9482 = vmatmul.msk.bf16.vlgmr.msrb.gmra.mxu0 %vm2360_vm10, %v5622_v35 }
 0x938   : > { %6617 = vmatpush.bf16.msra.mxu2 %v6605_v3  ;;  %6553 = vmatpush.bf16.msrb.mxu0 %v6541_v43 }
 0x93c   : > { %6554 = vmatpush.bf16.msrb.mxu0 %v6539_v58  ;;  %v10133_v58 = vld [vmem:[#allocation2] sm:$0xff] }
 0x93d   : > { %v5822_v49 = vpop.f32.mrf.mxu2  ;;  %v6110_v51 = vpop.f32.mrf.mxu1 }
 0x93f   : > { %v6603_v18 = vpop.permute.xlu1 %6602 }
 0x940   : > { %6618 = vmatpush.bf16.msra.mxu2 %v6603_v18  ;;  %v10134_v18 = vld [vmem:[#allocation2 + $0x8] sm:$0xff] }
 0x941   : > { %9501 = vmatmul.msk.bf16.gmra.mxu1 %vm2360_vm10, %v6657_v5 }
 0x943   : > { %9487 = vmatmul.msk.bf16.vlgmr.msrb.gmra.mxu2 %vm2360_vm10, %v5627_v7 }
 0x945   : > { %v5884_v29 = vpop.f32.mrf.mxu2  ;;  %v13933_v17 = vpop.f32.mrf.mxu1 }
 0x946   : > { %v6659_v57 = vpack.c.bf16 %v5884_v29, %v13838_v1 }
 0x947   : > { %9485 = vmatmul.msk.bf16.vlgmr.msra.gmra.mxu0 %vm2360_vm10, %v5625_v33 }
 0x948   : > { %6649 = vmatpush.bf16.msra.mxu0 %v6637_v50  ;;  %v10135_v50 = vld [vmem:[#allocation2 + $0x10] sm:$0xff] }
 0x94c   : > { %6650 = vmatpush.bf16.msra.mxu0 %v6635_v27 }
 0x94d   : > { %v5886_v59 = vpop.f32.mrf.mxu2  ;;  %v6206_v60 = vpop.f32.mrf.mxu1 }
 0x951   : > { %9502 = vmatmul.msk.bf16.gmra.mxu1 %vm2360_vm10, %v6658_v9 }
 0x955   : > { %v5948_v42 = vpop.f32.mrf.mxu2  ;;  %v13939_v55 = vpop.f32.mrf.mxu1 }
 0x956   : > { %v6660_v61 = vpack.c.bf16 %v5948_v42, %v13901_v32 }
 0x957   : > { %9488 = vmatmul.msk.bf16.vlgmr.msrb.gmra.mxu0 %vm2360_vm10, %v5628_v19  ;;  %v10136_v19 = vld [vmem:[#allocation2 + $0x18] sm:$0xff] }
 0x95d   : > { %v5950_v23 = vpop.f32.mrf.mxu2  ;;  %v6302_v10 = vpop.f32.mrf.mxu1 }
 0x961   : > { %9503 = vmatmul.msk.bf16.gmra.mxu1 %vm2360_vm10, %v6659_v57 }
 0x965   : > { %v6044_v48 = vpop.f32.mrf.mxu2  ;;  %v13944_v31 = vpop.f32.mrf.mxu1 }
 0x96d   : > { %v6046_v30 = vpop.f32.mrf.mxu2  ;;  %v6398_v11 = vpop.f32.mrf.mxu1 }
 0x971   : > { %9504 = vmatmul.msk.bf16.gmra.mxu1 %vm2360_vm10, %v6660_v61 }
 0x975   : > { %v6140_v15 = vpop.f32.mrf.mxu2 }
 0x976   : > { %v5498_v12 = vpop.f32.mrf.mxu3  ;;  %v6663_v47 = vpack.c.bf16 %v6140_v15, %v13924_v53  ;;  %v10137_v15 = vld [vmem:[#allocation2 + $0x20] sm:$0xff] }
 0x977   : > { %v5534_v22 = vadd.f32 1e-20, %v5498_v12 }
 0x979   : > { %9996 = vrcp.f32 %v5534_v22 }
 0x97d   : > { %v6142_v21 = vpop.f32.mrf.mxu2 }
 0x97e   : > { %v5501_v39 = vpop.f32.mrf.mxu3 }
 0x97f   : > { %v9997_v8 = vpop.eup %9996  ;;  %v5535_v6 = vadd.f32 1e-20, %v5501_v39 }
 0x980   : > { %v5598_v1 = vmul.f32 %v9997_v8, %v13870_v54 }
 0x981   : > { %9998 = vrcp.f32 %v5535_v6  ;;  %9505 = vmatmul.msk.bf16.gmra.mxu1 %vm2360_vm10, %v6661_v0 }
 0x982   : > { %v5630_v41 = vpack.c.bf16 %v5598_v1, %v5598_v1  ;;  %v10138_v1 = vld [vmem:[#allocation2 + $0x28] sm:$0xff] }
 0x984   : > { %v6076_v16 = vpop.f32.mrf.mxu0  ;;  %9490 = vmatmul.msk.bf16.vlgmr.msra.gmra.mxu2 %vm2360_vm10, %v5630_v41 }
 0x985   : > { %v6236_v32 = vpop.f32.mrf.mxu2  ;;  %v6662_v36 = vpack.c.bf16 %v6076_v16, %v6044_v48 }
 0x986   : > { %v6492_v38 = vpop.f32.mrf.mxu1 }
 0x987   : > { %v9999_v45 = vpop.eup %9998 }
 0x988   : > { %v5599_v14 = vmul.f32 %v9999_v45, %v13877_v34 }
 0x98a   : > { %v5631_v62 = vpack.c.bf16 %v5599_v14, %v5599_v14  ;;  %v10139_v14 = vld [vmem:[#allocation2 + $0x30] sm:$0xff] }
 0x98c   : > { %v6078_v2 = vpop.f32.mrf.mxu0  ;;  %9491 = vmatmul.msk.bf16.vlgmr.msra.gmra.mxu0 %vm2360_vm10, %v5631_v62 }
 0x98d   : > { %v6238_v28 = vpop.f32.mrf.mxu2 }
 0x98e   : > { %v6494_v54 = vpop.f32.mrf.mxu1 }
 0x991   : > { %9506 = vmatmul.msk.bf16.gmra.mxu1 %vm2360_vm10, %v6662_v36 }
 0x994   : > { %v6172_v40 = vpop.f32.mrf.mxu0 }
 0x995   : > { %v6664_v4 = vpack.c.bf16 %v13933_v17, %v6172_v40 }
 0x99c   : > { %v6174_v25 = vpop.f32.mrf.mxu0 }
 0x99e   : > { %v6588_v0 = vpop.f32.mrf.mxu1 }
 0x9a1   : > { %9507 = vmatmul.msk.bf16.gmra.mxu1 %vm2360_vm10, %v6663_v47 }
 0x9a4   : > { %v6268_v20 = vpop.f32.mrf.mxu0 }
 0x9a5   : > { %v6665_v17 = vpack.c.bf16 %v6268_v20, %v6236_v32 }
 0x9a6   : > { %v6332_v3 = vpop.f32.mrf.mxu2  ;;  %v6590_v34 = vpop.f32.mrf.mxu1 }
 0x9a7   : > { %v6666_v61 = vpack.c.bf16 %v6332_v3, %v13939_v55  ;;  %v15824_v34 = vld [vmem:[#allocation10_spill] sm:$0xff] }
 0x9ac   : > { %v6270_v52 = vpop.f32.mrf.mxu0 }
 0x9ae   : > { %v6334_v35 = vpop.f32.mrf.mxu2  ;;  %v6745_v43 = vpop.f32.mrf.mxu1 }
 0x9af   : > { %v6825_v49 = vadd.f32 %v10133_v58, %v6745_v43 }
 0x9b1   : > { %v13964_v26 = vadd.f32 %v13960_v56, %v6825_v49  ;;  %9508 = vmatmul.msk.bf16.gmra.mxu1 %vm2360_vm10, %v6664_v4  ;;  %v10140_v4 = vld [vmem:[#allocation2 + $0x38] sm:$0xff] }
 0x9b3   : > { %v6895_v53 = vsel %vm2360_vm10, %v13964_v26, 0.0 }
 0x9b4   : > { %6896 = vadd.xlane.f32.xlu1 %v6895_v53  ;;  %v6364_v51 = vpop.f32.mrf.mxu0 }
 0x9b5   : > { %v6667_v45 = vpack.c.bf16 %v13944_v31, %v6364_v51 }
 0x9b6   : > { %v6428_v37 = vpop.f32.mrf.mxu2  ;;  %v6747_v5 = vpop.f32.mrf.mxu1 }
 0x9b7   : > { %v6826_v24 = vadd.f32 %v10134_v18, %v6747_v5 }
 0x9b9   : > { %v13970_v46 = vadd.f32 %v13960_v56, %v6826_v24 }
 0x9bb   : > { %v6898_v7 = vsel %vm2360_vm10, %v13970_v46, 0.0 }
 0x9bc   : > { %6899 = vadd.xlane.f32.xlu0 %v6898_v7  ;;  %v6366_v29 = vpop.f32.mrf.mxu0  ;;  %v10141_v7 = vld [vmem:[#allocation2 + $0x40] sm:$0xff] }
 0x9be   : > { %v6430_v63 = vpop.f32.mrf.mxu2  ;;  %v6750_v33 = vpop.f32.mrf.mxu1 }
 0x9bf   : > { %v6827_v27 = vadd.f32 %v10135_v50, %v6750_v33 }
 0x9c1   : > { %v13975_v59 = vadd.f32 %v13960_v56, %v6827_v27  ;;  %9509 = vmatmul.msk.bf16.gmra.mxu1 %vm2360_vm10, %v6665_v17 }
 0x9c3   : > { %v6901_v60 = vsel %vm2360_vm10, %v13975_v59, 0.0 }
 0x9c4   : > { %6902 = vadd.xlane.f32.xlu2 %v6901_v60  ;;  %v6460_v44 = vpop.f32.mrf.mxu0 }
 0x9c5   : > { %v6668_v54 = vpack.c.bf16 %v6460_v44, %v6428_v37 }
 0x9c6   : > { %v6524_v9 = vpop.f32.mrf.mxu2  ;;  %v6752_v13 = vpop.f32.mrf.mxu1 }
 0x9c7   : > { %v6669_v42 = vpack.c.bf16 %v6524_v9, %v6492_v38  ;;  %v6828_v23 = vadd.f32 %v10136_v19, %v6752_v13  ;;  %v10142_v13 = vld [vmem:[#allocation2 + $0x48] sm:$0xff] }
 0x9c9   : > { %v13981_v10 = vadd.f32 %v13960_v56, %v6828_v23  ;;  %9513 = vmatmul.msk.bf16.vlgmr.msra.gmra.mxu3 %vm2360_vm10, %v6669_v42 }
 0x9cb   : > { %v6904_v57 = vsel %vm2360_vm10, %v13981_v10, 0.0 }
 0x9cc   : > { %6905 = vadd.xlane.f32.xlu1 %v6904_v57  ;;  %v6462_v48 = vpop.f32.mrf.mxu0 }
 0x9ce   : > { %v6526_v30 = vpop.f32.mrf.mxu2  ;;  %v6755_v11 = vpop.f32.mrf.mxu1 }
 0x9cf   : > { %v6829_v12 = vadd.f32 %v10137_v15, %v6755_v11 }
 0x9d1   : > { %v13988_v22 = vadd.f32 %v13960_v56, %v6829_v12  ;;  %9510 = vmatmul.msk.bf16.gmra.mxu1 %vm2360_vm10, %v6666_v61  ;;  %v10143_v12 = vld [vmem:[#allocation2 + $0x50] sm:$0xff] }
 0x9d3   : > { %v6907_v21 = vsel %vm2360_vm10, %v13988_v22, 0.0 }
 0x9d4   : > { %6908 = vadd.xlane.f32.xlu0 %v6907_v21  ;;  %v6556_v39 = vpop.f32.mrf.mxu0 }
 0x9d5   : > { %v6670_v6 = vpack.c.bf16 %v6588_v0, %v6556_v39 }
 0x9d6   : > { %v6757_v8 = vpop.f32.mrf.mxu1 }
 0x9d7   : > { %v6830_v41 = vadd.f32 %v10138_v1, %v6757_v8 }
 0x9d9   : > { %v13994_v32 = vadd.f32 %v13960_v56, %v6830_v41  ;;  %9514 = vmatmul.msk.bf16.gmra.mxu3 %vm2360_vm10, %v6670_v6 }
 0x9db   : > { %v6910_v55 = vsel %vm2360_vm10, %v13994_v32, 0.0 }
 0x9dc   : > { %6911 = vadd.xlane.f32.xlu2 %v6910_v55  ;;  %v6558_v16 = vpop.f32.mrf.mxu0 }
 0x9de   : > { %v6760_v38 = vpop.f32.mrf.mxu1 }
 0x9df   : > { %v6831_v62 = vadd.f32 %v10139_v14, %v6760_v38  ;;  %v10144_v38 = vld [vmem:[#allocation2 + $0x58] sm:$0xff] }
 0x9e1   : > { %v14001_v28 = vadd.f32 %v13960_v56, %v6831_v62  ;;  %9511 = vmatmul.msk.bf16.gmra.mxu1 %vm2360_vm10, %v6667_v45 }
 0x9e3   : > { %v6913_v2 = vsel %vm2360_vm10, %v14001_v28, 0.0 }
 0x9e4   : > { %6914 = vadd.xlane.f32.xlu2 %v6913_v2 }
 0x9e6   : > { %v6762_v47 = vpop.f32.mrf.mxu1 }
 0x9e7   : > { %v6832_v58 = vadd.f32 %v10140_v4, %v6762_v47 }
 0x9e9   : > { %v14017_v5 = vadd.f32 %v13960_v56, %v6832_v58 }
 0x9eb   : > { %v6916_v33 = vsel %vm2360_vm10, %v14017_v5, 0.0 }
 0x9ee   : > { %v6765_v20 = vpop.f32.mrf.mxu1 }
 0x9ef   : > { %v6833_v29 = vadd.f32 %v10141_v7, %v6765_v20 }
 0x9f1   : > { %9512 = vmatmul.msk.bf16.gmra.mxu1 %vm2360_vm10, %v6668_v54  ;;  %v14029_v27 = vadd.f32 %v13960_v56, %v6833_v29 }
 0x9f3   : > { %v6919_v19 = vsel %vm2360_vm10, %v14029_v27, 0.0 }
 0x9f6   : > { %v6767_v37 = vpop.f32.mrf.mxu1 }
 0x9f7   : > { %v6834_v42 = vadd.f32 %v10142_v13, %v6767_v37 }
 0x9f9   : > { %v14041_v30 = vadd.f32 %v13960_v56, %v6834_v42 }
 0x9fb   : > { %v6922_v8 = vsel %vm2360_vm10, %v14041_v30, 0.0 }
 0x9fe   : > { %v6770_v44 = vpop.f32.mrf.mxu1 }
 0x9ff   : > { %v6835_v21 = vadd.f32 %v10143_v12, %v6770_v44 }
 0xa01   : > { %v14053_v41 = vadd.f32 %v13960_v56, %v6835_v21 }
 0xa03   : > { %v6925_v62 = vsel %vm2360_vm10, %v14053_v41, 0.0 }
 0xa06   : > { %v6772_v15 = vpop.f32.mrf.mxu1 }
 0xa07   : > { %v6620_v36 = vpop.f32.mrf.mxu2  ;;  %v6836_v45 = vadd.f32 %v10144_v38, %v6772_v15 }
 0xa09   : > { %v6652_v40 = vpop.f32.mrf.mxu0 }
 0xa0a   : > { %v6671_v25 = vpack.c.bf16 %v6652_v40, %v6620_v36  ;;  %v14065_v40 = vadd.f32 %v13960_v56, %v6836_v45  ;;  %v9627_v45 = vld [vmem:[%s10431_s3 + $0x8] sm:$0xff] }
 0xa0b   : > { %7759 = vmatpush.bf16.msrb.mxu2 %v9627_v45  ;;  %9658 = vmatpush.bf16.msrb.mxu3 %v9627_v45 }
 0xa0c   : > { %9515 = vmatmul.msk.bf16.gmra.mxu3 %vm2360_vm10, %v6671_v25  ;;  %v6928_v20 = vsel %vm2360_vm10, %v14065_v40, 0.0 }
 0xa0e   : > { %v6775_v2 = vpop.f32.mrf.mxu1 }
 0xa0f   : > { %v6622_v31 = vpop.f32.mrf.mxu2 }
 0xa11   : > { %v6654_v0 = vpop.f32.mrf.mxu0 }
 0xa12   : > { %v10145_v0 = vld [vmem:[#allocation2 + $0x60] sm:$0xff] }
 0xa13   : > { %v6837_v47 = vadd.f32 %v10145_v0, %v6775_v2 }
 0xa15   : > { %v14077_v58 = vadd.f32 %v13960_v56, %v6837_v47 }
 0xa16   : > { %v6777_v4 = vpop.f32.mrf.mxu1 }
 0xa27   : > { %v6897_v3 = vpop.xlane.xlu1 %6896 }
 0xa28   : > { %v6991_v52 = vmul.f32 %v6897_v3, %v15824_v34 }
 0xa2a   : > { %v14010_v35 = vsub.f32 %v13964_v26, %v6991_v52 }
 0xa2c   : > { %v7055_v43 = vmul.f32 %v14010_v35, %v14010_v35 }
 0xa2e   : > { %v7087_v49 = vsel %vm2360_vm10, %v7055_v43, 0.0 }
 0xa2f   : > { %v6900_v53 = vpop.xlane.xlu0 %6899  ;;  %7088 = vadd.xlane.f32.xlu1 %v7087_v49 }
 0xa30   : > { %v6992_v51 = vmul.f32 %v6900_v53, %v15824_v34 }
 0xa32   : > { %v14020_v18 = vsub.f32 %v13970_v46, %v6992_v51  ;;  %v10146_v51 = vld [vmem:[#allocation2 + $0x68] sm:$0xff] }
 0xa33   : > { %v6838_v37 = vadd.f32 %v10146_v51, %v6777_v4 }
 0xa34   : > { %v7056_v24 = vmul.f32 %v14020_v18, %v14020_v18 }
 0xa35   : > { %v14088_v29 = vadd.f32 %v13960_v56, %v6838_v37 }
 0xa36   : > { %v7090_v63 = vsel %vm2360_vm10, %v7056_v24, 0.0  ;;  %v6931_v24 = vsel %vm2360_vm10, %v14077_v58, 0.0 }
 0xa37   : > { %7091 = vadd.xlane.f32.xlu0 %v7090_v63  ;;  %6917 = vadd.xlane.f32.xlu1 %v6916_v33  ;;  %v6903_v17 = vpop.xlane.xlu2 %6902  ;;  %v6780_v63 = vpop.f32.mrf.mxu1  ;;  %v10147_v33 = vld [vmem:[#allocation2 + $0x70] sm:$0xff] }
 0xa38   : > { %v6993_v50 = vmul.f32 %v6903_v17, %v15824_v34  ;;  %v6839_v17 = vadd.f32 %v10147_v33, %v6780_v63 }
 0xa3a   : > { %v14032_v60 = vsub.f32 %v13975_v59, %v6993_v50  ;;  %v6934_v50 = vsel %vm2360_vm10, %v14088_v29, 0.0  ;;  %v14093_v44 = vadd.f32 %v13960_v56, %v6839_v17 }
 0xa3c   : > { %v7057_v9 = vmul.f32 %v14032_v60, %v14032_v60 }
 0xa3e   : > { %v7093_v23 = vsel %vm2360_vm10, %v7057_v9, 0.0  ;;  %v6937_v9 = vsel %vm2360_vm10, %v14093_v44, 0.0 }
 0xa3f   : > { %v6906_v57 = vpop.xlane.xlu1 %6905  ;;  %6920 = vadd.xlane.f32.xlu1 %v6919_v19  ;;  %7094 = vadd.xlane.f32.xlu0 %v7093_v23  ;;  %v6782_v23 = vpop.f32.mrf.mxu1 }
 0xa40   : > { %v6994_v48 = vmul.f32 %v6906_v57, %v15824_v34 }
 0xa42   : > { %v14044_v11 = vsub.f32 %v13981_v10, %v6994_v48 }
 0xa44   : > { %v7058_v61 = vmul.f32 %v14044_v11, %v14044_v11 }
 0xa46   : > { %v7096_v39 = vsel %vm2360_vm10, %v7058_v61, 0.0 }
 0xa47   : > { %v6909_v6 = vpop.xlane.xlu0 %6908  ;;  %7097 = vadd.xlane.f32.xlu2 %v7096_v39  ;;  %6923 = vadd.xlane.f32.xlu0 %v6922_v8 }
 0xa48   : > { %v6995_v1 = vmul.f32 %v6909_v6, %v15824_v34 }
 0xa4a   : > { %v14056_v55 = vsub.f32 %v13988_v22, %v6995_v1 }
 0xa4c   : > { %v7059_v16 = vmul.f32 %v14056_v55, %v14056_v55 }
 0xa4e   : > { %v7099_v14 = vsel %vm2360_vm10, %v7059_v16, 0.0  ;;  %v6785_v16 = vpop.f32.mrf.mxu1 }
 0xa4f   : > { %7100 = vadd.xlane.f32.xlu2 %v7099_v14  ;;  %6926 = vadd.xlane.f32.xlu0 %v6925_v62  ;;  %v6912_v54 = vpop.xlane.xlu2 %6911 }
 0xa50   : > { %v6996_v36 = vmul.f32 %v6912_v54, %v15824_v34 }
 0xa52   : > { %v14068_v25 = vsub.f32 %v13994_v32, %v6996_v36 }
 0xa54   : > { %v7060_v31 = vmul.f32 %v14068_v25, %v14068_v25 }
 0xa56   : > { %v7102_v3 = vsel %vm2360_vm10, %v7060_v31, 0.0 }
 0xa57   : > { %6929 = vadd.xlane.f32.xlu2 %v6928_v20  ;;  %7103 = vadd.xlane.f32.xlu1 %v7102_v3  ;;  %v6915_v52 = vpop.xlane.xlu2 %6914 }
 0xa58   : > { %v6997_v43 = vmul.f32 %v6915_v52, %v15824_v34 }
 0xa5a   : > { %v14080_v49 = vsub.f32 %v14001_v28, %v6997_v43 }
 0xa5c   : > { %v7061_v53 = vmul.f32 %v14080_v49, %v14080_v49 }
 0xa5e   : > { %v7105_v7 = vsel %vm2360_vm10, %v7061_v53, 0.0  ;;  %v10148_v53 = vld [vmem:[#allocation2 + $0x78] sm:$0xff] }
 0xa5f   : > { %6932 = vadd.xlane.f32.xlu2 %v6931_v24  ;;  %7106 = vadd.xlane.f32.xlu1 %v7105_v7  ;;  %v6840_v51 = vadd.f32 %v10148_v53, %v6782_v23  ;;  %v9626_v7 = vld [vmem:[%s10431_s3] sm:$0xff] }
 0xa60   : > { %7760 = vmatpush.bf16.msrb.mxu2 %v9626_v7  ;;  %9659 = vmatpush.bf16.msrb.mxu3 %v9626_v7 }
 0xa67   : > { %6935 = vadd.xlane.f32.xlu1 %v6934_v50 }
 0xa6f   : > { %6938 = vadd.xlane.f32.xlu1 %v6937_v9 }
 0xaa2   : > { %v7089_v13 = vpop.xlane.xlu1 %7088 }
 0xaa3   : > { %v7183_v42 = vmul.f32 %v7089_v13, %v15824_v34 }
 0xaa5   : > { %v7215_v19 = vadd.f32 1e-05, %v7183_v42  ;;  %v6787_v42 = vpop.f32.mrf.mxu1 }
 0xaa7   : > { %10000 = vrsqrt.f32 %v7215_v19  ;;  %vm7253_vm3 = vweird.f32 %v7215_v19 }
 0xaaa   : > { %v7092_v57 = vpop.xlane.xlu0 %7091  ;;  %v6918_v48 = vpop.xlane.xlu1 %6917 }
 0xaab   : > { %v7184_v61 = vmul.f32 %v7092_v57, %v15824_v34  ;;  %v6998_v15 = vmul.f32 %v6918_v48, %v15824_v34  ;;  %v14130_v57 = vadd.f32 %v13960_v56, %v6840_v51  ;;  %v14133_v48 = vld [vmem:[%s10421_s10] ss:$0 sm:$0xff] }
 0xaad   : > { %v10001_v12 = vpop.eup %10000  ;;  %v7216_v21 = vadd.f32 1e-05, %v7184_v61  ;;  %v14101_v39 = vsub.f32 %v14017_v5, %v6998_v15 }
 0xaae   : > { %v7248_v8 = vmul.f32 %v10001_v12, %v7215_v19  ;;  %vm7254_vm1 = vweird.f32 %v10001_v12 }
 0xaaf   : > { %10002 = vrsqrt.f32 %v7216_v21  ;;  %v7062_v6 = vmul.f32 %v14101_v39, %v14101_v39  ;;  %vm14117_vm4 = vmor %vm7253_vm3, %vm7254_vm1  ;;  %vm7263_vm6 = vweird.f32 %v7216_v21 }
 0xab0   : > { %v7249_v1 = vmul.f32 %v10001_v12, %v7248_v8 }
 0xab1   : > { %v7108_v38 = vsel %vm2360_vm10, %v7062_v6, 0.0 }
 0xab2   : > { %v7250_v14 = vmul.f32 0.5, %v7249_v1  ;;  %v6921_v62 = vpop.xlane.xlu1 %6920  ;;  %7109 = vadd.xlane.f32.xlu0 %v7108_v38  ;;  %v7095_v2 = vpop.xlane.xlu0 %7094  ;;  %v10149_v38 = vld [vmem:[#allocation2 + $0x80] sm:$0xff] }
 0xab3   : > { %v6999_v54 = vmul.f32 %v6921_v62, %v15824_v34  ;;  %v7185_v36 = vmul.f32 %v7095_v2, %v15824_v34  ;;  %v6841_v45 = vadd.f32 %v10149_v38, %v6785_v16  ;;  %v14148_v62 = vld [vmem:[%s10426_s7] ss:$0 sm:$0xff] }
 0xab4   : > { %v7251_v31 = vsub.f32 1.5, %v7250_v14 }
 0xab5   : > { %v10003_v0 = vpop.eup %10002  ;;  %v14110_v47 = vsub.f32 %v14029_v27, %v6999_v54  ;;  %v14112_v20 = vadd.f32 1e-05, %v7185_v36  ;;  %v6940_v54 = vsel %vm2360_vm10, %v14130_v57, 0.0 }
 0xab6   : > { %v7252_v3 = vmul.f32 %v10001_v12, %v7251_v31  ;;  %v7258_v52 = vmul.f32 %v10003_v0, %v7216_v21  ;;  %vm7264_vm5 = vweird.f32 %v10003_v0 }
 0xab7   : > { %10004 = vrsqrt.f32 %v14112_v20  ;;  %v7063_v43 = vmul.f32 %v14110_v47, %v14110_v47  ;;  %vm7265_vm7 = vmor %vm7263_vm6, %vm7264_vm5  ;;  %vm7273_vm9 = vweird.f32 %v14112_v20 }
 0xab8   : > { %v7259_v4 = vmul.f32 %v10003_v0, %v7258_v52  ;;  %v7256_v63 = vsel %vm14117_vm4, %v10001_v12, %v7252_v3 }
 0xab9   : > { %v7111_v24 = vsel %vm2360_vm10, %v7063_v43, 0.0  ;;  %v7567_v61 = vmul.f32 %v7256_v63, %v14010_v35  ;;  %v6790_v63 = vpop.f32.mrf.mxu1 }
 0xaba   : > { %v7260_v33 = vmul.f32 0.5, %v7259_v4  ;;  %7112 = vadd.xlane.f32.xlu0 %v7111_v24  ;;  %v6924_v17 = vpop.xlane.xlu0 %6923  ;;  %v7098_v50 = vpop.xlane.xlu2 %7097  ;;  %v14159_v4 = vadd.f32 %v13960_v56, %v6841_v45 }
 0xabb   : > { %v7000_v9 = vmul.f32 %v6924_v17, %v15824_v34  ;;  %v7186_v13 = vmul.f32 %v7098_v50, %v15824_v34  ;;  %v7602_v2 = vmul.f32 %v14133_v48, %v7567_v61 }
 0xabc   : > { %v7261_v19 = vsub.f32 1.5, %v7260_v33 }
 0xabd   : > { %v14127_v23 = vpop.eup %10004  ;;  %v14137_v15 = vsub.f32 %v14041_v30, %v7000_v9  ;;  %v14139_v12 = vadd.f32 1e-05, %v7186_v13  ;;  %v7637_v51 = vadd.f32 %v14148_v62, %v7602_v2 }
 0xabe   : > { %v7262_v8 = vmul.f32 %v10003_v0, %v7261_v19  ;;  %v7268_v6 = vmul.f32 %v14127_v23, %v14112_v20  ;;  %vm7274_vm8 = vweird.f32 %v14127_v23  ;;  %v10150_v19 = vld [vmem:[#allocation2 + $0x88] sm:$0xff] }
 0xabf   : > { %10006 = vrsqrt.f32 %v14139_v12  ;;  %v7064_v1 = vmul.f32 %v14137_v15, %v14137_v15  ;;  %v6842_v61 = vadd.f32 %v10150_v19, %v6787_v42  ;;  %vm14175_vm2 = vmor %vm7273_vm9, %vm7274_vm8  ;;  %vm7283_vm12 = vweird.f32 %v14139_v12 }
 0xac0   : > { %v7266_v14 = vsel %vm7265_vm7, %v10003_v0, %v7262_v8  ;;  %v7269_v35 = vmul.f32 %v14127_v23, %v7268_v6  ;;  %v6943_v6 = vsel %vm2360_vm10, %v14159_v4, 0.0 }
 0xac1   : > { %v7568_v21 = vmul.f32 %v7266_v14, %v14020_v18  ;;  %v7114_v36 = vsel %vm2360_vm10, %v7064_v1, 0.0 }
 0xac2   : > { %v7270_v31 = vmul.f32 0.5, %v7269_v35  ;;  %6941 = vadd.xlane.f32.xlu0 %v6940_v54  ;;  %7115 = vadd.xlane.f32.xlu2 %v7114_v36  ;;  %v6927_v3 = vpop.xlane.xlu0 %6926  ;;  %v7101_v52 = vpop.xlane.xlu2 %7100  ;;  %v14189_v54 = vadd.f32 %v13960_v56, %v6842_v61 }
 0xac3   : > { %v7603_v16 = vmul.f32 %v14133_v48, %v7568_v21  ;;  %v7001_v0 = vmul.f32 %v6927_v3, %v15824_v34  ;;  %v7187_v43 = vmul.f32 %v7101_v52, %v15824_v34 }
 0xac4   : > { %v7271_v18 = vsub.f32 1.5, %v7270_v31 }
 0xac5   : > { %v10007_v53 = vpop.eup %10006  ;;  %v7638_v37 = vadd.f32 %v14148_v62, %v7603_v16  ;;  %v14164_v24 = vsub.f32 %v14053_v41, %v7001_v0  ;;  %v14166_v7 = vadd.f32 1e-05, %v7187_v43  ;;  %v10151_v0 = vld [vmem:[#allocation2 + $0x90] sm:$0xff] }
 0xac6   : > { %v7272_v33 = vmul.f32 %v14127_v23, %v7271_v18  ;;  %v7278_v17 = vmul.f32 %v10007_v53, %v14139_v12  ;;  %vm7284_vm11 = vweird.f32 %v10007_v53  ;;  %v6843_v43 = vadd.f32 %v10151_v0, %v6790_v63  ;;  %v6792_v18 = vpop.f32.mrf.mxu1 }
 0xac7   : > { %v7669_v50 = vpack.c.bf16 %v7638_v37, %v7637_v51  ;;  %10008 = vrsqrt.f32 %v14166_v7  ;;  %v7065_v9 = vmul.f32 %v14164_v24, %v14164_v24  ;;  %vm7285_vm13 = vmor %vm7283_vm12, %vm7284_vm11  ;;  %vm7293_vm15 = vweird.f32 %v14166_v7 }
 0xac8   : > { %v7279_v13 = vmul.f32 %v10007_v53, %v7278_v17  ;;  %v7276_v38 = vsel %vm14175_vm2, %v14127_v23, %v7272_v33  ;;  %v6946_v33 = vsel %vm2360_vm10, %v14189_v54, 0.0 }
 0xac9   : > { %9524 = vmatmul.msk.bf16.vlgmr.msrb.gmra.mxu2 %vm2360_vm10, %v7669_v50  ;;  %v7117_v1 = vsel %vm2360_vm10, %v7065_v9, 0.0  ;;  %v7569_v36 = vmul.f32 %v7276_v38, %v14032_v60 }
 0xaca   : > { %v7280_v45 = vmul.f32 0.5, %v7279_v13  ;;  %6944 = vadd.xlane.f32.xlu0 %v6943_v6  ;;  %7118 = vadd.xlane.f32.xlu2 %v7117_v1  ;;  %v7104_v20 = vpop.xlane.xlu1 %7103  ;;  %v6930_v42 = vpop.xlane.xlu2 %6929 }
 0xacb   : > { %v7188_v14 = vmul.f32 %v7104_v20, %v15824_v34  ;;  %v7002_v35 = vmul.f32 %v6930_v42, %v15824_v34  ;;  %v7604_v12 = vmul.f32 %v14133_v48, %v7569_v36 }
 0xacc   : > { %v7281_v2 = vsub.f32 1.5, %v7280_v45 }
 0xacd   : > { %v10009_v21 = vpop.eup %10008  ;;  %v7220_v31 = vadd.f32 1e-05, %v7188_v14  ;;  %v14193_v23 = vsub.f32 %v14065_v40, %v7002_v35  ;;  %v7639_v6 = vadd.f32 %v14148_v62, %v7604_v12  ;;  %v10152_v35 = vld [vmem:[#allocation2 + $0x98] sm:$0xff] }
 0xace   : > { %v7282_v3 = vmul.f32 %v10007_v53, %v7281_v2  ;;  %v7288_v52 = vmul.f32 %v10009_v21, %v14166_v7  ;;  %vm7294_vm14 = vweird.f32 %v10009_v21  ;;  %v6844_v2 = vadd.f32 %v10152_v35, %v6792_v18 }
 0xacf   : > { %10010 = vrsqrt.f32 %v7220_v31  ;;  %v7066_v16 = vmul.f32 %v14193_v23, %v14193_v23  ;;  %vm7295_vm0 = vmor %vm7293_vm15, %vm7294_vm14  ;;  %vm7303_vm3 = vweird.f32 %v7220_v31 }
 0xad0   : > { %v7286_v51 = vsel %vm7285_vm13, %v10007_v53, %v7282_v3  ;;  %v7289_v37 = vmul.f32 %v10009_v21, %v7288_v52  ;;  %v6795_v52 = vpop.f32.mrf.mxu1  ;;  %v14225_v18 = vadd.f32 %v13960_v56, %v6844_v2 }
 0xad1   : > { %v7570_v60 = vmul.f32 %v7286_v51, %v14044_v11  ;;  %v7120_v17 = vsel %vm2360_vm10, %v7066_v16, 0.0  ;;  %v14209_v11 = vadd.f32 %v13960_v56, %v6843_v43 }
 0xad2   : > { %v7290_v50 = vmul.f32 0.5, %v7289_v37  ;;  %6947 = vadd.xlane.f32.xlu2 %v6946_v33  ;;  %v14204_v9 = vpop.xlane.xlu1 %7106  ;;  %7121 = vadd.xlane.f32.xlu1 %v7120_v17  ;;  %v6933_v13 = vpop.xlane.xlu2 %6932  ;;  %15830 = vst [vmem:[#allocation20_spill] sm:$0xff] %v14225_v18  ;;  %v10153_v17 = vld [vmem:[#allocation2 + $0xa0] sm:$0xff] }
 0xad3   : > { %v7003_v63 = vmul.f32 %v6933_v13, %v15824_v34  ;;  %v7605_v53 = vmul.f32 %v14133_v48, %v7570_v60  ;;  %15829 = vst [vmem:[#allocation27_spill] sm:$0xff] %v14209_v11  ;;  %v6949_v36 = vsel %vm2360_vm10, %v14209_v11, 0.0  ;;  %v6845_v12 = vadd.f32 %v10153_v17, %v6795_v52 }
 0xad4   : > { %v7291_v19 = vsub.f32 1.5, %v7290_v50 }
 0xad5   : > { %v10011_v61 = vpop.eup %10010  ;;  %v14212_v8 = vsub.f32 %v14077_v58, %v7003_v63  ;;  %v7640_v1 = vadd.f32 %v14148_v62, %v7605_v53  ;;  %v6952_v53 = vsel %vm2360_vm10, %v14225_v18, 0.0 }
 0xad6   : > { %v7292_v38 = vmul.f32 %v10009_v21, %v7291_v19  ;;  %v7298_v45 = vmul.f32 %v10011_v61, %v7220_v31  ;;  %vm7304_vm1 = vweird.f32 %v10011_v61 }
 0xad7   : > { %v7670_v20 = vpack.c.bf16 %v7640_v1, %v7639_v6  ;;  %v7067_v42 = vmul.f32 %v14212_v8, %v14212_v8  ;;  %vm7305_vm4 = vmor %vm7303_vm3, %vm7304_vm1 }
 0xad8   : > { %v7299_v14 = vmul.f32 %v10011_v61, %v7298_v45  ;;  %v7296_v16 = vsel %vm7295_vm0, %v10009_v21, %v7292_v38  ;;  %v6797_v1 = vpop.f32.mrf.mxu1  ;;  %v14241_v38 = vadd.f32 %v13960_v56, %v6845_v12 }
 0xad9   : > { %9525 = vmatmul.msk.bf16.gmra.mxu2 %vm2360_vm10, %v7670_v20  ;;  %v7123_v3 = vsel %vm2360_vm10, %v7067_v42, 0.0  ;;  %v7571_v37 = vmul.f32 %v7296_v16, %v14056_v55  ;;  %v10155_v16 = vld [vmem:[#allocation2 + $0xb0] sm:$0xff] }
 0xada   : > { %v7300_v0 = vmul.f32 0.5, %v7299_v14  ;;  %6950 = vadd.xlane.f32.xlu2 %v6949_v36  ;;  %v6936_v43 = vpop.xlane.xlu1 %6935  ;;  %7124 = vadd.xlane.f32.xlu1 %v7123_v3  ;;  %v10154_v14 = vld [vmem:[#allocation2 + $0xa8] sm:$0xff]  ;;  %v6955_v36 = vsel %vm2360_vm10, %v14241_v38, 0.0 }
 0xadb   : > { %v7004_v51 = vmul.f32 %v6936_v43, %v15824_v34  ;;  %v7606_v55 = vmul.f32 %v14133_v48, %v7571_v37  ;;  %v6846_v35 = vadd.f32 %v10154_v14, %v6797_v1  ;;  %v7189_v37 = vmul.f32 %v14204_v9, %v15824_v34 }
 0xadc   : > { %v7301_v7 = vsub.f32 1.5, %v7300_v0 }
 0xadd   : > { %v14229_v60 = vsub.f32 %v14088_v29, %v7004_v51  ;;  %v14255_v3 = vadd.f32 %v13960_v56, %v6846_v35 }
 0xade   : > { %v7302_v33 = vmul.f32 %v10011_v61, %v7301_v7 }
 0xadf   : > { %v7068_v21 = vmul.f32 %v14229_v60, %v14229_v60  ;;  %v6958_v43 = vsel %vm2360_vm10, %v14255_v3, 0.0 }
 0xae0   : > { %v7306_v50 = vsel %vm7305_vm4, %v10011_v61, %v7302_v33  ;;  %v7641_v61 = vadd.f32 %v14148_v62, %v7606_v55  ;;  %v6800_v52 = vpop.f32.mrf.mxu1  ;;  %v7221_v33 = vadd.f32 1e-05, %v7189_v37 }
 0xae1   : > { %v7572_v13 = vmul.f32 %v7306_v50, %v14068_v25  ;;  %v7126_v63 = vsel %vm2360_vm10, %v7068_v21, 0.0  ;;  %v6847_v0 = vadd.f32 %v10155_v16, %v6800_v52 }
 0xae2   : > { %7127 = vadd.xlane.f32.xlu0 %v7126_v63  ;;  %v6939_v19 = vpop.xlane.xlu1 %6938  ;;  %6953 = vadd.xlane.f32.xlu1 %v6952_v53  ;;  %10012 = vrsqrt.f32 %v7221_v33  ;;  %vm7313_vm6 = vweird.f32 %v7221_v33 }
 0xae3   : > { %v7005_v31 = vmul.f32 %v6939_v19, %v15824_v34  ;;  %v7607_v6 = vmul.f32 %v14133_v48, %v7572_v13  ;;  %v14260_v51 = vadd.f32 %v13960_v56, %v6847_v0 }
 0xae5   : > { %v14244_v25 = vsub.f32 %v14093_v44, %v7005_v31  ;;  %v7642_v45 = vadd.f32 %v14148_v62, %v7607_v6  ;;  %v6961_v7 = vsel %vm2360_vm10, %v14260_v51, 0.0 }
 0xae7   : > { %v7671_v20 = vpack.c.bf16 %v7642_v45, %v7641_v61  ;;  %v7069_v42 = vmul.f32 %v14244_v25, %v14244_v25 }
 0xae8   : > { %v10013_v21 = vpop.eup %10012 }
 0xae9   : > { %9526 = vmatmul.msk.bf16.gmra.mxu2 %vm2360_vm10, %v7671_v20  ;;  %v7129_v2 = vsel %vm2360_vm10, %v7069_v42, 0.0  ;;  %v7308_v17 = vmul.f32 %v10013_v21, %v7221_v33  ;;  %vm7314_vm5 = vweird.f32 %v10013_v21 }
 0xaea   : > { %7130 = vadd.xlane.f32.xlu0 %v7129_v2  ;;  %6956 = vadd.xlane.f32.xlu1 %v6955_v36  ;;  %vm7315_vm7 = vmor %vm7313_vm6, %vm7314_vm5 }
 0xaeb   : > { %v7309_v12 = vmul.f32 %v10013_v21, %v7308_v17 }
 0xaed   : > { %v7310_v63 = vmul.f32 0.5, %v7309_v12 }
 0xaef   : > { %v7311_v55 = vsub.f32 1.5, %v7310_v63 }
 0xaf1   : > { %v7312_v1 = vmul.f32 %v10013_v21, %v7311_v55  ;;  %v9635_v55 = vld [vmem:[%s10441_s5 + $0x38] sm:$0xff] }
 0xaf2   : > { %6959 = vadd.xlane.f32.xlu0 %v6958_v43  ;;  %8082 = vmatpush.bf16.msrb.mxu0 %v9635_v55 }
 0xaf3   : > { %v7316_v20 = vsel %vm7315_vm7, %v10013_v21, %v7312_v1 }
 0xaf4   : > { %v7573_v52 = vmul.f32 %v7316_v20, %v14080_v49 }
 0xaf6   : > { %v7608_v12 = vmul.f32 %v14133_v48, %v7573_v52 }
 0xafa   : > { %6962 = vadd.xlane.f32.xlu0 %v6961_v7 }
 0xb25   : > { %v7110_v50 = vpop.xlane.xlu0 %7109 }
 0xb26   : > { %v7190_v13 = vmul.f32 %v7110_v50, %v15824_v34  ;;  %v6802_v50 = vpop.f32.mrf.mxu1 }
 0xb28   : > { %v7222_v53 = vadd.f32 1e-05, %v7190_v13 }
 0xb2a   : > { %10014 = vrsqrt.f32 %v7222_v53  ;;  %vm7323_vm9 = vweird.f32 %v7222_v53 }
 0xb2d   : > { %v7113_v19 = vpop.xlane.xlu0 %7112 }
 0xb2e   : > { %v7191_v31 = vmul.f32 %v7113_v19, %v15824_v34 }
 0xb30   : > { %v10015_v6 = vpop.eup %10014  ;;  %v7223_v61 = vadd.f32 1e-05, %v7191_v31 }
 0xb31   : > { %v7318_v9 = vmul.f32 %v10015_v6, %v7222_v53  ;;  %vm7324_vm8 = vweird.f32 %v10015_v6 }
 0xb32   : > { %10016 = vrsqrt.f32 %v7223_v61  ;;  %vm7325_vm2 = vmor %vm7323_vm9, %vm7324_vm8  ;;  %vm7333_vm12 = vweird.f32 %v7223_v61 }
 0xb33   : > { %v7319_v45 = vmul.f32 %v10015_v6, %v7318_v9 }
 0xb35   : > { %v7320_v42 = vmul.f32 0.5, %v7319_v45  ;;  %v6942_v14 = vpop.xlane.xlu0 %6941  ;;  %v7116_v35 = vpop.xlane.xlu2 %7115 }
 0xb36   : > { %v7006_v2 = vmul.f32 %v6942_v14, %v15824_v34  ;;  %v7192_v36 = vmul.f32 %v7116_v35, %v15824_v34 }
 0xb37   : > { %v7321_v16 = vsub.f32 1.5, %v7320_v42  ;;  %v7643_v42 = vadd.f32 %v14148_v62, %v7608_v12 }
 0xb38   : > { %v10017_v0 = vpop.eup %10016  ;;  %v14272_v43 = vsub.f32 %v14130_v57, %v7006_v2  ;;  %v14274_v7 = vadd.f32 1e-05, %v7192_v36 }
 0xb39   : > { %v7322_v37 = vmul.f32 %v10015_v6, %v7321_v16  ;;  %v7328_v33 = vmul.f32 %v10017_v0, %v7223_v61  ;;  %vm7334_vm11 = vweird.f32 %v10017_v0 }
 0xb3a   : > { %10018 = vrsqrt.f32 %v14274_v7  ;;  %v7070_v21 = vmul.f32 %v14272_v43, %v14272_v43  ;;  %vm14298_vm13 = vmor %vm7333_vm12, %vm7334_vm11  ;;  %vm7343_vm15 = vweird.f32 %v14274_v7 }
 0xb3b   : > { %v7326_v49 = vsel %vm7325_vm2, %v10015_v6, %v7322_v37  ;;  %v7329_v17 = vmul.f32 %v10017_v0, %v7328_v33  ;;  %v9634_v6 = vld [vmem:[%s10441_s5 + $0x30] sm:$0xff] }
 0xb3c   : > { %v7574_v13 = vmul.f32 %v7326_v49, %v14101_v39  ;;  %v7132_v63 = vsel %vm2360_vm10, %v7070_v21, 0.0  ;;  %8083 = vmatpush.bf16.msrb.mxu0 %v9634_v6  ;;  %v10156_v49 = vld [vmem:[#allocation2 + $0xb8] sm:$0xff] }
 0xb3d   : > { %v7330_v19 = vmul.f32 0.5, %v7329_v17  ;;  %7133 = vadd.xlane.f32.xlu2 %v7132_v63  ;;  %v6945_v53 = vpop.xlane.xlu0 %6944  ;;  %v7119_v31 = vpop.xlane.xlu2 %7118  ;;  %v6848_v17 = vadd.f32 %v10156_v49, %v6802_v50 }
 0xb3e   : > { %v7007_v1 = vmul.f32 %v6945_v53, %v15824_v34  ;;  %v7193_v9 = vmul.f32 %v7119_v31, %v15824_v34  ;;  %v7609_v45 = vmul.f32 %v14133_v48, %v7574_v13  ;;  %v9633_v13 = vld [vmem:[%s10441_s5 + $0x28] sm:$0xff]  ;;  %v6805_v50 = vpop.f32.mrf.mxu1 }
 0xb3f   : > { %v7331_v20 = vsub.f32 1.5, %v7330_v19  ;;  %v14314_v6 = vadd.f32 %v13960_v56, %v6848_v17 }
 0xb40   : > { %v10019_v14 = vpop.eup %10018  ;;  %v14289_v39 = vsub.f32 %v14159_v4, %v7007_v1  ;;  %v14291_v35 = vadd.f32 1e-05, %v7193_v9  ;;  %v7644_v2 = vadd.f32 %v14148_v62, %v7609_v45  ;;  %8084 = vmatpush.bf16.msrb.mxu0 %v9633_v13  ;;  %v9632_v1 = vld [vmem:[%s10441_s5 + $0x20] sm:$0xff]  ;;  %v9631_v13 = vld [vmem:[%s10441_s5 + $0x18] sm:$0xff] }
 0xb41   : > { %v7332_v36 = vmul.f32 %v10017_v0, %v7331_v20  ;;  %v7338_v52 = vmul.f32 %v10019_v14, %v14274_v7  ;;  %vm7344_vm14 = vweird.f32 %v10019_v14  ;;  %15833 = vst [vmem:[#allocation30_spill] sm:$0xff] %v14314_v6 }
 0xb42   : > { %10020 = vrsqrt.f32 %v14291_v35  ;;  %v7672_v16 = vpack.c.bf16 %v7644_v2, %v7643_v42  ;;  %v7071_v37 = vmul.f32 %v14289_v39, %v14289_v39  ;;  %vm7345_vm0 = vmor %vm7343_vm15, %vm7344_vm14  ;;  %vm7353_vm3 = vweird.f32 %v14291_v35 }
 0xb43   : > { %v7339_v21 = vmul.f32 %v10019_v14, %v7338_v52  ;;  %v7336_v12 = vsel %vm14298_vm13, %v10017_v0, %v7332_v36 }
 0xb44   : > { %9527 = vmatmul.msk.bf16.gmra.mxu2 %vm2360_vm10, %v7672_v16  ;;  %v7135_v61 = vsel %vm2360_vm10, %v7071_v37, 0.0  ;;  %v7575_v9 = vmul.f32 %v7336_v12, %v14110_v47  ;;  %v14325_v47 = vld [vmem:[%s10436_s12] ss:$0 sm:$0xff]  ;;  %8085 = vmatpush.bf16.msrb.mxu0 %v9632_v1  ;;  %v10157_v16 = vld [vmem:[#allocation2 + $0xc0] sm:$0xff]  ;;  %v6964_v12 = vsel %vm2360_vm10, %v14314_v6, 0.0  ;;  %v9630_v1 = vld [vmem:[%s10441_s5 + $0x10] sm:$0xff] }
 0xb45   : > { %v7340_v63 = vmul.f32 0.5, %v7339_v21  ;;  %7136 = vadd.xlane.f32.xlu2 %v7135_v61  ;;  %v7122_v55 = vpop.xlane.xlu1 %7121  ;;  %v6948_v19 = vpop.xlane.xlu2 %6947  ;;  %v6849_v37 = vadd.f32 %v10157_v16, %v6805_v50 }
 0xb46   : > { %v7194_v53 = vmul.f32 %v7122_v55, %v15824_v34  ;;  %v7008_v31 = vmul.f32 %v6948_v19, %v15824_v34  ;;  %v7610_v7 = vmul.f32 %v14133_v48, %v7575_v9 }
 0xb47   : > { %v7341_v0 = vsub.f32 1.5, %v7340_v63  ;;  %v14345_v50 = vadd.f32 %v13960_v56, %v6849_v37  ;;  %v6810_v37 = vpop.f32.mrf.mxu3 }
 0xb48   : > { %v14311_v45 = vpop.eup %10020  ;;  %v14316_v20 = vadd.f32 1e-05, %v7194_v53  ;;  %v14319_v42 = vsub.f32 %v14189_v54, %v7008_v31  ;;  %8086 = vmatpush.bf16.msrb.mxu0 %v9631_v13  ;;  %v10158_v13 = vld [vmem:[#allocation2 + $0xc8] sm:$0xff] }
 0xb49   : > { %v7342_v2 = vmul.f32 %v10019_v14, %v7341_v0  ;;  %v7348_v36 = vmul.f32 %v14311_v45, %v14291_v35  ;;  %15834 = vst [vmem:[#allocation31_spill] sm:$0xff] %v14345_v50  ;;  %vm7354_vm1 = vweird.f32 %v14311_v45 }
 0xb4a   : > { %10022 = vrsqrt.f32 %v14316_v20  ;;  %v7072_v52 = vmul.f32 %v14319_v42, %v14319_v42  ;;  %vm14362_vm4 = vmor %vm7353_vm3, %vm7354_vm1  ;;  %vm7363_vm6 = vweird.f32 %v14316_v20 }
 0xb4b   : > { %v7346_v33 = vsel %vm7345_vm0, %v10019_v14, %v7342_v2  ;;  %v7349_v21 = vmul.f32 %v14311_v45, %v7348_v36  ;;  %v7645_v2 = vadd.f32 %v14148_v62, %v7610_v7 }
 0xb4c   : > { %v7576_v49 = vmul.f32 %v7346_v33, %v14137_v15  ;;  %v7762_v17 = vpop.f32.mrf.mxu2  ;;  %v7138_v61 = vsel %vm2360_vm10, %v7072_v52, 0.0  ;;  %8087 = vmatpush.bf16.msrb.mxu0 %v9630_v1 }
 0xb4d   : > { %v7350_v63 = vmul.f32 0.5, %v7349_v21  ;;  %v14338_v55 = vadd.f32 %v14325_v47, %v7762_v17  ;;  %6965 = vadd.xlane.f32.xlu2 %v6964_v12  ;;  %v7125_v14 = vpop.xlane.xlu1 %7124  ;;  %7139 = vadd.xlane.f32.xlu1 %v7138_v61  ;;  %v6951_v19 = vpop.xlane.xlu2 %6950 }
 0xb4e   : > { %v7195_v53 = vmul.f32 %v7125_v14, %v15824_v34  ;;  %v7009_v31 = vmul.f32 %v6951_v19, %v15824_v34  ;;  %v7611_v15 = vmul.f32 %v14133_v48, %v7576_v49  ;;  %v6807_v21 = vpop.f32.mrf.mxu1  ;;  %v6967_v19 = vsel %vm2360_vm10, %v14345_v50, 0.0 }
 0xb4f   : > { %v7351_v9 = vsub.f32 1.5, %v7350_v63  ;;  %v7842_v0 = vmul.f32 0.851, %v14338_v55  ;;  %v6850_v63 = vadd.f32 %v10158_v13, %v6807_v21 }
 0xb50   : > { %v10023_v36 = vpop.eup %10022  ;;  %v14350_v52 = vadd.f32 1e-05, %v7195_v53  ;;  %v14353_v16 = vsub.f32 %v14209_v11, %v7009_v31  ;;  %v7646_v33 = vadd.f32 %v14148_v62, %v7611_v15  ;;  %v9629_v31 = vld [vmem:[%s10441_s5 + $0x8] sm:$0xff] }
 0xb51   : > { %v7352_v49 = vmul.f32 %v14311_v45, %v7351_v9  ;;  %v7358_v56 = vmul.f32 %v10023_v36, %v14316_v20  ;;  %8088 = vmatpush.bf16.msrb.mxu0 %v9629_v31  ;;  %vm7364_vm5 = vweird.f32 %v10023_v36 }
 0xb52   : > { %10024 = vrsqrt.f32 %v14350_v52  ;;  %v7673_v7 = vpack.c.bf16 %v7646_v33, %v7645_v2  ;;  %v7073_v17 = vmul.f32 %v14353_v16, %v14353_v16  ;;  %v9628_v33 = vld [vmem:[%s10441_s5] sm:$0xff]  ;;  %vm7365_vm7 = vmor %vm7363_vm6, %vm7364_vm5  ;;  %vm7373_vm9 = vweird.f32 %v14350_v52 }
 0xb53   : > { %v7359_v61 = vmul.f32 %v10023_v36, %v7358_v56  ;;  %10026 = vtanh.f32 %v7842_v0  ;;  %v7356_v35 = vsel %vm14362_vm4, %v14311_v45, %v7352_v49 }
 0xb54   : > { %v7764_v14 = vpop.f32.mrf.mxu2  ;;  %9528 = vmatmul.msk.bf16.gmra.mxu2 %vm2360_vm10, %v7673_v7  ;;  %v7141_v53 = vsel %vm2360_vm10, %v7073_v17, 0.0  ;;  %v7577_v21 = vmul.f32 %v7356_v35, %v14164_v24  ;;  %v14385_v17 = vld [vmem:[%s10416_s9] ss:$0 sm:$0xff]  ;;  %v10160_v35 = vld [vmem:[#allocation2 + $0xd0] sm:$0xff] }
 0xb55   : > { %v7360_v15 = vmul.f32 0.5, %v7359_v61  ;;  %v14375_v1 = vadd.f32 %v14325_v47, %v7764_v14  ;;  %6968 = vadd.xlane.f32.xlu2 %v6967_v19  ;;  %v7128_v9 = vpop.xlane.xlu0 %7127  ;;  %v6954_v0 = vpop.xlane.xlu1 %6953  ;;  %7142 = vadd.xlane.f32.xlu1 %v7141_v53  ;;  %v14388_v12 = vadd.f32 %v14385_v17, %v6850_v63  ;;  %v6851_v53 = vadd.f32 %v10160_v35, %v6810_v37 }
 0xb56   : > { %v7196_v45 = vmul.f32 %v7128_v9, %v15824_v34  ;;  %v7010_v2 = vmul.f32 %v6954_v0, %v15824_v34  ;;  %8089 = vmatpush.bf16.msrb.mxu0 %v9628_v33  ;;  %v7612_v9 = vmul.f32 %v14133_v48, %v7577_v21  ;;  %v6812_v0 = vpop.f32.mrf.mxu3 }
 0xb57   : > { %v7361_v49 = vsub.f32 1.5, %v7360_v15  ;;  %v7843_v56 = vmul.f32 0.851, %v14375_v1  ;;  %15837 = vst [vmem:[#allocation22_spill] sm:$0xff] %v14388_v12  ;;  %v6970_v37 = vsel %vm2360_vm10, %v14388_v12, 0.0  ;;  %v14413_v21 = vadd.f32 %v14385_v17, %v6851_v53 }
 0xb58   : > { %v14382_v7 = vpop.eup %10024  ;;  %v14390_v61 = vadd.f32 1e-05, %v7196_v45  ;;  %v14393_v13 = vsub.f32 %v14225_v18, %v7010_v2 }
 0xb59   : > { %v10027_v14 = vpop.eup %10026  ;;  %v7362_v19 = vmul.f32 %v10023_v36, %v7361_v49  ;;  %v7368_v24 = vmul.f32 %v14382_v7, %v14350_v52  ;;  %10028 = vtanh.f32 %v7843_v56  ;;  %vm7374_vm8 = vweird.f32 %v14382_v7 }
 0xb5a   : > { %10030 = vrsqrt.f32 %v14390_v61  ;;  %v7074_v63 = vmul.f32 %v14393_v13, %v14393_v13  ;;  %v7906_v45 = vadd.f32 1.0, %v10027_v14  ;;  %vm14427_vm2 = vmor %vm7373_vm9, %vm7374_vm8  ;;  %vm7383_vm12 = vweird.f32 %v14390_v61 }
 0xb5b   : > { %v7366_v31 = vsel %vm7365_vm7, %v10023_v36, %v7362_v19  ;;  %v7369_v15 = vmul.f32 %v14382_v7, %v7368_v24 }
 0xb5c   : > { %v7578_v20 = vmul.f32 %v7366_v31, %v14193_v23  ;;  %v7767_v2 = vpop.f32.mrf.mxu2  ;;  %v7144_v49 = vsel %vm2360_vm10, %v7074_v63, 0.0  ;;  %v7647_v31 = vadd.f32 %v14148_v62, %v7612_v9 }
 0xb5d   : > { %v7370_v56 = vmul.f32 0.5, %v7369_v15  ;;  %v14408_v35 = vadd.f32 %v14325_v47, %v7767_v2  ;;  %v14410_v33 = vpop.xlane.xlu0 %7130  ;;  %7145 = vadd.xlane.f32.xlu0 %v7144_v49  ;;  %v6957_v36 = vpop.xlane.xlu1 %6956  ;;  %6971 = vadd.xlane.f32.xlu1 %v6970_v37  ;;  %v7938_v2 = vmul.f32 0.5, %v7906_v45 }
 0xb5e   : > { %v7011_v23 = vmul.f32 %v6957_v36, %v15824_v34  ;;  %v7613_v14 = vmul.f32 %v14133_v48, %v7578_v20 }
 0xb5f   : > { %v10029_v19 = vpop.eup %10028  ;;  %v7371_v24 = vsub.f32 1.5, %v7370_v56  ;;  %v7844_v63 = vmul.f32 0.851, %v14408_v35 }
 0xb60   : > { %v10031_v15 = vpop.eup %10030  ;;  %v7907_v49 = vadd.f32 1.0, %v10029_v19  ;;  %v14421_v37 = vsub.f32 %v14241_v38, %v7011_v23  ;;  %v7648_v53 = vadd.f32 %v14148_v62, %v7613_v14  ;;  %v7970_v23 = vmul.f32 %v7938_v2, %v14338_v55 }
 0xb61   : > { %v7372_v36 = vmul.f32 %v14382_v7, %v7371_v24  ;;  %v7378_v20 = vmul.f32 %v10031_v15, %v14390_v61  ;;  %10032 = vtanh.f32 %v7844_v63  ;;  %v6973_v24 = vsel %vm2360_vm10, %v14413_v21, 0.0 }
 0xb62   : > { %v7939_v56 = vmul.f32 0.5, %v7907_v49  ;;  %v7674_v18 = vpack.c.bf16 %v7648_v53, %v7647_v31  ;;  %v7075_v45 = vmul.f32 %v14421_v37, %v14421_v37  ;;  %v10161_v31 = vld [vmem:[#allocation2 + $0xd8] sm:$0xff]  ;;  %vm7384_vm11 = vweird.f32 %v10031_v15 }
 0xb63   : > { %v7379_v9 = vmul.f32 %v10031_v15, %v7378_v20  ;;  %v7376_v14 = vsel %vm14427_vm2, %v14382_v7, %v7372_v36  ;;  %v6852_v49 = vadd.f32 %v10161_v31, %v6812_v0  ;;  %vm7385_vm13 = vmor %vm7383_vm12, %vm7384_vm11 }
 0xb64   : > { %v7971_v19 = vmul.f32 %v7939_v56, %v14375_v1  ;;  %v7769_v52 = vpop.f32.mrf.mxu2  ;;  %9529 = vmatmul.msk.bf16.gmra.mxu2 %vm2360_vm10, %v7674_v18  ;;  %v7147_v55 = vsel %vm2360_vm10, %v7075_v45, 0.0  ;;  %v6815_v1 = vpop.f32.mrf.mxu3  ;;  %v7579_v7 = vmul.f32 %v7376_v14, %v14212_v8 }
 0xb65   : > { %v7380_v63 = vmul.f32 0.5, %v7379_v9  ;;  %v7770_v53 = vadd.f32 %v14325_v47, %v7769_v52  ;;  %v6960_v20 = vpop.xlane.xlu0 %6959  ;;  %6974 = vadd.xlane.f32.xlu1 %v6973_v24  ;;  %7148 = vadd.xlane.f32.xlu0 %v7147_v55  ;;  %v14449_v9 = vadd.f32 %v14385_v17, %v6852_v49 }
 0xb66   : > { %v8002_v2 = vpack.c.bf16 %v7971_v19, %v7970_v23  ;;  %v7012_v11 = vmul.f32 %v6960_v20, %v15824_v34  ;;  %v7614_v14 = vmul.f32 %v14133_v48, %v7579_v7 }
 0xb67   : > { %v7381_v18 = vsub.f32 1.5, %v7380_v63  ;;  %v7845_v36 = vmul.f32 0.851, %v7770_v53  ;;  %v10033_v0 = vpop.eup %10032  ;;  %15840 = vst [vmem:[#allocation36_spill] sm:$0xff] %v14449_v9  ;;  %v10162_v63 = vld [vmem:[#allocation2 + $0xe0] sm:$0xff]  ;;  %v6976_v55 = vsel %vm2360_vm10, %v14449_v9, 0.0 }
 0xb68   : > { %v14446_v56 = vsub.f32 %v14255_v3, %v7012_v11  ;;  %8090 = vmatmul.bf16.vlgmr.msrb.gmra.mxu0 %v8002_v2  ;;  %v7908_v52 = vadd.f32 1.0, %v10033_v0  ;;  %v6853_v49 = vadd.f32 %v10162_v63, %v6815_v1  ;;  %v7649_v7 = vadd.f32 %v14148_v62, %v7614_v14 }
 0xb69   : > { %v7382_v45 = vmul.f32 %v10031_v15, %v7381_v18  ;;  %10034 = vtanh.f32 %v7845_v36 }
 0xb6a   : > { %v7076_v23 = vmul.f32 %v14446_v56, %v14446_v56  ;;  %v7940_v18 = vmul.f32 0.5, %v7908_v52 }
 0xb6b   : > { %v7386_v8 = vsel %vm7385_vm13, %v10031_v15, %v7382_v45  ;;  %v14468_v45 = vadd.f32 %v14385_v17, %v6853_v49 }
 0xb6c   : > { %v7580_v19 = vmul.f32 %v7386_v8, %v14229_v60  ;;  %v7772_v24 = vpop.f32.mrf.mxu2  ;;  %v7150_v31 = vsel %vm2360_vm10, %v7076_v23, 0.0  ;;  %v6817_v23 = vpop.f32.mrf.mxu3  ;;  %v7972_v14 = vmul.f32 %v7940_v18, %v14408_v35 }
 0xb6d   : > { %v7773_v20 = vadd.f32 %v14325_v47, %v7772_v24  ;;  %7151 = vadd.xlane.f32.xlu2 %v7150_v31  ;;  %v6963_v61 = vpop.xlane.xlu0 %6962  ;;  %6977 = vadd.xlane.f32.xlu0 %v6976_v55  ;;  %v10163_v31 = vld [vmem:[#allocation2 + $0xe8] sm:$0xff] }
 0xb6e   : > { %v7013_v2 = vmul.f32 %v6963_v61, %v15824_v34  ;;  %v7615_v15 = vmul.f32 %v14133_v48, %v7580_v19  ;;  %v6854_v63 = vadd.f32 %v10163_v31, %v6817_v23 }
 0xb6f   : > { %v10035_v11 = vpop.eup %10034  ;;  %v7846_v60 = vmul.f32 0.851, %v7773_v20 }
 0xb70   : > { %v7909_v36 = vadd.f32 1.0, %v10035_v11  ;;  %v14464_v1 = vsub.f32 %v14260_v51, %v7013_v2  ;;  %v7650_v0 = vadd.f32 %v14148_v62, %v7615_v15  ;;  %v6979_v2 = vsel %vm2360_vm10, %v14468_v45, 0.0 }
 0xb71   : > { %10036 = vtanh.f32 %v7846_v60  ;;  %v14479_v60 = vadd.f32 %v14385_v17, %v6854_v63 }
 0xb72   : > { %v7941_v8 = vmul.f32 0.5, %v7909_v36  ;;  %v7675_v24 = vpack.c.bf16 %v7650_v0, %v7649_v7  ;;  %v7077_v19 = vmul.f32 %v14464_v1, %v14464_v1  ;;  %v10164_v7 = vld [vmem:[#allocation2 + $0xf0] sm:$0xff] }
 0xb73   : > { %v6982_v0 = vsel %vm2360_vm10, %v14479_v60, 0.0 }
 0xb74   : > { %v7973_v52 = vmul.f32 %v7941_v8, %v7770_v53  ;;  %v7774_v61 = vpop.f32.mrf.mxu2  ;;  %9530 = vmatmul.msk.bf16.gmra.mxu2 %vm2360_vm10, %v7675_v24  ;;  %v7153_v55 = vsel %vm2360_vm10, %v7077_v19, 0.0  ;;  %v6820_v53 = vpop.f32.mrf.mxu3 }
 0xb75   : > { %v7775_v49 = vadd.f32 %v14325_v47, %v7774_v61  ;;  %7154 = vadd.xlane.f32.xlu2 %v7153_v55  ;;  %6980 = vadd.xlane.f32.xlu0 %v6979_v2  ;;  %v6855_v18 = vadd.f32 %v10164_v7, %v6820_v53  ;;  %v7197_v55 = vmul.f32 %v14410_v33, %v15824_v34 }
 0xb76   : > { %v8003_v15 = vpack.c.bf16 %v7973_v52, %v7972_v14 }
 0xb77   : > { %v7847_v11 = vmul.f32 0.851, %v7775_v49  ;;  %v10037_v35 = vpop.eup %10036  ;;  %v14484_v8 = vadd.f32 %v14385_v17, %v6855_v18  ;;  %v7229_v2 = vadd.f32 1e-05, %v7197_v55 }
 0xb78   : > { %8095 = vmatmul.bf16.gmra.mxu0 %v8003_v15  ;;  %v7910_v36 = vadd.f32 1.0, %v10037_v35 }
 0xb79   : > { %10038 = vtanh.f32 %v7847_v11  ;;  %v6985_v52 = vsel %vm2360_vm10, %v14484_v8, 0.0  ;;  %vm7393_vm15 = vweird.f32 %v7229_v2 }
 0xb7a   : > { %v7942_v24 = vmul.f32 0.5, %v7910_v36  ;;  %10040 = vrsqrt.f32 %v7229_v2 }
 0xb7c   : > { %v7974_v63 = vmul.f32 %v7942_v24, %v7773_v20 }
 0xb7d   : > { %6983 = vadd.xlane.f32.xlu2 %v6982_v0 }
 0xb7f   : > { %v10039_v23 = vpop.eup %10038 }
 0xb80   : > { %v7911_v19 = vadd.f32 1.0, %v10039_v23  ;;  %v10041_v15 = vpop.eup %10040 }
 0xb81   : > { %v7388_v11 = vmul.f32 %v10041_v15, %v7229_v2  ;;  %vm7394_vm14 = vweird.f32 %v10041_v15 }
 0xb82   : > { %v7943_v31 = vmul.f32 0.5, %v7911_v19  ;;  %vm7395_vm0 = vmor %vm7393_vm15, %vm7394_vm14 }
 0xb83   : > { %v7389_v35 = vmul.f32 %v10041_v15, %v7388_v11 }
 0xb84   : > { %v7975_v14 = vmul.f32 %v7943_v31, %v7775_v49 }
 0xb85   : > { %6986 = vadd.xlane.f32.xlu2 %v6985_v52  ;;  %v7390_v18 = vmul.f32 0.5, %v7389_v35 }
 0xb86   : > { %v8004_v61 = vpack.c.bf16 %v7975_v14, %v7974_v63 }
 0xb87   : > { %v7391_v49 = vsub.f32 1.5, %v7390_v18 }
 0xb88   : > { %8100 = vmatmul.bf16.gmra.mxu0 %v8004_v61 }
 0xb89   : > { %v7392_v24 = vmul.f32 %v10041_v15, %v7391_v49 }
 0xb8b   : > { %v7396_v63 = vsel %vm7395_vm0, %v10041_v15, %v7392_v24 }
 0xb8c   : > { %v7581_v35 = vmul.f32 %v7396_v63, %v14244_v25 }
 0xb8e   : > { %v7616_v25 = vmul.f32 %v14133_v48, %v7581_v35 }
 0xbb0   : > { %v7134_v53 = vpop.xlane.xlu2 %7133 }
 0xbb1   : > { %v7198_v7 = vmul.f32 %v7134_v53, %v15824_v34 }
 0xbb3   : > { %v7230_v20 = vadd.f32 1e-05, %v7198_v7 }
 0xbb5   : > { %10042 = vrsqrt.f32 %v7230_v20  ;;  %vm7403_vm3 = vweird.f32 %v7230_v20 }
 0xbb8   : > { %v7137_v36 = vpop.xlane.xlu2 %7136 }
 0xbb9   : > { %v7199_v0 = vmul.f32 %v7137_v36, %v15824_v34 }
 0xbbb   : > { %v10043_v23 = vpop.eup %10042  ;;  %v7231_v19 = vadd.f32 1e-05, %v7199_v0 }
 0xbbc   : > { %v7398_v33 = vmul.f32 %v10043_v23, %v7230_v20  ;;  %vm7404_vm1 = vweird.f32 %v10043_v23 }
 0xbbd   : > { %10044 = vrsqrt.f32 %v7231_v19  ;;  %vm7405_vm4 = vmor %vm7403_vm3, %vm7404_vm1  ;;  %vm7413_vm6 = vweird.f32 %v7231_v19 }
 0xbbe   : > { %v7399_v31 = vmul.f32 %v10043_v23, %v7398_v33 }
 0xbc0   : > { %v7400_v14 = vmul.f32 0.5, %v7399_v31  ;;  %v7140_v52 = vpop.xlane.xlu1 %7139  ;;  %v6966_v61 = vpop.xlane.xlu2 %6965 }
 0xbc1   : > { %v7200_v55 = vmul.f32 %v7140_v52, %v15824_v34  ;;  %v7014_v11 = vmul.f32 %v6966_v61, %v15824_v34 }
 0xbc2   : > { %v7401_v53 = vsub.f32 1.5, %v7400_v14 }
 0xbc3   : > { %v10045_v7 = vpop.eup %10044  ;;  %v14495_v18 = vadd.f32 1e-05, %v7200_v55  ;;  %v14498_v2 = vsub.f32 %v14314_v6, %v7014_v11 }
 0xbc4   : > { %v7402_v49 = vmul.f32 %v10043_v23, %v7401_v53  ;;  %v7408_v15 = vmul.f32 %v10045_v7, %v7231_v19  ;;  %vm7414_vm5 = vweird.f32 %v10045_v7 }
 0xbc5   : > { %10046 = vrsqrt.f32 %v14495_v18  ;;  %v7078_v36 = vmul.f32 %v14498_v2, %v14498_v2  ;;  %vm14524_vm7 = vmor %vm7413_vm6, %vm7414_vm5  ;;  %vm7423_vm9 = vweird.f32 %v14495_v18 }
 0xbc6   : > { %v7406_v0 = vsel %vm7405_vm4, %v10043_v23, %v7402_v49  ;;  %v7409_v24 = vmul.f32 %v10045_v7, %v7408_v15 }
 0xbc7   : > { %v7582_v33 = vmul.f32 %v7406_v0, %v14272_v43  ;;  %v7777_v31 = vpop.f32.mrf.mxu2  ;;  %v7156_v63 = vsel %vm2360_vm10, %v7078_v36, 0.0  ;;  %v7651_v43 = vadd.f32 %v14148_v62, %v7616_v25 }
 0xbc8   : > { %v7410_v14 = vmul.f32 0.5, %v7409_v24  ;;  %v14507_v52 = vadd.f32 %v14325_v47, %v7777_v31  ;;  %v7143_v20 = vpop.xlane.xlu1 %7142  ;;  %7157 = vadd.xlane.f32.xlu1 %v7156_v63  ;;  %v6969_v61 = vpop.xlane.xlu2 %6968 }
 0xbc9   : > { %v7201_v55 = vmul.f32 %v7143_v20, %v15824_v34  ;;  %v7015_v11 = vmul.f32 %v6969_v61, %v15824_v34  ;;  %v7617_v23 = vmul.f32 %v14133_v48, %v7582_v33  ;;  %v6822_v24 = vpop.f32.mrf.mxu3  ;;  %v10165_v20 = vld [vmem:[#allocation2 + $0xf8] sm:$0xff] }
 0xbca   : > { %v7411_v53 = vsub.f32 1.5, %v7410_v14  ;;  %v7848_v35 = vmul.f32 0.851, %v14507_v52  ;;  %v6856_v61 = vadd.f32 %v10165_v20, %v6822_v24 }
 0xbcb   : > { %v10047_v49 = vpop.eup %10046  ;;  %v14514_v15 = vadd.f32 1e-05, %v7201_v55  ;;  %v14517_v36 = vsub.f32 %v14345_v50, %v7015_v11  ;;  %v7652_v0 = vadd.f32 %v14148_v62, %v7617_v23 }
 0xbcc   : > { %v7412_v31 = vmul.f32 %v10045_v7, %v7411_v53  ;;  %v7418_v63 = vmul.f32 %v10047_v49, %v14495_v18  ;;  %vm7424_vm8 = vweird.f32 %v10047_v49 }
 0xbcd   : > { %10048 = vrsqrt.f32 %v14514_v15  ;;  %v7676_v48 = vpack.c.bf16 %v7652_v0, %v7651_v43  ;;  %v7079_v25 = vmul.f32 %v14517_v36, %v14517_v36  ;;  %vm7425_vm2 = vmor %vm7423_vm9, %vm7424_vm8  ;;  %vm7433_vm12 = vweird.f32 %v14514_v15 }
 0xbce   : > { %v7419_v14 = vmul.f32 %v10047_v49, %v7418_v63  ;;  %10050 = vtanh.f32 %v7848_v35  ;;  %v7416_v62 = vsel %vm14524_vm7, %v10045_v7, %v7412_v31 }
 0xbcf   : > { %v7779_v55 = vpop.f32.mrf.mxu2  ;;  %9531 = vmatmul.msk.bf16.gmra.mxu2 %vm2360_vm10, %v7676_v48  ;;  %v7159_v19 = vsel %vm2360_vm10, %v7079_v25, 0.0  ;;  %v7583_v24 = vmul.f32 %v7416_v62, %v14289_v39  ;;  %v14539_v48 = vadd.f32 %v14385_v17, %v6856_v61 }
 0xbd0   : > { %v7420_v11 = vmul.f32 0.5, %v7419_v14  ;;  %v7780_v23 = vadd.f32 %v14325_v47, %v7779_v55  ;;  %v7146_v53 = vpop.xlane.xlu0 %7145  ;;  %v6972_v43 = vpop.xlane.xlu1 %6971  ;;  %7160 = vadd.xlane.f32.xlu1 %v7159_v19  ;;  %v14554_v55 = vld [vmem:[%s10421_s10] ss:$0 sm:$0xff] }
 0xbd1   : > { %v7202_v0 = vmul.f32 %v7146_v53, %v15824_v34  ;;  %v7016_v35 = vmul.f32 %v6972_v43, %v15824_v34  ;;  %v7618_v19 = vmul.f32 %v14554_v55, %v7583_v24 }
 0xbd2   : > { %v7421_v63 = vsub.f32 1.5, %v7420_v11  ;;  %v7849_v7 = vmul.f32 0.851, %v7780_v23 }
 0xbd3   : > { %v14536_v31 = vpop.eup %10048  ;;  %v14541_v25 = vadd.f32 1e-05, %v7202_v0  ;;  %v14544_v33 = vsub.f32 %v14388_v12, %v7016_v35  ;;  %v6988_v0 = vsel %vm2360_vm10, %v14539_v48, 0.0 }
 0xbd4   : > { %v10051_v14 = vpop.eup %10050  ;;  %v7422_v20 = vmul.f32 %v10047_v49, %v7421_v63  ;;  %v7428_v39 = vmul.f32 %v14536_v31, %v14514_v15  ;;  %10052 = vtanh.f32 %v7849_v7  ;;  %vm7434_vm11 = vweird.f32 %v14536_v31 }
 0xbd5   : > { %10054 = vrsqrt.f32 %v14541_v25  ;;  %v7080_v17 = vmul.f32 %v14544_v33, %v14544_v33  ;;  %v7912_v18 = vadd.f32 1.0, %v10051_v14  ;;  %vm14587_vm13 = vmor %vm7433_vm12, %vm7434_vm11  ;;  %vm7443_vm15 = vweird.f32 %v14541_v25 }
 0xbd6   : > { %v7426_v61 = vsel %vm7425_vm2, %v10047_v49, %v7422_v20  ;;  %v7429_v62 = vmul.f32 %v14536_v31, %v7428_v39 }
 0xbd7   : > { %v7584_v11 = vmul.f32 %v7426_v61, %v14319_v42  ;;  %v7782_v53 = vpop.f32.mrf.mxu2  ;;  %v7162_v43 = vsel %vm2360_vm10, %v7080_v17, 0.0  ;;  %v14569_v61 = vld [vmem:[%s10426_s7] ss:$0 sm:$0xff]  ;;  %v7944_v12 = vmul.f32 0.5, %v7912_v18  ;;  %s15857_s7 = sld [smem:[#allocation57_spill]] (!%p9572_p9) }
 0xbd8   : > { %v7430_v35 = vmul.f32 0.5, %v7429_v62  ;;  %v14562_v63 = vadd.f32 %v14325_v47, %v7782_v53  ;;  %7163 = vadd.xlane.f32.xlu0 %v7162_v43  ;;  %v6975_v49 = vpop.xlane.xlu1 %6974  ;;  %6989 = vadd.xlane.f32.xlu1 %v6988_v0  ;;  %v7149_v7 = vpop.xlane.xlu0 %7148  ;;  %v7653_v62 = vadd.f32 %v14569_v61, %v7618_v19 }
 0xbd9   : > { %v7017_v24 = vmul.f32 %v6975_v49, %v15824_v34  ;;  %v7619_v42 = vmul.f32 %v14554_v55, %v7584_v11  ;;  %v7203_v17 = vmul.f32 %v7149_v7, %v15824_v34 }
 0xbda   : > { %v10053_v14 = vpop.eup %10052  ;;  %v7431_v20 = vsub.f32 1.5, %v7430_v35  ;;  %v7850_v39 = vmul.f32 0.851, %v14562_v63 }
 0xbdb   : > { %v10055_v53 = vpop.eup %10054  ;;  %v7913_v43 = vadd.f32 1.0, %v10053_v14  ;;  %v14573_v0 = vsub.f32 %v14413_v21, %v7017_v24  ;;  %v7654_v49 = vadd.f32 %v14569_v61, %v7619_v42  ;;  %v14579_v7 = vadd.f32 1e-05, %v7203_v17 }
 0xbdc   : > { %v7432_v11 = vmul.f32 %v14536_v31, %v7431_v20  ;;  %v7438_v35 = vmul.f32 %v10055_v53, %v14541_v25  ;;  %10056 = vtanh.f32 %v7850_v39  ;;  %v7976_v24 = vmul.f32 %v7944_v12, %v14507_v52 }
 0xbdd   : > { %v7945_v50 = vmul.f32 0.5, %v7913_v43  ;;  %v7677_v6 = vpack.c.bf16 %v7654_v49, %v7653_v62  ;;  %v7081_v19 = vmul.f32 %v14573_v0, %v14573_v0  ;;  %10058 = vrsqrt.f32 %v14579_v7 }
 0xbde   : > { %v7439_v18 = vmul.f32 %v10055_v53, %v7438_v35  ;;  %vm7444_vm14 = vweird.f32 %v10055_v53  ;;  %vm7453_vm3 = vweird.f32 %v14579_v7 }
 0xbdf   : > { %v7977_v42 = vmul.f32 %v7945_v50, %v7780_v23  ;;  %v7784_v14 = vpop.f32.mrf.mxu2  ;;  %9532 = vmatmul.msk.bf16.gmra.mxu2 %vm2360_vm10, %v7677_v6  ;;  %v7165_v39 = vsel %vm2360_vm10, %v7081_v19, 0.0  ;;  %v7436_v50 = vsel %vm14587_vm13, %v14536_v31, %v7432_v11  ;;  %vm7445_vm0 = vmor %vm7443_vm15, %vm7444_vm14 }
 0xbe0   : > { %v7440_v17 = vmul.f32 0.5, %v7439_v18  ;;  %v14592_v62 = vadd.f32 %v14325_v47, %v7784_v14  ;;  %v7152_v43 = vpop.xlane.xlu2 %7151  ;;  %v6978_v12 = vpop.xlane.xlu0 %6977  ;;  %7166 = vadd.xlane.f32.xlu0 %v7165_v39  ;;  %v7585_v31 = vmul.f32 %v7436_v50, %v14353_v16 }
 0xbe1   : > { %v7204_v6 = vmul.f32 %v7152_v43, %v15824_v34  ;;  %v8005_v52 = vpack.c.bf16 %v7977_v42, %v7976_v24  ;;  %v7018_v49 = vmul.f32 %v6978_v12, %v15824_v34  ;;  %v14609_v24 = vld [vmem:[%s10446_s30] ss:$0 sm:$0xff] }
 0xbe2   : > { %v7441_v15 = vsub.f32 1.5, %v7440_v17  ;;  %v7851_v23 = vmul.f32 0.851, %v14592_v62  ;;  %v10057_v19 = vpop.eup %10056 }
 0xbe3   : > { %v14602_v35 = vadd.f32 1e-05, %v7204_v6  ;;  %8105 = vmatmul.bf16.gmra.mxu0 %v8005_v52  ;;  %v14606_v18 = vsub.f32 %v14449_v9, %v7018_v49  ;;  %v14611_v42 = vpop.eup %10058  ;;  %v7914_v39 = vadd.f32 1.0, %v10057_v19 }
 0xbe4   : > { %v7442_v11 = vmul.f32 %v10055_v53, %v7441_v15  ;;  %10060 = vtanh.f32 %v7851_v23  ;;  %v7448_v20 = vmul.f32 %v14611_v42, %v14579_v7  ;;  %v7620_v15 = vmul.f32 %v14554_v55, %v7585_v31 }
 0xbe5   : > { %10062 = vrsqrt.f32 %v14602_v35  ;;  %v8091_v14 = vpop.f32.mrf.mxu0  ;;  %v7082_v50 = vmul.f32 %v14606_v18, %v14606_v18  ;;  %vm7454_vm1 = vweird.f32 %v14611_v42  ;;  %vm7463_vm6 = vweird.f32 %v14602_v35 }
 0xbe6   : > { %v7446_v25 = vsel %vm7445_vm0, %v10055_v53, %v7442_v11  ;;  %v8171_v17 = vadd.f32 %v8091_v14, %v13964_v26  ;;  %v7449_v12 = vmul.f32 %v14611_v42, %v7448_v20  ;;  %v7946_v20 = vmul.f32 0.5, %v7914_v39  ;;  %vm14647_vm4 = vmor %vm7453_vm3, %vm7454_vm1 }
 0xbe7   : > { %v7586_v16 = vmul.f32 %v7446_v25, %v14393_v13  ;;  %v7787_v43 = vpop.f32.mrf.mxu2  ;;  %v7168_v26 = vsel %vm2360_vm10, %v7082_v50, 0.0  ;;  %v7655_v50 = vadd.f32 %v14569_v61, %v7620_v15 }
 0xbe8   : > { %v14622_v6 = vadd.f32 %v14609_v24, %v8171_v17  ;;  %v14625_v52 = vadd.f32 %v14325_v47, %v7787_v43  ;;  %v14627_v53 = vpop.xlane.xlu2 %7154  ;;  %v6981_v13 = vpop.xlane.xlu0 %6980  ;;  %v7450_v19 = vmul.f32 0.5, %v7449_v12  ;;  %7169 = vadd.xlane.f32.xlu2 %v7168_v26 }
 0xbe9   : > { %v7621_v23 = vmul.f32 %v14554_v55, %v7586_v16  ;;  %v7019_v14 = vmul.f32 %v6981_v13, %v15824_v34 }
 0xbea   : > { %15845 = vst [vmem:[#allocation35_spill] sm:$0xff] %v14622_v6  ;;  %v10061_v49 = vpop.eup %10060  ;;  %v7852_v11 = vmul.f32 0.851, %v14625_v52  ;;  %v7451_v43 = vsub.f32 1.5, %v7450_v19 }
 0xbeb   : > { %8239 = vst.msk [vmem:[#allocation2] sm:$0xff] %vm2360_vm10, %v14622_v6  ;;  %v10063_v25 = vpop.eup %10062  ;;  %v7915_v17 = vadd.f32 1.0, %v10061_v49  ;;  %v7656_v31 = vadd.f32 %v14569_v61, %v7621_v23  ;;  %v14642_v26 = vsub.f32 %v14468_v45, %v7019_v14  ;;  %v7978_v6 = vmul.f32 %v7946_v20, %v14562_v63 }
 0xbec   : > { %v7458_v16 = vmul.f32 %v10063_v25, %v14602_v35  ;;  %10064 = vtanh.f32 %v7852_v11  ;;  %v7452_v39 = vmul.f32 %v14611_v42, %v7451_v43  ;;  %vm7464_vm5 = vweird.f32 %v10063_v25 }
 0xbed   : > { %v7947_v12 = vmul.f32 0.5, %v7915_v17  ;;  %v8093_v13 = vpop.f32.mrf.mxu0  ;;  %v7678_v19 = vpack.c.bf16 %v7656_v31, %v7655_v50  ;;  %v7083_v11 = vmul.f32 %v14642_v26, %v14642_v26  ;;  %vm7465_vm7 = vmor %vm7463_vm6, %vm7464_vm5 }
 0xbee   : > { %v7459_v49 = vmul.f32 %v10063_v25, %v7458_v16  ;;  %v8172_v23 = vadd.f32 %v8093_v13, %v13970_v46  ;;  %v7456_v14 = vsel %vm14647_vm4, %v14611_v42, %v7452_v39 }
 0xbef   : > { %v7979_v7 = vmul.f32 %v7947_v12, %v14592_v62  ;;  %v7789_v15 = vpop.f32.mrf.mxu2  ;;  %9533 = vmatmul.msk.bf16.gmra.mxu2 %vm2360_vm10, %v7678_v19  ;;  %v7171_v31 = vsel %vm2360_vm10, %v7083_v11, 0.0  ;;  %v7587_v50 = vmul.f32 %v7456_v14, %v14421_v37 }
 0xbf0   : > { %v7460_v17 = vmul.f32 0.5, %v7459_v49  ;;  %v14658_v46 = vadd.f32 %v14609_v24, %v8172_v23  ;;  %v7790_v63 = vadd.f32 %v14325_v47, %v7789_v15  ;;  %v6984_v20 = vpop.xlane.xlu2 %6983  ;;  %7172 = vadd.xlane.f32.xlu1 %v7171_v31 }
 0xbf1   : > { %v7020_v62 = vmul.f32 %v6984_v20, %v15824_v34  ;;  %v8006_v43 = vpack.c.bf16 %v7979_v7, %v7978_v6  ;;  %v7622_v11 = vmul.f32 %v14554_v55, %v7587_v50 }
 0xbf2   : > { %v7461_v16 = vsub.f32 1.5, %v7460_v17  ;;  %8240 = vst.msk [vmem:[#allocation2 + $0x8] sm:$0xff] %vm2360_vm10, %v14658_v46  ;;  %v7853_v9 = vmul.f32 0.851, %v7790_v63  ;;  %v10065_v42 = vpop.eup %10064 }
 0xbf3   : > { %v14668_v12 = vsub.f32 %v14479_v60, %v7020_v62  ;;  %8110 = vmatmul.bf16.gmra.mxu0 %v8006_v43  ;;  %v7916_v23 = vadd.f32 1.0, %v10065_v42 }
 0xbf4   : > { %v7462_v13 = vmul.f32 %v10063_v25, %v7461_v16  ;;  %10066 = vtanh.f32 %v7853_v9  ;;  %v7657_v16 = vadd.f32 %v14569_v61, %v7622_v11 }
 0xbf5   : > { %v8096_v6 = vpop.f32.mrf.mxu0  ;;  %v7084_v39 = vmul.f32 %v14668_v12, %v14668_v12 }
 0xbf6   : > { %v7466_v49 = vsel %vm7465_vm7, %v10063_v25, %v7462_v13  ;;  %v8173_v19 = vadd.f32 %v8096_v6, %v13975_v59  ;;  %v7948_v59 = vmul.f32 0.5, %v7916_v23 }
 0xbf7   : > { %v7588_v7 = vmul.f32 %v7466_v49, %v14446_v56  ;;  %v7792_v37 = vpop.f32.mrf.mxu2  ;;  %v7174_v15 = vsel %vm2360_vm10, %v7084_v39, 0.0 }
 0xbf8   : > { %v14678_v14 = vadd.f32 %v14609_v24, %v8173_v19  ;;  %v7793_v35 = vadd.f32 %v14325_v47, %v7792_v37  ;;  %7175 = vadd.xlane.f32.xlu0 %v7174_v15  ;;  %v6987_v17 = vpop.xlane.xlu2 %6986  ;;  %v7980_v49 = vmul.f32 %v7948_v59, %v14625_v52 }
 0xbf9   : > { %v7021_v20 = vmul.f32 %v6987_v17, %v15824_v34  ;;  %v7623_v25 = vmul.f32 %v14554_v55, %v7588_v7 }
 0xbfa   : > { %v10067_v31 = vpop.eup %10066  ;;  %8241 = vst.msk [vmem:[#allocation2 + $0x10] sm:$0xff] %vm2360_vm10, %v14678_v14  ;;  %v7854_v56 = vmul.f32 0.851, %v7793_v35 }
 0xbfb   : > { %v7917_v62 = vadd.f32 1.0, %v10067_v31  ;;  %v14686_v43 = vsub.f32 %v14484_v8, %v7021_v20  ;;  %v7658_v9 = vadd.f32 %v14569_v61, %v7623_v25 }
 0xbfc   : > { %10068 = vtanh.f32 %v7854_v56 }
 0xbfd   : > { %v7949_v42 = vmul.f32 0.5, %v7917_v62  ;;  %v8098_v50 = vpop.f32.mrf.mxu0  ;;  %v7679_v13 = vpack.c.bf16 %v7658_v9, %v7657_v16  ;;  %v7085_v6 = vmul.f32 %v14686_v43, %v14686_v43 }
 0xbfe   : > { %v8174_v39 = vadd.f32 %v8098_v50, %v13981_v10 }
 0xbff   : > { %v7981_v23 = vmul.f32 %v7949_v42, %v7790_v63  ;;  %v7794_v19 = vpop.f32.mrf.mxu2  ;;  %v7177_v7 = vsel %vm2360_vm10, %v7085_v6, 0.0  ;;  %9534 = vmatmul.msk.bf16.gmra.mxu2 %vm2360_vm10, %v7679_v13  ;;  %v7205_v13 = vmul.f32 %v14627_v53, %v15824_v34 }
 0xc00   : > { %v14696_v37 = vadd.f32 %v14609_v24, %v8174_v39  ;;  %v7795_v15 = vadd.f32 %v14325_v47, %v7794_v19  ;;  %7178 = vadd.xlane.f32.xlu2 %v7177_v7 }
 0xc01   : > { %v8007_v11 = vpack.c.bf16 %v7981_v23, %v7980_v49  ;;  %v7237_v6 = vadd.f32 1e-05, %v7205_v13 }
 0xc02   : > { %8242 = vst.msk [vmem:[#allocation2 + $0x18] sm:$0xff] %vm2360_vm10, %v14696_v37  ;;  %v7855_v17 = vmul.f32 0.851, %v7795_v15  ;;  %v10069_v10 = vpop.eup %10068 }
 0xc03   : > { %8115 = vmatmul.bf16.gmra.mxu0 %v8007_v11  ;;  %v7918_v20 = vadd.f32 1.0, %v10069_v10  ;;  %vm7473_vm9 = vweird.f32 %v7237_v6 }
 0xc04   : > { %10070 = vtanh.f32 %v7855_v17 }
 0xc05   : > { %v8101_v52 = vpop.f32.mrf.mxu0  ;;  %v7950_v47 = vmul.f32 0.5, %v7918_v20  ;;  %10072 = vrsqrt.f32 %v7237_v6 }
 0xc06   : > { %v8175_v63 = vadd.f32 %v8101_v52, %v13988_v22 }
 0xc07   : > { %v7982_v9 = vmul.f32 %v7950_v47, %v7793_v35 }
 0xc08   : > { %v14704_v25 = vadd.f32 %v14609_v24, %v8175_v63 }
 0xc0a   : > { %v10071_v31 = vpop.eup %10070  ;;  %8243 = vst.msk [vmem:[#allocation2 + $0x20] sm:$0xff] %vm2360_vm10, %v14704_v25 }
 0xc0b   : > { %v7919_v59 = vadd.f32 1.0, %v10071_v31  ;;  %v10073_v39 = vpop.eup %10072 }
 0xc0c   : > { %v7468_v49 = vmul.f32 %v10073_v39, %v7237_v6  ;;  %vm7474_vm8 = vweird.f32 %v10073_v39 }
 0xc0d   : > { %v7951_v56 = vmul.f32 0.5, %v7919_v59  ;;  %v8103_v62 = vpop.f32.mrf.mxu0  ;;  %vm7475_vm2 = vmor %vm7473_vm9, %vm7474_vm8 }
 0xc0e   : > { %v8176_v16 = vadd.f32 %v8103_v62, %v13994_v32  ;;  %v7469_v23 = vmul.f32 %v10073_v39, %v7468_v49 }
 0xc0f   : > { %v7983_v42 = vmul.f32 %v7951_v56, %v7795_v15 }
 0xc10   : > { %v14710_v50 = vadd.f32 %v14609_v24, %v8176_v16  ;;  %v7470_v7 = vmul.f32 0.5, %v7469_v23 }
 0xc11   : > { %v8008_v22 = vpack.c.bf16 %v7983_v42, %v7982_v9 }
 0xc12   : > { %8244 = vst.msk [vmem:[#allocation2 + $0x28] sm:$0xff] %vm2360_vm10, %v14710_v50  ;;  %v7471_v15 = vsub.f32 1.5, %v7470_v7 }
 0xc13   : > { %8120 = vmatmul.bf16.gmra.mxu0 %v8008_v22 }
 0xc14   : > { %v7472_v63 = vmul.f32 %v10073_v39, %v7471_v15 }
 0xc16   : > { %v7476_v31 = vsel %vm7475_vm2, %v10073_v39, %v7472_v63  ;;  %v14730_v63 = vld [vmem:[%s10436_s12] ss:$0 sm:$0xff] }
 0xc17   : > { %v7589_v22 = vmul.f32 %v7476_v31, %v14464_v1 }
 0xc3b   : > { %v7158_v19 = vpop.xlane.xlu1 %7157 }
 0xc3c   : > { %v7206_v32 = vmul.f32 %v7158_v19, %v15824_v34 }
 0xc3e   : > { %v7238_v35 = vadd.f32 1e-05, %v7206_v32 }
 0xc40   : > { %10074 = vrsqrt.f32 %v7238_v35  ;;  %vm7483_vm12 = vweird.f32 %v7238_v35 }
 0xc43   : > { %v7161_v11 = vpop.xlane.xlu1 %7160 }
 0xc44   : > { %v7207_v17 = vmul.f32 %v7161_v11, %v15824_v34  ;;  %v7624_v11 = vmul.f32 %v14554_v55, %v7589_v22 }
 0xc46   : > { %v10075_v10 = vpop.eup %10074  ;;  %v7239_v52 = vadd.f32 1e-05, %v7207_v17 }
 0xc47   : > { %v7478_v53 = vmul.f32 %v10075_v10, %v7238_v35  ;;  %vm7484_vm11 = vweird.f32 %v10075_v10 }
 0xc48   : > { %10076 = vrsqrt.f32 %v7239_v52  ;;  %vm7485_vm13 = vmor %vm7483_vm12, %vm7484_vm11  ;;  %vm7493_vm15 = vweird.f32 %v7239_v52 }
 0xc49   : > { %v7479_v20 = vmul.f32 %v10075_v10, %v7478_v53 }
 0xc4b   : > { %v7480_v47 = vmul.f32 0.5, %v7479_v20  ;;  %v7164_v59 = vpop.xlane.xlu0 %7163  ;;  %v6990_v56 = vpop.xlane.xlu1 %6989 }
 0xc4c   : > { %v7208_v62 = vmul.f32 %v7164_v59, %v15824_v34  ;;  %v7022_v16 = vmul.f32 %v6990_v56, %v15824_v34  ;;  %v7659_v59 = vadd.f32 %v14569_v61, %v7624_v11 }
 0xc4d   : > { %v7481_v9 = vsub.f32 1.5, %v7480_v47 }
 0xc4e   : > { %v10077_v42 = vpop.eup %10076  ;;  %v7240_v13 = vadd.f32 1e-05, %v7208_v62  ;;  %v14722_v49 = vsub.f32 %v14539_v48, %v7022_v16 }
 0xc4f   : > { %v7482_v6 = vmul.f32 %v10075_v10, %v7481_v9  ;;  %v7488_v39 = vmul.f32 %v10077_v42, %v7239_v52  ;;  %vm7494_vm14 = vweird.f32 %v10077_v42 }
 0xc50   : > { %10078 = vrsqrt.f32 %v7240_v13  ;;  %v7086_v23 = vmul.f32 %v14722_v49, %v14722_v49  ;;  %vm7495_vm0 = vmor %vm7493_vm15, %vm7494_vm14  ;;  %vm7503_vm3 = vweird.f32 %v7240_v13 }
 0xc51   : > { %v7486_v19 = vsel %vm7485_vm13, %v10075_v10, %v7482_v6  ;;  %v7489_v32 = vmul.f32 %v10077_v42, %v7488_v39 }
 0xc52   : > { %v7590_v7 = vmul.f32 %v7486_v19, %v14498_v2  ;;  %v7797_v15 = vpop.f32.mrf.mxu2  ;;  %v7180_v1 = vsel %vm2360_vm10, %v7086_v23, 0.0 }
 0xc53   : > { %v7490_v17 = vmul.f32 0.5, %v7489_v32  ;;  %v14733_v35 = vadd.f32 %v14730_v63, %v7797_v15  ;;  %7181 = vadd.xlane.f32.xlu1 %v7180_v1  ;;  %v7167_v53 = vpop.xlane.xlu0 %7166 }
 0xc54   : > { %v7625_v20 = vmul.f32 %v14554_v55, %v7590_v7  ;;  %v7209_v2 = vmul.f32 %v7167_v53, %v15824_v34 }
 0xc55   : > { %v7491_v31 = vsub.f32 1.5, %v7490_v17  ;;  %v7856_v10 = vmul.f32 0.851, %v14733_v35 }
 0xc56   : > { %v10079_v47 = vpop.eup %10078  ;;  %v7660_v56 = vadd.f32 %v14569_v61, %v7625_v20  ;;  %v14740_v9 = vadd.f32 1e-05, %v7209_v2 }
 0xc57   : > { %v7492_v62 = vmul.f32 %v10077_v42, %v7491_v31  ;;  %v7498_v16 = vmul.f32 %v10079_v47, %v7240_v13  ;;  %10080 = vtanh.f32 %v7856_v10  ;;  %vm7504_vm1 = vweird.f32 %v10079_v47 }
 0xc58   : > { %v7680_v22 = vpack.c.bf16 %v7660_v56, %v7659_v59  ;;  %10082 = vrsqrt.f32 %v14740_v9  ;;  %vm7505_vm4 = vmor %vm7503_vm3, %vm7504_vm1  ;;  %vm7513_vm6 = vweird.f32 %v14740_v9 }
 0xc59   : > { %v7499_v6 = vmul.f32 %v10079_v47, %v7498_v16  ;;  %v7496_v39 = vsel %vm7495_vm0, %v10077_v42, %v7492_v62 }
 0xc5a   : > { %v7799_v23 = vpop.f32.mrf.mxu2  ;;  %9535 = vmatmul.msk.bf16.gmra.mxu2 %vm2360_vm10, %v7680_v22  ;;  %v7591_v7 = vmul.f32 %v7496_v39, %v14517_v36 }
 0xc5b   : > { %v7500_v19 = vmul.f32 0.5, %v7499_v6  ;;  %v7800_v32 = vadd.f32 %v14730_v63, %v7799_v23  ;;  %v7170_v1 = vpop.xlane.xlu2 %7169 }
 0xc5c   : > { %v7210_v11 = vmul.f32 %v7170_v1, %v15824_v34  ;;  %v7626_v59 = vmul.f32 %v14554_v55, %v7591_v7 }
 0xc5d   : > { %v7501_v15 = vsub.f32 1.5, %v7500_v19  ;;  %v7857_v52 = vmul.f32 0.851, %v7800_v32  ;;  %v10081_v17 = vpop.eup %10080 }
 0xc5e   : > { %v10083_v42 = vpop.eup %10082  ;;  %v14747_v20 = vadd.f32 1e-05, %v7210_v11  ;;  %v7920_v62 = vadd.f32 1.0, %v10081_v17  ;;  %v7661_v19 = vadd.f32 %v14569_v61, %v7626_v59 }
 0xc5f   : > { %v7502_v53 = vmul.f32 %v10079_v47, %v7501_v15  ;;  %10084 = vtanh.f32 %v7857_v52  ;;  %v7508_v2 = vmul.f32 %v10083_v42, %v14740_v9  ;;  %vm7514_vm5 = vweird.f32 %v10083_v42 }
 0xc60   : > { %v8106_v31 = vpop.f32.mrf.mxu0  ;;  %10086 = vrsqrt.f32 %v14747_v20  ;;  %v7952_v7 = vmul.f32 0.5, %v7920_v62  ;;  %vm7515_vm7 = vmor %vm7513_vm6, %vm7514_vm5  ;;  %vm7523_vm9 = vweird.f32 %v14747_v20 }
 0xc61   : > { %v7506_v10 = vsel %vm7505_vm4, %v10079_v47, %v7502_v53  ;;  %v8177_v36 = vadd.f32 %v8106_v31, %v14001_v28  ;;  %v7509_v13 = vmul.f32 %v10083_v42, %v7508_v2 }
 0xc62   : > { %v7592_v56 = vmul.f32 %v7506_v10, %v14544_v33  ;;  %v7802_v16 = vpop.f32.mrf.mxu2  ;;  %v7984_v62 = vmul.f32 %v7952_v7, %v14733_v35 }
 0xc63   : > { %v14755_v22 = vadd.f32 %v14609_v24, %v8177_v36  ;;  %v14758_v6 = vadd.f32 %v14730_v63, %v7802_v16  ;;  %v7510_v23 = vmul.f32 0.5, %v7509_v13  ;;  %v7173_v33 = vpop.xlane.xlu1 %7172 }
 0xc64   : > { %v7627_v47 = vmul.f32 %v14554_v55, %v7592_v56  ;;  %v7211_v52 = vmul.f32 %v7173_v33, %v15824_v34 }
 0xc65   : > { %v10085_v39 = vpop.eup %10084  ;;  %8245 = vst.msk [vmem:[#allocation2 + $0x30] sm:$0xff] %vm2360_vm10, %v14755_v22  ;;  %v7858_v28 = vmul.f32 0.851, %v14758_v6  ;;  %v7511_v11 = vsub.f32 1.5, %v7510_v23 }
 0xc66   : > { %v7921_v15 = vadd.f32 1.0, %v10085_v39  ;;  %v7662_v1 = vadd.f32 %v14569_v61, %v7627_v47  ;;  %v10087_v17 = vpop.eup %10086  ;;  %v14767_v31 = vadd.f32 1e-05, %v7211_v52 }
 0xc67   : > { %v7512_v36 = vmul.f32 %v10083_v42, %v7511_v11  ;;  %v7518_v56 = vmul.f32 %v10087_v17, %v14747_v20  ;;  %10088 = vtanh.f32 %v7858_v28  ;;  %vm7524_vm8 = vweird.f32 %v10087_v17 }
 0xc68   : > { %v7953_v53 = vmul.f32 0.5, %v7921_v15  ;;  %v8108_v10 = vpop.f32.mrf.mxu0  ;;  %v7681_v2 = vpack.c.bf16 %v7662_v1, %v7661_v19  ;;  %10090 = vrsqrt.f32 %v14767_v31  ;;  %vm7525_vm2 = vmor %vm7523_vm9, %vm7524_vm8  ;;  %vm7533_vm12 = vweird.f32 %v14767_v31 }
 0xc69   : > { %v8178_v59 = vadd.f32 %v8108_v10, %v14017_v5  ;;  %v7519_v47 = vmul.f32 %v10087_v17, %v7518_v56 }
 0xc6a   : > { %v7985_v16 = vmul.f32 %v7953_v53, %v7800_v32  ;;  %v7804_v13 = vpop.f32.mrf.mxu2  ;;  %9536 = vmatmul.msk.bf16.gmra.mxu2 %vm2360_vm10, %v7681_v2  ;;  %v7516_v32 = vsel %vm7515_vm7, %v10083_v42, %v7512_v36 }
 0xc6b   : > { %v14776_v39 = vadd.f32 %v14609_v24, %v8178_v59  ;;  %v7805_v23 = vadd.f32 %v14730_v63, %v7804_v13  ;;  %v7176_v33 = vpop.xlane.xlu0 %7175  ;;  %v7520_v28 = vmul.f32 0.5, %v7519_v47  ;;  %v7593_v1 = vmul.f32 %v7516_v32, %v14573_v0 }
 0xc6c   : > { %v7212_v5 = vmul.f32 %v7176_v33, %v15824_v34  ;;  %v8009_v35 = vpack.c.bf16 %v7985_v16, %v7984_v62 }
 0xc6d   : > { %8246 = vst.msk [vmem:[#allocation2 + $0x38] sm:$0xff] %vm2360_vm10, %v14776_v39  ;;  %v7859_v19 = vmul.f32 0.851, %v7805_v23  ;;  %v10089_v9 = vpop.eup %10088  ;;  %v7521_v15 = vsub.f32 1.5, %v7520_v28  ;;  %v7628_v0 = vmul.f32 %v14554_v55, %v7593_v1 }
 0xc6e   : > { %v14783_v7 = vadd.f32 1e-05, %v7212_v5  ;;  %8125 = vmatmul.bf16.gmra.mxu0 %v8009_v35  ;;  %v10091_v52 = vpop.eup %10090  ;;  %v7922_v2 = vadd.f32 1.0, %v10089_v9 }
 0xc6f   : > { %10092 = vtanh.f32 %v7859_v19  ;;  %v7522_v53 = vmul.f32 %v10087_v17, %v7521_v15  ;;  %v7528_v42 = vmul.f32 %v10091_v52, %v14767_v31  ;;  %vm7534_vm11 = vweird.f32 %v10091_v52 }
 0xc70   : > { %10094 = vrsqrt.f32 %v14783_v7  ;;  %v8111_v11 = vpop.f32.mrf.mxu0  ;;  %v7954_v33 = vmul.f32 0.5, %v7922_v2  ;;  %vm7535_vm13 = vmor %vm7533_vm12, %vm7534_vm11  ;;  %vm7543_vm15 = vweird.f32 %v14783_v7 }
 0xc71   : > { %v8179_v10 = vadd.f32 %v8111_v11, %v14029_v27  ;;  %v7526_v36 = vsel %vm7525_vm2, %v10087_v17, %v7522_v53  ;;  %v7529_v56 = vmul.f32 %v10091_v52, %v7528_v42 }
 0xc72   : > { %v7807_v62 = vpop.f32.mrf.mxu2  ;;  %v7594_v16 = vmul.f32 %v7526_v36, %v14606_v18  ;;  %v7663_v18 = vadd.f32 %v14569_v61, %v7628_v0 }
 0xc73   : > { %v14791_v59 = vadd.f32 %v14609_v24, %v8179_v10  ;;  %v14796_v13 = vadd.f32 %v14730_v63, %v7807_v62  ;;  %v7530_v47 = vmul.f32 0.5, %v7529_v56  ;;  %v7986_v10 = vmul.f32 %v7954_v33, %v14758_v6 }
 0xc74   : > { %v7629_v17 = vmul.f32 %v14554_v55, %v7594_v16 }
 0xc75   : > { %v10093_v20 = vpop.eup %10092  ;;  %8247 = vst.msk [vmem:[#allocation2 + $0x40] sm:$0xff] %vm2360_vm10, %v14791_v59  ;;  %v7860_v35 = vmul.f32 0.851, %v14796_v13  ;;  %v7531_v32 = vsub.f32 1.5, %v7530_v47 }
 0xc76   : > { %v10095_v27 = vpop.eup %10094  ;;  %v7923_v5 = vadd.f32 1.0, %v10093_v20  ;;  %v7664_v19 = vadd.f32 %v14569_v61, %v7629_v17 }
 0xc77   : > { %v7538_v28 = vmul.f32 %v10095_v27, %v14783_v7  ;;  %v7532_v1 = vmul.f32 %v10091_v52, %v7531_v32  ;;  %10096 = vtanh.f32 %v7860_v35  ;;  %vm7544_vm14 = vweird.f32 %v10095_v27 }
 0xc78   : > { %v7955_v9 = vmul.f32 0.5, %v7923_v5  ;;  %v8113_v15 = vpop.f32.mrf.mxu0  ;;  %v7682_v42 = vpack.c.bf16 %v7664_v19, %v7663_v18  ;;  %vm7545_vm0 = vmor %vm7543_vm15, %vm7544_vm14 }
 0xc79   : > { %v7539_v11 = vmul.f32 %v10095_v27, %v7538_v28  ;;  %v8180_v53 = vadd.f32 %v8113_v15, %v14041_v30  ;;  %v7536_v36 = vsel %vm7535_vm13, %v10091_v52, %v7532_v1 }
 0xc7a   : > { %v7987_v2 = vmul.f32 %v7955_v9, %v7805_v23  ;;  %v7809_v0 = vpop.f32.mrf.mxu2  ;;  %9537 = vmatmul.msk.bf16.vlgmr.msrb.gmra.mxu3 %vm2360_vm10, %v7682_v42  ;;  %v7595_v30 = vmul.f32 %v7536_v36, %v14642_v26 }
 0xc7b   : > { %v7540_v56 = vmul.f32 0.5, %v7539_v11  ;;  %v14809_v62 = vadd.f32 %v14609_v24, %v8180_v53  ;;  %v7810_v16 = vadd.f32 %v14730_v63, %v7809_v0 }
 0xc7c   : > { %v8010_v31 = vpack.c.bf16 %v7987_v2, %v7986_v10  ;;  %v7630_v35 = vmul.f32 %v14554_v55, %v7595_v30 }
 0xc7d   : > { %v7541_v20 = vsub.f32 1.5, %v7540_v56  ;;  %8248 = vst.msk [vmem:[#allocation2 + $0x48] sm:$0xff] %vm2360_vm10, %v14809_v62  ;;  %v7861_v6 = vmul.f32 0.851, %v7810_v16  ;;  %v10097_v52 = vpop.eup %10096 }
 0xc7e   : > { %8130 = vmatmul.bf16.gmra.mxu0 %v8010_v31  ;;  %v7924_v32 = vadd.f32 1.0, %v10097_v52 }
 0xc7f   : > { %v7542_v23 = vmul.f32 %v10095_v27, %v7541_v20  ;;  %10098 = vtanh.f32 %v7861_v6 }
 0xc80   : > { %v8116_v47 = vpop.f32.mrf.mxu0  ;;  %v7956_v9 = vmul.f32 0.5, %v7924_v32 }
 0xc81   : > { %v7546_v17 = vsel %vm7545_vm0, %v10095_v27, %v7542_v23  ;;  %v8181_v33 = vadd.f32 %v8116_v47, %v14053_v41  ;;  %v7665_v41 = vadd.f32 %v14569_v61, %v7630_v35 }
 0xc82   : > { %v7596_v5 = vmul.f32 %v7546_v17, %v14668_v12  ;;  %v7812_v26 = vpop.f32.mrf.mxu2  ;;  %v7988_v10 = vmul.f32 %v7956_v9, %v14796_v13 }
 0xc83   : > { %v14821_v28 = vadd.f32 %v14609_v24, %v8181_v33  ;;  %v7813_v18 = vadd.f32 %v14730_v63, %v7812_v26 }
 0xc84   : > { %v7631_v7 = vmul.f32 %v14554_v55, %v7596_v5 }
 0xc85   : > { %8249 = vst.msk [vmem:[#allocation2 + $0x50] sm:$0xff] %vm2360_vm10, %v14821_v28  ;;  %v10099_v19 = vpop.eup %10098  ;;  %v7862_v27 = vmul.f32 0.851, %v7813_v18 }
 0xc86   : > { %v7666_v12 = vadd.f32 %v14569_v61, %v7631_v7  ;;  %v7925_v15 = vadd.f32 1.0, %v10099_v19  ;;  %v7179_v7 = vpop.xlane.xlu2 %7178 }
 0xc87   : > { %10100 = vtanh.f32 %v7862_v27  ;;  %v7213_v19 = vmul.f32 %v7179_v7, %v15824_v34 }
 0xc88   : > { %v8118_v1 = vpop.f32.mrf.mxu0  ;;  %v7683_v11 = vpack.c.bf16 %v7666_v12, %v7665_v41  ;;  %v7957_v53 = vmul.f32 0.5, %v7925_v15 }
 0xc89   : > { %v8182_v42 = vadd.f32 %v8118_v1, %v14065_v40  ;;  %v7245_v27 = vadd.f32 1e-05, %v7213_v19 }
 0xc8a   : > { %v7989_v2 = vmul.f32 %v7957_v53, %v7810_v16  ;;  %v7814_v56 = vpop.f32.mrf.mxu2  ;;  %9538 = vmatmul.msk.bf16.gmra.mxu3 %vm2360_vm10, %v7683_v11 }
 0xc8b   : > { %v14832_v36 = vadd.f32 %v14609_v24, %v8182_v42  ;;  %v7815_v0 = vadd.f32 %v14730_v63, %v7814_v56  ;;  %vm7553_vm3 = vweird.f32 %v7245_v27 }
 0xc8c   : > { %v8011_v31 = vpack.c.bf16 %v7989_v2, %v7988_v10 }
 0xc8d   : > { %8250 = vst.msk [vmem:[#allocation2 + $0x58] sm:$0xff] %vm2360_vm10, %v14832_v36  ;;  %v7863_v20 = vmul.f32 0.851, %v7815_v0  ;;  %v10101_v30 = vpop.eup %10100 }
 0xc8e   : > { %8135 = vmatmul.bf16.gmra.mxu0 %v8011_v31  ;;  %v7926_v16 = vadd.f32 1.0, %v10101_v30 }
 0xc8f   : > { %10102 = vtanh.f32 %v7863_v20 }
 0xc90   : > { %v8121_v40 = vpop.f32.mrf.mxu0  ;;  %v7958_v52 = vmul.f32 0.5, %v7926_v16  ;;  %10104 = vrsqrt.f32 %v7245_v27 }
 0xc91   : > { %v8183_v13 = vadd.f32 %v8121_v40, %v14077_v58 }
 0xc92   : > { %v7990_v35 = vmul.f32 %v7958_v52, %v7813_v18 }
 0xc93   : > { %v14840_v6 = vadd.f32 %v14609_v24, %v8183_v13 }
 0xc95   : > { %8251 = vst.msk [vmem:[#allocation2 + $0x60] sm:$0xff] %vm2360_vm10, %v14840_v6  ;;  %v10103_v23 = vpop.eup %10102 }
 0xc96   : > { %v7927_v47 = vadd.f32 1.0, %v10103_v23  ;;  %v10105_v41 = vpop.eup %10104 }
 0xc97   : > { %v7548_v12 = vmul.f32 %v10105_v41, %v7245_v27  ;;  %vm7554_vm1 = vweird.f32 %v10105_v41 }
 0xc98   : > { %v8123_v17 = vpop.f32.mrf.mxu0  ;;  %v7959_v33 = vmul.f32 0.5, %v7927_v47  ;;  %vm7555_vm4 = vmor %vm7553_vm3, %vm7554_vm1 }
 0xc99   : > { %v8184_v5 = vadd.f32 %v8123_v17, %v14088_v29  ;;  %v7549_v9 = vmul.f32 %v10105_v41, %v7548_v12 }
 0xc9a   : > { %v7991_v32 = vmul.f32 %v7959_v33, %v7815_v0 }
 0xc9b   : > { %v14846_v26 = vadd.f32 %v14609_v24, %v8184_v5  ;;  %v7550_v1 = vmul.f32 0.5, %v7549_v9 }
 0xc9c   : > { %v8012_v58 = vpack.c.bf16 %v7991_v32, %v7990_v35 }
 0xc9d   : > { %8252 = vst.msk [vmem:[#allocation2 + $0x68] sm:$0xff] %vm2360_vm10, %v14846_v26  ;;  %v7551_v11 = vsub.f32 1.5, %v7550_v1 }
 0xc9e   : > { %8140 = vmatmul.bf16.gmra.mxu0 %v8012_v58 }
 0xc9f   : > { %v7552_v42 = vmul.f32 %v10105_v41, %v7551_v11 }
 0xca1   : > { %v7556_v56 = vsel %vm7555_vm4, %v10105_v41, %v7552_v42 }
 0xca2   : > { %v7597_v20 = vmul.f32 %v7556_v56, %v14686_v43 }
 0xca4   : > { %v7632_v16 = vmul.f32 %v14554_v55, %v7597_v20 }
 0xca6   : > { %v7667_v17 = vadd.f32 %v14569_v61, %v7632_v16 }
 0xcc6   : > { %v7182_v15 = vpop.xlane.xlu1 %7181 }
 0xcc7   : > { %v7214_v29 = vmul.f32 %v7182_v15, %v15824_v34 }
 0xcc9   : > { %v7246_v18 = vadd.f32 1e-05, %v7214_v29 }
 0xccb   : > { %10106 = vrsqrt.f32 %v7246_v18  ;;  %vm7563_vm6 = vweird.f32 %v7246_v18 }
 0xcd1   : > { %v10107_v53 = vpop.eup %10106 }
 0xcd2   : > { %v7558_v10 = vmul.f32 %v10107_v53, %v7246_v18  ;;  %vm7564_vm5 = vweird.f32 %v10107_v53 }
 0xcd3   : > { %vm7565_vm7 = vmor %vm7563_vm6, %vm7564_vm5 }
 0xcd4   : > { %v7559_v2 = vmul.f32 %v10107_v53, %v7558_v10 }
 0xcd6   : > { %v7560_v0 = vmul.f32 0.5, %v7559_v2 }
 0xcd8   : > { %v7561_v31 = vsub.f32 1.5, %v7560_v0 }
 0xcda   : > { %v7562_v30 = vmul.f32 %v10107_v53, %v7561_v31 }
 0xcdc   : > { %v7566_v34 = vsel %vm7565_vm7, %v10107_v53, %v7562_v30 }
 0xcdd   : > { %v7598_v40 = vmul.f32 %v7566_v34, %v14722_v49  ;;  %v7817_v13 = vpop.f32.mrf.mxu2 }
 0xcde   : > { %v7818_v23 = vadd.f32 %v14730_v63, %v7817_v13 }
 0xcdf   : > { %v7633_v52 = vmul.f32 %v14554_v55, %v7598_v40 }
 0xce0   : > { %v7864_v47 = vmul.f32 0.851, %v7818_v23 }
 0xce1   : > { %v7668_v33 = vadd.f32 %v14569_v61, %v7633_v52 }
 0xce2   : > { %10108 = vtanh.f32 %v7864_v47 }
 0xce3   : > { %v7684_v5 = vpack.c.bf16 %v7668_v33, %v7667_v17 }
 0xce5   : > { %v7819_v43 = vpop.f32.mrf.mxu2  ;;  %9539 = vmatmul.msk.bf16.gmra.mxu3 %vm2360_vm10, %v7684_v5 }
 0xce6   : > { %v7820_v35 = vadd.f32 %v14730_v63, %v7819_v43 }
 0xce8   : > { %v7865_v49 = vmul.f32 0.851, %v7820_v35  ;;  %v10109_v32 = vpop.eup %10108 }
 0xce9   : > { %v7928_v19 = vadd.f32 1.0, %v10109_v32 }
 0xcea   : > { %10110 = vtanh.f32 %v7865_v49 }
 0xceb   : > { %v8126_v58 = vpop.f32.mrf.mxu0  ;;  %v7960_v9 = vmul.f32 0.5, %v7928_v19 }
 0xcec   : > { %v8185_v7 = vadd.f32 %v8126_v58, %v14093_v44 }
 0xced   : > { %v7822_v55 = vpop.f32.mrf.mxu2  ;;  %v7992_v44 = vmul.f32 %v7960_v9, %v7818_v23 }
 0xcee   : > { %v14863_v27 = vadd.f32 %v14609_v24, %v8185_v7  ;;  %v7823_v61 = vadd.f32 %v14730_v63, %v7822_v55  ;;  %v15848_v55 = vld [vmem:[#allocation27_spill] sm:$0xff] }
 0xcf0   : > { %v10111_v41 = vpop.eup %10110  ;;  %8253 = vst.msk [vmem:[#allocation2 + $0x70] sm:$0xff] %vm2360_vm10, %v14863_v27  ;;  %v7866_v12 = vmul.f32 0.851, %v7823_v61 }
 0xcf1   : > { %v7929_v15 = vadd.f32 1.0, %v10111_v41 }
 0xcf2   : > { %10112 = vtanh.f32 %v7866_v12 }
 0xcf3   : > { %v7961_v29 = vmul.f32 0.5, %v7929_v15  ;;  %v8128_v18 = vpop.f32.mrf.mxu0 }
 0xcf4   : > { %v8186_v1 = vadd.f32 %v8128_v18, %v14130_v57 }
 0xcf5   : > { %v7993_v11 = vmul.f32 %v7961_v29, %v7820_v35  ;;  %v7824_v53 = vpop.f32.mrf.mxu2 }
 0xcf6   : > { %v14870_v42 = vadd.f32 %v14609_v24, %v8186_v1  ;;  %v7825_v10 = vadd.f32 %v14730_v63, %v7824_v53  ;;  %v15849_v53 = vld [vmem:[#allocation20_spill] sm:$0xff] }
 0xcf7   : > { %v8013_v2 = vpack.c.bf16 %v7993_v11, %v7992_v44 }
 0xcf8   : > { %8254 = vst.msk [vmem:[#allocation2 + $0x78] sm:$0xff] %vm2360_vm10, %v14870_v42  ;;  %v7867_v56 = vmul.f32 0.851, %v7825_v10  ;;  %v10113_v0 = vpop.eup %10112 }
 0xcf9   : > { %8145 = vmatmul.bf16.gmra.mxu0 %v8013_v2  ;;  %v7930_v57 = vadd.f32 1.0, %v10113_v0 }
 0xcfa   : > { %10114 = vtanh.f32 %v7867_v56 }
 0xcfb   : > { %v8131_v31 = vpop.f32.mrf.mxu0  ;;  %v7962_v16 = vmul.f32 0.5, %v7930_v57 }
 0xcfc   : > { %v8187_v20 = vadd.f32 %v8131_v31, %v14159_v4 }
 0xcfd   : > { %v7827_v34 = vpop.f32.mrf.mxu3  ;;  %v7994_v5 = vmul.f32 %v7962_v16, %v7823_v61 }
 0xcfe   : > { %v14877_v30 = vadd.f32 %v14609_v24, %v8187_v20  ;;  %v7828_v13 = vadd.f32 %v14730_v63, %v7827_v34 }
 0xd00   : > { %v10115_v40 = vpop.eup %10114  ;;  %8255 = vst.msk [vmem:[#allocation2 + $0x80] sm:$0xff] %vm2360_vm10, %v14877_v30  ;;  %v7868_v52 = vmul.f32 0.851, %v7828_v13 }
 0xd01   : > { %v7931_v23 = vadd.f32 1.0, %v10115_v40 }
 0xd02   : > { %10116 = vtanh.f32 %v7868_v52 }
 0xd03   : > { %v7963_v47 = vmul.f32 0.5, %v7931_v23  ;;  %v8133_v17 = vpop.f32.mrf.mxu0 }
 0xd04   : > { %v8188_v33 = vadd.f32 %v8133_v17, %v14189_v54 }
 0xd05   : > { %v7995_v4 = vmul.f32 %v7963_v47, %v7825_v10  ;;  %v7829_v35 = vpop.f32.mrf.mxu3 }
 0xd06   : > { %v14884_v43 = vadd.f32 %v14609_v24, %v8188_v33  ;;  %v7830_v32 = vadd.f32 %v14730_v63, %v7829_v35 }
 0xd07   : > { %v8014_v49 = vpack.c.bf16 %v7995_v4, %v7994_v5 }
 0xd08   : > { %8256 = vst.msk [vmem:[#allocation2 + $0x88] sm:$0xff] %vm2360_vm10, %v14884_v43  ;;  %v7869_v58 = vmul.f32 0.851, %v7830_v32  ;;  %v10117_v7 = vpop.eup %10116 }
 0xd09   : > { %8150 = vmatmul.bf16.gmra.mxu0 %v8014_v49  ;;  %v7932_v61 = vadd.f32 1.0, %v10117_v7 }
 0xd0a   : > { %10118 = vtanh.f32 %v7869_v58  ;;  %v10169_v58 = vld [vmem:[%s10446_s30] ss:$0 sm:$0xff] }
 0xd0b   : > { %v8136_v19 = vpop.f32.mrf.mxu0  ;;  %v7964_v18 = vmul.f32 0.5, %v7932_v61 }
 0xd0c   : > { %v8189_v54 = vadd.f32 %v8136_v19, %v15848_v55 }
 0xd0d   : > { %v7832_v12 = vpop.f32.mrf.mxu3  ;;  %v7996_v2 = vmul.f32 %v7964_v18, %v7828_v13 }
 0xd0e   : > { %v14891_v41 = vadd.f32 %v14609_v24, %v8189_v54  ;;  %v7833_v9 = vadd.f32 %v14730_v63, %v7832_v12 }
 0xd10   : > { %8257 = vst.msk [vmem:[#allocation2 + $0x90] sm:$0xff] %vm2360_vm10, %v14891_v41  ;;  %v10119_v15 = vpop.eup %10118  ;;  %v7870_v29 = vmul.f32 0.851, %v7833_v9 }
 0xd11   : > { %v7933_v1 = vadd.f32 1.0, %v10119_v15 }
 0xd12   : > { %10120 = vtanh.f32 %v7870_v29 }
 0xd13   : > { %v8138_v44 = vpop.f32.mrf.mxu0  ;;  %v7965_v11 = vmul.f32 0.5, %v7933_v1 }
 0xd14   : > { %v8190_v10 = vadd.f32 %v8138_v44, %v15849_v53 }
 0xd15   : > { %v7997_v56 = vmul.f32 %v7965_v11, %v7830_v32  ;;  %v7834_v31 = vpop.f32.mrf.mxu3 }
 0xd16   : > { %v14898_v0 = vadd.f32 %v14609_v24, %v8190_v10  ;;  %v7835_v20 = vadd.f32 %v14730_v63, %v7834_v31 }
 0xd17   : > { %v8015_v57 = vpack.c.bf16 %v7997_v56, %v7996_v2  ;;  %v15850_v2 = vld [vmem:[#allocation30_spill] sm:$0xff] }
 0xd18   : > { %8258 = vst.msk [vmem:[#allocation2 + $0x98] sm:$0xff] %vm2360_vm10, %v14898_v0  ;;  %v7871_v34 = vmul.f32 0.851, %v7835_v20  ;;  %v10121_v40 = vpop.eup %10120 }
 0xd19   : > { %8155 = vmatmul.bf16.gmra.mxu0 %v8015_v57  ;;  %v7934_v13 = vadd.f32 1.0, %v10121_v40 }
 0xd1a   : > { %10122 = vtanh.f32 %v7871_v34  ;;  %v15851_v34 = vld [vmem:[#allocation31_spill] sm:$0xff] }
 0xd1b   : > { %v8141_v16 = vpop.f32.mrf.mxu0  ;;  %v7966_v17 = vmul.f32 0.5, %v7934_v13  ;;  %v15852_v13 = vld [vmem:[#allocation22_spill] sm:$0xff] }
 0xd1c   : > { %v8191_v23 = vadd.f32 %v8141_v16, %v14241_v38 }
 0xd1d   : > { %v7998_v49 = vmul.f32 %v7966_v17, %v7833_v9 }
 0xd1e   : > { %v14905_v52 = vadd.f32 %v14609_v24, %v8191_v23 }
 0xd20   : > { %8259 = vst.msk [vmem:[#allocation2 + $0xa0] sm:$0xff] %vm2360_vm10, %v14905_v52  ;;  %v10123_v47 = vpop.eup %10122 }
 0xd21   : > { %v7935_v33 = vadd.f32 1.0, %v10123_v47 }
 0xd23   : > { %v8143_v5 = vpop.f32.mrf.mxu0  ;;  %v7967_v4 = vmul.f32 0.5, %v7935_v33 }
 0xd24   : > { %v8192_v35 = vadd.f32 %v8143_v5, %v14255_v3 }
 0xd25   : > { %v7999_v32 = vmul.f32 %v7967_v4, %v7835_v20 }
 0xd26   : > { %v14911_v7 = vadd.f32 %v10169_v58, %v8192_v35 }
 0xd27   : > { %v8016_v38 = vpack.c.bf16 %v7999_v32, %v7998_v49  ;;  %v15853_v49 = vld [vmem:[#allocation36_spill] sm:$0xff] }
 0xd28   : > { %8260 = vst.msk [vmem:[#allocation2 + $0xa8] sm:$0xff] %vm2360_vm10, %v14911_v7 }
 0xd29   : > { %8160 = vmatmul.bf16.gmra.mxu0 %v8016_v38 }
 0xd68   : > { %v7837_v24 = vpop.f32.mrf.mxu3 }
 0xd69   : > { %v7838_v19 = vadd.f32 %v14730_v63, %v7837_v24 }
 0xd6b   : > { %v7872_v55 = vmul.f32 0.851, %v7838_v19 }
 0xd6d   : > { %10124 = vtanh.f32 %v7872_v55 }
 0xd70   : > { %v7839_v54 = vpop.f32.mrf.mxu3 }
 0xd71   : > { %v7840_v61 = vadd.f32 %v14730_v63, %v7839_v54 }
 0xd73   : > { %v7873_v12 = vmul.f32 0.851, %v7840_v61  ;;  %v10125_v3 = vpop.eup %10124 }
 0xd74   : > { %v7936_v29 = vadd.f32 1.0, %v10125_v3 }
 0xd75   : > { %10126 = vtanh.f32 %v7873_v12 }
 0xd76   : > { %v8146_v9 = vpop.f32.mrf.mxu0  ;;  %v7968_v44 = vmul.f32 0.5, %v7936_v29 }
 0xd77   : > { %v8193_v15 = vadd.f32 %v8146_v9, %v14260_v51 }
 0xd78   : > { %v8000_v63 = vmul.f32 %v7968_v44, %v7838_v19 }
 0xd79   : > { %v14918_v18 = vadd.f32 %v10169_v58, %v8193_v15 }
 0xd7b   : > { %v10127_v1 = vpop.eup %10126  ;;  %8261 = vst.msk [vmem:[#allocation2 + $0xb0] sm:$0xff] %vm2360_vm10, %v14918_v18 }
 0xd7c   : > { %v7937_v11 = vadd.f32 1.0, %v10127_v1 }
 0xd7e   : > { %v7969_v53 = vmul.f32 0.5, %v7937_v11  ;;  %v8148_v10 = vpop.f32.mrf.mxu0 }
 0xd7f   : > { %v8194_v56 = vadd.f32 %v8148_v10, %v15850_v2 }
 0xd80   : > { %v8001_v31 = vmul.f32 %v7969_v53, %v7840_v61 }
 0xd81   : > { %v14923_v20 = vadd.f32 %v10169_v58, %v8194_v56 }
 0xd82   : > { %v8017_v57 = vpack.c.bf16 %v8001_v31, %v8000_v63 }
 0xd83   : > { %8262 = vst.msk [vmem:[#allocation2 + $0xb8] sm:$0xff] %vm2360_vm10, %v14923_v20 }
 0xd84   : > { %8165 = vmatmul.bf16.gmra.mxu0 %v8017_v57 }
 0xd86   : > { %v8151_v51 = vpop.f32.mrf.mxu0 }
 0xd87   : > { %v8195_v40 = vadd.f32 %v8151_v51, %v15851_v34 }
 0xd89   : > { %v14928_v16 = vadd.f32 %v10169_v58, %v8195_v40 }
 0xd8b   : > { %8263 = vst.msk [vmem:[#allocation2 + $0xc0] sm:$0xff] %vm2360_vm10, %v14928_v16 }
 0xd8e   : > { %v8153_v23 = vpop.f32.mrf.mxu0 }
 0xd8f   : > { %v8196_v47 = vadd.f32 %v8153_v23, %v15852_v13 }
 0xd91   : > { %v14933_v17 = vadd.f32 %v10169_v58, %v8196_v47 }
 0xd93   : > { %8264 = vst.msk [vmem:[#allocation2 + $0xc8] sm:$0xff] %vm2360_vm10, %v14933_v17 }
 0xd96   : > { %v8156_v33 = vpop.f32.mrf.mxu0 }
 0xd97   : > { %v8197_v5 = vadd.f32 %v8156_v33, %v14413_v21 }
 0xd99   : > { %v14938_v4 = vadd.f32 %v10169_v58, %v8197_v5 }
 0xd9b   : > { %8265 = vst.msk [vmem:[#allocation2 + $0xd0] sm:$0xff] %vm2360_vm10, %v14938_v4 }
 0xd9e   : > { %v8158_v35 = vpop.f32.mrf.mxu0 }
 0xd9f   : > { %v8198_v32 = vadd.f32 %v8158_v35, %v15853_v49 }
 0xda1   : > { %v14943_v38 = vadd.f32 %v10169_v58, %v8198_v32 }
 0xda3   : > { %8266 = vst.msk [vmem:[#allocation2 + $0xd8] sm:$0xff] %vm2360_vm10, %v14943_v38 }
 0xda6   : > { %v8161_v24 = vpop.f32.mrf.mxu0 }
 0xda7   : > { %v8199_v19 = vadd.f32 %v8161_v24, %v14468_v45 }
 0xda9   : > { %v14948_v55 = vadd.f32 %v10169_v58, %v8199_v19 }
 0xdab   : > { %8267 = vst.msk [vmem:[#allocation2 + $0xe0] sm:$0xff] %vm2360_vm10, %v14948_v55 }
 0xdae   : > { %v8163_v21 = vpop.f32.mrf.mxu0 }
 0xdaf   : > { %v8200_v54 = vadd.f32 %v8163_v21, %v14479_v60 }
 0xdb1   : > { %v14953_v61 = vadd.f32 %v10169_v58, %v8200_v54 }
 0xdb3   : > { %8268 = vst.msk [vmem:[#allocation2 + $0xe8] sm:$0xff] %vm2360_vm10, %v14953_v61 }
 0xe01   : > { %v8166_v12 = vpop.f32.mrf.mxu0 }
 0xe02   : > { %v8201_v3 = vadd.f32 %v8166_v12, %v14484_v8 }
 0xe04   : > { %v14958_v9 = vadd.f32 %v10169_v58, %v8201_v3 }
 0xe06   : > { %8269 = vst.msk [vmem:[#allocation2 + $0xf0] sm:$0xff] %vm2360_vm10, %v14958_v9 }
 0xe09   : > { %v8168_v45 = vpop.f32.mrf.mxu0 }
 0xe0a   : > { %v8202_v15 = vadd.f32 %v8168_v45, %v14539_v48  ;;  %8274 = sbr.rel (%p9572_p9) target bundleno = 4093 (0xffd), region = 120 }
 0xe0c   : > { %v14963_v29 = vadd.f32 %v10169_v58, %v8202_v15 }
 0xe0e   : > { %8270 = vst.msk [vmem:[#allocation2 + $0xf8] sm:$0xff] %vm2360_vm10, %v14963_v29 }
 0xe0f   : > { %vm8310_vm8 = vcmask 1041409   ;;  %vm8313_vm9 = vcmask 1042434   ;;  %vm8316_vm2 = vcmask 1043459   ;;  %vm8319_vm11 = vcmask 1044484   ;;  %v15855_v51 = vld [vmem:[#allocation35_spill] sm:$0xff] }
 0xe10   : > { %vm8322_vm12 = vcmask 1045509   ;;  %vm8325_vm13 = vcmask 1046534   ;;  %vm8328_vm14 = vcmask 1047559   ;;  %v8344_v60 = vrot.slane %v14884_v43, 7 }
 0xe11   : > { %v8346_v8 = vrot.slane %v14891_v41, 6  ;;  %v8348_v48 = vrot.slane %v14898_v0, 5  ;;  %v8350_v58 = vrot.slane %v14905_v52, 4  ;;  %v8352_v1 = vrot.slane %v14911_v7, 3 }
 0xe12   : > { %v8345_v44 = vsel %vm8310_vm8, %v8344_v60, %v14877_v30  ;;  %v8354_v11 = vrot.slane %v14918_v18, 2  ;;  %v8356_v53 = vrot.slane %v14923_v20, 1  ;;  %v8309_v10 = vrot.slane %v14658_v46, 7 }
 0xe13   : > { %v8347_v2 = vsel %vm8313_vm9, %v8346_v8, %v8345_v44  ;;  %v8312_v56 = vrot.slane %v14678_v14, 6  ;;  %v8315_v63 = vrot.slane %v14696_v37, 5  ;;  %v8318_v31 = vrot.slane %v14704_v25, 4 }
 0xe14   : > { %v8349_v57 = vsel %vm8316_vm2, %v8348_v48, %v8347_v2  ;;  %v8311_v34 = vsel %vm8310_vm8, %v8309_v10, %v15855_v51  ;;  %v8321_v40 = vrot.slane %v14710_v50, 3  ;;  %v8324_v23 = vrot.slane %v14755_v22, 2 }
 0xe15   : > { %v8351_v13 = vsel %vm8319_vm11, %v8350_v58, %v8349_v57  ;;  %v8314_v47 = vsel %vm8313_vm9, %v8312_v56, %v8311_v34  ;;  %v8327_v33 = vrot.slane %v14776_v39, 1  ;;  %v8358_v5 = vrot.slane %v14933_v17, 7 }
 0xe16   : > { %v8353_v35 = vsel %vm8322_vm12, %v8352_v1, %v8351_v13  ;;  %v8317_v49 = vsel %vm8316_vm2, %v8315_v63, %v8314_v47  ;;  %v8360_v32 = vrot.slane %v14938_v4, 6  ;;  %v8362_v24 = vrot.slane %v14943_v38, 5 }
 0xe17   : > { %v8355_v19 = vsel %vm8325_vm13, %v8354_v11, %v8353_v35  ;;  %v8320_v21 = vsel %vm8319_vm11, %v8318_v31, %v8317_v49  ;;  %v8359_v54 = vsel %vm8310_vm8, %v8358_v5, %v14928_v16  ;;  %v8364_v12 = vrot.slane %v14948_v55, 4 }
 0xe18   : > { %v8357_v3 = vsel %vm8328_vm14, %v8356_v53, %v8355_v19  ;;  %v8323_v45 = vsel %vm8322_vm12, %v8321_v40, %v8320_v21  ;;  %v8361_v15 = vsel %vm8313_vm9, %v8360_v32, %v8359_v54  ;;  %v8366_v60 = vrot.slane %v14953_v61, 3 }
 0xe19   : > { %v8382_v8 = vsel %vm2360_vm10, %v8357_v3, 0.0  ;;  %v8326_v48 = vsel %vm8325_vm13, %v8324_v23, %v8323_v45  ;;  %v8363_v58 = vsel %vm8316_vm2, %v8362_v24, %v8361_v15  ;;  %v8368_v1 = vrot.slane %v14958_v9, 2  ;;  %v15856_v3 = vld [vmem:[#allocation10_spill] sm:$0xff] }
 0xe1a   : > { %8383 = vadd.xlane.f32.xlu1 %v8382_v8  ;;  %v8329_v44 = vsel %vm8328_vm14, %v8327_v33, %v8326_v48  ;;  %v8365_v11 = vsel %vm8319_vm11, %v8364_v12, %v8363_v58  ;;  %v8370_v53 = vrot.slane %v14963_v29, 1  ;;  %v8330_v10 = vrot.slane %v14809_v62, 7 }
 0xe1b   : > { %v8376_v2 = vsel %vm2360_vm10, %v8329_v44, 0.0  ;;  %v8367_v56 = vsel %vm8322_vm12, %v8366_v60, %v8365_v11  ;;  %v8332_v63 = vrot.slane %v14821_v28, 6  ;;  %v8334_v31 = vrot.slane %v14832_v36, 5 }
 0xe1c   : > { %8377 = vadd.xlane.f32.xlu0 %v8376_v2  ;;  %v8369_v57 = vsel %vm8325_vm13, %v8368_v1, %v8367_v56  ;;  %v8331_v34 = vsel %vm8310_vm8, %v8330_v10, %v14791_v59  ;;  %v8336_v40 = vrot.slane %v14840_v6, 4  ;;  %v8338_v23 = vrot.slane %v14846_v26, 3 }
 0xe1d   : > { %v8371_v13 = vsel %vm8328_vm14, %v8370_v53, %v8369_v57  ;;  %v8333_v47 = vsel %vm8313_vm9, %v8332_v63, %v8331_v34  ;;  %v8340_v33 = vrot.slane %v14863_v27, 2  ;;  %v8342_v35 = vrot.slane %v14870_v42, 1 }
 0xe1e   : > { %v8335_v5 = vsel %vm8316_vm2, %v8334_v31, %v8333_v47  ;;  %v8385_v49 = vsel %vm2360_vm10, %v8371_v13, 0.0 }
 0xe1f   : > { %v8337_v32 = vsel %vm8319_vm11, %v8336_v40, %v8335_v5 }
 0xe20   : > { %v8339_v24 = vsel %vm8322_vm12, %v8338_v23, %v8337_v32 }
 0xe21   : > { %v8341_v19 = vsel %vm8325_vm13, %v8340_v33, %v8339_v24 }
 0xe22   : > { %8386 = vadd.xlane.f32.xlu1 %v8385_v49  ;;  %v8343_v21 = vsel %vm8328_vm14, %v8342_v35, %v8341_v19 }
 0xe23   : > { %v8379_v54 = vsel %vm2360_vm10, %v8343_v21, 0.0 }
 0xe24   : > { %8380 = vadd.xlane.f32.xlu0 %v8379_v54 }
 0xe8d   : > { %v8384_v12 = vpop.xlane.xlu1 %8383 }
 0xe8e   : > { %v8390_v45 = vmul.f32 %v8384_v12, %v15856_v3 }
 0xe8f   : > { %v8378_v15 = vpop.xlane.xlu0 %8377 }
 0xe90   : > { %v8388_v60 = vmul.f32 %v8378_v15, %v15856_v3  ;;  %v8410_v8 = vrot.slane %v8390_v45, 1  ;;  %v8411_v48 = vrot.slane %v8390_v45, 2  ;;  %v8412_v58 = vrot.slane %v8390_v45, 3 }
 0xe91   : > { %v8413_v1 = vrot.slane %v8390_v45, 4  ;;  %v8414_v44 = vrot.slane %v8390_v45, 5  ;;  %v8415_v11 = vrot.slane %v8390_v45, 6  ;;  %v8416_v53 = vrot.slane %v8390_v45, 7 }
 0xe92   : > { %v15035_v10 = vsub.f32 %v14877_v30, %v8390_v45  ;;  %v15038_v2 = vsub.f32 %v14884_v43, %v8410_v8  ;;  %v15041_v56 = vsub.f32 %v14891_v41, %v8411_v48  ;;  %v15044_v63 = vsub.f32 %v14898_v0, %v8412_v58 }
 0xe93   : > { %v15047_v31 = vsub.f32 %v14905_v52, %v8413_v1  ;;  %v15050_v57 = vsub.f32 %v14911_v7, %v8414_v44  ;;  %v15053_v34 = vsub.f32 %v14918_v18, %v8415_v11  ;;  %v15056_v30 = vsub.f32 %v14923_v20, %v8416_v53 }
 0xe94   : > { %v8504_v43 = vmul.f32 %v15035_v10, %v15035_v10  ;;  %v8505_v41 = vmul.f32 %v15038_v2, %v15038_v2  ;;  %v8506_v0 = vmul.f32 %v15041_v56, %v15041_v56  ;;  %v8507_v52 = vmul.f32 %v15044_v63, %v15044_v63 }
 0xe95   : > { %v8387_v7 = vpop.xlane.xlu1 %8386  ;;  %v8508_v18 = vmul.f32 %v15047_v31, %v15047_v31  ;;  %v8509_v20 = vmul.f32 %v15050_v57, %v15050_v57  ;;  %v8510_v40 = vmul.f32 %v15053_v34, %v15053_v34  ;;  %v8511_v23 = vmul.f32 %v15056_v30, %v15056_v30 }
 0xe96   : > { %v15075_v13 = vmul.f32 %v8387_v7, %v15856_v3  ;;  %v8580_v47 = vrot.slane %v8505_v41, 7  ;;  %v8582_v33 = vrot.slane %v8506_v0, 6  ;;  %v8584_v5 = vrot.slane %v8507_v52, 5 }
 0xe97   : > { %v8381_v35 = vpop.xlane.xlu0 %8380  ;;  %v8586_v49 = vrot.slane %v8508_v18, 4  ;;  %v8588_v32 = vrot.slane %v8509_v20, 3  ;;  %v8590_v24 = vrot.slane %v8510_v40, 2  ;;  %v8592_v19 = vrot.slane %v8511_v23, 1 }
 0xe98   : > { %v15078_v21 = vmul.f32 %v8381_v35, %v15856_v3  ;;  %v8581_v54 = vsel %vm8310_vm8, %v8580_v47, %v8504_v43  ;;  %v8396_v12 = vrot.slane %v8388_v60, 1  ;;  %v8397_v45 = vrot.slane %v8388_v60, 2 }
 0xe99   : > { %v8583_v15 = vsel %vm8313_vm9, %v8582_v33, %v8581_v54  ;;  %v8398_v8 = vrot.slane %v8388_v60, 3  ;;  %v8399_v48 = vrot.slane %v8388_v60, 4  ;;  %v8400_v58 = vrot.slane %v8388_v60, 5 }
 0xe9a   : > { %v8585_v1 = vsel %vm8316_vm2, %v8584_v5, %v8583_v15  ;;  %v8401_v44 = vrot.slane %v8388_v60, 6  ;;  %v8402_v11 = vrot.slane %v8388_v60, 7  ;;  %v15084_v53 = vsub.f32 %v15855_v51, %v8388_v60 }
 0xe9b   : > { %v8587_v41 = vsel %vm8319_vm11, %v8586_v49, %v8585_v1  ;;  %v15088_v0 = vsub.f32 %v14658_v46, %v8396_v12  ;;  %v15091_v43 = vsub.f32 %v14678_v14, %v8397_v45  ;;  %v15094_v52 = vsub.f32 %v14696_v37, %v8398_v8 }
 0xe9c   : > { %v8589_v7 = vsel %vm8322_vm12, %v8588_v32, %v8587_v41  ;;  %v15098_v18 = vsub.f32 %v14704_v25, %v8399_v48  ;;  %v15101_v20 = vsub.f32 %v14710_v50, %v8400_v58  ;;  %v15104_v51 = vsub.f32 %v14755_v22, %v8401_v44 }
 0xe9d   : > { %v8591_v46 = vsel %vm8325_vm13, %v8590_v24, %v8589_v7  ;;  %v15108_v60 = vsub.f32 %v14776_v39, %v8402_v11  ;;  %v8488_v14 = vmul.f32 %v15084_v53, %v15084_v53  ;;  %v8489_v37 = vmul.f32 %v15088_v0, %v15088_v0 }
 0xe9e   : > { %v8593_v25 = vsel %vm8328_vm14, %v8592_v19, %v8591_v46  ;;  %v8490_v50 = vmul.f32 %v15091_v43, %v15091_v43  ;;  %v8491_v22 = vmul.f32 %v15094_v52, %v15094_v52  ;;  %v8492_v40 = vmul.f32 %v15098_v18, %v15098_v18 }
 0xe9f   : > { %v8618_v39 = vsel %vm2360_vm10, %v8593_v25, 0.0  ;;  %v8493_v23 = vmul.f32 %v15101_v20, %v15101_v20  ;;  %v8494_v47 = vmul.f32 %v15104_v51, %v15104_v51  ;;  %v8495_v33 = vmul.f32 %v15108_v60, %v15108_v60 }
 0xea0   : > { %8619 = vadd.xlane.f32.xlu0 %v8618_v39  ;;  %v8552_v5 = vrot.slane %v8489_v37, 7  ;;  %v8554_v35 = vrot.slane %v8490_v50, 6  ;;  %v8556_v49 = vrot.slane %v8491_v22, 5  ;;  %v8558_v32 = vrot.slane %v8492_v40, 4 }
 0xea1   : > { %v8560_v24 = vrot.slane %v8493_v23, 3  ;;  %v8562_v19 = vrot.slane %v8494_v47, 2  ;;  %v8564_v54 = vrot.slane %v8495_v33, 1  ;;  %v8417_v12 = vrot.slane %v15075_v13, 1 }
 0xea2   : > { %v8553_v45 = vsel %vm8310_vm8, %v8552_v5, %v8488_v14  ;;  %v8418_v15 = vrot.slane %v15075_v13, 2  ;;  %v8419_v8 = vrot.slane %v15075_v13, 3  ;;  %v8420_v48 = vrot.slane %v15075_v13, 4 }
 0xea3   : > { %v8555_v58 = vsel %vm8313_vm9, %v8554_v35, %v8553_v45  ;;  %v8421_v1 = vrot.slane %v15075_v13, 5  ;;  %v8422_v44 = vrot.slane %v15075_v13, 6  ;;  %v8423_v11 = vrot.slane %v15075_v13, 7 }
 0xea4   : > { %v8557_v41 = vsel %vm8316_vm2, %v8556_v49, %v8555_v58  ;;  %v15140_v7 = vsub.f32 %v14928_v16, %v15075_v13  ;;  %v15143_v46 = vsub.f32 %v14933_v17, %v8417_v12  ;;  %v15146_v14 = vsub.f32 %v14938_v4, %v8418_v15 }
 0xea5   : > { %v8559_v37 = vsel %vm8319_vm11, %v8558_v32, %v8557_v41  ;;  %v15150_v25 = vsub.f32 %v14943_v38, %v8419_v8  ;;  %v15153_v50 = vsub.f32 %v14948_v55, %v8420_v48  ;;  %v15156_v22 = vsub.f32 %v14953_v61, %v8421_v1 }
 0xea6   : > { %v8561_v16 = vsel %vm8322_vm12, %v8560_v24, %v8559_v37  ;;  %v15160_v13 = vsub.f32 %v14958_v9, %v8422_v44  ;;  %v15163_v17 = vsub.f32 %v14963_v29, %v8423_v11  ;;  %v8512_v4 = vmul.f32 %v15140_v7, %v15140_v7 }
 0xea7   : > { %v8563_v38 = vsel %vm8325_vm13, %v8562_v19, %v8561_v16  ;;  %v8513_v55 = vmul.f32 %v15143_v46, %v15143_v46  ;;  %v8514_v61 = vmul.f32 %v15146_v14, %v15146_v14  ;;  %v8515_v40 = vmul.f32 %v15150_v25, %v15150_v25 }
 0xea8   : > { %v8565_v9 = vsel %vm8328_vm14, %v8564_v54, %v8563_v38  ;;  %v8516_v29 = vmul.f32 %v15153_v50, %v15153_v50  ;;  %v8517_v39 = vmul.f32 %v15156_v22, %v15156_v22  ;;  %v8518_v23 = vmul.f32 %v15160_v13, %v15160_v13 }
 0xea9   : > { %v8612_v47 = vsel %vm2360_vm10, %v8565_v9, 0.0  ;;  %v8519_v33 = vmul.f32 %v15163_v17, %v15163_v17  ;;  %v8594_v5 = vrot.slane %v8513_v55, 7  ;;  %v8596_v35 = vrot.slane %v8514_v61, 6 }
 0xeaa   : > { %8613 = vadd.xlane.f32.xlu2 %v8612_v47  ;;  %v8598_v49 = vrot.slane %v8515_v40, 5  ;;  %v8600_v32 = vrot.slane %v8516_v29, 4  ;;  %v8602_v24 = vrot.slane %v8517_v39, 3  ;;  %v8604_v54 = vrot.slane %v8518_v23, 2 }
 0xeab   : > { %v8595_v19 = vsel %vm8310_vm8, %v8594_v5, %v8512_v4  ;;  %v8403_v12 = vrot.slane %v15078_v21, 1  ;;  %v8404_v45 = vrot.slane %v15078_v21, 2  ;;  %v8405_v8 = vrot.slane %v15078_v21, 3 }
 0xeac   : > { %v8597_v15 = vsel %vm8313_vm9, %v8596_v35, %v8595_v19  ;;  %v8406_v48 = vrot.slane %v15078_v21, 4  ;;  %v8407_v58 = vrot.slane %v15078_v21, 5  ;;  %v8606_v44 = vrot.slane %v8519_v33, 1 }
 0xead   : > { %v8599_v1 = vsel %vm8316_vm2, %v8598_v49, %v8597_v15  ;;  %v8408_v11 = vrot.slane %v15078_v21, 6  ;;  %v8409_v41 = vrot.slane %v15078_v21, 7  ;;  %v15196_v16 = vsub.f32 %v14809_v62, %v8403_v12 }
 0xeae   : > { %v8601_v37 = vsel %vm8319_vm11, %v8600_v32, %v8599_v1  ;;  %v15199_v4 = vsub.f32 %v14821_v28, %v8404_v45  ;;  %v15202_v38 = vsub.f32 %v14832_v36, %v8405_v8  ;;  %v15207_v61 = vsub.f32 %v14791_v59, %v15078_v21 }
 0xeaf   : > { %v8603_v55 = vsel %vm8322_vm12, %v8602_v24, %v8601_v37  ;;  %v15210_v40 = vsub.f32 %v14840_v6, %v8406_v48  ;;  %v15213_v9 = vsub.f32 %v14846_v26, %v8407_v58  ;;  %v15217_v28 = vsub.f32 %v14863_v27, %v8408_v11 }
 0xeb0   : > { %v8605_v62 = vsel %vm8325_vm13, %v8604_v54, %v8603_v55  ;;  %v8497_v36 = vmul.f32 %v15196_v16, %v15196_v16  ;;  %v15223_v39 = vsub.f32 %v14870_v42, %v8409_v41  ;;  %v8498_v59 = vmul.f32 %v15199_v4, %v15199_v4 }
 0xeb1   : > { %v8607_v29 = vsel %vm8328_vm14, %v8606_v44, %v8605_v62  ;;  %v8499_v6 = vmul.f32 %v15202_v38, %v15202_v38  ;;  %v8500_v27 = vmul.f32 %v15210_v40, %v15210_v40  ;;  %v8496_v21 = vmul.f32 %v15207_v61, %v15207_v61 }
 0xeb2   : > { %v8621_v26 = vsel %vm2360_vm10, %v8607_v29, 0.0  ;;  %v8501_v23 = vmul.f32 %v15213_v9, %v15213_v9  ;;  %v8566_v42 = vrot.slane %v8497_v36, 7  ;;  %v8568_v47 = vrot.slane %v8498_v59, 6 }
 0xeb3   : > { %8622 = vadd.xlane.f32.xlu1 %v8621_v26  ;;  %v8502_v33 = vmul.f32 %v15217_v28, %v15217_v28  ;;  %v8503_v5 = vmul.f32 %v15223_v39, %v15223_v39  ;;  %v8570_v49 = vrot.slane %v8499_v6, 5  ;;  %v8572_v24 = vrot.slane %v8500_v27, 4 }
 0xeb4   : > { %v8567_v35 = vsel %vm8310_vm8, %v8566_v42, %v8496_v21  ;;  %v8574_v54 = vrot.slane %v8501_v23, 3  ;;  %v9637_v42 = vld [vmem:[%s15857_s7 + $0x8] sm:$0xff] }
 0xeb5   : > { %v8569_v32 = vsel %vm8313_vm9, %v8568_v47, %v8567_v35  ;;  %v8576_v45 = vrot.slane %v8502_v33, 2  ;;  %v8578_v8 = vrot.slane %v8503_v5, 1  ;;  %9020 = vmatpush.bf16.msra.mxu0 %v9637_v42  ;;  %9660 = vmatpush.bf16.msra.mxu1 %v9637_v42  ;;  %v9636_v35 = vld [vmem:[%s15857_s7] sm:$0xff] }
 0xeb6   : > { %v8571_v19 = vsel %vm8316_vm2, %v8570_v49, %v8569_v32 }
 0xeb7   : > { %v8573_v12 = vsel %vm8319_vm11, %v8572_v24, %v8571_v19 }
 0xeb8   : > { %v8575_v15 = vsel %vm8322_vm12, %v8574_v54, %v8573_v12 }
 0xeb9   : > { %v8577_v48 = vsel %vm8325_vm13, %v8576_v45, %v8575_v15  ;;  %9021 = vmatpush.bf16.msra.mxu0 %v9636_v35  ;;  %9661 = vmatpush.bf16.msra.mxu1 %v9636_v35 }
 0xeba   : > { %v8579_v58 = vsel %vm8328_vm14, %v8578_v8, %v8577_v48 }
 0xebb   : > { %v8615_v1 = vsel %vm2360_vm10, %v8579_v58, 0.0 }
 0xebc   : > { %8616 = vadd.xlane.f32.xlu2 %v8615_v1 }
 0xf13   : > { %v8620_v44 = vpop.xlane.xlu0 %8619 }
 0xf14   : > { %v8626_v11 = vmul.f32 %v8620_v44, %v15856_v3 }
 0xf16   : > { %v8630_v41 = vadd.f32 1e-05, %v8626_v11 }
 0xf18   : > { %10172 = vrsqrt.f32 %v8630_v41  ;;  %vm8658_vm0 = vweird.f32 %v8630_v41 }
 0xf1d   : > { %v8614_v37 = vpop.xlane.xlu2 %8613 }
 0xf1e   : > { %v10173_v55 = vpop.eup %10172  ;;  %v8624_v62 = vmul.f32 %v8614_v37, %v15856_v3 }
 0xf1f   : > { %v8653_v36 = vmul.f32 %v10173_v55, %v8630_v41  ;;  %vm8659_vm15 = vweird.f32 %v10173_v55 }
 0xf20   : > { %v8628_v29 = vadd.f32 1e-05, %v8624_v62  ;;  %vm8660_vm1 = vmor %vm8658_vm0, %vm8659_vm15 }
 0xf21   : > { %v8654_v59 = vmul.f32 %v10173_v55, %v8653_v36 }
 0xf22   : > { %10174 = vrsqrt.f32 %v8628_v29  ;;  %vm8638_vm4 = vweird.f32 %v8628_v29 }
 0xf23   : > { %v8655_v6 = vmul.f32 0.5, %v8654_v59 }
 0xf25   : > { %v8656_v26 = vsub.f32 1.5, %v8655_v6 }
 0xf26   : > { %v8623_v27 = vpop.xlane.xlu1 %8622 }
 0xf27   : > { %v8657_v21 = vmul.f32 %v10173_v55, %v8656_v26  ;;  %v8627_v23 = vmul.f32 %v8623_v27, %v15856_v3 }
 0xf28   : > { %v10175_v47 = vpop.eup %10174 }
 0xf29   : > { %v8633_v33 = vmul.f32 %v10175_v47, %v8628_v29  ;;  %v15254_v5 = vadd.f32 1e-05, %v8627_v23  ;;  %v15259_v32 = vsel %vm8660_vm1, %v10173_v55, %v8657_v21  ;;  %vm8639_vm3 = vweird.f32 %v10175_v47 }
 0xf2a   : > { %v8690_v19 = vrot.slane %v15259_v32, 1  ;;  %v8691_v54 = vrot.slane %v15259_v32, 2  ;;  %v8692_v45 = vrot.slane %v15259_v32, 3  ;;  %v8693_v15 = vrot.slane %v15259_v32, 4  ;;  %vm8640_vm5 = vmor %vm8638_vm4, %vm8639_vm3 }
 0xf2b   : > { %v8634_v49 = vmul.f32 %v10175_v47, %v8633_v33  ;;  %10176 = vrsqrt.f32 %v15254_v5  ;;  %v8694_v48 = vrot.slane %v15259_v32, 5  ;;  %v8752_v44 = vmul.f32 %v15259_v32, %v15035_v10 }
 0xf2c   : > { %v8695_v41 = vrot.slane %v15259_v32, 6  ;;  %v8696_v55 = vrot.slane %v15259_v32, 7  ;;  %v8753_v62 = vmul.f32 %v8690_v19, %v15038_v2  ;;  %v15278_v36 = vmul.f32 %v8691_v54, %v15041_v56  ;;  %v15307_v32 = vld [vmem:[%s15859_s15] ss:$0 sm:$0xff] }
 0xf2d   : > { %v8635_v24 = vmul.f32 0.5, %v8634_v49  ;;  %v15283_v10 = vmul.f32 %v8692_v45, %v15044_v63  ;;  %v15290_v21 = vmul.f32 %v8694_v48, %v15050_v57  ;;  %v15297_v63 = vld [vmem:[%s15858_s8] ss:$0 sm:$0xff]  ;;  %vm8668_vm6 = vweird.f32 %v15254_v5 }
 0xf2f   : > { %v8636_v12 = vsub.f32 1.5, %v8635_v24  ;;  %v8617_v8 = vpop.xlane.xlu2 %8616 }
 0xf30   : > { %v8625_v11 = vmul.f32 %v8617_v8, %v15856_v3  ;;  %v15286_v3 = vmul.f32 %v8693_v15, %v15047_v31 }
 0xf31   : > { %v15267_v58 = vpop.eup %10176  ;;  %v8637_v1 = vmul.f32 %v10175_v47, %v8636_v12 }
 0xf32   : > { %v8663_v37 = vmul.f32 %v15267_v58, %v15254_v5  ;;  %v15280_v59 = vadd.f32 1e-05, %v8625_v11  ;;  %vm8669_vm7 = vweird.f32 %v15267_v58 }
 0xf33   : > { %v8641_v29 = vsel %vm8640_vm5, %v10175_v47, %v8637_v1  ;;  %vm8670_vm15 = vmor %vm8668_vm6, %vm8669_vm7 }
 0xf34   : > { %v8676_v6 = vrot.slane %v8641_v29, 1  ;;  %v8677_v26 = vrot.slane %v8641_v29, 2  ;;  %v8664_v27 = vmul.f32 %v15267_v58, %v8663_v37  ;;  %v8736_v2 = vmul.f32 %v8641_v29, %v15084_v53 }
 0xf35   : > { %10178 = vrsqrt.f32 %v15280_v59  ;;  %v8678_v56 = vrot.slane %v8641_v29, 3  ;;  %v8679_v23 = vrot.slane %v8641_v29, 4  ;;  %v8680_v42 = vrot.slane %v8641_v29, 5 }
 0xf36   : > { %v8665_v31 = vmul.f32 0.5, %v8664_v27  ;;  %v8681_v47 = vrot.slane %v8641_v29, 6  ;;  %v8682_v33 = vrot.slane %v8641_v29, 7  ;;  %v8737_v57 = vmul.f32 %v8676_v6, %v15088_v0 }
 0xf37   : > { %v8738_v35 = vmul.f32 %v8677_v26, %v15091_v43  ;;  %v8739_v53 = vmul.f32 %v8678_v56, %v15094_v52  ;;  %v8740_v49 = vmul.f32 %v8679_v23, %v15098_v18  ;;  %v8741_v19 = vmul.f32 %v8680_v42, %v15101_v20 }
 0xf38   : > { %v8666_v24 = vsub.f32 1.5, %v8665_v31  ;;  %v8742_v54 = vmul.f32 %v8681_v47, %v15104_v51  ;;  %v8743_v12 = vmul.f32 %v8682_v33, %v15108_v60  ;;  %v8771_v0 = vmul.f32 %v15297_v63, %v8736_v2 }
 0xf39   : > { %v8772_v43 = vmul.f32 %v15297_v63, %v8737_v57  ;;  %v8773_v52 = vmul.f32 %v15297_v63, %v8738_v35  ;;  %v8774_v18 = vmul.f32 %v15297_v63, %v8739_v53  ;;  %v8775_v45 = vmul.f32 %v15297_v63, %v8740_v49 }
 0xf3a   : > { %v8776_v15 = vmul.f32 %v15297_v63, %v8741_v19  ;;  %v8777_v8 = vmul.f32 %v15297_v63, %v8742_v54  ;;  %v15320_v20 = vmul.f32 %v8695_v41, %v15053_v34  ;;  %v8778_v60 = vmul.f32 %v15297_v63, %v8743_v12 }
 0xf3b   : > { %v10179_v51 = vpop.eup %10178  ;;  %v8806_v48 = vadd.f32 %v15307_v32, %v8771_v0  ;;  %v8807_v1 = vadd.f32 %v15307_v32, %v8772_v43  ;;  %v8808_v11 = vadd.f32 %v15307_v32, %v8773_v52  ;;  %v8667_v37 = vmul.f32 %v15267_v58, %v8666_v24 }
 0xf3c   : > { %v8643_v29 = vmul.f32 %v10179_v51, %v15280_v59  ;;  %v8809_v6 = vadd.f32 %v15307_v32, %v8774_v18  ;;  %v8810_v34 = vadd.f32 %v15307_v32, %v8775_v45  ;;  %v15332_v41 = vmul.f32 %v8696_v55, %v15056_v30 }
 0xf3d   : > { %v15335_v26 = vmul.f32 %v15297_v63, %v8752_v44  ;;  %v15338_v27 = vmul.f32 %v15297_v63, %v8753_v62  ;;  %v8811_v56 = vadd.f32 %v15307_v32, %v8776_v15  ;;  %v8812_v23 = vadd.f32 %v15307_v32, %v8777_v8 }
 0xf3e   : > { %v8644_v2 = vmul.f32 %v10179_v51, %v8643_v29  ;;  %v8813_v31 = vadd.f32 %v15307_v32, %v8778_v60  ;;  %v8838_v42 = vpack.c.bf16 %v8806_v48, %v8806_v48  ;;  %v8839_v47 = vpack.c.bf16 %v8807_v1, %v8807_v1 }
 0xf3f   : > { %v8840_v30 = vpack.c.bf16 %v8808_v11, %v8808_v11  ;;  %v8841_v55 = vpack.c.bf16 %v8809_v6, %v8809_v6  ;;  %v15346_v44 = vsel %vm8670_vm15, %v15267_v58, %v8667_v37  ;;  %v8842_v62 = vpack.c.bf16 %v8810_v34, %v8810_v34 }
 0xf40   : > { %v8645_v33 = vmul.f32 0.5, %v8644_v2  ;;  %v8843_v57 = vpack.c.bf16 %v8811_v56, %v8811_v56  ;;  %v8844_v35 = vpack.c.bf16 %v8812_v23, %v8812_v23  ;;  %v8845_v53 = vpack.c.bf16 %v8813_v31, %v8813_v31 }
 0xf41   : > { %v8907_v49 = vunpack.c.l.b16 %v8839_v47  ;;  %v8908_v24 = vunpack.c.l.b16 %v8840_v30  ;;  %vm8649_vm0 = vweird.f32 %v10179_v51  ;;  %v15348_v54 = vunpack.c.l.b16 %v8841_v55 }
 0xf42   : > { %v8646_v19 = vsub.f32 1.5, %v8645_v33  ;;  %v15350_v5 = vunpack.c.l.b16 %v8842_v62  ;;  %v8906_v12 = vunpack.c.l.b16 %v8838_v42  ;;  %v15354_v58 = vmul.f32 %v15297_v63, %v15278_v36 }
 0xf43   : > { %v8938_v0 = vrot.slane %v8907_v49, 7  ;;  %v8940_v43 = vrot.slane %v8908_v24, 6  ;;  %v8697_v52 = vrot.slane %v15346_v44, 1  ;;  %v8698_v18 = vrot.slane %v15346_v44, 2 }
 0xf44   : > { %v8647_v45 = vmul.f32 %v10179_v51, %v8646_v19  ;;  %vm8648_vm1 = vweird.f32 %v15280_v59  ;;  %v15359_v15 = vunpack.c.l.b16 %v8843_v57  ;;  %v15361_v8 = vunpack.c.l.b16 %v8844_v35 }
 0xf45   : > { %vm8650_vm3 = vmor %vm8648_vm1, %vm8649_vm0  ;;  %v15363_v60 = vunpack.c.l.b16 %v8845_v53  ;;  %v8939_v48 = vsel %vm8310_vm8, %v8938_v0, %v8906_v12  ;;  %v8942_v11 = vrot.slane %v15348_v54, 5  ;;  %v8944_v37 = vrot.slane %v15350_v5, 4 }
 0xf46   : > { %v8651_v1 = vsel %vm8650_vm3, %v10179_v51, %v8647_v45  ;;  %v8941_v36 = vsel %vm8313_vm9, %v8940_v43, %v8939_v48  ;;  %v8946_v48 = vrot.slane %v15359_v15, 3 }
 0xf47   : > { %v8683_v29 = vrot.slane %v8651_v1, 1  ;;  %v8684_v6 = vrot.slane %v8651_v1, 2  ;;  %v8744_v59 = vmul.f32 %v8651_v1, %v15207_v61  ;;  %v8685_v34 = vrot.slane %v8651_v1, 3 }
 0xf48   : > { %v8686_v2 = vrot.slane %v8651_v1, 4  ;;  %v8687_v56 = vrot.slane %v8651_v1, 5  ;;  %v8688_v23 = vrot.slane %v8651_v1, 6  ;;  %v8689_v31 = vrot.slane %v8651_v1, 7 }
 0xf49   : > { %v8745_v42 = vmul.f32 %v8683_v29, %v15196_v16  ;;  %v8746_v47 = vmul.f32 %v8684_v6, %v15199_v4  ;;  %v8747_v51 = vmul.f32 %v8685_v34, %v15202_v38  ;;  %v8779_v30 = vmul.f32 %v15297_v63, %v8744_v59 }
 0xf4a   : > { %v8748_v55 = vmul.f32 %v8686_v2, %v15210_v40  ;;  %v8749_v33 = vmul.f32 %v8687_v56, %v15213_v9  ;;  %v8750_v62 = vmul.f32 %v8688_v23, %v15217_v28  ;;  %v8751_v61 = vmul.f32 %v8689_v31, %v15223_v39 }
 0xf4b   : > { %v8780_v57 = vmul.f32 %v15297_v63, %v8745_v42  ;;  %v8781_v35 = vmul.f32 %v15297_v63, %v8746_v47  ;;  %v8782_v16 = vmul.f32 %v15297_v63, %v8747_v51  ;;  %v8814_v4 = vadd.f32 %v15307_v32, %v8779_v30 }
 0xf4c   : > { %v8783_v38 = vmul.f32 %v15297_v63, %v8748_v55  ;;  %v8784_v53 = vmul.f32 %v15297_v63, %v8749_v33  ;;  %v8785_v40 = vmul.f32 %v15297_v63, %v8750_v62  ;;  %v8786_v9 = vmul.f32 %v15297_v63, %v8751_v61 }
 0xf4d   : > { %v8815_v28 = vadd.f32 %v15307_v32, %v8780_v57  ;;  %v8816_v39 = vadd.f32 %v15307_v32, %v8781_v35  ;;  %v8817_v49 = vadd.f32 %v15307_v32, %v8782_v16  ;;  %v8846_v24 = vpack.c.bf16 %v8814_v4, %v8814_v4 }
 0xf4e   : > { %v8818_v19 = vadd.f32 %v15307_v32, %v8783_v38  ;;  %v8819_v54 = vadd.f32 %v15307_v32, %v8784_v53  ;;  %v8820_v5 = vadd.f32 %v15307_v32, %v8785_v40  ;;  %v8821_v12 = vadd.f32 %v15307_v32, %v8786_v9 }
 0xf4f   : > { %v8847_v0 = vpack.c.bf16 %v8815_v28, %v8815_v28  ;;  %v8848_v43 = vpack.c.bf16 %v8816_v39, %v8816_v39  ;;  %v8849_v45 = vpack.c.bf16 %v8817_v49, %v8817_v49  ;;  %v8943_v23 = vsel %vm8316_vm2, %v8942_v11, %v8941_v36 }
 0xf50   : > { %v8850_v1 = vpack.c.bf16 %v8818_v19, %v8818_v19  ;;  %v8851_v29 = vpack.c.bf16 %v8819_v54, %v8819_v54  ;;  %v8852_v6 = vpack.c.bf16 %v8820_v5, %v8820_v5  ;;  %v8853_v59 = vpack.c.bf16 %v8821_v12, %v8821_v12 }
 0xf51   : > { %v8915_v34 = vunpack.c.l.b16 %v8847_v0  ;;  %v8916_v2 = vunpack.c.l.b16 %v8848_v43  ;;  %v8917_v56 = vunpack.c.l.b16 %v8849_v45  ;;  %v8914_v31 = vunpack.c.l.b16 %v8846_v24 }
 0xf52   : > { %v8918_v42 = vunpack.c.l.b16 %v8850_v1  ;;  %v8948_v47 = vrot.slane %v15361_v8, 2  ;;  %v8950_v51 = vrot.slane %v15363_v60, 1  ;;  %v8919_v30 = vunpack.c.l.b16 %v8851_v29 }
 0xf53   : > { %v8945_v55 = vsel %vm8319_vm11, %v8944_v37, %v8943_v23  ;;  %v8952_v33 = vrot.slane %v8915_v34, 7  ;;  %v8954_v15 = vrot.slane %v8916_v2, 6  ;;  %v8920_v62 = vunpack.c.l.b16 %v8852_v6 }
 0xf54   : > { %v8947_v61 = vsel %vm8322_vm12, %v8946_v48, %v8945_v55  ;;  %v8699_v57 = vrot.slane %v15346_v44, 3  ;;  %v8700_v35 = vrot.slane %v15346_v44, 4  ;;  %v8921_v16 = vunpack.c.l.b16 %v8853_v59 }
 0xf55   : > { %v8953_v36 = vsel %vm8310_vm8, %v8952_v33, %v8914_v31  ;;  %v8956_v11 = vrot.slane %v8917_v56, 5  ;;  %v8701_v8 = vrot.slane %v15346_v44, 5  ;;  %v8949_v60 = vsel %vm8325_vm13, %v8948_v47, %v8947_v61 }
 0xf56   : > { %v8955_v4 = vsel %vm8313_vm9, %v8954_v15, %v8953_v36  ;;  %v8958_v37 = vrot.slane %v8918_v42, 4  ;;  %v8702_v38 = vrot.slane %v15346_v44, 6  ;;  %v8960_v40 = vrot.slane %v8919_v30, 3 }
 0xf57   : > { %v8957_v53 = vsel %vm8316_vm2, %v8956_v11, %v8955_v4  ;;  %v8761_v9 = vmul.f32 %v8697_v52, %v15143_v46  ;;  %v8762_v28 = vmul.f32 %v8698_v18, %v15146_v14  ;;  %v8760_v39 = vmul.f32 %v15346_v44, %v15140_v7 }
 0xf58   : > { %v8959_v49 = vsel %vm8319_vm11, %v8958_v37, %v8957_v53  ;;  %v8962_v24 = vrot.slane %v8920_v62, 2  ;;  %v8703_v19 = vrot.slane %v15346_v44, 7  ;;  %v8951_v54 = vsel %vm8328_vm14, %v8950_v51, %v8949_v60 }
 0xf59   : > { %v8961_v5 = vsel %vm8322_vm12, %v8960_v40, %v8959_v49  ;;  %v8964_v12 = vrot.slane %v8921_v16, 1  ;;  %v8763_v0 = vmul.f32 %v8699_v57, %v15150_v25  ;;  %v8764_v52 = vmul.f32 %v8700_v35, %v15153_v50 }
 0xf5a   : > { %v8963_v46 = vsel %vm8325_vm13, %v8962_v24, %v8961_v5  ;;  %v8765_v14 = vmul.f32 %v8701_v8, %v15156_v22  ;;  %v8766_v7 = vmul.f32 %v8702_v38, %v15160_v13  ;;  %v8790_v44 = vmul.f32 %v15297_v63, %v15283_v10 }
 0xf5b   : > { %v8965_v18 = vsel %vm8328_vm14, %v8964_v12, %v8963_v46  ;;  %v8796_v43 = vmul.f32 %v15297_v63, %v8761_v9  ;;  %v8797_v45 = vmul.f32 %v15297_v63, %v8762_v28  ;;  %v8767_v25 = vmul.f32 %v8703_v19, %v15163_v17 }
 0xf5c   : > { %v8994_v48 = vpack.c.b16 %v8965_v18, %v8951_v54  ;;  %v8791_v1 = vmul.f32 %v15297_v63, %v15286_v3  ;;  %v8792_v50 = vmul.f32 %v15297_v63, %v15290_v21  ;;  %v8793_v22 = vmul.f32 %v15297_v63, %v15320_v20 }
 0xf5d   : > { %v8798_v13 = vmul.f32 %v15297_v63, %v8763_v0  ;;  %v8823_v10 = vadd.f32 %v15307_v32, %v15338_v27  ;;  %v8824_v29 = vadd.f32 %v15307_v32, %v15354_v58  ;;  %v8794_v17 = vmul.f32 %v15297_v63, %v15332_v41 }
 0xf5e   : > { %9581 = vmatmul.msk.bf16.vlgmr.msra.gmra.mxu0 %vm2360_vm10, %v8994_v48  ;;  %v8795_v3 = vmul.f32 %v15297_v63, %v8760_v39  ;;  %v8799_v21 = vmul.f32 %v15297_v63, %v8764_v52  ;;  %v8800_v6 = vmul.f32 %v15297_v63, %v8765_v14  ;;  %v8801_v20 = vmul.f32 %v15297_v63, %v8766_v7 }
 0xf5f   : > { %v8825_v59 = vadd.f32 %v15307_v32, %v8790_v44  ;;  %v8831_v27 = vadd.f32 %v15307_v32, %v8796_v43  ;;  %v8832_v34 = vadd.f32 %v15307_v32, %v8797_v45  ;;  %v8802_v58 = vmul.f32 %v15297_v63, %v8767_v25 }
 0xf60   : > { %v8822_v2 = vadd.f32 %v15307_v32, %v15335_v26  ;;  %v8826_v41 = vadd.f32 %v15307_v32, %v8791_v1  ;;  %v8827_v56 = vadd.f32 %v15307_v32, %v8792_v50  ;;  %v8828_v23 = vadd.f32 %v15307_v32, %v8793_v22 }
 0xf61   : > { %v8833_v31 = vadd.f32 %v15307_v32, %v8798_v13  ;;  %v8855_v42 = vpack.c.bf16 %v8823_v10, %v8823_v10  ;;  %v8856_v47 = vpack.c.bf16 %v8824_v29, %v8824_v29  ;;  %v8829_v51 = vadd.f32 %v15307_v32, %v8794_v17 }
 0xf62   : > { %v8830_v30 = vadd.f32 %v15307_v32, %v8795_v3  ;;  %v8834_v55 = vadd.f32 %v15307_v32, %v8799_v21  ;;  %v8835_v63 = vadd.f32 %v15307_v32, %v8800_v6  ;;  %v8836_v26 = vadd.f32 %v15307_v32, %v8801_v20 }
 0xf63   : > { %v8857_v33 = vpack.c.bf16 %v8825_v59, %v8825_v59  ;;  %v8863_v15 = vpack.c.bf16 %v8831_v27, %v8831_v27  ;;  %v8864_v62 = vpack.c.bf16 %v8832_v34, %v8832_v34  ;;  %v8837_v61 = vadd.f32 %v15307_v32, %v8802_v58 }
 0xf64   : > { %v8854_v57 = vpack.c.bf16 %v8822_v2, %v8822_v2  ;;  %v8858_v35 = vpack.c.bf16 %v8826_v41, %v8826_v41  ;;  %v8859_v16 = vpack.c.bf16 %v8827_v56, %v8827_v56  ;;  %v8860_v36 = vpack.c.bf16 %v8828_v23, %v8828_v23 }
 0xf65   : > { %v8865_v11 = vpack.c.bf16 %v8833_v31, %v8833_v31  ;;  %v8923_v8 = vunpack.c.l.b16 %v8855_v42  ;;  %v8924_v60 = vunpack.c.l.b16 %v8856_v47  ;;  %v8861_v4 = vpack.c.bf16 %v8829_v51, %v8829_v51 }
 0xf66   : > { %v8862_v37 = vpack.c.bf16 %v8830_v30, %v8830_v30  ;;  %v8866_v38 = vpack.c.bf16 %v8834_v55, %v8834_v55  ;;  %v8867_v53 = vpack.c.bf16 %v8835_v63, %v8835_v63  ;;  %v8868_v40 = vpack.c.bf16 %v8836_v26, %v8836_v26 }
 0xf67   : > { %v8925_v9 = vunpack.c.l.b16 %v8857_v33  ;;  %v8931_v28 = vunpack.c.l.b16 %v8863_v15  ;;  %v8932_v39 = vunpack.c.l.b16 %v8864_v62  ;;  %v8869_v49 = vpack.c.bf16 %v8837_v61, %v8837_v61 }
 0xf68   : > { %v8922_v24 = vunpack.c.l.b16 %v8854_v57  ;;  %v8926_v19 = vunpack.c.l.b16 %v8858_v35  ;;  %v8927_v54 = vunpack.c.l.b16 %v8859_v16  ;;  %v8928_v32 = vunpack.c.l.b16 %v8860_v36 }
 0xf69   : > { %v8933_v5 = vunpack.c.l.b16 %v8865_v11  ;;  %v8966_v12 = vrot.slane %v8923_v8, 7  ;;  %v8968_v0 = vrot.slane %v8924_v60, 6  ;;  %v8929_v46 = vunpack.c.l.b16 %v8861_v4 }
 0xf6a   : > { %v8930_v52 = vunpack.c.l.b16 %v8862_v37  ;;  %v8934_v14 = vunpack.c.l.b16 %v8866_v38  ;;  %v8935_v7 = vunpack.c.l.b16 %v8867_v53  ;;  %v8970_v44 = vrot.slane %v8925_v9, 5 }
 0xf6b   : > { %v8967_v18 = vsel %vm8310_vm8, %v8966_v12, %v8922_v24  ;;  %v8980_v43 = vrot.slane %v8931_v28, 7  ;;  %v8982_v45 = vrot.slane %v8932_v39, 6  ;;  %v8936_v48 = vunpack.c.l.b16 %v8868_v40 }
 0xf6c   : > { %v8937_v25 = vunpack.c.l.b16 %v8869_v49  ;;  %v8969_v1 = vsel %vm8313_vm9, %v8968_v0, %v8967_v18  ;;  %v8972_v50 = vrot.slane %v8926_v19, 4  ;;  %v8974_v13 = vrot.slane %v8927_v54, 3 }
 0xf6d   : > { %v8971_v22 = vsel %vm8316_vm2, %v8970_v44, %v8969_v1  ;;  %v8981_v10 = vsel %vm8310_vm8, %v8980_v43, %v8930_v52  ;;  %v8984_v29 = vrot.slane %v8933_v5, 5  ;;  %v8976_v3 = vrot.slane %v8928_v32, 2 }
 0xf6e   : > { %v8973_v17 = vsel %vm8319_vm11, %v8972_v50, %v8971_v22  ;;  %v8983_v21 = vsel %vm8313_vm9, %v8982_v45, %v8981_v10  ;;  %v8986_v6 = vrot.slane %v8934_v14, 4  ;;  %v8988_v27 = vrot.slane %v8935_v7, 3 }
 0xf6f   : > { %v8975_v20 = vsel %vm8322_vm12, %v8974_v13, %v8973_v17  ;;  %v8985_v59 = vsel %vm8316_vm2, %v8984_v29, %v8983_v21  ;;  %v8990_v2 = vrot.slane %v8936_v48, 2  ;;  %v8978_v41 = vrot.slane %v8929_v46, 1 }
 0xf70   : > { %v8977_v34 = vsel %vm8325_vm13, %v8976_v3, %v8975_v20  ;;  %v8987_v58 = vsel %vm8319_vm11, %v8986_v6, %v8985_v59  ;;  %v8992_v23 = vrot.slane %v8937_v25, 1 }
 0xf71   : > { %v8989_v56 = vsel %vm8322_vm12, %v8988_v27, %v8987_v58  ;;  %v8979_v42 = vsel %vm8328_vm14, %v8978_v41, %v8977_v34 }
 0xf72   : > { %v8991_v31 = vsel %vm8325_vm13, %v8990_v2, %v8989_v56 }
 0xf73   : > { %v8993_v47 = vsel %vm8328_vm14, %v8992_v23, %v8991_v31 }
 0xf74   : > { %v8995_v51 = vpack.c.b16 %v8993_v47, %v8979_v42 }
 0xf76   : > { %9582 = vmatmul.msk.bf16.vlgmr.msra.gmra.mxu1 %vm2360_vm10, %v8995_v51 }
 0xfdb   : > { %v9023_v30 = vpop.f32.mrf.mxu0 }
 0xfdc   : > { %9033 = vst [vmem:[%s10451_s14] sm:$0xff] %v9023_v30 }
 0xfe3   : > { %v9025_v55 = vpop.f32.mrf.mxu0 }
 0xfe4   : > { %9034 = vst [vmem:[%s10451_s14 + $0x8] sm:$0xff] %v9025_v55 }
 0xff3   : > { %v9028_v63 = vpop.f32.mrf.mxu1 }
 0xff4   : > { %9035 = vst [vmem:[%s10451_s14 + $0x10] sm:$0xff] %v9028_v63 }
 0xffb   : > { %v9030_v26 = vpop.f32.mrf.mxu1 }
 0xffc   : > { %9036 = vst [vmem:[%s10451_s14 + $0x18] sm:$0xff] %v9030_v26 }
 0xffd PF: > { %s15860_s24 = sld [smem:[#allocation6_spill]] }
 0xffe   : > { %s15861_s4 = sld [smem:[#allocation4_spill]] }
 0xfff   : > { %s15862_s30 = sld [smem:[#allocation5_spill]] }
0x1000   : > { %s15864_s25 = sld [smem:[#allocation8_spill]] }
0x1003   : > { %s33_s5 = sadd.s32 1, %s15860_s24   ;;  %s15863_s24 = sld [smem:[#allocation7_spill]] }
0x1004   : > { %p30_p10 = scmp.ge.s32.totalorder %s33_s5, 6  }
0x1006   :  { %32 = sbr.rel (!%p30_p10) target bundleno = 20 (0x14), region = 189 }

</bundles_post_ra>
